<compile_context>
chip_gen: v6e
topology: v6e:2x2x1
jax: 0.10.0
libtpu: 0.0.40
codegen_flags: <defaults>
</compile_context>

<pallas_src>
import functools
import math

import jax
import jax.numpy as jnp
from jax import lax
from jax.experimental import pallas as pl
from jax.experimental.pallas import tpu as pltpu

# Make the pure-JAX reference matmuls full f32 precision so the self-check
# compares like with like (the in-kernel MXU matmuls are f32-accurate).
jax.config.update("jax_default_matmul_precision", "highest")


# ---------------------------------------------------------------------------
# Fused kernel: [all encoder layers] + flatten + classifier, whole batch.
# ---------------------------------------------------------------------------
def _layer_norm(t, gamma, beta, eps=1e-5):
    m = jnp.mean(t, axis=-1, keepdims=True)
    var = jnp.mean(jnp.square(t - m), axis=-1, keepdims=True)
    return gamma * ((t - m) * lax.rsqrt(var + eps)) + beta


def _encoder_kernel(x_ref, wqkv_ref, wo_ref, w1_ref, w2_ref, vecs_ref,
                    wc_ref, bc_ref, o_ref, *,
                    num_layers, num_heads, head_dim, batch, seq):
    f32 = jnp.float32
    H, hd, B, S = num_heads, head_dim, batch, seq
    BS = B * S
    BHS = B * H * S

    x = x_ref[...]                                   # (B*S, D) float32
    D = x.shape[-1]
    F = w1_ref.shape[-1]
    n_cls = wc_ref.shape[-1]

    # ---- trace-time constant selection matrices (built once) ----------------
    # torch quirk: values[R, c*hd:(c+1)*hd] = V_stack[H*R + c]
    #   where V_stack rows are ordered (batch, head, query) and R = b*S + r.
    row_v = lax.broadcasted_iota(jnp.int32, (BS, BHS), 0)
    col_v = lax.broadcasted_iota(jnp.int32, (BS, BHS), 1)
    sel_v = [jnp.where(col_v == H * row_v + c, 1.0, 0.0) for c in range(H)]
    # nn.Flatten: flat[b, s*D:(s+1)*D] = x[b*S + s, :]
    row_c = lax.broadcasted_iota(jnp.int32, (B, BS), 0)
    col_c = lax.broadcasted_iota(jnp.int32, (B, BS), 1)
    sel_f = [jnp.where(col_c == S * row_c + s, 1.0, 0.0) for s in range(S)]

    for l in range(num_layers):                      # static unroll, weights resident
        vl = vecs_ref[l]                             # (8, Wv): packed per-layer vectors
        bqkv = vl[0:1, 0:3 * D]
        bo   = vl[1:2, 0:D]
        g1   = vl[2:3, 0:D]
        be1  = vl[3:4, 0:D]
        b1   = vl[4:5, 0:F]
        b2   = vl[5:6, 0:D]
        g2   = vl[6:7, 0:D]
        be2  = vl[7:8, 0:D]

        resid = x

        # ---- multi-head self-attention --------------------------------------
        # qkv column layout = torch's reshape(B,S,H,3hd): head h -> [q|k|v] at
        # columns h*3hd.  The 1/sqrt(hd) scale is pre-folded into the q columns
        # of wqkv/bqkv on the host.
        # NOTE: at realistic D cast operands to bf16 here (MXU-native on
        #       v6e/v7x); f32 keeps exact reference semantics at this toy size.
        qkv = jnp.dot(x, wqkv_ref[l], preferred_element_type=f32) + bqkv  # (BS, 3D)

        scores, v_list = [], []
        for b in range(B):
            for h in range(H):
                base = h * 3 * hd
                q = qkv[b * S:(b + 1) * S, base:base + hd]
                k = qkv[b * S:(b + 1) * S, base + hd:base + 2 * hd]
                v = qkv[b * S:(b + 1) * S, base + 2 * hd:base + 3 * hd]
                scores.append(lax.dot_general(                     # q @ k^T (scaled)
                    q, k, (((1,), (1,)), ((), ())), preferred_element_type=f32))
                v_list.append(v)

        # One softmax over all (batch, head) score blocks at once.
        s_all = jnp.concatenate(scores, axis=0)                    # (B*H*S, S)
        s_all = s_all - jnp.max(s_all, axis=-1, keepdims=True)
        p_all = jnp.exp(s_all)
        p_all = p_all / jnp.sum(p_all, axis=-1, keepdims=True)     # exact divide

        vals = [jnp.dot(p_all[i * S:(i + 1) * S, :], v_list[i],
                        preferred_element_type=f32) for i in range(B * H)]
        v_stack = jnp.concatenate(vals, axis=0)                    # (B*H*S, hd)

        # torch reshape-quirk + output projection, fused via selection matmuls:
        #   attn = sum_c (sel_v[c] @ v_stack) @ wo[c*hd:(c+1)*hd, :] + bo
        wo_l = wo_ref[l]
        attn = bo
        for c in range(H):
            seg = jnp.dot(sel_v[c], v_stack, preferred_element_type=f32)   # (BS, hd)
            attn = attn + jnp.dot(seg, wo_l[c * hd:(c + 1) * hd, :],
                                  preferred_element_type=f32)
        # TODO(synk): dropout1 is identity (eval mode).
        x = _layer_norm(attn + resid, g1, be1)

        # ---- position-wise FFN ----------------------------------------------
        hidden = jnp.maximum(
            jnp.dot(x, w1_ref[l], preferred_element_type=f32) + b1, 0.0)
        # TODO(synk): FFN dropout / dropout2 are identity (eval mode).
        ffn = jnp.dot(hidden, w2_ref[l], preferred_element_type=f32) + b2
        x = _layer_norm(ffn + x, g2, be2)

    # ---- nn.Flatten + classifier (fused, no in-kernel relayout) --------------
    #   logits[b] = bc + sum_s x[b*S+s, :] @ wc[s*D:(s+1)*D, :]
    acc = bc_ref[...]                                              # (1, n_cls)
    for s in range(S):
        rows_s = jnp.dot(sel_f[s], x, preferred_element_type=f32)  # (B, D)
        acc = acc + jnp.dot(rows_s, wc_ref[s * D:(s + 1) * D, :],
                            preferred_element_type=f32)
    o_ref[...] = acc                                               # (B, n_cls)


def encoder_forward(x, params, num_heads):
    B, S, D = x.shape
    L, _, F = params["w1"].shape
    n_cls = params["wc"].shape[-1]
    head_dim = D // num_heads
    # The classifier implicitly requires S == max_sequence_length.
    assert params["wc"].shape[0] == S * D, "sequence length != max_sequence_length"

    # Fold the 1/sqrt(head_dim) attention scale into the q columns of wqkv/bqkv.
    col = jnp.arange(3 * D)
    qscale = jnp.where((col % (3 * head_dim)) < head_dim,
                       1.0 / math.sqrt(head_dim), 1.0).astype(jnp.float32)
    wqkv = params["wqkv"] * qscale                    # (L, D, 3D)
    bqkv = params["bqkv"] * qscale                    # (L, 3D)

    # Pack the eight small per-layer vectors into one (L, 8, Wv) array
    # (fewer kernel inputs -> fewer DMA descriptors per invocation).
    Wv = ((max(3 * D, F, 128) + 127) // 128) * 128

    def pad_row(v):                                   # (L, w) -> (L, 1, Wv)
        return jnp.pad(v, ((0, 0), (0, Wv - v.shape[-1])))[:, None, :]

    vecs = jnp.concatenate([
        pad_row(bqkv), pad_row(params["bo"]), pad_row(params["g1"]),
        pad_row(params["be1"]), pad_row(params["b1"]), pad_row(params["b2"]),
        pad_row(params["g2"]), pad_row(params["be2"]),
    ], axis=1).astype(jnp.float32)                    # (L, 8, Wv)

    kernel = functools.partial(_encoder_kernel, num_layers=L,
                               num_heads=num_heads, head_dim=head_dim,
                               batch=B, seq=S)

    vmem = pl.BlockSpec(memory_space=pltpu.MemorySpace.VMEM)   # whole array, resident
    logits = pl.pallas_call(
        kernel,
        out_shape=jax.ShapeDtypeStruct((B, n_cls), jnp.float32),
        in_specs=[vmem] * 8,
        out_specs=vmem,
    )(x.reshape(B * S, D), wqkv, params["wo"], params["w1"], params["w2"],
      vecs, params["wc"], params["bc"])
    return logits


# ---------------------------------------------------------------------------
# Parameter init (per-layer weights stacked on a leading layer axis).
# ---------------------------------------------------------------------------
def init_params(key, d_model, ffn_hidden, num_layers, n_cls, max_seq_len):
    ks = jax.random.split(key, 14)
    L = num_layers
    w = lambda k, shape: 0.02 * jax.random.normal(k, shape, jnp.float32)
    return {
        "wqkv": w(ks[0], (L, d_model, 3 * d_model)),
        "bqkv": w(ks[1], (L, 3 * d_model)),
        "wo":   w(ks[2], (L, d_model, d_model)),
        "bo":   w(ks[3], (L, d_model)),
        "g1":   1.0 + w(ks[4], (L, d_model)),
        "be1":  w(ks[5], (L, d_model)),
        "w1":   w(ks[6], (L, d_model, ffn_hidden)),
        "b1":   w(ks[7], (L, ffn_hidden)),
        "w2":   w(ks[8], (L, ffn_hidden, d_model)),
        "b2":   w(ks[9], (L, d_model)),
        "g2":   1.0 + w(ks[10], (L, d_model)),
        "be2":  w(ks[11], (L, d_model)),
        "wc":   w(ks[12], (d_model * max_seq_len, n_cls)),
        "bc":   w(ks[13], (1, n_cls)),
    }


# ---------------------------------------------------------------------------
# Pure-JAX reference (mirrors the PyTorch module exactly, incl. the reshape
# quirk) — used only for the correctness self-check.
# ---------------------------------------------------------------------------
def encoder_reference(x, params, num_heads):
    B, S, D = x.shape
    hd = D // num_heads
    L = params["wqkv"].shape[0]

    def ln(t, g, b, eps=1e-5):
        m = t.mean(-1, keepdims=True)
        var = ((t - m) ** 2).mean(-1, keepdims=True)
        return g * (t - m) / jnp.sqrt(var + eps) + b

    for l in range(L):
        resid = x
        qkv = x @ params["wqkv"][l] + params["bqkv"][l]
        qkv = qkv.reshape(B, S, num_heads, 3 * hd).transpose(0, 2, 1, 3)
        q, k, v = jnp.split(qkv, 3, axis=-1)
        s = jnp.einsum("bhqd,bhkd->bhqk", q, k) / math.sqrt(hd)
        p = jax.nn.softmax(s, axis=-1)
        vals = jnp.einsum("bhqk,bhkd->bhqd", p, v)       # (B,H,S,hd)
        values = vals.reshape(B, S, D)                   # same quirk as torch code
        attn = values @ params["wo"][l] + params["bo"][l]
        x = ln(attn + resid, params["g1"][l], params["be1"][l])
        h = jax.nn.relu(x @ params["w1"][l] + params["b1"][l])
        f = h @ params["w2"][l] + params["b2"][l]
        x = ln(f + x, params["g2"][l], params["be2"][l])
    return x.reshape(B, S * D) @ params["wc"] + params["bc"]


if __name__ == "__main__":
    # Small config implied by the module: d_model=32, heads=4, seq=8, ffn=64,
    # 2 layers, 4 classes, batch=2.
    B, S, D = 2, 8, 32
    NUM_HEADS, FFN_HIDDEN, NUM_LAYERS, N_CLS = 4, 64, 2, 4

    key = jax.random.PRNGKey(0)
    kx, kp = jax.random.split(key)
    x = jax.random.normal(kx, (B, S, D), jnp.float32)
    params = init_params(kp, D, FFN_HIDDEN, NUM_LAYERS, N_CLS, S)

    fwd = jax.jit(encoder_forward, static_argnums=2)
    logits = jax.block_until_ready(fwd(x, params, NUM_HEADS))
    assert logits.shape == (B, N_CLS)
    assert bool(jnp.all(jnp.isfinite(logits)))

    ref = encoder_reference(x, params, NUM_HEADS)
    max_diff = float(jnp.max(jnp.abs(logits - ref)))
    assert jnp.allclose(logits, ref, rtol=2e-2, atol=2e-3), f"max diff={max_diff}"
    print("KERNEL_OK")
</pallas_src>

<mosaic_0001>
module attributes {stable_mosaic.version = 11 : i64} {
  func.func @_encoder_kernel(%arg0: memref<16x32xf32, #tpu.memory_space<vmem>>, %arg1: memref<2x32x96xf32, #tpu.memory_space<vmem>>, %arg2: memref<2x32x32xf32, #tpu.memory_space<vmem>>, %arg3: memref<2x32x64xf32, #tpu.memory_space<vmem>>, %arg4: memref<2x64x32xf32, #tpu.memory_space<vmem>>, %arg5: memref<2x8x128xf32, #tpu.memory_space<vmem>>, %arg6: memref<256x4xf32, #tpu.memory_space<vmem>>, %arg7: memref<1x4xf32, #tpu.memory_space<vmem>>, %arg8: memref<2x4xf32, #tpu.memory_space<vmem>>) attributes {dimension_semantics = [], scalar_prefetch = 0 : i64, scratch_operands = 0 : i64, tpu.core_type = #tpu.core_type<tc>} {
    %c0 = arith.constant 0 : index
    %c0_0 = arith.constant 0 : index
    %0 = vector.load %arg0[%c0, %c0_0] : memref<16x32xf32, #tpu.memory_space<vmem>>, vector<16x32xf32>
    %1 = tpu.iota {dimensions = array<i32: 0>} : vector<16x64xi32>
    %2 = tpu.iota {dimensions = array<i32: 1>} : vector<16x64xi32>
    %c4_i32 = arith.constant 4 : i32
    %3 = vector.broadcast %c4_i32 : i32 to vector<16x64xi32>
    %4 = arith.muli %3, %1 : vector<16x64xi32>
    %c0_i32 = arith.constant 0 : i32
    %5 = vector.broadcast %c0_i32 : i32 to vector<16x64xi32>
    %6 = arith.addi %4, %5 : vector<16x64xi32>
    %7 = arith.cmpi eq, %2, %6 : vector<16x64xi32>
    %cst = arith.constant 1.000000e+00 : f32
    %cst_1 = arith.constant 0.000000e+00 : f32
    %8 = vector.broadcast %cst : f32 to vector<16x64xf32>
    %9 = vector.broadcast %cst_1 : f32 to vector<16x64xf32>
    %10 = arith.select %7, %8, %9 : vector<16x64xi1>, vector<16x64xf32>
    %c4_i32_2 = arith.constant 4 : i32
    %11 = vector.broadcast %c4_i32_2 : i32 to vector<16x64xi32>
    %12 = arith.muli %11, %1 : vector<16x64xi32>
    %c1_i32 = arith.constant 1 : i32
    %13 = vector.broadcast %c1_i32 : i32 to vector<16x64xi32>
    %14 = arith.addi %12, %13 : vector<16x64xi32>
    %15 = arith.cmpi eq, %2, %14 : vector<16x64xi32>
    %cst_3 = arith.constant 1.000000e+00 : f32
    %cst_4 = arith.constant 0.000000e+00 : f32
    %16 = vector.broadcast %cst_3 : f32 to vector<16x64xf32>
    %17 = vector.broadcast %cst_4 : f32 to vector<16x64xf32>
    %18 = arith.select %15, %16, %17 : vector<16x64xi1>, vector<16x64xf32>
    %c4_i32_5 = arith.constant 4 : i32
    %19 = vector.broadcast %c4_i32_5 : i32 to vector<16x64xi32>
    %20 = arith.muli %19, %1 : vector<16x64xi32>
    %c2_i32 = arith.constant 2 : i32
    %21 = vector.broadcast %c2_i32 : i32 to vector<16x64xi32>
    %22 = arith.addi %20, %21 : vector<16x64xi32>
    %23 = arith.cmpi eq, %2, %22 : vector<16x64xi32>
    %cst_6 = arith.constant 1.000000e+00 : f32
    %cst_7 = arith.constant 0.000000e+00 : f32
    %24 = vector.broadcast %cst_6 : f32 to vector<16x64xf32>
    %25 = vector.broadcast %cst_7 : f32 to vector<16x64xf32>
    %26 = arith.select %23, %24, %25 : vector<16x64xi1>, vector<16x64xf32>
    %c4_i32_8 = arith.constant 4 : i32
    %27 = vector.broadcast %c4_i32_8 : i32 to vector<16x64xi32>
    %28 = arith.muli %27, %1 : vector<16x64xi32>
    %c3_i32 = arith.constant 3 : i32
    %29 = vector.broadcast %c3_i32 : i32 to vector<16x64xi32>
    %30 = arith.addi %28, %29 : vector<16x64xi32>
    %31 = arith.cmpi eq, %2, %30 : vector<16x64xi32>
    %cst_9 = arith.constant 1.000000e+00 : f32
    %cst_10 = arith.constant 0.000000e+00 : f32
    %32 = vector.broadcast %cst_9 : f32 to vector<16x64xf32>
    %33 = vector.broadcast %cst_10 : f32 to vector<16x64xf32>
    %34 = arith.select %31, %32, %33 : vector<16x64xi1>, vector<16x64xf32>
    %35 = tpu.iota {dimensions = array<i32: 0>} : vector<2x16xi32>
    %36 = tpu.iota {dimensions = array<i32: 1>} : vector<2x16xi32>
    %c8_i32 = arith.constant 8 : i32
    %37 = vector.broadcast %c8_i32 : i32 to vector<2x16xi32>
    %38 = arith.muli %37, %35 : vector<2x16xi32>
    %c0_i32_11 = arith.constant 0 : i32
    %39 = vector.broadcast %c0_i32_11 : i32 to vector<2x16xi32>
    %40 = arith.addi %38, %39 : vector<2x16xi32>
    %41 = arith.cmpi eq, %36, %40 : vector<2x16xi32>
    %cst_12 = arith.constant 1.000000e+00 : f32
    %cst_13 = arith.constant 0.000000e+00 : f32
    %42 = vector.broadcast %cst_12 : f32 to vector<2x16xf32>
    %43 = vector.broadcast %cst_13 : f32 to vector<2x16xf32>
    %44 = arith.select %41, %42, %43 : vector<2x16xi1>, vector<2x16xf32>
    %c8_i32_14 = arith.constant 8 : i32
    %45 = vector.broadcast %c8_i32_14 : i32 to vector<2x16xi32>
    %46 = arith.muli %45, %35 : vector<2x16xi32>
    %c1_i32_15 = arith.constant 1 : i32
    %47 = vector.broadcast %c1_i32_15 : i32 to vector<2x16xi32>
    %48 = arith.addi %46, %47 : vector<2x16xi32>
    %49 = arith.cmpi eq, %36, %48 : vector<2x16xi32>
    %cst_16 = arith.constant 1.000000e+00 : f32
    %cst_17 = arith.constant 0.000000e+00 : f32
    %50 = vector.broadcast %cst_16 : f32 to vector<2x16xf32>
    %51 = vector.broadcast %cst_17 : f32 to vector<2x16xf32>
    %52 = arith.select %49, %50, %51 : vector<2x16xi1>, vector<2x16xf32>
    %c8_i32_18 = arith.constant 8 : i32
    %53 = vector.broadcast %c8_i32_18 : i32 to vector<2x16xi32>
    %54 = arith.muli %53, %35 : vector<2x16xi32>
    %c2_i32_19 = arith.constant 2 : i32
    %55 = vector.broadcast %c2_i32_19 : i32 to vector<2x16xi32>
    %56 = arith.addi %54, %55 : vector<2x16xi32>
    %57 = arith.cmpi eq, %36, %56 : vector<2x16xi32>
    %cst_20 = arith.constant 1.000000e+00 : f32
    %cst_21 = arith.constant 0.000000e+00 : f32
    %58 = vector.broadcast %cst_20 : f32 to vector<2x16xf32>
    %59 = vector.broadcast %cst_21 : f32 to vector<2x16xf32>
    %60 = arith.select %57, %58, %59 : vector<2x16xi1>, vector<2x16xf32>
    %c8_i32_22 = arith.constant 8 : i32
    %61 = vector.broadcast %c8_i32_22 : i32 to vector<2x16xi32>
    %62 = arith.muli %61, %35 : vector<2x16xi32>
    %c3_i32_23 = arith.constant 3 : i32
    %63 = vector.broadcast %c3_i32_23 : i32 to vector<2x16xi32>
    %64 = arith.addi %62, %63 : vector<2x16xi32>
    %65 = arith.cmpi eq, %36, %64 : vector<2x16xi32>
    %cst_24 = arith.constant 1.000000e+00 : f32
    %cst_25 = arith.constant 0.000000e+00 : f32
    %66 = vector.broadcast %cst_24 : f32 to vector<2x16xf32>
    %67 = vector.broadcast %cst_25 : f32 to vector<2x16xf32>
    %68 = arith.select %65, %66, %67 : vector<2x16xi1>, vector<2x16xf32>
    %c8_i32_26 = arith.constant 8 : i32
    %69 = vector.broadcast %c8_i32_26 : i32 to vector<2x16xi32>
    %70 = arith.muli %69, %35 : vector<2x16xi32>
    %c4_i32_27 = arith.constant 4 : i32
    %71 = vector.broadcast %c4_i32_27 : i32 to vector<2x16xi32>
    %72 = arith.addi %70, %71 : vector<2x16xi32>
    %73 = arith.cmpi eq, %36, %72 : vector<2x16xi32>
    %cst_28 = arith.constant 1.000000e+00 : f32
    %cst_29 = arith.constant 0.000000e+00 : f32
    %74 = vector.broadcast %cst_28 : f32 to vector<2x16xf32>
    %75 = vector.broadcast %cst_29 : f32 to vector<2x16xf32>
    %76 = arith.select %73, %74, %75 : vector<2x16xi1>, vector<2x16xf32>
    %c8_i32_30 = arith.constant 8 : i32
    %77 = vector.broadcast %c8_i32_30 : i32 to vector<2x16xi32>
    %78 = arith.muli %77, %35 : vector<2x16xi32>
    %c5_i32 = arith.constant 5 : i32
    %79 = vector.broadcast %c5_i32 : i32 to vector<2x16xi32>
    %80 = arith.addi %78, %79 : vector<2x16xi32>
    %81 = arith.cmpi eq, %36, %80 : vector<2x16xi32>
    %cst_31 = arith.constant 1.000000e+00 : f32
    %cst_32 = arith.constant 0.000000e+00 : f32
    %82 = vector.broadcast %cst_31 : f32 to vector<2x16xf32>
    %83 = vector.broadcast %cst_32 : f32 to vector<2x16xf32>
    %84 = arith.select %81, %82, %83 : vector<2x16xi1>, vector<2x16xf32>
    %c8_i32_33 = arith.constant 8 : i32
    %85 = vector.broadcast %c8_i32_33 : i32 to vector<2x16xi32>
    %86 = arith.muli %85, %35 : vector<2x16xi32>
    %c6_i32 = arith.constant 6 : i32
    %87 = vector.broadcast %c6_i32 : i32 to vector<2x16xi32>
    %88 = arith.addi %86, %87 : vector<2x16xi32>
    %89 = arith.cmpi eq, %36, %88 : vector<2x16xi32>
    %cst_34 = arith.constant 1.000000e+00 : f32
    %cst_35 = arith.constant 0.000000e+00 : f32
    %90 = vector.broadcast %cst_34 : f32 to vector<2x16xf32>
    %91 = vector.broadcast %cst_35 : f32 to vector<2x16xf32>
    %92 = arith.select %89, %90, %91 : vector<2x16xi1>, vector<2x16xf32>
    %c8_i32_36 = arith.constant 8 : i32
    %93 = vector.broadcast %c8_i32_36 : i32 to vector<2x16xi32>
    %94 = arith.muli %93, %35 : vector<2x16xi32>
    %c7_i32 = arith.constant 7 : i32
    %95 = vector.broadcast %c7_i32 : i32 to vector<2x16xi32>
    %96 = arith.addi %94, %95 : vector<2x16xi32>
    %97 = arith.cmpi eq, %36, %96 : vector<2x16xi32>
    %cst_37 = arith.constant 1.000000e+00 : f32
    %cst_38 = arith.constant 0.000000e+00 : f32
    %98 = vector.broadcast %cst_37 : f32 to vector<2x16xf32>
    %99 = vector.broadcast %cst_38 : f32 to vector<2x16xf32>
    %100 = arith.select %97, %98, %99 : vector<2x16xi1>, vector<2x16xf32>
    %c0_39 = arith.constant 0 : index
    %c0_40 = arith.constant 0 : index
    %c0_41 = arith.constant 0 : index
    %101 = vector.load %arg5[%c0_39, %c0_40, %c0_41] : memref<2x8x128xf32, #tpu.memory_space<vmem>>, vector<1x8x128xf32>
    %102 = vector.shape_cast %101 : vector<1x8x128xf32> to vector<8x128xf32>
    %103 = vector.extract_strided_slice %102 {offsets = [0, 0], sizes = [1, 96], strides = [1, 1]} : vector<8x128xf32> to vector<1x96xf32>
    %104 = vector.extract_strided_slice %102 {offsets = [1, 0], sizes = [1, 32], strides = [1, 1]} : vector<8x128xf32> to vector<1x32xf32>
    %105 = vector.extract_strided_slice %102 {offsets = [2, 0], sizes = [1, 32], strides = [1, 1]} : vector<8x128xf32> to vector<1x32xf32>
    %106 = vector.extract_strided_slice %102 {offsets = [3, 0], sizes = [1, 32], strides = [1, 1]} : vector<8x128xf32> to vector<1x32xf32>
    %107 = vector.extract_strided_slice %102 {offsets = [4, 0], sizes = [1, 64], strides = [1, 1]} : vector<8x128xf32> to vector<1x64xf32>
    %108 = vector.extract_strided_slice %102 {offsets = [5, 0], sizes = [1, 32], strides = [1, 1]} : vector<8x128xf32> to vector<1x32xf32>
    %109 = vector.extract_strided_slice %102 {offsets = [6, 0], sizes = [1, 32], strides = [1, 1]} : vector<8x128xf32> to vector<1x32xf32>
    %110 = vector.extract_strided_slice %102 {offsets = [7, 0], sizes = [1, 32], strides = [1, 1]} : vector<8x128xf32> to vector<1x32xf32>
    %c0_42 = arith.constant 0 : index
    %c0_43 = arith.constant 0 : index
    %c0_44 = arith.constant 0 : index
    %111 = vector.load %arg1[%c0_42, %c0_43, %c0_44] : memref<2x32x96xf32, #tpu.memory_space<vmem>>, vector<1x32x96xf32>
    %112 = vector.shape_cast %111 : vector<1x32x96xf32> to vector<32x96xf32>
    %cst_45 = arith.constant dense<0.000000e+00> : vector<16x96xf32>
    %113 = tpu.matmul %0, %112, %cst_45 {dimension_numbers = #tpu.dot_dimension_numbers<[1], [0], [0], [1], [0, 0, 1, 1], [], []>, precision = #tpu.contract_precision<fp32>} : vector<16x32xf32>, vector<32x96xf32>, vector<16x96xf32> -> vector<16x96xf32>
    %114 = vector.broadcast %103 : vector<1x96xf32> to vector<16x96xf32>
    %115 = arith.addf %113, %114 : vector<16x96xf32>
    %116 = vector.extract_strided_slice %115 {offsets = [0, 0], sizes = [8, 8], strides = [1, 1]} : vector<16x96xf32> to vector<8x8xf32>
    %117 = vector.extract_strided_slice %115 {offsets = [0, 8], sizes = [8, 8], strides = [1, 1]} : vector<16x96xf32> to vector<8x8xf32>
    %118 = vector.extract_strided_slice %115 {offsets = [0, 16], sizes = [8, 8], strides = [1, 1]} : vector<16x96xf32> to vector<8x8xf32>
    %cst_46 = arith.constant dense<0.000000e+00> : vector<8x8xf32>
    %119 = tpu.matmul %116, %117, %cst_46 {dimension_numbers = #tpu.dot_dimension_numbers<[1], [1], [0], [0], [0, 0, 1, 0], [], []>, precision = #tpu.contract_precision<fp32>} : vector<8x8xf32>, vector<8x8xf32>, vector<8x8xf32> -> vector<8x8xf32>
    %120 = vector.extract_strided_slice %115 {offsets = [0, 24], sizes = [8, 8], strides = [1, 1]} : vector<16x96xf32> to vector<8x8xf32>
    %121 = vector.extract_strided_slice %115 {offsets = [0, 32], sizes = [8, 8], strides = [1, 1]} : vector<16x96xf32> to vector<8x8xf32>
    %122 = vector.extract_strided_slice %115 {offsets = [0, 40], sizes = [8, 8], strides = [1, 1]} : vector<16x96xf32> to vector<8x8xf32>
    %cst_47 = arith.constant dense<0.000000e+00> : vector<8x8xf32>
    %123 = tpu.matmul %120, %121, %cst_47 {dimension_numbers = #tpu.dot_dimension_numbers<[1], [1], [0], [0], [0, 0, 1, 0], [], []>, precision = #tpu.contract_precision<fp32>} : vector<8x8xf32>, vector<8x8xf32>, vector<8x8xf32> -> vector<8x8xf32>
    %124 = vector.extract_strided_slice %115 {offsets = [0, 48], sizes = [8, 8], strides = [1, 1]} : vector<16x96xf32> to vector<8x8xf32>
    %125 = vector.extract_strided_slice %115 {offsets = [0, 56], sizes = [8, 8], strides = [1, 1]} : vector<16x96xf32> to vector<8x8xf32>
    %126 = vector.extract_strided_slice %115 {offsets = [0, 64], sizes = [8, 8], strides = [1, 1]} : vector<16x96xf32> to vector<8x8xf32>
    %cst_48 = arith.constant dense<0.000000e+00> : vector<8x8xf32>
    %127 = tpu.matmul %124, %125, %cst_48 {dimension_numbers = #tpu.dot_dimension_numbers<[1], [1], [0], [0], [0, 0, 1, 0], [], []>, precision = #tpu.contract_precision<fp32>} : vector<8x8xf32>, vector<8x8xf32>, vector<8x8xf32> -> vector<8x8xf32>
    %128 = vector.extract_strided_slice %115 {offsets = [0, 72], sizes = [8, 8], strides = [1, 1]} : vector<16x96xf32> to vector<8x8xf32>
    %129 = vector.extract_strided_slice %115 {offsets = [0, 80], sizes = [8, 8], strides = [1, 1]} : vector<16x96xf32> to vector<8x8xf32>
    %130 = vector.extract_strided_slice %115 {offsets = [0, 88], sizes = [8, 8], strides = [1, 1]} : vector<16x96xf32> to vector<8x8xf32>
    %cst_49 = arith.constant dense<0.000000e+00> : vector<8x8xf32>
    %131 = tpu.matmul %128, %129, %cst_49 {dimension_numbers = #tpu.dot_dimension_numbers<[1], [1], [0], [0], [0, 0, 1, 0], [], []>, precision = #tpu.contract_precision<fp32>} : vector<8x8xf32>, vector<8x8xf32>, vector<8x8xf32> -> vector<8x8xf32>
    %132 = vector.extract_strided_slice %115 {offsets = [8, 0], sizes = [8, 8], strides = [1, 1]} : vector<16x96xf32> to vector<8x8xf32>
    %133 = vector.extract_strided_slice %115 {offsets = [8, 8], sizes = [8, 8], strides = [1, 1]} : vector<16x96xf32> to vector<8x8xf32>
    %134 = vector.extract_strided_slice %115 {offsets = [8, 16], sizes = [8, 8], strides = [1, 1]} : vector<16x96xf32> to vector<8x8xf32>
    %cst_50 = arith.constant dense<0.000000e+00> : vector<8x8xf32>
    %135 = tpu.matmul %132, %133, %cst_50 {dimension_numbers = #tpu.dot_dimension_numbers<[1], [1], [0], [0], [0, 0, 1, 0], [], []>, precision = #tpu.contract_precision<fp32>} : vector<8x8xf32>, vector<8x8xf32>, vector<8x8xf32> -> vector<8x8xf32>
    %136 = vector.extract_strided_slice %115 {offsets = [8, 24], sizes = [8, 8], strides = [1, 1]} : vector<16x96xf32> to vector<8x8xf32>
    %137 = vector.extract_strided_slice %115 {offsets = [8, 32], sizes = [8, 8], strides = [1, 1]} : vector<16x96xf32> to vector<8x8xf32>
    %138 = vector.extract_strided_slice %115 {offsets = [8, 40], sizes = [8, 8], strides = [1, 1]} : vector<16x96xf32> to vector<8x8xf32>
    %cst_51 = arith.constant dense<0.000000e+00> : vector<8x8xf32>
    %139 = tpu.matmul %136, %137, %cst_51 {dimension_numbers = #tpu.dot_dimension_numbers<[1], [1], [0], [0], [0, 0, 1, 0], [], []>, precision = #tpu.contract_precision<fp32>} : vector<8x8xf32>, vector<8x8xf32>, vector<8x8xf32> -> vector<8x8xf32>
    %140 = vector.extract_strided_slice %115 {offsets = [8, 48], sizes = [8, 8], strides = [1, 1]} : vector<16x96xf32> to vector<8x8xf32>
    %141 = vector.extract_strided_slice %115 {offsets = [8, 56], sizes = [8, 8], strides = [1, 1]} : vector<16x96xf32> to vector<8x8xf32>
    %142 = vector.extract_strided_slice %115 {offsets = [8, 64], sizes = [8, 8], strides = [1, 1]} : vector<16x96xf32> to vector<8x8xf32>
    %cst_52 = arith.constant dense<0.000000e+00> : vector<8x8xf32>
    %143 = tpu.matmul %140, %141, %cst_52 {dimension_numbers = #tpu.dot_dimension_numbers<[1], [1], [0], [0], [0, 0, 1, 0], [], []>, precision = #tpu.contract_precision<fp32>} : vector<8x8xf32>, vector<8x8xf32>, vector<8x8xf32> -> vector<8x8xf32>
    %144 = vector.extract_strided_slice %115 {offsets = [8, 72], sizes = [8, 8], strides = [1, 1]} : vector<16x96xf32> to vector<8x8xf32>
    %145 = vector.extract_strided_slice %115 {offsets = [8, 80], sizes = [8, 8], strides = [1, 1]} : vector<16x96xf32> to vector<8x8xf32>
    %146 = vector.extract_strided_slice %115 {offsets = [8, 88], sizes = [8, 8], strides = [1, 1]} : vector<16x96xf32> to vector<8x8xf32>
    %cst_53 = arith.constant dense<0.000000e+00> : vector<8x8xf32>
    %147 = tpu.matmul %144, %145, %cst_53 {dimension_numbers = #tpu.dot_dimension_numbers<[1], [1], [0], [0], [0, 0, 1, 0], [], []>, precision = #tpu.contract_precision<fp32>} : vector<8x8xf32>, vector<8x8xf32>, vector<8x8xf32> -> vector<8x8xf32>
    %148 = tpu.concatenate %119, %123, %127, %131, %135, %139, %143, %147 in 0 : vector<8x8xf32>, vector<8x8xf32>, vector<8x8xf32>, vector<8x8xf32>, vector<8x8xf32>, vector<8x8xf32>, vector<8x8xf32>, vector<8x8xf32> -> vector<64x8xf32>
    %cst_54 = arith.constant dense<0xFF800000> : vector<64xf32>
    %149 = vector.multi_reduction <maximumf>, %148, %cst_54 [1] : vector<64x8xf32> to vector<64xf32>
    %150 = vector.shape_cast %149 : vector<64xf32> to vector<64x1xf32>
    %151 = vector.broadcast %150 : vector<64x1xf32> to vector<64x8xf32>
    %152 = arith.subf %148, %151 : vector<64x8xf32>
    %153 = math.exp %152 : vector<64x8xf32>
    %cst_55 = arith.constant dense<0.000000e+00> : vector<64xf32>
    %154 = vector.multi_reduction <add>, %153, %cst_55 [1] : vector<64x8xf32> to vector<64xf32>
    %155 = vector.shape_cast %154 : vector<64xf32> to vector<64x1xf32>
    %156 = vector.broadcast %155 : vector<64x1xf32> to vector<64x8xf32>
    %157 = arith.divf %153, %156 : vector<64x8xf32>
    %158 = vector.extract_strided_slice %157 {offsets = [0, 0], sizes = [8, 8], strides = [1, 1]} : vector<64x8xf32> to vector<8x8xf32>
    %cst_56 = arith.constant dense<0.000000e+00> : vector<8x8xf32>
    %159 = tpu.matmul %158, %118, %cst_56 {dimension_numbers = #tpu.dot_dimension_numbers<[1], [0], [0], [1], [0, 0, 1, 1], [], []>, precision = #tpu.contract_precision<fp32>} : vector<8x8xf32>, vector<8x8xf32>, vector<8x8xf32> -> vector<8x8xf32>
    %160 = vector.extract_strided_slice %157 {offsets = [8, 0], sizes = [8, 8], strides = [1, 1]} : vector<64x8xf32> to vector<8x8xf32>
    %cst_57 = arith.constant dense<0.000000e+00> : vector<8x8xf32>
    %161 = tpu.matmul %160, %122, %cst_57 {dimension_numbers = #tpu.dot_dimension_numbers<[1], [0], [0], [1], [0, 0, 1, 1], [], []>, precision = #tpu.contract_precision<fp32>} : vector<8x8xf32>, vector<8x8xf32>, vector<8x8xf32> -> vector<8x8xf32>
    %162 = vector.extract_strided_slice %157 {offsets = [16, 0], sizes = [8, 8], strides = [1, 1]} : vector<64x8xf32> to vector<8x8xf32>
    %cst_58 = arith.constant dense<0.000000e+00> : vector<8x8xf32>
    %163 = tpu.matmul %162, %126, %cst_58 {dimension_numbers = #tpu.dot_dimension_numbers<[1], [0], [0], [1], [0, 0, 1, 1], [], []>, precision = #tpu.contract_precision<fp32>} : vector<8x8xf32>, vector<8x8xf32>, vector<8x8xf32> -> vector<8x8xf32>
    %164 = vector.extract_strided_slice %157 {offsets = [24, 0], sizes = [8, 8], strides = [1, 1]} : vector<64x8xf32> to vector<8x8xf32>
    %cst_59 = arith.constant dense<0.000000e+00> : vector<8x8xf32>
    %165 = tpu.matmul %164, %130, %cst_59 {dimension_numbers = #tpu.dot_dimension_numbers<[1], [0], [0], [1], [0, 0, 1, 1], [], []>, precision = #tpu.contract_precision<fp32>} : vector<8x8xf32>, vector<8x8xf32>, vector<8x8xf32> -> vector<8x8xf32>
    %166 = vector.extract_strided_slice %157 {offsets = [32, 0], sizes = [8, 8], strides = [1, 1]} : vector<64x8xf32> to vector<8x8xf32>
    %cst_60 = arith.constant dense<0.000000e+00> : vector<8x8xf32>
    %167 = tpu.matmul %166, %134, %cst_60 {dimension_numbers = #tpu.dot_dimension_numbers<[1], [0], [0], [1], [0, 0, 1, 1], [], []>, precision = #tpu.contract_precision<fp32>} : vector<8x8xf32>, vector<8x8xf32>, vector<8x8xf32> -> vector<8x8xf32>
    %168 = vector.extract_strided_slice %157 {offsets = [40, 0], sizes = [8, 8], strides = [1, 1]} : vector<64x8xf32> to vector<8x8xf32>
    %cst_61 = arith.constant dense<0.000000e+00> : vector<8x8xf32>
    %169 = tpu.matmul %168, %138, %cst_61 {dimension_numbers = #tpu.dot_dimension_numbers<[1], [0], [0], [1], [0, 0, 1, 1], [], []>, precision = #tpu.contract_precision<fp32>} : vector<8x8xf32>, vector<8x8xf32>, vector<8x8xf32> -> vector<8x8xf32>
    %170 = vector.extract_strided_slice %157 {offsets = [48, 0], sizes = [8, 8], strides = [1, 1]} : vector<64x8xf32> to vector<8x8xf32>
    %cst_62 = arith.constant dense<0.000000e+00> : vector<8x8xf32>
    %171 = tpu.matmul %170, %142, %cst_62 {dimension_numbers = #tpu.dot_dimension_numbers<[1], [0], [0], [1], [0, 0, 1, 1], [], []>, precision = #tpu.contract_precision<fp32>} : vector<8x8xf32>, vector<8x8xf32>, vector<8x8xf32> -> vector<8x8xf32>
    %172 = vector.extract_strided_slice %157 {offsets = [56, 0], sizes = [8, 8], strides = [1, 1]} : vector<64x8xf32> to vector<8x8xf32>
    %cst_63 = arith.constant dense<0.000000e+00> : vector<8x8xf32>
    %173 = tpu.matmul %172, %146, %cst_63 {dimension_numbers = #tpu.dot_dimension_numbers<[1], [0], [0], [1], [0, 0, 1, 1], [], []>, precision = #tpu.contract_precision<fp32>} : vector<8x8xf32>, vector<8x8xf32>, vector<8x8xf32> -> vector<8x8xf32>
    %174 = tpu.concatenate %159, %161, %163, %165, %167, %169, %171, %173 in 0 : vector<8x8xf32>, vector<8x8xf32>, vector<8x8xf32>, vector<8x8xf32>, vector<8x8xf32>, vector<8x8xf32>, vector<8x8xf32>, vector<8x8xf32> -> vector<64x8xf32>
    %c0_64 = arith.constant 0 : index
    %c0_65 = arith.constant 0 : index
    %c0_66 = arith.constant 0 : index
    %175 = vector.load %arg2[%c0_64, %c0_65, %c0_66] : memref<2x32x32xf32, #tpu.memory_space<vmem>>, vector<1x32x32xf32>
    %176 = vector.shape_cast %175 : vector<1x32x32xf32> to vector<32x32xf32>
    %cst_67 = arith.constant dense<0.000000e+00> : vector<16x8xf32>
    %177 = tpu.matmul %10, %174, %cst_67 {dimension_numbers = #tpu.dot_dimension_numbers<[1], [0], [0], [1], [0, 0, 1, 1], [], []>, precision = #tpu.contract_precision<fp32>} : vector<16x64xf32>, vector<64x8xf32>, vector<16x8xf32> -> vector<16x8xf32>
    %178 = vector.extract_strided_slice %176 {offsets = [0, 0], sizes = [8, 32], strides = [1, 1]} : vector<32x32xf32> to vector<8x32xf32>
    %cst_68 = arith.constant dense<0.000000e+00> : vector<16x32xf32>
    %179 = tpu.matmul %177, %178, %cst_68 {dimension_numbers = #tpu.dot_dimension_numbers<[1], [0], [0], [1], [0, 0, 1, 1], [], []>, precision = #tpu.contract_precision<fp32>} : vector<16x8xf32>, vector<8x32xf32>, vector<16x32xf32> -> vector<16x32xf32>
    %180 = vector.broadcast %104 : vector<1x32xf32> to vector<16x32xf32>
    %181 = arith.addf %180, %179 : vector<16x32xf32>
    %cst_69 = arith.constant dense<0.000000e+00> : vector<16x8xf32>
    %182 = tpu.matmul %18, %174, %cst_69 {dimension_numbers = #tpu.dot_dimension_numbers<[1], [0], [0], [1], [0, 0, 1, 1], [], []>, precision = #tpu.contract_precision<fp32>} : vector<16x64xf32>, vector<64x8xf32>, vector<16x8xf32> -> vector<16x8xf32>
    %183 = vector.extract_strided_slice %176 {offsets = [8, 0], sizes = [8, 32], strides = [1, 1]} : vector<32x32xf32> to vector<8x32xf32>
    %cst_70 = arith.constant dense<0.000000e+00> : vector<16x32xf32>
    %184 = tpu.matmul %182, %183, %cst_70 {dimension_numbers = #tpu.dot_dimension_numbers<[1], [0], [0], [1], [0, 0, 1, 1], [], []>, precision = #tpu.contract_precision<fp32>} : vector<16x8xf32>, vector<8x32xf32>, vector<16x32xf32> -> vector<16x32xf32>
    %185 = arith.addf %181, %184 : vector<16x32xf32>
    %cst_71 = arith.constant dense<0.000000e+00> : vector<16x8xf32>
    %186 = tpu.matmul %26, %174, %cst_71 {dimension_numbers = #tpu.dot_dimension_numbers<[1], [0], [0], [1], [0, 0, 1, 1], [], []>, precision = #tpu.contract_precision<fp32>} : vector<16x64xf32>, vector<64x8xf32>, vector<16x8xf32> -> vector<16x8xf32>
    %187 = vector.extract_strided_slice %176 {offsets = [16, 0], sizes = [8, 32], strides = [1, 1]} : vector<32x32xf32> to vector<8x32xf32>
    %cst_72 = arith.constant dense<0.000000e+00> : vector<16x32xf32>
    %188 = tpu.matmul %186, %187, %cst_72 {dimension_numbers = #tpu.dot_dimension_numbers<[1], [0], [0], [1], [0, 0, 1, 1], [], []>, precision = #tpu.contract_precision<fp32>} : vector<16x8xf32>, vector<8x32xf32>, vector<16x32xf32> -> vector<16x32xf32>
    %189 = arith.addf %185, %188 : vector<16x32xf32>
    %cst_73 = arith.constant dense<0.000000e+00> : vector<16x8xf32>
    %190 = tpu.matmul %34, %174, %cst_73 {dimension_numbers = #tpu.dot_dimension_numbers<[1], [0], [0], [1], [0, 0, 1, 1], [], []>, precision = #tpu.contract_precision<fp32>} : vector<16x64xf32>, vector<64x8xf32>, vector<16x8xf32> -> vector<16x8xf32>
    %191 = vector.extract_strided_slice %176 {offsets = [24, 0], sizes = [8, 32], strides = [1, 1]} : vector<32x32xf32> to vector<8x32xf32>
    %cst_74 = arith.constant dense<0.000000e+00> : vector<16x32xf32>
    %192 = tpu.matmul %190, %191, %cst_74 {dimension_numbers = #tpu.dot_dimension_numbers<[1], [0], [0], [1], [0, 0, 1, 1], [], []>, precision = #tpu.contract_precision<fp32>} : vector<16x8xf32>, vector<8x32xf32>, vector<16x32xf32> -> vector<16x32xf32>
    %193 = arith.addf %189, %192 : vector<16x32xf32>
    %194 = arith.addf %193, %0 : vector<16x32xf32>
    %cst_75 = arith.constant dense<0.000000e+00> : vector<16xf32>
    %195 = vector.multi_reduction <add>, %194, %cst_75 [1] : vector<16x32xf32> to vector<16xf32>
    %196 = vector.shape_cast %195 : vector<16xf32> to vector<16x1xf32>
    %cst_76 = arith.constant 3.200000e+01 : f32
    %197 = vector.broadcast %cst_76 : f32 to vector<16x1xf32>
    %198 = arith.divf %196, %197 : vector<16x1xf32>
    %199 = vector.broadcast %198 : vector<16x1xf32> to vector<16x32xf32>
    %200 = arith.subf %194, %199 : vector<16x32xf32>
    %201 = arith.mulf %200, %200 : vector<16x32xf32>
    %cst_77 = arith.constant dense<0.000000e+00> : vector<16xf32>
    %202 = vector.multi_reduction <add>, %201, %cst_77 [1] : vector<16x32xf32> to vector<16xf32>
    %203 = vector.shape_cast %202 : vector<16xf32> to vector<16x1xf32>
    %cst_78 = arith.constant 3.200000e+01 : f32
    %204 = vector.broadcast %cst_78 : f32 to vector<16x1xf32>
    %205 = arith.divf %203, %204 : vector<16x1xf32>
    %206 = vector.broadcast %198 : vector<16x1xf32> to vector<16x32xf32>
    %207 = arith.subf %194, %206 : vector<16x32xf32>
    %cst_79 = arith.constant 9.99999974E-6 : f32
    %208 = vector.broadcast %cst_79 : f32 to vector<16x1xf32>
    %209 = arith.addf %205, %208 : vector<16x1xf32>
    %210 = math.rsqrt %209 : vector<16x1xf32>
    %211 = vector.broadcast %210 : vector<16x1xf32> to vector<16x32xf32>
    %212 = arith.mulf %207, %211 : vector<16x32xf32>
    %213 = vector.broadcast %105 : vector<1x32xf32> to vector<16x32xf32>
    %214 = arith.mulf %213, %212 : vector<16x32xf32>
    %215 = vector.broadcast %106 : vector<1x32xf32> to vector<16x32xf32>
    %216 = arith.addf %214, %215 : vector<16x32xf32>
    %c0_80 = arith.constant 0 : index
    %c0_81 = arith.constant 0 : index
    %c0_82 = arith.constant 0 : index
    %217 = vector.load %arg3[%c0_80, %c0_81, %c0_82] : memref<2x32x64xf32, #tpu.memory_space<vmem>>, vector<1x32x64xf32>
    %218 = vector.shape_cast %217 : vector<1x32x64xf32> to vector<32x64xf32>
    %cst_83 = arith.constant dense<0.000000e+00> : vector<16x64xf32>
    %219 = tpu.matmul %216, %218, %cst_83 {dimension_numbers = #tpu.dot_dimension_numbers<[1], [0], [0], [1], [0, 0, 1, 1], [], []>, precision = #tpu.contract_precision<fp32>} : vector<16x32xf32>, vector<32x64xf32>, vector<16x64xf32> -> vector<16x64xf32>
    %220 = vector.broadcast %107 : vector<1x64xf32> to vector<16x64xf32>
    %221 = arith.addf %219, %220 : vector<16x64xf32>
    %cst_84 = arith.constant 0.000000e+00 : f32
    %222 = vector.broadcast %cst_84 : f32 to vector<16x64xf32>
    %223 = arith.maximumf %221, %222 : vector<16x64xf32>
    %c0_85 = arith.constant 0 : index
    %c0_86 = arith.constant 0 : index
    %c0_87 = arith.constant 0 : index
    %224 = vector.load %arg4[%c0_85, %c0_86, %c0_87] : memref<2x64x32xf32, #tpu.memory_space<vmem>>, vector<1x64x32xf32>
    %225 = vector.shape_cast %224 : vector<1x64x32xf32> to vector<64x32xf32>
    %cst_88 = arith.constant dense<0.000000e+00> : vector<16x32xf32>
    %226 = tpu.matmul %223, %225, %cst_88 {dimension_numbers = #tpu.dot_dimension_numbers<[1], [0], [0], [1], [0, 0, 1, 1], [], []>, precision = #tpu.contract_precision<fp32>} : vector<16x64xf32>, vector<64x32xf32>, vector<16x32xf32> -> vector<16x32xf32>
    %227 = vector.broadcast %108 : vector<1x32xf32> to vector<16x32xf32>
    %228 = arith.addf %226, %227 : vector<16x32xf32>
    %229 = arith.addf %228, %216 : vector<16x32xf32>
    %cst_89 = arith.constant dense<0.000000e+00> : vector<16xf32>
    %230 = vector.multi_reduction <add>, %229, %cst_89 [1] : vector<16x32xf32> to vector<16xf32>
    %231 = vector.shape_cast %230 : vector<16xf32> to vector<16x1xf32>
    %cst_90 = arith.constant 3.200000e+01 : f32
    %232 = vector.broadcast %cst_90 : f32 to vector<16x1xf32>
    %233 = arith.divf %231, %232 : vector<16x1xf32>
    %234 = vector.broadcast %233 : vector<16x1xf32> to vector<16x32xf32>
    %235 = arith.subf %229, %234 : vector<16x32xf32>
    %236 = arith.mulf %235, %235 : vector<16x32xf32>
    %cst_91 = arith.constant dense<0.000000e+00> : vector<16xf32>
    %237 = vector.multi_reduction <add>, %236, %cst_91 [1] : vector<16x32xf32> to vector<16xf32>
    %238 = vector.shape_cast %237 : vector<16xf32> to vector<16x1xf32>
    %cst_92 = arith.constant 3.200000e+01 : f32
    %239 = vector.broadcast %cst_92 : f32 to vector<16x1xf32>
    %240 = arith.divf %238, %239 : vector<16x1xf32>
    %241 = vector.broadcast %233 : vector<16x1xf32> to vector<16x32xf32>
    %242 = arith.subf %229, %241 : vector<16x32xf32>
    %cst_93 = arith.constant 9.99999974E-6 : f32
    %243 = vector.broadcast %cst_93 : f32 to vector<16x1xf32>
    %244 = arith.addf %240, %243 : vector<16x1xf32>
    %245 = math.rsqrt %244 : vector<16x1xf32>
    %246 = vector.broadcast %245 : vector<16x1xf32> to vector<16x32xf32>
    %247 = arith.mulf %242, %246 : vector<16x32xf32>
    %248 = vector.broadcast %109 : vector<1x32xf32> to vector<16x32xf32>
    %249 = arith.mulf %248, %247 : vector<16x32xf32>
    %250 = vector.broadcast %110 : vector<1x32xf32> to vector<16x32xf32>
    %251 = arith.addf %249, %250 : vector<16x32xf32>
    %c1 = arith.constant 1 : index
    %c0_94 = arith.constant 0 : index
    %c0_95 = arith.constant 0 : index
    %252 = vector.load %arg5[%c1, %c0_94, %c0_95] : memref<2x8x128xf32, #tpu.memory_space<vmem>>, vector<1x8x128xf32>
    %253 = vector.shape_cast %252 : vector<1x8x128xf32> to vector<8x128xf32>
    %254 = vector.extract_strided_slice %253 {offsets = [0, 0], sizes = [1, 96], strides = [1, 1]} : vector<8x128xf32> to vector<1x96xf32>
    %255 = vector.extract_strided_slice %253 {offsets = [1, 0], sizes = [1, 32], strides = [1, 1]} : vector<8x128xf32> to vector<1x32xf32>
    %256 = vector.extract_strided_slice %253 {offsets = [2, 0], sizes = [1, 32], strides = [1, 1]} : vector<8x128xf32> to vector<1x32xf32>
    %257 = vector.extract_strided_slice %253 {offsets = [3, 0], sizes = [1, 32], strides = [1, 1]} : vector<8x128xf32> to vector<1x32xf32>
    %258 = vector.extract_strided_slice %253 {offsets = [4, 0], sizes = [1, 64], strides = [1, 1]} : vector<8x128xf32> to vector<1x64xf32>
    %259 = vector.extract_strided_slice %253 {offsets = [5, 0], sizes = [1, 32], strides = [1, 1]} : vector<8x128xf32> to vector<1x32xf32>
    %260 = vector.extract_strided_slice %253 {offsets = [6, 0], sizes = [1, 32], strides = [1, 1]} : vector<8x128xf32> to vector<1x32xf32>
    %261 = vector.extract_strided_slice %253 {offsets = [7, 0], sizes = [1, 32], strides = [1, 1]} : vector<8x128xf32> to vector<1x32xf32>
    %c1_96 = arith.constant 1 : index
    %c0_97 = arith.constant 0 : index
    %c0_98 = arith.constant 0 : index
    %262 = vector.load %arg1[%c1_96, %c0_97, %c0_98] : memref<2x32x96xf32, #tpu.memory_space<vmem>>, vector<1x32x96xf32>
    %263 = vector.shape_cast %262 : vector<1x32x96xf32> to vector<32x96xf32>
    %cst_99 = arith.constant dense<0.000000e+00> : vector<16x96xf32>
    %264 = tpu.matmul %251, %263, %cst_99 {dimension_numbers = #tpu.dot_dimension_numbers<[1], [0], [0], [1], [0, 0, 1, 1], [], []>, precision = #tpu.contract_precision<fp32>} : vector<16x32xf32>, vector<32x96xf32>, vector<16x96xf32> -> vector<16x96xf32>
    %265 = vector.broadcast %254 : vector<1x96xf32> to vector<16x96xf32>
    %266 = arith.addf %264, %265 : vector<16x96xf32>
    %267 = vector.extract_strided_slice %266 {offsets = [0, 0], sizes = [8, 8], strides = [1, 1]} : vector<16x96xf32> to vector<8x8xf32>
    %268 = vector.extract_strided_slice %266 {offsets = [0, 8], sizes = [8, 8], strides = [1, 1]} : vector<16x96xf32> to vector<8x8xf32>
    %269 = vector.extract_strided_slice %266 {offsets = [0, 16], sizes = [8, 8], strides = [1, 1]} : vector<16x96xf32> to vector<8x8xf32>
    %cst_100 = arith.constant dense<0.000000e+00> : vector<8x8xf32>
    %270 = tpu.matmul %267, %268, %cst_100 {dimension_numbers = #tpu.dot_dimension_numbers<[1], [1], [0], [0], [0, 0, 1, 0], [], []>, precision = #tpu.contract_precision<fp32>} : vector<8x8xf32>, vector<8x8xf32>, vector<8x8xf32> -> vector<8x8xf32>
    %271 = vector.extract_strided_slice %266 {offsets = [0, 24], sizes = [8, 8], strides = [1, 1]} : vector<16x96xf32> to vector<8x8xf32>
    %272 = vector.extract_strided_slice %266 {offsets = [0, 32], sizes = [8, 8], strides = [1, 1]} : vector<16x96xf32> to vector<8x8xf32>
    %273 = vector.extract_strided_slice %266 {offsets = [0, 40], sizes = [8, 8], strides = [1, 1]} : vector<16x96xf32> to vector<8x8xf32>
    %cst_101 = arith.constant dense<0.000000e+00> : vector<8x8xf32>
    %274 = tpu.matmul %271, %272, %cst_101 {dimension_numbers = #tpu.dot_dimension_numbers<[1], [1], [0], [0], [0, 0, 1, 0], [], []>, precision = #tpu.contract_precision<fp32>} : vector<8x8xf32>, vector<8x8xf32>, vector<8x8xf32> -> vector<8x8xf32>
    %275 = vector.extract_strided_slice %266 {offsets = [0, 48], sizes = [8, 8], strides = [1, 1]} : vector<16x96xf32> to vector<8x8xf32>
    %276 = vector.extract_strided_slice %266 {offsets = [0, 56], sizes = [8, 8], strides = [1, 1]} : vector<16x96xf32> to vector<8x8xf32>
    %277 = vector.extract_strided_slice %266 {offsets = [0, 64], sizes = [8, 8], strides = [1, 1]} : vector<16x96xf32> to vector<8x8xf32>
    %cst_102 = arith.constant dense<0.000000e+00> : vector<8x8xf32>
    %278 = tpu.matmul %275, %276, %cst_102 {dimension_numbers = #tpu.dot_dimension_numbers<[1], [1], [0], [0], [0, 0, 1, 0], [], []>, precision = #tpu.contract_precision<fp32>} : vector<8x8xf32>, vector<8x8xf32>, vector<8x8xf32> -> vector<8x8xf32>
    %279 = vector.extract_strided_slice %266 {offsets = [0, 72], sizes = [8, 8], strides = [1, 1]} : vector<16x96xf32> to vector<8x8xf32>
    %280 = vector.extract_strided_slice %266 {offsets = [0, 80], sizes = [8, 8], strides = [1, 1]} : vector<16x96xf32> to vector<8x8xf32>
    %281 = vector.extract_strided_slice %266 {offsets = [0, 88], sizes = [8, 8], strides = [1, 1]} : vector<16x96xf32> to vector<8x8xf32>
    %cst_103 = arith.constant dense<0.000000e+00> : vector<8x8xf32>
    %282 = tpu.matmul %279, %280, %cst_103 {dimension_numbers = #tpu.dot_dimension_numbers<[1], [1], [0], [0], [0, 0, 1, 0], [], []>, precision = #tpu.contract_precision<fp32>} : vector<8x8xf32>, vector<8x8xf32>, vector<8x8xf32> -> vector<8x8xf32>
    %283 = vector.extract_strided_slice %266 {offsets = [8, 0], sizes = [8, 8], strides = [1, 1]} : vector<16x96xf32> to vector<8x8xf32>
    %284 = vector.extract_strided_slice %266 {offsets = [8, 8], sizes = [8, 8], strides = [1, 1]} : vector<16x96xf32> to vector<8x8xf32>
    %285 = vector.extract_strided_slice %266 {offsets = [8, 16], sizes = [8, 8], strides = [1, 1]} : vector<16x96xf32> to vector<8x8xf32>
    %cst_104 = arith.constant dense<0.000000e+00> : vector<8x8xf32>
    %286 = tpu.matmul %283, %284, %cst_104 {dimension_numbers = #tpu.dot_dimension_numbers<[1], [1], [0], [0], [0, 0, 1, 0], [], []>, precision = #tpu.contract_precision<fp32>} : vector<8x8xf32>, vector<8x8xf32>, vector<8x8xf32> -> vector<8x8xf32>
    %287 = vector.extract_strided_slice %266 {offsets = [8, 24], sizes = [8, 8], strides = [1, 1]} : vector<16x96xf32> to vector<8x8xf32>
    %288 = vector.extract_strided_slice %266 {offsets = [8, 32], sizes = [8, 8], strides = [1, 1]} : vector<16x96xf32> to vector<8x8xf32>
    %289 = vector.extract_strided_slice %266 {offsets = [8, 40], sizes = [8, 8], strides = [1, 1]} : vector<16x96xf32> to vector<8x8xf32>
    %cst_105 = arith.constant dense<0.000000e+00> : vector<8x8xf32>
    %290 = tpu.matmul %287, %288, %cst_105 {dimension_numbers = #tpu.dot_dimension_numbers<[1], [1], [0], [0], [0, 0, 1, 0], [], []>, precision = #tpu.contract_precision<fp32>} : vector<8x8xf32>, vector<8x8xf32>, vector<8x8xf32> -> vector<8x8xf32>
    %291 = vector.extract_strided_slice %266 {offsets = [8, 48], sizes = [8, 8], strides = [1, 1]} : vector<16x96xf32> to vector<8x8xf32>
    %292 = vector.extract_strided_slice %266 {offsets = [8, 56], sizes = [8, 8], strides = [1, 1]} : vector<16x96xf32> to vector<8x8xf32>
    %293 = vector.extract_strided_slice %266 {offsets = [8, 64], sizes = [8, 8], strides = [1, 1]} : vector<16x96xf32> to vector<8x8xf32>
    %cst_106 = arith.constant dense<0.000000e+00> : vector<8x8xf32>
    %294 = tpu.matmul %291, %292, %cst_106 {dimension_numbers = #tpu.dot_dimension_numbers<[1], [1], [0], [0], [0, 0, 1, 0], [], []>, precision = #tpu.contract_precision<fp32>} : vector<8x8xf32>, vector<8x8xf32>, vector<8x8xf32> -> vector<8x8xf32>
    %295 = vector.extract_strided_slice %266 {offsets = [8, 72], sizes = [8, 8], strides = [1, 1]} : vector<16x96xf32> to vector<8x8xf32>
    %296 = vector.extract_strided_slice %266 {offsets = [8, 80], sizes = [8, 8], strides = [1, 1]} : vector<16x96xf32> to vector<8x8xf32>
    %297 = vector.extract_strided_slice %266 {offsets = [8, 88], sizes = [8, 8], strides = [1, 1]} : vector<16x96xf32> to vector<8x8xf32>
    %cst_107 = arith.constant dense<0.000000e+00> : vector<8x8xf32>
    %298 = tpu.matmul %295, %296, %cst_107 {dimension_numbers = #tpu.dot_dimension_numbers<[1], [1], [0], [0], [0, 0, 1, 0], [], []>, precision = #tpu.contract_precision<fp32>} : vector<8x8xf32>, vector<8x8xf32>, vector<8x8xf32> -> vector<8x8xf32>
    %299 = tpu.concatenate %270, %274, %278, %282, %286, %290, %294, %298 in 0 : vector<8x8xf32>, vector<8x8xf32>, vector<8x8xf32>, vector<8x8xf32>, vector<8x8xf32>, vector<8x8xf32>, vector<8x8xf32>, vector<8x8xf32> -> vector<64x8xf32>
    %cst_108 = arith.constant dense<0xFF800000> : vector<64xf32>
    %300 = vector.multi_reduction <maximumf>, %299, %cst_108 [1] : vector<64x8xf32> to vector<64xf32>
    %301 = vector.shape_cast %300 : vector<64xf32> to vector<64x1xf32>
    %302 = vector.broadcast %301 : vector<64x1xf32> to vector<64x8xf32>
    %303 = arith.subf %299, %302 : vector<64x8xf32>
    %304 = math.exp %303 : vector<64x8xf32>
    %cst_109 = arith.constant dense<0.000000e+00> : vector<64xf32>
    %305 = vector.multi_reduction <add>, %304, %cst_109 [1] : vector<64x8xf32> to vector<64xf32>
    %306 = vector.shape_cast %305 : vector<64xf32> to vector<64x1xf32>
    %307 = vector.broadcast %306 : vector<64x1xf32> to vector<64x8xf32>
    %308 = arith.divf %304, %307 : vector<64x8xf32>
    %309 = vector.extract_strided_slice %308 {offsets = [0, 0], sizes = [8, 8], strides = [1, 1]} : vector<64x8xf32> to vector<8x8xf32>
    %cst_110 = arith.constant dense<0.000000e+00> : vector<8x8xf32>
    %310 = tpu.matmul %309, %269, %cst_110 {dimension_numbers = #tpu.dot_dimension_numbers<[1], [0], [0], [1], [0, 0, 1, 1], [], []>, precision = #tpu.contract_precision<fp32>} : vector<8x8xf32>, vector<8x8xf32>, vector<8x8xf32> -> vector<8x8xf32>
    %311 = vector.extract_strided_slice %308 {offsets = [8, 0], sizes = [8, 8], strides = [1, 1]} : vector<64x8xf32> to vector<8x8xf32>
    %cst_111 = arith.constant dense<0.000000e+00> : vector<8x8xf32>
    %312 = tpu.matmul %311, %273, %cst_111 {dimension_numbers = #tpu.dot_dimension_numbers<[1], [0], [0], [1], [0, 0, 1, 1], [], []>, precision = #tpu.contract_precision<fp32>} : vector<8x8xf32>, vector<8x8xf32>, vector<8x8xf32> -> vector<8x8xf32>
    %313 = vector.extract_strided_slice %308 {offsets = [16, 0], sizes = [8, 8], strides = [1, 1]} : vector<64x8xf32> to vector<8x8xf32>
    %cst_112 = arith.constant dense<0.000000e+00> : vector<8x8xf32>
    %314 = tpu.matmul %313, %277, %cst_112 {dimension_numbers = #tpu.dot_dimension_numbers<[1], [0], [0], [1], [0, 0, 1, 1], [], []>, precision = #tpu.contract_precision<fp32>} : vector<8x8xf32>, vector<8x8xf32>, vector<8x8xf32> -> vector<8x8xf32>
    %315 = vector.extract_strided_slice %308 {offsets = [24, 0], sizes = [8, 8], strides = [1, 1]} : vector<64x8xf32> to vector<8x8xf32>
    %cst_113 = arith.constant dense<0.000000e+00> : vector<8x8xf32>
    %316 = tpu.matmul %315, %281, %cst_113 {dimension_numbers = #tpu.dot_dimension_numbers<[1], [0], [0], [1], [0, 0, 1, 1], [], []>, precision = #tpu.contract_precision<fp32>} : vector<8x8xf32>, vector<8x8xf32>, vector<8x8xf32> -> vector<8x8xf32>
    %317 = vector.extract_strided_slice %308 {offsets = [32, 0], sizes = [8, 8], strides = [1, 1]} : vector<64x8xf32> to vector<8x8xf32>
    %cst_114 = arith.constant dense<0.000000e+00> : vector<8x8xf32>
    %318 = tpu.matmul %317, %285, %cst_114 {dimension_numbers = #tpu.dot_dimension_numbers<[1], [0], [0], [1], [0, 0, 1, 1], [], []>, precision = #tpu.contract_precision<fp32>} : vector<8x8xf32>, vector<8x8xf32>, vector<8x8xf32> -> vector<8x8xf32>
    %319 = vector.extract_strided_slice %308 {offsets = [40, 0], sizes = [8, 8], strides = [1, 1]} : vector<64x8xf32> to vector<8x8xf32>
    %cst_115 = arith.constant dense<0.000000e+00> : vector<8x8xf32>
    %320 = tpu.matmul %319, %289, %cst_115 {dimension_numbers = #tpu.dot_dimension_numbers<[1], [0], [0], [1], [0, 0, 1, 1], [], []>, precision = #tpu.contract_precision<fp32>} : vector<8x8xf32>, vector<8x8xf32>, vector<8x8xf32> -> vector<8x8xf32>
    %321 = vector.extract_strided_slice %308 {offsets = [48, 0], sizes = [8, 8], strides = [1, 1]} : vector<64x8xf32> to vector<8x8xf32>
    %cst_116 = arith.constant dense<0.000000e+00> : vector<8x8xf32>
    %322 = tpu.matmul %321, %293, %cst_116 {dimension_numbers = #tpu.dot_dimension_numbers<[1], [0], [0], [1], [0, 0, 1, 1], [], []>, precision = #tpu.contract_precision<fp32>} : vector<8x8xf32>, vector<8x8xf32>, vector<8x8xf32> -> vector<8x8xf32>
    %323 = vector.extract_strided_slice %308 {offsets = [56, 0], sizes = [8, 8], strides = [1, 1]} : vector<64x8xf32> to vector<8x8xf32>
    %cst_117 = arith.constant dense<0.000000e+00> : vector<8x8xf32>
    %324 = tpu.matmul %323, %297, %cst_117 {dimension_numbers = #tpu.dot_dimension_numbers<[1], [0], [0], [1], [0, 0, 1, 1], [], []>, precision = #tpu.contract_precision<fp32>} : vector<8x8xf32>, vector<8x8xf32>, vector<8x8xf32> -> vector<8x8xf32>
    %325 = tpu.concatenate %310, %312, %314, %316, %318, %320, %322, %324 in 0 : vector<8x8xf32>, vector<8x8xf32>, vector<8x8xf32>, vector<8x8xf32>, vector<8x8xf32>, vector<8x8xf32>, vector<8x8xf32>, vector<8x8xf32> -> vector<64x8xf32>
    %c1_118 = arith.constant 1 : index
    %c0_119 = arith.constant 0 : index
    %c0_120 = arith.constant 0 : index
    %326 = vector.load %arg2[%c1_118, %c0_119, %c0_120] : memref<2x32x32xf32, #tpu.memory_space<vmem>>, vector<1x32x32xf32>
    %327 = vector.shape_cast %326 : vector<1x32x32xf32> to vector<32x32xf32>
    %cst_121 = arith.constant dense<0.000000e+00> : vector<16x8xf32>
    %328 = tpu.matmul %10, %325, %cst_121 {dimension_numbers = #tpu.dot_dimension_numbers<[1], [0], [0], [1], [0, 0, 1, 1], [], []>, precision = #tpu.contract_precision<fp32>} : vector<16x64xf32>, vector<64x8xf32>, vector<16x8xf32> -> vector<16x8xf32>
    %329 = vector.extract_strided_slice %327 {offsets = [0, 0], sizes = [8, 32], strides = [1, 1]} : vector<32x32xf32> to vector<8x32xf32>
    %cst_122 = arith.constant dense<0.000000e+00> : vector<16x32xf32>
    %330 = tpu.matmul %328, %329, %cst_122 {dimension_numbers = #tpu.dot_dimension_numbers<[1], [0], [0], [1], [0, 0, 1, 1], [], []>, precision = #tpu.contract_precision<fp32>} : vector<16x8xf32>, vector<8x32xf32>, vector<16x32xf32> -> vector<16x32xf32>
    %331 = vector.broadcast %255 : vector<1x32xf32> to vector<16x32xf32>
    %332 = arith.addf %331, %330 : vector<16x32xf32>
    %cst_123 = arith.constant dense<0.000000e+00> : vector<16x8xf32>
    %333 = tpu.matmul %18, %325, %cst_123 {dimension_numbers = #tpu.dot_dimension_numbers<[1], [0], [0], [1], [0, 0, 1, 1], [], []>, precision = #tpu.contract_precision<fp32>} : vector<16x64xf32>, vector<64x8xf32>, vector<16x8xf32> -> vector<16x8xf32>
    %334 = vector.extract_strided_slice %327 {offsets = [8, 0], sizes = [8, 32], strides = [1, 1]} : vector<32x32xf32> to vector<8x32xf32>
    %cst_124 = arith.constant dense<0.000000e+00> : vector<16x32xf32>
    %335 = tpu.matmul %333, %334, %cst_124 {dimension_numbers = #tpu.dot_dimension_numbers<[1], [0], [0], [1], [0, 0, 1, 1], [], []>, precision = #tpu.contract_precision<fp32>} : vector<16x8xf32>, vector<8x32xf32>, vector<16x32xf32> -> vector<16x32xf32>
    %336 = arith.addf %332, %335 : vector<16x32xf32>
    %cst_125 = arith.constant dense<0.000000e+00> : vector<16x8xf32>
    %337 = tpu.matmul %26, %325, %cst_125 {dimension_numbers = #tpu.dot_dimension_numbers<[1], [0], [0], [1], [0, 0, 1, 1], [], []>, precision = #tpu.contract_precision<fp32>} : vector<16x64xf32>, vector<64x8xf32>, vector<16x8xf32> -> vector<16x8xf32>
    %338 = vector.extract_strided_slice %327 {offsets = [16, 0], sizes = [8, 32], strides = [1, 1]} : vector<32x32xf32> to vector<8x32xf32>
    %cst_126 = arith.constant dense<0.000000e+00> : vector<16x32xf32>
    %339 = tpu.matmul %337, %338, %cst_126 {dimension_numbers = #tpu.dot_dimension_numbers<[1], [0], [0], [1], [0, 0, 1, 1], [], []>, precision = #tpu.contract_precision<fp32>} : vector<16x8xf32>, vector<8x32xf32>, vector<16x32xf32> -> vector<16x32xf32>
    %340 = arith.addf %336, %339 : vector<16x32xf32>
    %cst_127 = arith.constant dense<0.000000e+00> : vector<16x8xf32>
    %341 = tpu.matmul %34, %325, %cst_127 {dimension_numbers = #tpu.dot_dimension_numbers<[1], [0], [0], [1], [0, 0, 1, 1], [], []>, precision = #tpu.contract_precision<fp32>} : vector<16x64xf32>, vector<64x8xf32>, vector<16x8xf32> -> vector<16x8xf32>
    %342 = vector.extract_strided_slice %327 {offsets = [24, 0], sizes = [8, 32], strides = [1, 1]} : vector<32x32xf32> to vector<8x32xf32>
    %cst_128 = arith.constant dense<0.000000e+00> : vector<16x32xf32>
    %343 = tpu.matmul %341, %342, %cst_128 {dimension_numbers = #tpu.dot_dimension_numbers<[1], [0], [0], [1], [0, 0, 1, 1], [], []>, precision = #tpu.contract_precision<fp32>} : vector<16x8xf32>, vector<8x32xf32>, vector<16x32xf32> -> vector<16x32xf32>
    %344 = arith.addf %340, %343 : vector<16x32xf32>
    %345 = arith.addf %344, %251 : vector<16x32xf32>
    %cst_129 = arith.constant dense<0.000000e+00> : vector<16xf32>
    %346 = vector.multi_reduction <add>, %345, %cst_129 [1] : vector<16x32xf32> to vector<16xf32>
    %347 = vector.shape_cast %346 : vector<16xf32> to vector<16x1xf32>
    %cst_130 = arith.constant 3.200000e+01 : f32
    %348 = vector.broadcast %cst_130 : f32 to vector<16x1xf32>
    %349 = arith.divf %347, %348 : vector<16x1xf32>
    %350 = vector.broadcast %349 : vector<16x1xf32> to vector<16x32xf32>
    %351 = arith.subf %345, %350 : vector<16x32xf32>
    %352 = arith.mulf %351, %351 : vector<16x32xf32>
    %cst_131 = arith.constant dense<0.000000e+00> : vector<16xf32>
    %353 = vector.multi_reduction <add>, %352, %cst_131 [1] : vector<16x32xf32> to vector<16xf32>
    %354 = vector.shape_cast %353 : vector<16xf32> to vector<16x1xf32>
    %cst_132 = arith.constant 3.200000e+01 : f32
    %355 = vector.broadcast %cst_132 : f32 to vector<16x1xf32>
    %356 = arith.divf %354, %355 : vector<16x1xf32>
    %357 = vector.broadcast %349 : vector<16x1xf32> to vector<16x32xf32>
    %358 = arith.subf %345, %357 : vector<16x32xf32>
    %cst_133 = arith.constant 9.99999974E-6 : f32
    %359 = vector.broadcast %cst_133 : f32 to vector<16x1xf32>
    %360 = arith.addf %356, %359 : vector<16x1xf32>
    %361 = math.rsqrt %360 : vector<16x1xf32>
    %362 = vector.broadcast %361 : vector<16x1xf32> to vector<16x32xf32>
    %363 = arith.mulf %358, %362 : vector<16x32xf32>
    %364 = vector.broadcast %256 : vector<1x32xf32> to vector<16x32xf32>
    %365 = arith.mulf %364, %363 : vector<16x32xf32>
    %366 = vector.broadcast %257 : vector<1x32xf32> to vector<16x32xf32>
    %367 = arith.addf %365, %366 : vector<16x32xf32>
    %c1_134 = arith.constant 1 : index
    %c0_135 = arith.constant 0 : index
    %c0_136 = arith.constant 0 : index
    %368 = vector.load %arg3[%c1_134, %c0_135, %c0_136] : memref<2x32x64xf32, #tpu.memory_space<vmem>>, vector<1x32x64xf32>
    %369 = vector.shape_cast %368 : vector<1x32x64xf32> to vector<32x64xf32>
    %cst_137 = arith.constant dense<0.000000e+00> : vector<16x64xf32>
    %370 = tpu.matmul %367, %369, %cst_137 {dimension_numbers = #tpu.dot_dimension_numbers<[1], [0], [0], [1], [0, 0, 1, 1], [], []>, precision = #tpu.contract_precision<fp32>} : vector<16x32xf32>, vector<32x64xf32>, vector<16x64xf32> -> vector<16x64xf32>
    %371 = vector.broadcast %258 : vector<1x64xf32> to vector<16x64xf32>
    %372 = arith.addf %370, %371 : vector<16x64xf32>
    %cst_138 = arith.constant 0.000000e+00 : f32
    %373 = vector.broadcast %cst_138 : f32 to vector<16x64xf32>
    %374 = arith.maximumf %372, %373 : vector<16x64xf32>
    %c1_139 = arith.constant 1 : index
    %c0_140 = arith.constant 0 : index
    %c0_141 = arith.constant 0 : index
    %375 = vector.load %arg4[%c1_139, %c0_140, %c0_141] : memref<2x64x32xf32, #tpu.memory_space<vmem>>, vector<1x64x32xf32>
    %376 = vector.shape_cast %375 : vector<1x64x32xf32> to vector<64x32xf32>
    %cst_142 = arith.constant dense<0.000000e+00> : vector<16x32xf32>
    %377 = tpu.matmul %374, %376, %cst_142 {dimension_numbers = #tpu.dot_dimension_numbers<[1], [0], [0], [1], [0, 0, 1, 1], [], []>, precision = #tpu.contract_precision<fp32>} : vector<16x64xf32>, vector<64x32xf32>, vector<16x32xf32> -> vector<16x32xf32>
    %378 = vector.broadcast %259 : vector<1x32xf32> to vector<16x32xf32>
    %379 = arith.addf %377, %378 : vector<16x32xf32>
    %380 = arith.addf %379, %367 : vector<16x32xf32>
    %cst_143 = arith.constant dense<0.000000e+00> : vector<16xf32>
    %381 = vector.multi_reduction <add>, %380, %cst_143 [1] : vector<16x32xf32> to vector<16xf32>
    %382 = vector.shape_cast %381 : vector<16xf32> to vector<16x1xf32>
    %cst_144 = arith.constant 3.200000e+01 : f32
    %383 = vector.broadcast %cst_144 : f32 to vector<16x1xf32>
    %384 = arith.divf %382, %383 : vector<16x1xf32>
    %385 = vector.broadcast %384 : vector<16x1xf32> to vector<16x32xf32>
    %386 = arith.subf %380, %385 : vector<16x32xf32>
    %387 = arith.mulf %386, %386 : vector<16x32xf32>
    %cst_145 = arith.constant dense<0.000000e+00> : vector<16xf32>
    %388 = vector.multi_reduction <add>, %387, %cst_145 [1] : vector<16x32xf32> to vector<16xf32>
    %389 = vector.shape_cast %388 : vector<16xf32> to vector<16x1xf32>
    %cst_146 = arith.constant 3.200000e+01 : f32
    %390 = vector.broadcast %cst_146 : f32 to vector<16x1xf32>
    %391 = arith.divf %389, %390 : vector<16x1xf32>
    %392 = vector.broadcast %384 : vector<16x1xf32> to vector<16x32xf32>
    %393 = arith.subf %380, %392 : vector<16x32xf32>
    %cst_147 = arith.constant 9.99999974E-6 : f32
    %394 = vector.broadcast %cst_147 : f32 to vector<16x1xf32>
    %395 = arith.addf %391, %394 : vector<16x1xf32>
    %396 = math.rsqrt %395 : vector<16x1xf32>
    %397 = vector.broadcast %396 : vector<16x1xf32> to vector<16x32xf32>
    %398 = arith.mulf %393, %397 : vector<16x32xf32>
    %399 = vector.broadcast %260 : vector<1x32xf32> to vector<16x32xf32>
    %400 = arith.mulf %399, %398 : vector<16x32xf32>
    %401 = vector.broadcast %261 : vector<1x32xf32> to vector<16x32xf32>
    %402 = arith.addf %400, %401 : vector<16x32xf32>
    %c0_148 = arith.constant 0 : index
    %c0_149 = arith.constant 0 : index
    %403 = vector.load %arg7[%c0_148, %c0_149] : memref<1x4xf32, #tpu.memory_space<vmem>>, vector<1x4xf32>
    %cst_150 = arith.constant dense<0.000000e+00> : vector<2x32xf32>
    %404 = tpu.matmul %44, %402, %cst_150 {dimension_numbers = #tpu.dot_dimension_numbers<[1], [0], [0], [1], [0, 0, 1, 1], [], []>, precision = #tpu.contract_precision<fp32>} : vector<2x16xf32>, vector<16x32xf32>, vector<2x32xf32> -> vector<2x32xf32>
    %c0_151 = arith.constant 0 : index
    %c0_152 = arith.constant 0 : index
    %405 = vector.load %arg6[%c0_151, %c0_152] : memref<256x4xf32, #tpu.memory_space<vmem>>, vector<32x4xf32>
    %cst_153 = arith.constant dense<0.000000e+00> : vector<2x4xf32>
    %406 = tpu.matmul %404, %405, %cst_153 {dimension_numbers = #tpu.dot_dimension_numbers<[1], [0], [0], [1], [0, 0, 1, 1], [], []>, precision = #tpu.contract_precision<fp32>} : vector<2x32xf32>, vector<32x4xf32>, vector<2x4xf32> -> vector<2x4xf32>
    %407 = vector.broadcast %403 : vector<1x4xf32> to vector<2x4xf32>
    %408 = arith.addf %407, %406 : vector<2x4xf32>
    %cst_154 = arith.constant dense<0.000000e+00> : vector<2x32xf32>
    %409 = tpu.matmul %52, %402, %cst_154 {dimension_numbers = #tpu.dot_dimension_numbers<[1], [0], [0], [1], [0, 0, 1, 1], [], []>, precision = #tpu.contract_precision<fp32>} : vector<2x16xf32>, vector<16x32xf32>, vector<2x32xf32> -> vector<2x32xf32>
    %c32 = arith.constant 32 : index
    %c0_155 = arith.constant 0 : index
    %410 = vector.load %arg6[%c32, %c0_155] : memref<256x4xf32, #tpu.memory_space<vmem>>, vector<32x4xf32>
    %cst_156 = arith.constant dense<0.000000e+00> : vector<2x4xf32>
    %411 = tpu.matmul %409, %410, %cst_156 {dimension_numbers = #tpu.dot_dimension_numbers<[1], [0], [0], [1], [0, 0, 1, 1], [], []>, precision = #tpu.contract_precision<fp32>} : vector<2x32xf32>, vector<32x4xf32>, vector<2x4xf32> -> vector<2x4xf32>
    %412 = arith.addf %408, %411 : vector<2x4xf32>
    %cst_157 = arith.constant dense<0.000000e+00> : vector<2x32xf32>
    %413 = tpu.matmul %60, %402, %cst_157 {dimension_numbers = #tpu.dot_dimension_numbers<[1], [0], [0], [1], [0, 0, 1, 1], [], []>, precision = #tpu.contract_precision<fp32>} : vector<2x16xf32>, vector<16x32xf32>, vector<2x32xf32> -> vector<2x32xf32>
    %c64 = arith.constant 64 : index
    %c0_158 = arith.constant 0 : index
    %414 = vector.load %arg6[%c64, %c0_158] : memref<256x4xf32, #tpu.memory_space<vmem>>, vector<32x4xf32>
    %cst_159 = arith.constant dense<0.000000e+00> : vector<2x4xf32>
    %415 = tpu.matmul %413, %414, %cst_159 {dimension_numbers = #tpu.dot_dimension_numbers<[1], [0], [0], [1], [0, 0, 1, 1], [], []>, precision = #tpu.contract_precision<fp32>} : vector<2x32xf32>, vector<32x4xf32>, vector<2x4xf32> -> vector<2x4xf32>
    %416 = arith.addf %412, %415 : vector<2x4xf32>
    %cst_160 = arith.constant dense<0.000000e+00> : vector<2x32xf32>
    %417 = tpu.matmul %68, %402, %cst_160 {dimension_numbers = #tpu.dot_dimension_numbers<[1], [0], [0], [1], [0, 0, 1, 1], [], []>, precision = #tpu.contract_precision<fp32>} : vector<2x16xf32>, vector<16x32xf32>, vector<2x32xf32> -> vector<2x32xf32>
    %c96 = arith.constant 96 : index
    %c0_161 = arith.constant 0 : index
    %418 = vector.load %arg6[%c96, %c0_161] : memref<256x4xf32, #tpu.memory_space<vmem>>, vector<32x4xf32>
    %cst_162 = arith.constant dense<0.000000e+00> : vector<2x4xf32>
    %419 = tpu.matmul %417, %418, %cst_162 {dimension_numbers = #tpu.dot_dimension_numbers<[1], [0], [0], [1], [0, 0, 1, 1], [], []>, precision = #tpu.contract_precision<fp32>} : vector<2x32xf32>, vector<32x4xf32>, vector<2x4xf32> -> vector<2x4xf32>
    %420 = arith.addf %416, %419 : vector<2x4xf32>
    %cst_163 = arith.constant dense<0.000000e+00> : vector<2x32xf32>
    %421 = tpu.matmul %76, %402, %cst_163 {dimension_numbers = #tpu.dot_dimension_numbers<[1], [0], [0], [1], [0, 0, 1, 1], [], []>, precision = #tpu.contract_precision<fp32>} : vector<2x16xf32>, vector<16x32xf32>, vector<2x32xf32> -> vector<2x32xf32>
    %c128 = arith.constant 128 : index
    %c0_164 = arith.constant 0 : index
    %422 = vector.load %arg6[%c128, %c0_164] : memref<256x4xf32, #tpu.memory_space<vmem>>, vector<32x4xf32>
    %cst_165 = arith.constant dense<0.000000e+00> : vector<2x4xf32>
    %423 = tpu.matmul %421, %422, %cst_165 {dimension_numbers = #tpu.dot_dimension_numbers<[1], [0], [0], [1], [0, 0, 1, 1], [], []>, precision = #tpu.contract_precision<fp32>} : vector<2x32xf32>, vector<32x4xf32>, vector<2x4xf32> -> vector<2x4xf32>
    %424 = arith.addf %420, %423 : vector<2x4xf32>
    %cst_166 = arith.constant dense<0.000000e+00> : vector<2x32xf32>
    %425 = tpu.matmul %84, %402, %cst_166 {dimension_numbers = #tpu.dot_dimension_numbers<[1], [0], [0], [1], [0, 0, 1, 1], [], []>, precision = #tpu.contract_precision<fp32>} : vector<2x16xf32>, vector<16x32xf32>, vector<2x32xf32> -> vector<2x32xf32>
    %c160 = arith.constant 160 : index
    %c0_167 = arith.constant 0 : index
    %426 = vector.load %arg6[%c160, %c0_167] : memref<256x4xf32, #tpu.memory_space<vmem>>, vector<32x4xf32>
    %cst_168 = arith.constant dense<0.000000e+00> : vector<2x4xf32>
    %427 = tpu.matmul %425, %426, %cst_168 {dimension_numbers = #tpu.dot_dimension_numbers<[1], [0], [0], [1], [0, 0, 1, 1], [], []>, precision = #tpu.contract_precision<fp32>} : vector<2x32xf32>, vector<32x4xf32>, vector<2x4xf32> -> vector<2x4xf32>
    %428 = arith.addf %424, %427 : vector<2x4xf32>
    %cst_169 = arith.constant dense<0.000000e+00> : vector<2x32xf32>
    %429 = tpu.matmul %92, %402, %cst_169 {dimension_numbers = #tpu.dot_dimension_numbers<[1], [0], [0], [1], [0, 0, 1, 1], [], []>, precision = #tpu.contract_precision<fp32>} : vector<2x16xf32>, vector<16x32xf32>, vector<2x32xf32> -> vector<2x32xf32>
    %c192 = arith.constant 192 : index
    %c0_170 = arith.constant 0 : index
    %430 = vector.load %arg6[%c192, %c0_170] : memref<256x4xf32, #tpu.memory_space<vmem>>, vector<32x4xf32>
    %cst_171 = arith.constant dense<0.000000e+00> : vector<2x4xf32>
    %431 = tpu.matmul %429, %430, %cst_171 {dimension_numbers = #tpu.dot_dimension_numbers<[1], [0], [0], [1], [0, 0, 1, 1], [], []>, precision = #tpu.contract_precision<fp32>} : vector<2x32xf32>, vector<32x4xf32>, vector<2x4xf32> -> vector<2x4xf32>
    %432 = arith.addf %428, %431 : vector<2x4xf32>
    %cst_172 = arith.constant dense<0.000000e+00> : vector<2x32xf32>
    %433 = tpu.matmul %100, %402, %cst_172 {dimension_numbers = #tpu.dot_dimension_numbers<[1], [0], [0], [1], [0, 0, 1, 1], [], []>, precision = #tpu.contract_precision<fp32>} : vector<2x16xf32>, vector<16x32xf32>, vector<2x32xf32> -> vector<2x32xf32>
    %c224 = arith.constant 224 : index
    %c0_173 = arith.constant 0 : index
    %434 = vector.load %arg6[%c224, %c0_173] : memref<256x4xf32, #tpu.memory_space<vmem>>, vector<32x4xf32>
    %cst_174 = arith.constant dense<0.000000e+00> : vector<2x4xf32>
    %435 = tpu.matmul %433, %434, %cst_174 {dimension_numbers = #tpu.dot_dimension_numbers<[1], [0], [0], [1], [0, 0, 1, 1], [], []>, precision = #tpu.contract_precision<fp32>} : vector<2x32xf32>, vector<32x4xf32>, vector<2x4xf32> -> vector<2x4xf32>
    %436 = arith.addf %432, %435 : vector<2x4xf32>
    %c0_175 = arith.constant 0 : index
    %c0_176 = arith.constant 0 : index
    %437 = vector.load %arg8[%c0_175, %c0_176] : memref<2x4xf32, #tpu.memory_space<vmem>>, vector<2x4xf32>
    tpu.vector_store %arg8[%c0_175, %c0_176], %436 {strides = array<i32>} : memref<2x4xf32, #tpu.memory_space<vmem>>, vector<2x4xf32>,
    return
  }
}

</mosaic_0001>

<bundles_post_ra>
// kernel: encoder_forward.1
= control target key start
LH: loop header
LB: loop body
LE: loop exit
PB: predicated region body
PF: predicated region fallthrough
CT: control target
= control target key end

     0   :  { %vm94_vm0 = vcmask 261120   ;;  %s45047_s0 = inlined_call_operand.vmem [shape: f32[16,32], index: 0, kind: input, shape index: {}]   ;;  %s45048_s1 = inlined_call_operand.vmem [shape: f32[2,32,96], index: 1, kind: input, shape index: {}]   ;;  %s45049_s2 = inlined_call_operand.vmem [shape: f32[2,32,32], index: 2, kind: input, shape index: {}]   ;;  %s45050_s3 = inlined_call_operand.vmem [shape: f32[2,32,64], index: 3, kind: input, shape index: {}]   ;;  %s45051_s4 = inlined_call_operand.vmem [shape: f32[2,64,32], index: 4, kind: input, shape index: {}]   ;;  %s45052_s5 = inlined_call_operand.vmem [shape: f32[2,8,128], index: 5, kind: input, shape index: {}]   ;;  %s45053_s6 = inlined_call_operand.vmem [shape: f32[256,4], index: 6, kind: input, shape index: {}]   ;;  %s45054_s7 = inlined_call_operand.vmem [shape: f32[1,4], index: 7, kind: input, shape index: {}]   ;;  %s45055_s8 = inlined_call_operand.hbm [shape: f32[2,4], index: 8, kind: output, shape index: {}]  }
   0x1   :  { %v89_v0 = vld [vmem:[%s45048_s1 + $0x18] sm:$0xff]  ;;  %v88_v1 = vld [vmem:[%s45048_s1 + $0x10] sm:$0xff]  ;;  %v87_v2 = vld [vmem:[%s45048_s1 + $0x8] sm:$0xff] }
   0x2   :  { %v40020_v3 = vand.u32 4294901760, %v89_v0  ;;  %v40022_v4 = vand.u32 4294901760, %v88_v1  ;;  %v40024_v5 = vand.u32 4294901760, %v87_v2  ;;  %v86_v6 = vld [vmem:[%s45048_s1] sm:$0xff]  ;;  %v31_v8 = vld [vmem:[%s45047_s0 + $0x8] sm:$0xff] }
   0x3   :  { %v30_v7 = vld [vmem:[%s45047_s0] sm:$0xff]  ;;  %v40035_v9 = vand.u32 4294901760, %v86_v6  ;;  %v99_v11 = vsel %vm94_vm0, %v31_v8, 0 }
   0x4   :  { %v96_v10 = vsel %vm94_vm0, %v30_v7, 0  ;;  %36362 = vmatprep.subr.mxu0 %v40020_v3  ;;  %v216_v12 = vsub.f32 %v89_v0, %v40020_v3  ;;  %v223_v14 = vsub.f32 %v88_v1, %v40022_v4  ;;  %v40044_v15 = vand.u32 4294901760, %v99_v11 }
   0x5   :  { %v40041_v13 = vand.u32 4294901760, %v96_v10 }
   0x6   :  { %13 = vsyncpa [#allocation3], 0  ;;  %36363 = vmatpush3.msra.mxu0 %v40020_v3  ;;  %v230_v16 = vsub.f32 %v87_v2, %v40024_v5  ;;  %v237_v17 = vsub.f32 %v86_v6, %v40035_v9  ;;  %v217_v18 = vand.u32 4294901760, %v216_v12  ;;  %v224_v20 = vand.u32 4294901760, %v223_v14  ;;  %v85_v41 = vld [vmem:[%s45052_s5] sm:$0xff]  ;;  %s39954_s19 = smov 104  }
   0x7   :  { %36364 = vmatprep.subr.mxu0 %v40022_v4  ;;  %v171_v19 = vsub.f32 %v96_v10, %v40041_v13  ;;  %v181_v21 = vsub.f32 %v99_v11, %v40044_v15  ;;  %36381 = vmatprep.mubr.f32.mxu1 %v40041_v13  ;;  %v32_v38 = vlaneseq  ;;  %v45057_v54 = vmov 0.0   ;;  %s39955_s20 = smov 120   ;;  %s39956_s21 = smov 72  }
   0x8   :  { %36365 = vmatpush3.msra.mxu0 %v40022_v4  ;;  %v231_v22 = vand.u32 4294901760, %v230_v16  ;;  %v238_v23 = vand.u32 4294901760, %v237_v17  ;;  %v218_v24 = vsub.f32 %v216_v12, %v217_v18  ;;  %v225_v26 = vsub.f32 %v223_v14, %v224_v20  ;;  %s39957_s22 = smov 96   ;;  %s39958_s23 = smov 48  }
   0x9   :  { %36366 = vmatprep.subr.mxu0 %v40024_v5  ;;  %v172_v25 = vand.u32 4294901760, %v171_v19  ;;  %v182_v27 = vand.u32 4294901760, %v181_v21  ;;  %v40080_v39 = vshrl.u32 %v32_v38, 7  ;;  %vm39953_vm1 = vmmov 0   ;;  %s39959_s24 = smov 80   ;;  %s39960_s25 = smov 56  }
   0xa   :  { %36367 = vmatpush3.msra.mxu0 %v40024_v5  ;;  %v232_v28 = vsub.f32 %v230_v16, %v231_v22  ;;  %v239_v29 = vsub.f32 %v237_v17, %v238_v23  ;;  %v219_v30 = vand.u32 4294901760, %v218_v24  ;;  %v226_v32 = vand.u32 4294901760, %v225_v26  ;;  %s39961_s26 = smov 88   ;;  %s39962_s27 = smov 64  }
   0xb   :  { %36368 = vmatprep.subr.mxu0 %v40035_v9  ;;  %v173_v31 = vsub.f32 %v171_v19, %v172_v25  ;;  %v183_v33 = vsub.f32 %v181_v21, %v182_v27  ;;  %45115 = vst [vmem:[#allocation5_spill] sm:$0xff] %v40080_v39  ;;  %v45056_v40 = vsub.s32 0, %v40080_v39  ;;  %vm632_vm2 = vcmask 64512   ;;  %s39963_s28 = smov 112   ;;  %s39964_s29 = smov 40  }
   0xc   :  { %36369 = vmatpush3.msra.mxu0 %v40035_v9  ;;  %36373 = vmatprep.subr.mxu1 %v219_v30  ;;  %v233_v36 = vand.u32 4294901760, %v232_v28  ;;  %v240_v37 = vand.u32 4294901760, %v239_v29  ;;  %vm7968_vm4 = vcmask 523264   ;;  %vm26949_vm13 = vcmask 130048  }
   0xd   :  { %v174_v34 = vand.u32 4294901760, %v173_v31  ;;  %36384 = vmatprep.subr.mxu0 %v216_v12  ;;  %v184_v35 = vand.u32 4294901760, %v183_v33  ;;  %36374 = vmatpush3.msra.mxu1 %v219_v30  ;;  %v93_v43 = vrot.slane %v85_v41, %v45056_v40 }
   0xe   :  { %36375 = vmatprep.subr.mxu1 %v226_v32 }
   0xf   :  { %36370 = vmatprep.mubr.f32.mxu0 %v174_v34  ;;  %36376 = vmatpush3.msra.mxu1 %v226_v32 }
  0x10   :  { %36371 = vmatmul.mubr.f32.vlgmr.msra.gmra.mxu0 %v184_v35  ;;  %36377 = vmatprep.subr.mxu1 %v233_v36 }
  0x11   :  { %36385 = vmatpush3.msra.mxu0 %v216_v12  ;;  %36378 = vmatpush3.msra.mxu1 %v233_v36 }
  0x12   :  { %36386 = vmatprep.subr.mxu0 %v223_v14  ;;  %36379 = vmatprep.subr.mxu1 %v240_v37 }
  0x13   :  { %36387 = vmatpush3.msra.mxu0 %v223_v14  ;;  %36380 = vmatpush3.msra.mxu1 %v240_v37 }
  0x14   :  { %36388 = vmatprep.subr.mxu0 %v230_v16  ;;  %36382 = vmatmul.mubr.f32.vlgmr.msra.gmra.mxu1 %v40044_v15 }
  0x15   :  { %36389 = vmatpush3.msra.mxu0 %v230_v16  ;;  %36395 = vmatprep.subr.mxu1 %v40020_v3 }
  0x16   :  { %36390 = vmatprep.subr.mxu0 %v237_v17  ;;  %36392 = vmatprep.mubr.f32.mxu0 %v171_v19 }
  0x17   :  { %36391 = vmatpush3.msra.mxu0 %v237_v17  ;;  %36396 = vmatpush3.msra.mxu1 %v40020_v3 }
  0x18   :  { %36393 = vmatmul.mubr.f32.vlgmr.msra.gmra.mxu0 %v181_v21  ;;  %36397 = vmatprep.subr.mxu1 %v40022_v4 }
  0x19   :  { %36406 = vmatprep.subr.mxu0 %v217_v18  ;;  %36398 = vmatpush3.msra.mxu1 %v40022_v4 }
  0x1a   :  { %36407 = vmatpush3.msra.mxu0 %v217_v18  ;;  %36399 = vmatprep.subr.mxu1 %v40024_v5 }
  0x1b   :  { %36408 = vmatprep.subr.mxu0 %v224_v20  ;;  %36400 = vmatpush3.msra.mxu1 %v40024_v5 }
  0x1c   :  { %36409 = vmatpush3.msra.mxu0 %v224_v20  ;;  %36401 = vmatprep.subr.mxu1 %v40035_v9 }
  0x1d   :  { %36410 = vmatprep.subr.mxu0 %v231_v22  ;;  %36402 = vmatpush3.msra.mxu1 %v40035_v9 }
  0x1e   :  { %36403 = vmatprep.mubr.f32.mxu1 %v172_v25  ;;  %36411 = vmatpush3.msra.mxu0 %v231_v22 }
  0x1f   :  { %36404 = vmatmul.mubr.f32.vlgmr.msra.gmra.mxu1 %v182_v27  ;;  %36412 = vmatprep.subr.mxu0 %v238_v23 }
  0x20   :  { %36417 = vmatprep.subr.mxu1 %v40020_v3  ;;  %36413 = vmatpush3.msra.mxu0 %v238_v23 }
  0x21   :  { %36414 = vmatprep.mubr.f32.mxu0 %v40041_v13  ;;  %36418 = vmatpush3.msra.mxu1 %v40020_v3 }
  0x22   :  { %36415 = vmatmul.mubr.f32.vlgmr.msra.gmra.mxu0 %v40044_v15  ;;  %36419 = vmatprep.subr.mxu1 %v40022_v4 }
  0x23   :  { %36425 = vmatprep.mubr.f32.mxu1 %v40041_v13  ;;  %36420 = vmatpush3.msra.mxu1 %v40022_v4 }
  0x24   :  { %36421 = vmatprep.subr.mxu1 %v40024_v5  ;;  %36428 = vmatprep.subr.mxu0 %v45057_v54 }
  0x25   :  { %36422 = vmatpush3.msra.mxu1 %v40024_v5  ;;  %36430 = vmatprep.mubr.msk.f32.mxu0 %vm39953_vm1, %v45057_v54 }
  0x26   :  { %36423 = vmatprep.subr.mxu1 %v40035_v9 }
  0x27   :  { %36424 = vmatpush3.msra.mxu1 %v40035_v9 }
  0x28   :  { %36426 = vmatmul.mubr.f32.vlgmr.msra.gmra.mxu1 %v40044_v15  ;;  %36433 = vmatprep.subr.mxu1 %v45057_v54 }
  0x29   :  { %36435 = vmatprep.mubr.msk.f32.mxu1 %vm39953_vm1, %v45057_v54 }
  0xd0   :  { %v36372_v42 = vpop.f32.mrf.mxu0 }
  0xd1   :  { %v187_v58 = vadd.f32 %v36372_v42, %v93_v43 }
  0xd2   :  { %v176_v44 = vpop.f32.mrf.mxu0 }
  0xd3   :  { %v177_v46 = vadd.f32 %v176_v44, %v93_v43 }
  0xd4   :  { %v36383_v45 = vpop.f32.mrf.mxu1 }
  0xd5   :  { %v284_v62 = vadd.f32 %v36383_v45, %v187_v58 }
  0xd6   :  { %v277_v47 = vpop.f32.mrf.mxu1 }
  0xd7   :  { %v278_v50 = vadd.f32 %v277_v47, %v177_v46 }
  0xd8   :  { %v36394_v48 = vpop.f32.mrf.mxu0 }
  0xd9   :  { %v371_v0 = vadd.f32 %v36394_v48, %v284_v62 }
  0xda   :  { %v363_v51 = vpop.f32.mrf.mxu0 }
  0xdb   :  { %v364_v55 = vadd.f32 %v363_v51, %v278_v50 }
  0xdf   :  { %v36405_v49 = vpop.f32.mrf.mxu1 }
  0xe0   :  { %v456_v1 = vadd.f32 %v36405_v49, %v371_v0 }
  0xe1   :  { %v447_v52 = vpop.f32.mrf.mxu1 }
  0xe2   :  { %v36416_v53 = vpop.f32.mrf.mxu0  ;;  %v448_v56 = vadd.f32 %v447_v52, %v364_v55 }
  0xe3   :  { %v545_v2 = vadd.f32 %v36416_v53, %v456_v1 }
  0xe4   :  { %v538_v57 = vpop.f32.mrf.mxu0 }
  0xe5   :  { %v539_v60 = vadd.f32 %v538_v57, %v448_v56 }
  0xe8   :  { %v36427_v59 = vpop.f32.mrf.mxu1 }
  0xe9   :  { %v40108_v3 = vadd.f32 %v36427_v59, %v545_v2 }
  0xea   :  { %v619_v61 = vpop.f32.mrf.mxu1 }
  0xeb   :  { %v40094_v63 = vadd.f32 %v619_v61, %v539_v60  ;;  %v2448_v58 = vsel %vm632_vm2, %v40108_v3, 0 }
  0xec   :  { %v40233_v62 = vand.u32 4294901760, %v2448_v58 }
  0xed   :  { %1083 = vrot.lane.b32.xlu1 %v40094_v63, %s39954_s19  ;;  %630 = vrot.lane.b32.xlu0 %v40094_v63, %s39955_s20  ;;  %v633_v4 = vsel %vm632_vm2, %v40094_v63, 0 }
  0xee   :  { %v40128_v5 = vand.u32 4294901760, %v633_v4 }
  0xf0   :  { %v704_v6 = vsub.f32 %v633_v4, %v40128_v5 }
  0xf1   :  { %1539 = vrot.lane.b32.xlu1 %v40094_v63, %s39956_s21  ;;  %1085 = vrot.lane.b32.xlu0 %v40094_v63, %s39957_s22 }
  0xf2   :  { %v705_v7 = vand.u32 4294901760, %v704_v6 }
  0xf4   :  { %v706_v12 = vsub.f32 %v704_v6, %v705_v7 }
  0xf5   :  { %1993 = vrot.lane.b32.xlu1 %v40094_v63, %s39958_s23  ;;  %1537 = vrot.lane.b32.xlu0 %v40094_v63, %s39959_s24 }
  0xf6   :  { %v707_v19 = vand.u32 4294901760, %v706_v12 }
  0xf9   :  { %2446 = vrot.lane.b32.xlu1 %v40108_v3, %s39955_s20  ;;  %1991 = vrot.lane.b32.xlu0 %v40094_v63, %s39960_s25 }
  0xfd   :  { %2898 = vrot.lane.b32.xlu1 %v40108_v3, %s39954_s19  ;;  %2900 = vrot.lane.b32.xlu0 %v40108_v3, %s39957_s22 }
 0x101   :  { %3352 = vrot.lane.b32.xlu1 %v40108_v3, %s39959_s24  ;;  %3354 = vrot.lane.b32.xlu0 %v40108_v3, %s39956_s21 }
 0x105   :  { %3806 = vrot.lane.b32.xlu1 %v40108_v3, %s39960_s25  ;;  %3808 = vrot.lane.b32.xlu0 %v40108_v3, %s39958_s23 }
 0x15f   :  { %v1084_v8 = vpop.permute.xlu1 %1083  ;;  %v631_v9 = vpop.permute.xlu0 %630 }
 0x160   :  { %v1087_v10 = vsel %vm632_vm2, %v1084_v8, 0  ;;  %v635_v11 = vsel %vm632_vm2, %v631_v9, 0 }
 0x161   :  { %v40133_v13 = vand.u32 4294901760, %v1087_v10  ;;  %v668_v14 = vand.u32 4294901760, %v635_v11 }
 0x163   :  { %v745_v15 = vsub.f32 %v635_v11, %v668_v14  ;;  %36429 = vmatpush3.xpose.msra.mxu0 %v668_v14  ;;  %v1086_v16 = vpop.permute.xlu0 %1085  ;;  %v40136_v17 = vsub.f32 %v1087_v10, %v40133_v13  ;;  %v1540_v28 = vpop.permute.xlu1 %1539 }
 0x164   :  { %v1089_v18 = vsel %vm632_vm2, %v1086_v16, 0  ;;  %36438 = vmatprep.subr.mxu0 %v45057_v54  ;;  %v1543_v32 = vsel %vm632_vm2, %v1540_v28, 0 }
 0x165   :  { %v746_v20 = vand.u32 4294901760, %v745_v15  ;;  %v40140_v21 = vand.u32 4294901760, %v1089_v18  ;;  %v1159_v24 = vand.u32 4294901760, %v40136_v17  ;;  %v40165_v34 = vand.u32 4294901760, %v1543_v32 }
 0x166   :  { %36431 = vmatmul.mubr.f32.vlgmr.msra.gmra.mxu0 %v707_v19 }
 0x167   :  { %v747_v22 = vsub.f32 %v745_v15, %v746_v20  ;;  %v1538_v23 = vpop.permute.xlu0 %1537  ;;  %36439 = vmatpush3.xpose.msra.mxu0 %v745_v15  ;;  %36440 = vmatprep.mubr.msk.f32.mxu0 %vm39953_vm1, %v45057_v54  ;;  %v1199_v26 = vsub.f32 %v1089_v18, %v40140_v21  ;;  %v1160_v29 = vsub.f32 %v40136_v17, %v1159_v24  ;;  %v1994_v45 = vpop.permute.xlu1 %1993 }
 0x168   :  { %36448 = vmatprep.subr.mxu0 %v45057_v54  ;;  %v1541_v27 = vsel %vm632_vm2, %v1538_v23, 0  ;;  %v1653_v41 = vsub.f32 %v1543_v32, %v40165_v34  ;;  %v1997_v49 = vsel %vm632_vm2, %v1994_v45, 0 }
 0x169   :  { %v748_v25 = vand.u32 4294901760, %v747_v22  ;;  %v1200_v30 = vand.u32 4294901760, %v1199_v26  ;;  %v40154_v31 = vand.u32 4294901760, %v1541_v27  ;;  %v1161_v33 = vand.u32 4294901760, %v1160_v29 }
 0x16a   :  { %36441 = vmatmul.mubr.f32.vlgmr.msra.gmra.mxu0 %v704_v6  ;;  %v1654_v46 = vand.u32 4294901760, %v1653_v41  ;;  %v40201_v51 = vand.u32 4294901760, %v1997_v49 }
 0x16b   :  { %36434 = vmatpush3.xpose.msra.mxu1 %v748_v25  ;;  %36449 = vmatpush3.xpose.msra.mxu0 %v746_v20  ;;  %v1201_v35 = vsub.f32 %v1199_v26, %v1200_v30  ;;  %v40168_v36 = vsub.f32 %v1541_v27, %v40154_v31  ;;  %v1992_v37 = vpop.permute.xlu0 %1991  ;;  %v2447_v59 = vpop.permute.xlu1 %2446 }
 0x16c   :  { %36450 = vmatprep.mubr.msk.f32.mxu0 %vm39953_vm1, %v45057_v54  ;;  %36443 = vmatprep.subr.mxu1 %v45057_v54  ;;  %v1995_v44 = vsel %vm632_vm2, %v1992_v37, 0  ;;  %v1655_v50 = vsub.f32 %v1653_v41, %v1654_v46  ;;  %v2107_v56 = vsub.f32 %v1997_v49, %v40201_v51  ;;  %v2450_v0 = vsel %vm632_vm2, %v2447_v59, 0 }
 0x16d   :  { %36458 = vmatprep.subr.mxu0 %v45057_v54  ;;  %v1202_v42 = vand.u32 4294901760, %v1201_v35  ;;  %v1613_v43 = vand.u32 4294901760, %v40168_v36  ;;  %v40188_v48 = vand.u32 4294901760, %v1995_v44  ;;  %v40243_v2 = vand.u32 4294901760, %v2450_v0 }
 0x16e   :  { %36436 = vmatmul.mubr.f32.vlgmr.msra.gmra.mxu1 %v40128_v5  ;;  %36451 = vmatmul.mubr.f32.vlgmr.msra.gmra.mxu0 %v40128_v5  ;;  %v1656_v55 = vand.u32 4294901760, %v1655_v50  ;;  %v2108_v60 = vand.u32 4294901760, %v2107_v56 }
 0x16f   :  { %36444 = vmatpush3.xpose.msra.mxu1 %v668_v14  ;;  %36459 = vmatpush3.xpose.msra.mxu0 %v40140_v21  ;;  %v1614_v47 = vsub.f32 %v40168_v36, %v1613_v43  ;;  %v40204_v53 = vsub.f32 %v1995_v44, %v40188_v48  ;;  %v2899_v6 = vpop.permute.xlu1 %2898  ;;  %v2560_v8 = vsub.f32 %v2450_v0, %v40243_v2  ;;  %v2901_v11 = vpop.permute.xlu0 %2900 }
 0x170   :  { %36445 = vmatprep.mubr.msk.f32.mxu1 %vm39953_vm1, %v45057_v54  ;;  %36460 = vmatprep.mubr.msk.f32.mxu0 %vm39953_vm1, %v45057_v54  ;;  %v2109_v1 = vsub.f32 %v2107_v56, %v2108_v60  ;;  %v2902_v10 = vsel %vm632_vm2, %v2899_v6, 0  ;;  %v2904_v15 = vsel %vm632_vm2, %v2901_v11, 0 }
 0x171   :  { %36453 = vmatprep.subr.mxu1 %v45057_v54  ;;  %36468 = vmatprep.subr.mxu0 %v45057_v54  ;;  %v1615_v52 = vand.u32 4294901760, %v1614_v47  ;;  %v2067_v57 = vand.u32 4294901760, %v40204_v53  ;;  %v2561_v12 = vand.u32 4294901760, %v2560_v8  ;;  %v40287_v18 = vand.u32 4294901760, %v2904_v15 }
 0x172   :  { %36446 = vmatmul.mubr.f32.vlgmr.msra.gmra.mxu1 %v705_v7  ;;  %36461 = vmatmul.mubr.f32.vlgmr.msra.gmra.mxu0 %v1161_v33  ;;  %v2110_v7 = vand.u32 4294901760, %v2109_v1 }
 0x173   :  { %36454 = vmatpush3.xpose.msra.mxu1 %v668_v14  ;;  %36469 = vmatpush3.xpose.msra.mxu0 %v1199_v26  ;;  %v2068_v61 = vsub.f32 %v40204_v53, %v2067_v57  ;;  %v2562_v16 = vsub.f32 %v2560_v8, %v2561_v12  ;;  %v3353_v20 = vpop.permute.xlu1 %3352  ;;  %v3014_v23 = vsub.f32 %v2904_v15, %v40287_v18  ;;  %v3355_v25 = vpop.permute.xlu0 %3354 }
 0x174   :  { %36455 = vmatprep.mubr.msk.f32.mxu1 %vm39953_vm1, %v45057_v54  ;;  %36470 = vmatprep.mubr.msk.f32.mxu0 %vm39953_vm1, %v45057_v54  ;;  %v3358_v29 = vsel %vm632_vm2, %v3355_v25, 0 }
 0x175   :  { %36463 = vmatprep.subr.mxu1 %v45057_v54  ;;  %36478 = vmatprep.subr.mxu0 %v45057_v54  ;;  %v2069_v4 = vand.u32 4294901760, %v2068_v61  ;;  %v3015_v27 = vand.u32 4294901760, %v3014_v23  ;;  %v40328_v33 = vand.u32 4294901760, %v3358_v29 }
 0x176   :  { %36456 = vmatmul.mubr.f32.vlgmr.msra.gmra.mxu1 %v40128_v5  ;;  %36471 = vmatmul.mubr.f32.vlgmr.msra.gmra.mxu0 %v40136_v17  ;;  %v40249_v5 = vsub.f32 %v2448_v58, %v40233_v62 }
 0x177   :  { %36464 = vmatpush3.xpose.msra.mxu1 %v1202_v42  ;;  %36479 = vmatpush3.xpose.msra.mxu0 %v1200_v30  ;;  %v3468_v37 = vsub.f32 %v3358_v29, %v40328_v33  ;;  %v3809_v42 = vpop.permute.xlu0 %3808 }
 0x178   :  { %36465 = vmatprep.mubr.msk.f32.mxu1 %vm39953_vm1, %v45057_v54  ;;  %36480 = vmatprep.mubr.msk.f32.mxu0 %vm39953_vm1, %v45057_v54  ;;  %v2520_v9 = vand.u32 4294901760, %v40249_v5 }
 0x179   :  { %36473 = vmatprep.subr.mxu1 %v45057_v54  ;;  %36488 = vmatprep.subr.mxu0 %v45057_v54  ;;  %v3469_v44 = vand.u32 4294901760, %v3468_v37 }
 0x17a   :  { %36466 = vmatmul.mubr.f32.vlgmr.msra.gmra.mxu1 %v40133_v13  ;;  %36481 = vmatmul.mubr.f32.vlgmr.msra.gmra.mxu0 %v40133_v13  ;;  %v2521_v14 = vsub.f32 %v40249_v5, %v2520_v9 }
 0x17b   :  { %36474 = vmatpush3.xpose.msra.mxu1 %v40140_v21  ;;  %36489 = vmatpush3.xpose.msra.mxu0 %v40165_v34 }
 0x17c   :  { %36475 = vmatprep.mubr.msk.f32.mxu1 %vm39953_vm1, %v45057_v54  ;;  %36490 = vmatprep.mubr.msk.f32.mxu0 %vm39953_vm1, %v45057_v54  ;;  %v2522_v19 = vand.u32 4294901760, %v2521_v14 }
 0x17d   :  { %36483 = vmatprep.subr.mxu1 %v45057_v54  ;;  %36498 = vmatprep.subr.mxu0 %v45057_v54 }
 0x17e   :  { %36476 = vmatmul.mubr.f32.vlgmr.msra.gmra.mxu1 %v1159_v24  ;;  %36491 = vmatmul.mubr.f32.vlgmr.msra.gmra.mxu0 %v1615_v52  ;;  %v3356_v24 = vsel %vm632_vm2, %v3353_v20, 0 }
 0x17f   :  { %36484 = vmatpush3.xpose.msra.mxu1 %v40140_v21  ;;  %36499 = vmatpush3.xpose.msra.mxu0 %v1653_v41  ;;  %v2563_v21 = vand.u32 4294901760, %v2562_v16  ;;  %v40312_v28 = vand.u32 4294901760, %v3356_v24 }
 0x180   :  { %36485 = vmatprep.mubr.msk.f32.mxu1 %vm39953_vm1, %v45057_v54  ;;  %36500 = vmatprep.mubr.msk.f32.mxu0 %vm39953_vm1, %v45057_v54 }
 0x181   :  { %36493 = vmatprep.subr.mxu1 %v45057_v54  ;;  %36508 = vmatprep.subr.mxu0 %v45057_v54  ;;  %v40326_v32 = vsub.f32 %v3356_v24, %v40312_v28 }
 0x182   :  { %36486 = vmatmul.mubr.f32.vlgmr.msra.gmra.mxu1 %v40133_v13  ;;  %36501 = vmatmul.mubr.f32.vlgmr.msra.gmra.mxu0 %v40168_v36  ;;  %v40268_v13 = vand.u32 4294901760, %v2902_v10 }
 0x183   :  { %36494 = vmatpush3.xpose.msra.mxu1 %v1656_v55  ;;  %36509 = vmatpush3.xpose.msra.mxu0 %v1654_v46  ;;  %v3428_v36 = vand.u32 4294901760, %v40326_v32  ;;  %v3812_v46 = vsel %vm632_vm2, %v3809_v42, 0 }
 0x184   :  { %36495 = vmatprep.mubr.msk.f32.mxu1 %vm39953_vm1, %v45057_v54  ;;  %36510 = vmatprep.mubr.msk.f32.mxu0 %vm39953_vm1, %v45057_v54  ;;  %v40285_v17 = vsub.f32 %v2902_v10, %v40268_v13  ;;  %v3845_v50 = vand.u32 4294901760, %v3812_v46 }
 0x185   :  { %36503 = vmatprep.subr.mxu1 %v45057_v54  ;;  %36518 = vmatprep.subr.mxu0 %v45057_v54 }
 0x186   :  { %36496 = vmatmul.mubr.f32.vlgmr.msra.gmra.mxu1 %v40154_v31  ;;  %36511 = vmatmul.mubr.f32.vlgmr.msra.gmra.mxu0 %v40154_v31  ;;  %v2974_v22 = vand.u32 4294901760, %v40285_v17 }
 0x187   :  { %36504 = vmatpush3.xpose.msra.mxu1 %v40165_v34  ;;  %36519 = vmatpush3.xpose.msra.mxu0 %v40201_v51 }
 0x188   :  { %36505 = vmatprep.mubr.msk.f32.mxu1 %vm39953_vm1, %v45057_v54  ;;  %36520 = vmatprep.mubr.msk.f32.mxu0 %vm39953_vm1, %v45057_v54  ;;  %v2975_v26 = vsub.f32 %v40285_v17, %v2974_v22 }
 0x189   :  { %36513 = vmatprep.subr.mxu1 %v45057_v54  ;;  %36528 = vmatprep.subr.mxu0 %v45057_v54 }
 0x18a   :  { %36506 = vmatmul.mubr.f32.vlgmr.msra.gmra.mxu1 %v1613_v43  ;;  %36521 = vmatmul.mubr.f32.vlgmr.msra.gmra.mxu0 %v2069_v4  ;;  %v2976_v30 = vand.u32 4294901760, %v2975_v26  ;;  %v3429_v43 = vsub.f32 %v40326_v32, %v3428_v36 }
 0x18b   :  { %36514 = vmatpush3.xpose.msra.mxu1 %v40165_v34  ;;  %36529 = vmatpush3.xpose.msra.mxu0 %v2107_v56  ;;  %v3807_v34 = vpop.permute.xlu1 %3806 }
 0x18c   :  { %36515 = vmatprep.mubr.msk.f32.mxu1 %vm39953_vm1, %v45057_v54  ;;  %36530 = vmatprep.mubr.msk.f32.mxu0 %vm39953_vm1, %v45057_v54  ;;  %v3810_v41 = vsel %vm632_vm2, %v3807_v34, 0  ;;  %v3430_v47 = vand.u32 4294901760, %v3429_v43 }
 0x18d   :  { %36523 = vmatprep.subr.mxu1 %v45057_v54  ;;  %36538 = vmatprep.subr.mxu0 %v45057_v54  ;;  %v40351_v45 = vand.u32 4294901760, %v3810_v41 }
 0x18e   :  { %36516 = vmatmul.mubr.f32.vlgmr.msra.gmra.mxu1 %v40154_v31  ;;  %36531 = vmatmul.mubr.f32.vlgmr.msra.gmra.mxu0 %v40204_v53  ;;  %v3016_v31 = vsub.f32 %v3014_v23, %v3015_v27  ;;  %v3922_v53 = vsub.f32 %v3812_v46, %v3845_v50 }
 0x18f   :  { %36524 = vmatpush3.xpose.msra.mxu1 %v2110_v7  ;;  %36539 = vmatpush3.xpose.msra.mxu0 %v2108_v60  ;;  %v3881_v49 = vsub.f32 %v3810_v41, %v40351_v45 }
 0x190   :  { %36525 = vmatprep.mubr.msk.f32.mxu1 %vm39953_vm1, %v45057_v54  ;;  %36540 = vmatprep.mubr.msk.f32.mxu0 %vm39953_vm1, %v45057_v54  ;;  %v3017_v35 = vand.u32 4294901760, %v3016_v31  ;;  %v3923_v56 = vand.u32 4294901760, %v3922_v53 }
 0x191   :  { %36533 = vmatprep.subr.mxu1 %v45057_v54  ;;  %36548 = vmatprep.subr.mxu0 %v45057_v54  ;;  %v3882_v52 = vand.u32 4294901760, %v3881_v49 }
 0x192   :  { %36526 = vmatmul.mubr.f32.vlgmr.msra.gmra.mxu1 %v40188_v48  ;;  %36541 = vmatmul.mubr.f32.vlgmr.msra.gmra.mxu0 %v40188_v48  ;;  %v3924_v58 = vsub.f32 %v3922_v53, %v3923_v56 }
 0x193   :  { %36534 = vmatpush3.xpose.msra.mxu1 %v40201_v51  ;;  %36549 = vmatpush3.xpose.msra.mxu0 %v40243_v2  ;;  %v3883_v55 = vsub.f32 %v3881_v49, %v3882_v52 }
 0x194   :  { %36535 = vmatprep.mubr.msk.f32.mxu1 %vm39953_vm1, %v45057_v54  ;;  %36550 = vmatprep.mubr.msk.f32.mxu0 %vm39953_vm1, %v45057_v54  ;;  %v3925_v59 = vand.u32 4294901760, %v3924_v58 }
 0x195   :  { %36543 = vmatprep.subr.mxu1 %v45057_v54  ;;  %36558 = vmatprep.subr.mxu0 %v45057_v54 }
 0x196   :  { %36536 = vmatmul.mubr.f32.vlgmr.msra.gmra.mxu1 %v2067_v57  ;;  %36551 = vmatmul.mubr.f32.vlgmr.msra.gmra.mxu0 %v2522_v19  ;;  %v3884_v57 = vand.u32 4294901760, %v3883_v55 }
 0x197   :  { %36544 = vmatpush3.xpose.msra.mxu1 %v40201_v51  ;;  %36559 = vmatpush3.xpose.msra.mxu0 %v2560_v8 }
 0x198   :  { %36545 = vmatprep.mubr.msk.f32.mxu1 %vm39953_vm1, %v45057_v54  ;;  %36560 = vmatprep.mubr.msk.f32.mxu0 %vm39953_vm1, %v45057_v54 }
 0x199   :  { %36553 = vmatprep.subr.mxu1 %v45057_v54  ;;  %36568 = vmatprep.subr.mxu0 %v45057_v54 }
 0x19a   :  { %36546 = vmatmul.mubr.f32.vlgmr.msra.gmra.mxu1 %v40188_v48  ;;  %36561 = vmatmul.mubr.f32.vlgmr.msra.gmra.mxu0 %v40249_v5  ;;  %v3470_v48 = vsub.f32 %v3468_v37, %v3469_v44 }
 0x19b   :  { %36554 = vmatpush3.xpose.msra.mxu1 %v2563_v21  ;;  %36569 = vmatpush3.xpose.msra.mxu0 %v2561_v12 }
 0x19c   :  { %36555 = vmatprep.mubr.msk.f32.mxu1 %vm39953_vm1, %v45057_v54  ;;  %36570 = vmatprep.mubr.msk.f32.mxu0 %vm39953_vm1, %v45057_v54  ;;  %v3471_v51 = vand.u32 4294901760, %v3470_v48 }
 0x19d   :  { %36563 = vmatprep.subr.mxu1 %v45057_v54  ;;  %36578 = vmatprep.subr.mxu0 %v45057_v54 }
 0x19e   :  { %36556 = vmatmul.mubr.f32.vlgmr.msra.gmra.mxu1 %v40233_v62  ;;  %36571 = vmatmul.mubr.f32.vlgmr.msra.gmra.mxu0 %v40233_v62 }
 0x19f   :  { %36564 = vmatpush3.xpose.msra.mxu1 %v40243_v2  ;;  %36579 = vmatpush3.xpose.msra.mxu0 %v40287_v18 }
 0x1a0   :  { %36565 = vmatprep.mubr.msk.f32.mxu1 %vm39953_vm1, %v45057_v54  ;;  %36580 = vmatprep.mubr.msk.f32.mxu0 %vm39953_vm1, %v45057_v54 }
 0x1a1   :  { %36573 = vmatprep.subr.mxu1 %v45057_v54  ;;  %36588 = vmatprep.subr.mxu0 %v45057_v54 }
 0x1a2   :  { %36566 = vmatmul.mubr.f32.vlgmr.msra.gmra.mxu1 %v2520_v9  ;;  %36581 = vmatmul.mubr.f32.vlgmr.msra.gmra.mxu0 %v2976_v30 }
 0x1a3   :  { %36574 = vmatpush3.xpose.msra.mxu1 %v40243_v2  ;;  %36589 = vmatpush3.xpose.msra.mxu0 %v3014_v23 }
 0x1a4   :  { %36575 = vmatprep.mubr.msk.f32.mxu1 %vm39953_vm1, %v45057_v54  ;;  %36590 = vmatprep.mubr.msk.f32.mxu0 %vm39953_vm1, %v45057_v54 }
 0x1a5   :  { %36583 = vmatprep.subr.mxu1 %v45057_v54  ;;  %36598 = vmatprep.subr.mxu0 %v45057_v54 }
 0x1a6   :  { %36576 = vmatmul.mubr.f32.vlgmr.msra.gmra.mxu1 %v40233_v62  ;;  %36591 = vmatmul.mubr.f32.vlgmr.msra.gmra.mxu0 %v40285_v17 }
 0x1a7   :  { %36584 = vmatpush3.xpose.msra.mxu1 %v3017_v35  ;;  %36599 = vmatpush3.xpose.msra.mxu0 %v3015_v27 }
 0x1a8   :  { %36585 = vmatprep.mubr.msk.f32.mxu1 %vm39953_vm1, %v45057_v54  ;;  %36600 = vmatprep.mubr.msk.f32.mxu0 %vm39953_vm1, %v45057_v54 }
 0x1a9   :  { %36593 = vmatprep.subr.mxu1 %v45057_v54  ;;  %36608 = vmatprep.subr.mxu0 %v45057_v54 }
 0x1aa   :  { %36586 = vmatmul.mubr.f32.vlgmr.msra.gmra.mxu1 %v40268_v13  ;;  %36601 = vmatmul.mubr.f32.vlgmr.msra.gmra.mxu0 %v40268_v13 }
 0x1ab   :  { %36594 = vmatpush3.xpose.msra.mxu1 %v40287_v18  ;;  %36609 = vmatpush3.xpose.msra.mxu0 %v40328_v33 }
 0x1ac   :  { %36595 = vmatprep.mubr.msk.f32.mxu1 %vm39953_vm1, %v45057_v54  ;;  %36610 = vmatprep.mubr.msk.f32.mxu0 %vm39953_vm1, %v45057_v54 }
 0x1ad   :  { %36603 = vmatprep.subr.mxu1 %v45057_v54  ;;  %36618 = vmatprep.subr.mxu0 %v45057_v54 }
 0x1ae   :  { %36596 = vmatmul.mubr.f32.vlgmr.msra.gmra.mxu1 %v2974_v22  ;;  %36611 = vmatmul.mubr.f32.vlgmr.msra.gmra.mxu0 %v3430_v47 }
 0x1af   :  { %36604 = vmatpush3.xpose.msra.mxu1 %v40287_v18  ;;  %36619 = vmatpush3.xpose.msra.mxu0 %v3468_v37 }
 0x1b0   :  { %36605 = vmatprep.mubr.msk.f32.mxu1 %vm39953_vm1, %v45057_v54  ;;  %36620 = vmatprep.mubr.msk.f32.mxu0 %vm39953_vm1, %v45057_v54 }
 0x1b1   :  { %36613 = vmatprep.subr.mxu1 %v45057_v54  ;;  %36628 = vmatprep.subr.mxu0 %v45057_v54 }
 0x1b2   :  { %36606 = vmatmul.mubr.f32.vlgmr.msra.gmra.mxu1 %v40268_v13  ;;  %36621 = vmatmul.mubr.f32.vlgmr.msra.gmra.mxu0 %v40326_v32 }
 0x1b3   :  { %36614 = vmatpush3.xpose.msra.mxu1 %v3471_v51  ;;  %36629 = vmatpush3.xpose.msra.mxu0 %v3469_v44 }
 0x1b4   :  { %36615 = vmatprep.mubr.msk.f32.mxu1 %vm39953_vm1, %v45057_v54  ;;  %36630 = vmatprep.mubr.msk.f32.mxu0 %vm39953_vm1, %v45057_v54 }
 0x1b5   :  { %36623 = vmatprep.subr.mxu1 %v45057_v54  ;;  %36638 = vmatprep.subr.mxu0 %v45057_v54 }
 0x1b6   :  { %36616 = vmatmul.mubr.f32.vlgmr.msra.gmra.mxu1 %v40312_v28  ;;  %36631 = vmatmul.mubr.f32.vlgmr.msra.gmra.mxu0 %v40312_v28 }
 0x1b7   :  { %36624 = vmatpush3.xpose.msra.mxu1 %v40328_v33  ;;  %36639 = vmatpush3.xpose.msra.mxu0 %v3845_v50 }
 0x1b8   :  { %36625 = vmatprep.mubr.msk.f32.mxu1 %vm39953_vm1, %v45057_v54  ;;  %36640 = vmatprep.mubr.msk.f32.mxu0 %vm39953_vm1, %v45057_v54 }
 0x1b9   :  { %36633 = vmatprep.subr.mxu1 %v45057_v54  ;;  %36648 = vmatprep.subr.mxu0 %v45057_v54 }
 0x1ba   :  { %36626 = vmatmul.mubr.f32.vlgmr.msra.gmra.mxu1 %v3428_v36  ;;  %36641 = vmatmul.mubr.f32.vlgmr.msra.gmra.mxu0 %v3884_v57 }
 0x1bb   :  { %36634 = vmatpush3.xpose.msra.mxu1 %v40328_v33  ;;  %36649 = vmatpush3.xpose.msra.mxu0 %v3922_v53 }
 0x1bc   :  { %36635 = vmatprep.mubr.msk.f32.mxu1 %vm39953_vm1, %v45057_v54  ;;  %36650 = vmatprep.mubr.msk.f32.mxu0 %vm39953_vm1, %v45057_v54 }
 0x1bd   :  { %36643 = vmatprep.subr.mxu1 %v45057_v54  ;;  %36658 = vmatprep.subr.mxu0 %v45057_v54 }
 0x1be   :  { %36636 = vmatmul.mubr.f32.vlgmr.msra.gmra.mxu1 %v40312_v28  ;;  %36651 = vmatmul.mubr.f32.vlgmr.msra.gmra.mxu0 %v3881_v49 }
 0x1bf   :  { %36644 = vmatpush3.xpose.msra.mxu1 %v3925_v59  ;;  %36659 = vmatpush3.xpose.msra.mxu0 %v3923_v56 }
 0x1c0   :  { %36645 = vmatprep.mubr.msk.f32.mxu1 %vm39953_vm1, %v45057_v54  ;;  %36660 = vmatprep.mubr.msk.f32.mxu0 %vm39953_vm1, %v45057_v54 }
 0x1c1   :  { %36653 = vmatprep.subr.mxu1 %v45057_v54  ;;  %36668 = vmatprep.subr.mxu0 %v45057_v54 }
 0x1c2   :  { %36646 = vmatmul.mubr.f32.vlgmr.msra.gmra.mxu1 %v40351_v45  ;;  %36661 = vmatmul.mubr.f32.vlgmr.msra.gmra.mxu0 %v40351_v45 }
 0x1c3   :  { %36654 = vmatpush3.xpose.msra.mxu1 %v3845_v50  ;;  %36655 = vmatprep.mubr.msk.f32.mxu1 %vm39953_vm1, %v45057_v54 }
 0x1c4   :  { %36663 = vmatprep.subr.mxu1 %v45057_v54  ;;  %36670 = vmatprep.mubr.msk.f32.mxu0 %vm39953_vm1, %v45057_v54 }
 0x1c6   :  { %36656 = vmatmul.mubr.f32.vlgmr.msra.gmra.mxu1 %v3882_v52 }
 0x1c7   :  { %36664 = vmatpush3.xpose.msra.mxu1 %v3845_v50  ;;  %36665 = vmatprep.mubr.msk.f32.mxu1 %vm39953_vm1, %v45057_v54 }
 0x1c8   :  { %36673 = vmatprep.subr.mxu1 %v45057_v54 }
 0x1ca   :  { %36666 = vmatmul.mubr.f32.vlgmr.msra.gmra.mxu1 %v40351_v45 }
 0x1cb   :  { %36675 = vmatprep.mubr.msk.f32.mxu1 %vm39953_vm1, %v45057_v54 }
 0x226   :  { %v709_v60 = vpop.f32.mrf.mxu0 }
 0x228   :  { %v36432_v61 = vpop.f32.mrf.mxu0 }
 0x22a   :  { %v859_v62 = vpop.f32.mrf.mxu0 }
 0x22c   :  { %v36442_v0 = vpop.f32.mrf.mxu0 }
 0x22e   :  { %v785_v1 = vpop.f32.mrf.mxu1  ;;  %v1007_v2 = vpop.f32.mrf.mxu0 }
 0x22f   :  { %v786_v4 = vadd.f32 %v785_v1, %v709_v60 }
 0x230   :  { %v36437_v5 = vpop.f32.mrf.mxu1  ;;  %v36452_v6 = vpop.f32.mrf.mxu0 }
 0x231   :  { %v860_v7 = vadd.f32 %v859_v62, %v786_v4 }
 0x232   :  { %v933_v8 = vpop.f32.mrf.mxu1  ;;  %v1163_v9 = vpop.f32.mrf.mxu0 }
 0x233   :  { %v934_v10 = vadd.f32 %v933_v8, %v860_v7 }
 0x234   :  { %v36447_v11 = vpop.f32.mrf.mxu1  ;;  %v36462_v12 = vpop.f32.mrf.mxu0 }
 0x235   :  { %v1008_v13 = vadd.f32 %v1007_v2, %v934_v10 }
 0x236   :  { %v1079_v14 = vpop.f32.mrf.mxu1  ;;  %v1313_v16 = vpop.f32.mrf.mxu0 }
 0x237   :  { %v40422_v15 = vadd.f32 %v1079_v14, %v1008_v13 }
 0x238   :  { %v36457_v17 = vpop.f32.mrf.mxu1  ;;  %v36472_v18 = vpop.f32.mrf.mxu0 }
 0x239   :  { %v4260_v19 = vsel %vm632_vm2, %v40422_v15, -inf }
 0x23a   :  { %v1239_v20 = vpop.f32.mrf.mxu1  ;;  %4261 = vmax.xlane.f32.xlu0 %v4260_v19  ;;  %v1461_v22 = vpop.f32.mrf.mxu0 }
 0x23b   :  { %v1240_v21 = vadd.f32 %v1239_v20, %v1163_v9 }
 0x23c   :  { %v36467_v23 = vpop.f32.mrf.mxu1  ;;  %v36482_v24 = vpop.f32.mrf.mxu0 }
 0x23d   :  { %v1314_v25 = vadd.f32 %v1313_v16, %v1240_v21 }
 0x23e   :  { %v1387_v26 = vpop.f32.mrf.mxu1  ;;  %v1617_v28 = vpop.f32.mrf.mxu0 }
 0x23f   :  { %v1388_v27 = vadd.f32 %v1387_v26, %v1314_v25 }
 0x240   :  { %v36477_v29 = vpop.f32.mrf.mxu1  ;;  %v36492_v30 = vpop.f32.mrf.mxu0 }
 0x241   :  { %v1462_v31 = vadd.f32 %v1461_v22, %v1388_v27 }
 0x242   :  { %v1533_v32 = vpop.f32.mrf.mxu1  ;;  %v1767_v34 = vpop.f32.mrf.mxu0 }
 0x243   :  { %v40426_v33 = vadd.f32 %v1533_v32, %v1462_v31 }
 0x244   :  { %v36487_v35 = vpop.f32.mrf.mxu1  ;;  %v36502_v36 = vpop.f32.mrf.mxu0 }
 0x245   :  { %v4263_v37 = vsel %vm632_vm2, %v40426_v33, -inf }
 0x246   :  { %v1693_v41 = vpop.f32.mrf.mxu1  ;;  %4264 = vmax.xlane.f32.xlu1 %v4263_v37  ;;  %v1915_v43 = vpop.f32.mrf.mxu0 }
 0x247   :  { %v1694_v42 = vadd.f32 %v1693_v41, %v1617_v28 }
 0x248   :  { %v36497_v44 = vpop.f32.mrf.mxu1  ;;  %v36512_v45 = vpop.f32.mrf.mxu0 }
 0x249   :  { %v1768_v46 = vadd.f32 %v1767_v34, %v1694_v42 }
 0x24a   :  { %v1841_v47 = vpop.f32.mrf.mxu1  ;;  %v2071_v49 = vpop.f32.mrf.mxu0 }
 0x24b   :  { %v1842_v48 = vadd.f32 %v1841_v47, %v1768_v46 }
 0x24c   :  { %v36507_v50 = vpop.f32.mrf.mxu1  ;;  %v36522_v51 = vpop.f32.mrf.mxu0 }
 0x24d   :  { %v1916_v52 = vadd.f32 %v1915_v43, %v1842_v48 }
 0x24e   :  { %v1987_v53 = vpop.f32.mrf.mxu1  ;;  %v2221_v56 = vpop.f32.mrf.mxu0 }
 0x24f   :  { %v40430_v55 = vadd.f32 %v1987_v53, %v1916_v52 }
 0x250   :  { %v36517_v57 = vpop.f32.mrf.mxu1  ;;  %v36532_v58 = vpop.f32.mrf.mxu0 }
 0x251   :  { %v4266_v59 = vsel %vm632_vm2, %v40430_v55, -inf }
 0x252   :  { %v2147_v60 = vpop.f32.mrf.mxu1  ;;  %4267 = vmax.xlane.f32.xlu0 %v4266_v59  ;;  %v2369_v62 = vpop.f32.mrf.mxu0 }
 0x253   :  { %v2148_v61 = vadd.f32 %v2147_v60, %v2071_v49 }
 0x254   :  { %v36527_v0 = vpop.f32.mrf.mxu1  ;;  %v36542_v1 = vpop.f32.mrf.mxu0 }
 0x255   :  { %v2222_v2 = vadd.f32 %v2221_v56, %v2148_v61 }
 0x256   :  { %v2295_v4 = vpop.f32.mrf.mxu1  ;;  %v2524_v6 = vpop.f32.mrf.mxu0 }
 0x257   :  { %v2296_v5 = vadd.f32 %v2295_v4, %v2222_v2 }
 0x258   :  { %v36537_v7 = vpop.f32.mrf.mxu1  ;;  %v36552_v8 = vpop.f32.mrf.mxu0 }
 0x259   :  { %v2370_v9 = vadd.f32 %v2369_v62, %v2296_v5 }
 0x25a   :  { %v2441_v10 = vpop.f32.mrf.mxu1  ;;  %v2674_v12 = vpop.f32.mrf.mxu0 }
 0x25b   :  { %v40434_v11 = vadd.f32 %v2441_v10, %v2370_v9 }
 0x25c   :  { %v36547_v13 = vpop.f32.mrf.mxu1  ;;  %v36562_v14 = vpop.f32.mrf.mxu0 }
 0x25d   :  { %v4269_v16 = vsel %vm632_vm2, %v40434_v11, -inf }
 0x25e   :  { %v2600_v17 = vpop.f32.mrf.mxu1  ;;  %4270 = vmax.xlane.f32.xlu0 %v4269_v16  ;;  %v2822_v19 = vpop.f32.mrf.mxu0 }
 0x25f   :  { %v2601_v18 = vadd.f32 %v2600_v17, %v2524_v6 }
 0x260   :  { %v36557_v20 = vpop.f32.mrf.mxu1  ;;  %v36572_v21 = vpop.f32.mrf.mxu0 }
 0x261   :  { %v2675_v22 = vadd.f32 %v2674_v12, %v2601_v18 }
 0x262   :  { %v2748_v23 = vpop.f32.mrf.mxu1  ;;  %v2978_v25 = vpop.f32.mrf.mxu0 }
 0x263   :  { %v2749_v24 = vadd.f32 %v2748_v23, %v2675_v22 }
 0x264   :  { %v36567_v26 = vpop.f32.mrf.mxu1  ;;  %v36582_v27 = vpop.f32.mrf.mxu0 }
 0x265   :  { %v2823_v28 = vadd.f32 %v2822_v19, %v2749_v24 }
 0x266   :  { %v2894_v29 = vpop.f32.mrf.mxu1  ;;  %v3128_v31 = vpop.f32.mrf.mxu0 }
 0x267   :  { %v40438_v30 = vadd.f32 %v2894_v29, %v2823_v28 }
 0x268   :  { %v36577_v32 = vpop.f32.mrf.mxu1  ;;  %v36592_v34 = vpop.f32.mrf.mxu0 }
 0x269   :  { %v4272_v35 = vsel %vm632_vm2, %v40438_v30, -inf }
 0x26a   :  { %v3054_v36 = vpop.f32.mrf.mxu1  ;;  %4273 = vmax.xlane.f32.xlu1 %v4272_v35  ;;  %v3276_v41 = vpop.f32.mrf.mxu0 }
 0x26b   :  { %v3055_v37 = vadd.f32 %v3054_v36, %v2978_v25 }
 0x26c   :  { %v36587_v42 = vpop.f32.mrf.mxu1  ;;  %v36602_v43 = vpop.f32.mrf.mxu0 }
 0x26d   :  { %v3129_v44 = vadd.f32 %v3128_v31, %v3055_v37 }
 0x26e   :  { %v3202_v45 = vpop.f32.mrf.mxu1  ;;  %v3432_v47 = vpop.f32.mrf.mxu0 }
 0x26f   :  { %v3203_v46 = vadd.f32 %v3202_v45, %v3129_v44 }
 0x270   :  { %v36597_v48 = vpop.f32.mrf.mxu1  ;;  %v36612_v49 = vpop.f32.mrf.mxu0 }
 0x271   :  { %v3277_v50 = vadd.f32 %v3276_v41, %v3203_v46 }
 0x272   :  { %v3348_v51 = vpop.f32.mrf.mxu1  ;;  %v3582_v53 = vpop.f32.mrf.mxu0 }
 0x273   :  { %v40442_v52 = vadd.f32 %v3348_v51, %v3277_v50 }
 0x274   :  { %v36607_v56 = vpop.f32.mrf.mxu1  ;;  %v36622_v57 = vpop.f32.mrf.mxu0 }
 0x275   :  { %v4275_v58 = vsel %vm632_vm2, %v40442_v52, -inf }
 0x276   :  { %v3508_v59 = vpop.f32.mrf.mxu1  ;;  %4276 = vmax.xlane.f32.xlu0 %v4275_v58  ;;  %v3730_v61 = vpop.f32.mrf.mxu0 }
 0x277   :  { %v3509_v60 = vadd.f32 %v3508_v59, %v3432_v47 }
 0x278   :  { %v36617_v62 = vpop.f32.mrf.mxu1  ;;  %v36632_v0 = vpop.f32.mrf.mxu0 }
 0x279   :  { %v3583_v1 = vadd.f32 %v3582_v53, %v3509_v60 }
 0x27a   :  { %v3656_v2 = vpop.f32.mrf.mxu1  ;;  %v3886_v5 = vpop.f32.mrf.mxu0 }
 0x27b   :  { %v3657_v4 = vadd.f32 %v3656_v2, %v3583_v1 }
 0x27c   :  { %v36627_v6 = vpop.f32.mrf.mxu1  ;;  %v36642_v7 = vpop.f32.mrf.mxu0 }
 0x27d   :  { %v3731_v8 = vadd.f32 %v3730_v61, %v3657_v4 }
 0x27e   :  { %v3802_v9 = vpop.f32.mrf.mxu1  ;;  %v4036_v12 = vpop.f32.mrf.mxu0 }
 0x27f   :  { %v40446_v10 = vadd.f32 %v3802_v9, %v3731_v8 }
 0x280   :  { %v36637_v13 = vpop.f32.mrf.mxu1  ;;  %v36652_v14 = vpop.f32.mrf.mxu0 }
 0x281   :  { %v4278_v16 = vsel %vm632_vm2, %v40446_v10, -inf }
 0x282   :  { %v3962_v17 = vpop.f32.mrf.mxu1  ;;  %4279 = vmax.xlane.f32.xlu1 %v4278_v16  ;;  %v4184_v19 = vpop.f32.mrf.mxu0 }
 0x283   :  { %v3963_v18 = vadd.f32 %v3962_v17, %v3886_v5 }
 0x284   :  { %v36647_v20 = vpop.f32.mrf.mxu1  ;;  %v36662_v21 = vpop.f32.mrf.mxu0 }
 0x285   :  { %v4037_v22 = vadd.f32 %v4036_v12, %v3963_v18 }
 0x286   :  { %v4110_v23 = vpop.f32.mrf.mxu1 }
 0x287   :  { %v4111_v24 = vadd.f32 %v4110_v23, %v4037_v22 }
 0x288   :  { %v36657_v25 = vpop.f32.mrf.mxu1 }
 0x289   :  { %v4185_v26 = vadd.f32 %v4184_v19, %v4111_v24 }
 0x28a   :  { %v4256_v27 = vpop.f32.mrf.mxu1 }
 0x28b   :  { %v4257_v28 = vadd.f32 %v4256_v27, %v4185_v26 }
 0x28c   :  { %v36667_v29 = vpop.f32.mrf.mxu1 }
 0x28d   :  { %v4281_v31 = vsel %vm632_vm2, %v4257_v28, -inf }
 0x28e   :  { %4282 = vmax.xlane.f32.xlu0 %v4281_v31 }
 0x2c3   :  { %v4262_v32 = vpop.xlane.xlu0 %4261 }
 0x2c4   :  { %v4284_v34 = vsub.f32 %v40422_v15, %v4262_v32 }
 0x2c6   :  { %v4292_v35 = vmul.f32 1.442695, %v4284_v34 }
 0x2c8   :  { %39844 = vpow2.f32 %v4292_v35 }
 0x2cf   :  { %v4265_v36 = vpop.xlane.xlu1 %4264 }
 0x2d0   :  { %v4285_v37 = vsub.f32 %v40426_v33, %v4265_v36 }
 0x2d2   :  { %v4294_v41 = vmul.f32 1.442695, %v4285_v37 }
 0x2d4   :  { %39846 = vpow2.f32 %v4294_v41 }
 0x2d5   :  { %v40453_v42 = vpop.eup %39844 }
 0x2d6   :  { %v4308_v43 = vsel %vm632_vm2, %v40453_v42, 0.0 }
 0x2d7   :  { %4309 = vadd.xlane.f32.xlu1 %v4308_v43 }
 0x2db   :  { %v4268_v15 = vpop.xlane.xlu0 %4267 }
 0x2dc   :  { %v4286_v33 = vsub.f32 %v40430_v55, %v4268_v15 }
 0x2de   :  { %v4296_v47 = vmul.f32 1.442695, %v4286_v33 }
 0x2e0   :  { %39848 = vpow2.f32 %v4296_v47 }
 0x2e1   :  { %v40457_v44 = vpop.eup %39846 }
 0x2e2   :  { %v4311_v45 = vsel %vm632_vm2, %v40457_v44, 0.0 }
 0x2e3   :  { %4312 = vadd.xlane.f32.xlu0 %v4311_v45 }
 0x2e7   :  { %v4271_v46 = vpop.xlane.xlu0 %4270 }
 0x2e8   :  { %4800 = vrot.lane.b32.xlu1 %v40094_v63, %s39961_s26  ;;  %v4287_v48 = vsub.f32 %v40434_v11, %v4271_v46 }
 0x2ea   :  { %v4298_v50 = vmul.f32 1.442695, %v4287_v48 }
 0x2ec   :  { %5252 = vrot.lane.b32.xlu1 %v40094_v63, %s39962_s27  ;;  %39850 = vpow2.f32 %v4298_v50 }
 0x2ed   :  { %v40470_v56 = vpop.eup %39848 }
 0x2ee   :  { %v4314_v55 = vsel %vm632_vm2, %v40470_v56, 0.0 }
 0x2f3   :  { %v4274_v49 = vpop.xlane.xlu1 %4273 }
 0x2f4   :  { %v4288_v51 = vsub.f32 %v40438_v30, %v4274_v49 }
 0x2f6   :  { %v4300_v53 = vmul.f32 1.442695, %v4288_v51 }
 0x2f8   :  { %39852 = vpow2.f32 %v4300_v53 }
 0x2f9   :  { %4348 = vrot.lane.b32.xlu0 %v40094_v63, %s39963_s28  ;;  %v40474_v57 = vpop.eup %39850 }
 0x2fa   :  { %v4317_v58 = vsel %vm632_vm2, %v40474_v57, 0.0 }
 0x2ff   :  { %v4277_v59 = vpop.xlane.xlu0 %4276 }
 0x300   :  { %v4289_v60 = vsub.f32 %v40442_v52, %v4277_v59 }
 0x302   :  { %v4302_v1 = vmul.f32 1.442695, %v4289_v60 }
 0x304   :  { %39854 = vpow2.f32 %v4302_v1 }
 0x305   :  { %v40478_v11 = vpop.eup %39852 }
 0x306   :  { %v4320_v30 = vsel %vm632_vm2, %v40478_v11, 0.0 }
 0x30b   :  { %v4280_v61 = vpop.xlane.xlu1 %4279 }
 0x30c   :  { %v4290_v0 = vsub.f32 %v40446_v10, %v4280_v61 }
 0x30e   :  { %v4304_v4 = vmul.f32 1.442695, %v4290_v0 }
 0x310   :  { %4315 = vadd.xlane.f32.xlu1 %v4314_v55  ;;  %39856 = vpow2.f32 %v4304_v4 }
 0x311   :  { %v40488_v6 = vpop.eup %39854 }
 0x314   :  { %4318 = vadd.xlane.f32.xlu1 %v4317_v58 }
 0x317   :  { %v4283_v62 = vpop.xlane.xlu0 %4282 }
 0x318   :  { %4321 = vadd.xlane.f32.xlu0 %v4320_v30  ;;  %v4291_v2 = vsub.f32 %v4257_v28, %v4283_v62 }
 0x31a   :  { %v4306_v5 = vmul.f32 1.442695, %v4291_v2 }
 0x31c   :  { %39858 = vpow2.f32 %v4306_v5 }
 0x31d   :  { %v40490_v7 = vpop.eup %39856 }
 0x31e   :  { %v4326_v52 = vsel %vm632_vm2, %v40490_v7, 0.0 }
 0x325   :  { %6156 = vrot.lane.b32.xlu1 %v40108_v3, %s39963_s28 }
 0x329   :  { %v40494_v8 = vpop.eup %39858 }
 0x32a   :  { %v4329_v9 = vsel %vm632_vm2, %v40494_v8, 0.0 }
 0x32e   :  { %5704 = vrot.lane.b32.xlu0 %v40094_v63, %s39964_s29  ;;  %v4323_v63 = vsel %vm632_vm2, %v40488_v6, 0.0 }
 0x349   :  { %4324 = vadd.xlane.f32.xlu1 %v4323_v63 }
 0x34d   :  { %4327 = vadd.xlane.f32.xlu1 %v4326_v52  ;;  %4330 = vadd.xlane.f32.xlu0 %v4329_v9 }
 0x35e   :  { %6608 = vrot.lane.b32.xlu1 %v40108_v3, %s39961_s26 }
 0x360   :  { %v4310_v10 = vpop.xlane.xlu1 %4309 }
 0x361   :  { %39860 = vrcp.f32 %v4310_v10 }
 0x362   :  { %7060 = vrot.lane.b32.xlu1 %v40108_v3, %s39962_s27 }
 0x364   :  { %v4801_v17 = vpop.permute.xlu1 %4800 }
 0x365   :  { %v4837_v22 = vand.u32 4294901760, %v4801_v17 }
 0x366   :  { %7512 = vrot.lane.b32.xlu1 %v40108_v3, %s39964_s29 }
 0x367   :  { %v4914_v26 = vsub.f32 %v4801_v17, %v4837_v22 }
 0x368   :  { %v5253_v35 = vpop.permute.xlu1 %5252 }
 0x369   :  { %v4915_v34 = vand.u32 4294901760, %v4914_v26 }
 0x36b   :  { %v4916_v41 = vsub.f32 %v4914_v26, %v4915_v34 }
 0x36c   :  { %v4313_v12 = vpop.xlane.xlu0 %4312 }
 0x36d   :  { %39862 = vrcp.f32 %v4313_v12  ;;  %v4917_v45 = vand.u32 4294901760, %v4916_v41 }
 0x36e   :  { %v39861_v13 = vpop.eup %39860 }
 0x36f   :  { %v4333_v14 = vmul.f32 %v39861_v13, %v40453_v42  ;;  %v40517_v42 = vand.u32 4294901760, %v5253_v35 }
 0x370   :  { %v4349_v16 = vpop.permute.xlu0 %4348 }
 0x371   :  { %v4385_v18 = vand.u32 4294901760, %v4349_v16  ;;  %v4352_v19 = vsel %vm632_vm2, %v4333_v14, 0  ;;  %v40526_v15 = vsub.f32 %v5253_v35, %v40517_v42 }
 0x372   :  { %v4420_v20 = vand.u32 4294901760, %v4352_v19 }
 0x373   :  { %v4462_v21 = vsub.f32 %v4349_v16, %v4385_v18  ;;  %36669 = vmatpush3.msra.mxu0 %v4385_v18  ;;  %v5367_v47 = vand.u32 4294901760, %v40526_v15 }
 0x374   :  { %36678 = vmatprep.subr.mxu0 %v45057_v54  ;;  %v4421_v23 = vsub.f32 %v4352_v19, %v4420_v20 }
 0x375   :  { %v4463_v24 = vand.u32 4294901760, %v4462_v21  ;;  %v5368_v48 = vsub.f32 %v40526_v15, %v5367_v47 }
 0x376   :  { %v4422_v25 = vand.u32 4294901760, %v4421_v23 }
 0x377   :  { %v4464_v3 = vsub.f32 %v4462_v21, %v4463_v24  ;;  %v5369_v49 = vand.u32 4294901760, %v5368_v48 }
 0x378   :  { %v4423_v27 = vsub.f32 %v4421_v23, %v4422_v25 }
 0x379   :  { %v4465_v28 = vand.u32 4294901760, %v4464_v3 }
 0x37a   :  { %v39863_v29 = vpop.eup %39862  ;;  %v4424_v31 = vand.u32 4294901760, %v4423_v27 }
 0x37b   :  { %v4335_v32 = vmul.f32 %v39863_v29, %v40457_v44  ;;  %36674 = vmatpush3.msra.mxu1 %v4465_v28 }
 0x37c   :  { %36671 = vmatmul.mubr.f32.vlgmr.msra.gmra.mxu0 %v4424_v31  ;;  %36676 = vmatmul.mubr.f32.vlgmr.msra.gmra.mxu1 %v4420_v20 }
 0x37d   :  { %36679 = vmatpush3.msra.mxu0 %v4462_v21  ;;  %36683 = vmatprep.subr.mxu1 %v45057_v54  ;;  %v4804_v36 = vsel %vm632_vm2, %v4335_v32, 0 }
 0x37e   :  { %36684 = vmatpush3.msra.mxu1 %v4385_v18  ;;  %36680 = vmatprep.mubr.msk.f32.mxu0 %vm39953_vm1, %v45057_v54  ;;  %v4872_v37 = vand.u32 4294901760, %v4804_v36 }
 0x37f   :  { %36685 = vmatprep.mubr.msk.f32.mxu1 %vm39953_vm1, %v45057_v54  ;;  %36688 = vmatprep.subr.mxu0 %v45057_v54 }
 0x380   :  { %36693 = vmatprep.subr.mxu1 %v45057_v54  ;;  %36681 = vmatmul.mubr.f32.vlgmr.msra.gmra.mxu0 %v4421_v23  ;;  %v4873_v43 = vsub.f32 %v4804_v36, %v4872_v37 }
 0x381   :  { %36686 = vmatmul.mubr.f32.vlgmr.msra.gmra.mxu1 %v4422_v25  ;;  %36689 = vmatpush3.msra.mxu0 %v4463_v24 }
 0x382   :  { %36694 = vmatpush3.msra.mxu1 %v4385_v18  ;;  %36690 = vmatprep.mubr.msk.f32.mxu0 %vm39953_vm1, %v45057_v54  ;;  %v4874_v44 = vand.u32 4294901760, %v4873_v43 }
 0x383   :  { %36695 = vmatprep.mubr.msk.f32.mxu1 %vm39953_vm1, %v45057_v54  ;;  %36698 = vmatprep.subr.mxu0 %v45057_v54 }
 0x384   :  { %36703 = vmatprep.subr.mxu1 %v45057_v54  ;;  %36691 = vmatmul.mubr.f32.vlgmr.msra.gmra.mxu0 %v4420_v20  ;;  %v4875_v33 = vsub.f32 %v4873_v43, %v4874_v44 }
 0x385   :  { %36696 = vmatmul.mubr.f32.vlgmr.msra.gmra.mxu1 %v4420_v20  ;;  %36699 = vmatpush3.msra.mxu0 %v4837_v22 }
 0x386   :  { %36704 = vmatpush3.msra.mxu1 %v4917_v45  ;;  %36700 = vmatprep.mubr.msk.f32.mxu0 %vm39953_vm1, %v45057_v54  ;;  %v4876_v46 = vand.u32 4294901760, %v4875_v33 }
 0x387   :  { %36705 = vmatprep.mubr.msk.f32.mxu1 %vm39953_vm1, %v45057_v54  ;;  %36708 = vmatprep.subr.mxu0 %v45057_v54 }
 0x388   :  { %36713 = vmatprep.subr.mxu1 %v45057_v54  ;;  %36701 = vmatmul.mubr.f32.vlgmr.msra.gmra.mxu0 %v4876_v46 }
 0x389   :  { %36706 = vmatmul.mubr.f32.vlgmr.msra.gmra.mxu1 %v4872_v37  ;;  %36709 = vmatpush3.msra.mxu0 %v4914_v26 }
 0x38a   :  { %36714 = vmatpush3.msra.mxu1 %v4837_v22  ;;  %36710 = vmatprep.mubr.msk.f32.mxu0 %vm39953_vm1, %v45057_v54 }
 0x38b   :  { %36715 = vmatprep.mubr.msk.f32.mxu1 %vm39953_vm1, %v45057_v54  ;;  %36718 = vmatprep.subr.mxu0 %v45057_v54 }
 0x38c   :  { %36723 = vmatprep.subr.mxu1 %v45057_v54  ;;  %36711 = vmatmul.mubr.f32.vlgmr.msra.gmra.mxu0 %v4873_v43 }
 0x38d   :  { %36716 = vmatmul.mubr.f32.vlgmr.msra.gmra.mxu1 %v4874_v44  ;;  %36719 = vmatpush3.msra.mxu0 %v4915_v34 }
 0x38e   :  { %36724 = vmatpush3.msra.mxu1 %v4837_v22  ;;  %36720 = vmatprep.mubr.msk.f32.mxu0 %vm39953_vm1, %v45057_v54 }
 0x38f   :  { %36725 = vmatprep.mubr.msk.f32.mxu1 %vm39953_vm1, %v45057_v54  ;;  %36728 = vmatprep.subr.mxu0 %v45057_v54 }
 0x390   :  { %36733 = vmatprep.subr.mxu1 %v45057_v54  ;;  %36721 = vmatmul.mubr.f32.vlgmr.msra.gmra.mxu0 %v4872_v37 }
 0x391   :  { %36726 = vmatmul.mubr.f32.vlgmr.msra.gmra.mxu1 %v4872_v37  ;;  %36729 = vmatpush3.msra.mxu0 %v40517_v42 }
 0x392   :  { %36734 = vmatpush3.msra.mxu1 %v5369_v49  ;;  %36735 = vmatprep.mubr.msk.f32.mxu1 %vm39953_vm1, %v45057_v54 }
 0x393   :  { %36743 = vmatprep.subr.mxu1 %v45057_v54  ;;  %36730 = vmatprep.mubr.msk.f32.mxu0 %vm39953_vm1, %v45057_v54 }
 0x394   :  { %36738 = vmatprep.subr.mxu0 %v45057_v54 }
 0x399   :  { %v4316_v50 = vpop.xlane.xlu1 %4315 }
 0x39a   :  { %39864 = vrcp.f32 %v4316_v50 }
 0x39d   :  { %v4319_v51 = vpop.xlane.xlu1 %4318 }
 0x39e   :  { %39866 = vrcp.f32 %v4319_v51 }
 0x3a1   :  { %v4322_v53 = vpop.xlane.xlu0 %4321  ;;  %v6157_v4 = vpop.permute.xlu1 %6156 }
 0x3a2   :  { %39868 = vrcp.f32 %v4322_v53  ;;  %v40571_v9 = vand.u32 4294901760, %v6157_v4 }
 0x3a4   :  { %v40582_v16 = vsub.f32 %v6157_v4, %v40571_v9 }
 0x3a5   :  { %v5705_v55 = vpop.permute.xlu0 %5704 }
 0x3a6   :  { %v5741_v58 = vand.u32 4294901760, %v5705_v55  ;;  %v6271_v20 = vand.u32 4294901760, %v40582_v16 }
 0x3a7   :  { %v39865_v30 = vpop.eup %39864 }
 0x3a8   :  { %v40558_v59 = vsub.f32 %v5705_v55, %v5741_v58  ;;  %v4337_v60 = vmul.f32 %v39865_v30, %v40470_v56  ;;  %v6272_v23 = vsub.f32 %v40582_v16, %v6271_v20 }
 0x3aa   :  { %v5256_v61 = vsel %vm632_vm2, %v4337_v60, 0  ;;  %v5819_v1 = vand.u32 4294901760, %v40558_v59  ;;  %v6273_v3 = vand.u32 4294901760, %v6272_v23 }
 0x3ab   :  { %v39867_v62 = vpop.eup %39866  ;;  %v5324_v0 = vand.u32 4294901760, %v5256_v61 }
 0x3ac   :  { %v4339_v2 = vmul.f32 %v39867_v62, %v40474_v57  ;;  %v5820_v57 = vsub.f32 %v40558_v59, %v5819_v1 }
 0x3ad   :  { %v5325_v5 = vsub.f32 %v5256_v61, %v5324_v0  ;;  %36736 = vmatmul.mubr.f32.vlgmr.msra.gmra.mxu1 %v5324_v0 }
 0x3ae   :  { %36744 = vmatpush3.msra.mxu1 %v40517_v42  ;;  %36745 = vmatprep.mubr.msk.f32.mxu1 %vm39953_vm1, %v45057_v54  ;;  %v5708_v63 = vsel %vm632_vm2, %v4339_v2, 0  ;;  %v5821_v17 = vand.u32 4294901760, %v5820_v57 }
 0x3af   :  { %36753 = vmatprep.subr.mxu1 %v45057_v54  ;;  %v5326_v56 = vand.u32 4294901760, %v5325_v5  ;;  %v40569_v52 = vand.u32 4294901760, %v5708_v63  ;;  %v39869_v10 = vpop.eup %39868 }
 0x3b0   :  { %v4341_v18 = vmul.f32 %v39869_v10, %v40478_v11 }
 0x3b1   :  { %36746 = vmatmul.mubr.f32.vlgmr.msra.gmra.mxu1 %v5326_v56  ;;  %v5327_v12 = vsub.f32 %v5325_v5, %v5326_v56  ;;  %v5777_v14 = vsub.f32 %v5708_v63, %v40569_v52 }
 0x3b2   :  { %36754 = vmatpush3.msra.mxu1 %v40517_v42  ;;  %36755 = vmatprep.mubr.msk.f32.mxu1 %vm39953_vm1, %v45057_v54  ;;  %v6160_v11 = vsel %vm632_vm2, %v4341_v18, 0 }
 0x3b3   :  { %36763 = vmatprep.subr.mxu1 %v45057_v54  ;;  %v5328_v13 = vand.u32 4294901760, %v5327_v12  ;;  %v5778_v19 = vand.u32 4294901760, %v5777_v14  ;;  %v6228_v22 = vand.u32 4294901760, %v6160_v11 }
 0x3b5   :  { %36731 = vmatmul.mubr.f32.vlgmr.msra.gmra.mxu0 %v5328_v13  ;;  %36756 = vmatmul.mubr.f32.vlgmr.msra.gmra.mxu1 %v5324_v0  ;;  %v5779_v21 = vsub.f32 %v5777_v14, %v5778_v19  ;;  %v6229_v25 = vsub.f32 %v6160_v11, %v6228_v22 }
 0x3b6   :  { %36739 = vmatpush3.msra.mxu0 %v40526_v15  ;;  %36764 = vmatpush3.msra.mxu1 %v5821_v17 }
 0x3b7   :  { %36740 = vmatprep.mubr.msk.f32.mxu0 %vm39953_vm1, %v45057_v54  ;;  %36748 = vmatprep.subr.mxu0 %v45057_v54  ;;  %v5780_v24 = vand.u32 4294901760, %v5779_v21  ;;  %v6230_v26 = vand.u32 4294901760, %v6229_v25 }
 0x3b8   :  { %36765 = vmatprep.mubr.msk.f32.mxu1 %vm39953_vm1, %v45057_v54  ;;  %36773 = vmatprep.subr.mxu1 %v45057_v54 }
 0x3b9   :  { %36741 = vmatmul.mubr.f32.vlgmr.msra.gmra.mxu0 %v5325_v5  ;;  %36766 = vmatmul.mubr.f32.vlgmr.msra.gmra.mxu1 %v40569_v52  ;;  %v6231_v27 = vsub.f32 %v6229_v25, %v6230_v26 }
 0x3ba   :  { %36749 = vmatpush3.msra.mxu0 %v5367_v47  ;;  %36774 = vmatpush3.msra.mxu1 %v5741_v58 }
 0x3bb   :  { %36750 = vmatprep.mubr.msk.f32.mxu0 %vm39953_vm1, %v45057_v54  ;;  %36758 = vmatprep.subr.mxu0 %v45057_v54  ;;  %v6232_v28 = vand.u32 4294901760, %v6231_v27 }
 0x3bc   :  { %36775 = vmatprep.mubr.msk.f32.mxu1 %vm39953_vm1, %v45057_v54  ;;  %36783 = vmatprep.subr.mxu1 %v45057_v54 }
 0x3bd   :  { %36751 = vmatmul.mubr.f32.vlgmr.msra.gmra.mxu0 %v5324_v0  ;;  %36776 = vmatmul.mubr.f32.vlgmr.msra.gmra.mxu1 %v5778_v19 }
 0x3be   :  { %36759 = vmatpush3.msra.mxu0 %v5741_v58  ;;  %36784 = vmatpush3.msra.mxu1 %v5741_v58 }
 0x3bf   :  { %36760 = vmatprep.mubr.msk.f32.mxu0 %vm39953_vm1, %v45057_v54  ;;  %36768 = vmatprep.subr.mxu0 %v45057_v54 }
 0x3c0   :  { %36785 = vmatprep.mubr.msk.f32.mxu1 %vm39953_vm1, %v45057_v54  ;;  %36793 = vmatprep.subr.mxu1 %v45057_v54 }
 0x3c1   :  { %36761 = vmatmul.mubr.f32.vlgmr.msra.gmra.mxu0 %v5780_v24  ;;  %36786 = vmatmul.mubr.f32.vlgmr.msra.gmra.mxu1 %v40569_v52 }
 0x3c2   :  { %36769 = vmatpush3.msra.mxu0 %v40558_v59  ;;  %36794 = vmatpush3.msra.mxu1 %v6273_v3 }
 0x3c3   :  { %36770 = vmatprep.mubr.msk.f32.mxu0 %vm39953_vm1, %v45057_v54  ;;  %36778 = vmatprep.subr.mxu0 %v45057_v54 }
 0x3c4   :  { %36795 = vmatprep.mubr.msk.f32.mxu1 %vm39953_vm1, %v45057_v54  ;;  %36803 = vmatprep.subr.mxu1 %v45057_v54 }
 0x3c5   :  { %36771 = vmatmul.mubr.f32.vlgmr.msra.gmra.mxu0 %v5777_v14  ;;  %36796 = vmatmul.mubr.f32.vlgmr.msra.gmra.mxu1 %v6228_v22 }
 0x3c6   :  { %36779 = vmatpush3.msra.mxu0 %v5819_v1  ;;  %36804 = vmatpush3.msra.mxu1 %v40571_v9 }
 0x3c7   :  { %36780 = vmatprep.mubr.msk.f32.mxu0 %vm39953_vm1, %v45057_v54  ;;  %36788 = vmatprep.subr.mxu0 %v45057_v54 }
 0x3c8   :  { %36805 = vmatprep.mubr.msk.f32.mxu1 %vm39953_vm1, %v45057_v54  ;;  %36813 = vmatprep.subr.mxu1 %v45057_v54 }
 0x3c9   :  { %36781 = vmatmul.mubr.f32.vlgmr.msra.gmra.mxu0 %v40569_v52  ;;  %36806 = vmatmul.mubr.f32.vlgmr.msra.gmra.mxu1 %v6230_v26 }
 0x3ca   :  { %36789 = vmatpush3.msra.mxu0 %v40571_v9  ;;  %36814 = vmatpush3.msra.mxu1 %v40571_v9 }
 0x3cb   :  { %36790 = vmatprep.mubr.msk.f32.mxu0 %vm39953_vm1, %v45057_v54  ;;  %36798 = vmatprep.subr.mxu0 %v45057_v54 }
 0x3cc   :  { %36815 = vmatprep.mubr.msk.f32.mxu1 %vm39953_vm1, %v45057_v54  ;;  %36823 = vmatprep.subr.mxu1 %v45057_v54 }
 0x3cd   :  { %36791 = vmatmul.mubr.f32.vlgmr.msra.gmra.mxu0 %v6232_v28  ;;  %36816 = vmatmul.mubr.f32.vlgmr.msra.gmra.mxu1 %v6228_v22 }
 0x3ce   :  { %36799 = vmatpush3.msra.mxu0 %v40582_v16  ;;  %36800 = vmatprep.mubr.msk.f32.mxu0 %vm39953_vm1, %v45057_v54 }
 0x3cf   :  { %36808 = vmatprep.subr.mxu0 %v45057_v54  ;;  %36825 = vmatprep.mubr.msk.f32.mxu1 %vm39953_vm1, %v45057_v54 }
 0x3d1   :  { %36801 = vmatmul.mubr.f32.vlgmr.msra.gmra.mxu0 %v6229_v25 }
 0x3d2   :  { %36809 = vmatpush3.msra.mxu0 %v6271_v20  ;;  %v4325_v29 = vpop.xlane.xlu1 %4324  ;;  %36810 = vmatprep.mubr.msk.f32.mxu0 %vm39953_vm1, %v45057_v54 }
 0x3d3   :  { %39870 = vrcp.f32 %v4325_v29  ;;  %36818 = vmatprep.subr.mxu0 %v45057_v54 }
 0x3d5   :  { %36811 = vmatmul.mubr.f32.vlgmr.msra.gmra.mxu0 %v6228_v22 }
 0x3d6   :  { %v4328_v31 = vpop.xlane.xlu1 %4327  ;;  %36820 = vmatprep.mubr.msk.f32.mxu0 %vm39953_vm1, %v45057_v54  ;;  %v4331_v32 = vpop.xlane.xlu0 %4330 }
 0x3d7   :  { %39872 = vrcp.f32 %v4328_v31 }
 0x3d8   :  { %39874 = vrcp.f32 %v4331_v32 }
 0x3da   :  { %v6609_v34 = vpop.permute.xlu1 %6608 }
 0x3db   :  { %v6645_v35 = vand.u32 4294901760, %v6609_v34 }
 0x3dd   :  { %v6722_v36 = vsub.f32 %v6609_v34, %v6645_v35  ;;  %36819 = vmatpush3.msra.mxu0 %v6645_v35 }
 0x3de   :  { %v7061_v37 = vpop.permute.xlu1 %7060  ;;  %36828 = vmatprep.subr.mxu0 %v45057_v54 }
 0x3df   :  { %v6723_v41 = vand.u32 4294901760, %v6722_v36  ;;  %v7097_v42 = vand.u32 4294901760, %v7061_v37 }
 0x3e0   :  { %v39871_v43 = vpop.eup %39870 }
 0x3e1   :  { %v6724_v44 = vsub.f32 %v6722_v36, %v6723_v41  ;;  %v40648_v45 = vsub.f32 %v7061_v37, %v7097_v42  ;;  %v4343_v15 = vmul.f32 %v39871_v43, %v40488_v6 }
 0x3e2   :  { %v7513_v51 = vpop.permute.xlu1 %7512 }
 0x3e3   :  { %v6725_v33 = vand.u32 4294901760, %v6724_v44  ;;  %v6612_v46 = vsel %vm632_vm2, %v4343_v15, 0  ;;  %v7175_v49 = vand.u32 4294901760, %v40648_v45  ;;  %v40664_v30 = vand.u32 4294901760, %v7513_v51 }
 0x3e4   :  { %v39873_v47 = vpop.eup %39872  ;;  %v6680_v48 = vand.u32 4294901760, %v6612_v46 }
 0x3e5   :  { %36824 = vmatpush3.msra.mxu1 %v6725_v33  ;;  %v4345_v50 = vmul.f32 %v39873_v47, %v40490_v7  ;;  %v7176_v7 = vsub.f32 %v40648_v45, %v7175_v49  ;;  %v39875_v59 = vpop.eup %39874  ;;  %v40671_v1 = vsub.f32 %v7513_v51, %v40664_v30  ;;  %v40732_v51 = vand.u32 127, %v32_v38 }
 0x3e6   :  { %v6681_v53 = vsub.f32 %v6612_v46, %v6680_v48  ;;  %36826 = vmatmul.mubr.f32.vlgmr.msra.gmra.mxu1 %v6680_v48  ;;  %36833 = vmatprep.subr.mxu1 %v45057_v54  ;;  %v4347_v2 = vmul.f32 %v39875_v59, %v40494_v8 }
 0x3e7   :  { %36834 = vmatpush3.msra.mxu1 %v6645_v35  ;;  %36835 = vmatprep.mubr.msk.f32.mxu1 %vm39953_vm1, %v45057_v54  ;;  %v7064_v6 = vsel %vm632_vm2, %v4345_v50, 0  ;;  %v7177_v0 = vand.u32 4294901760, %v7176_v7  ;;  %v7627_v5 = vand.u32 4294901760, %v40671_v1  ;;  %45116 = vst [vmem:[#allocation6_spill] sm:$0xff] %v40732_v51 }
 0x3e8   :  { %36843 = vmatprep.subr.mxu1 %v45057_v54  ;;  %v6682_v55 = vand.u32 4294901760, %v6681_v53  ;;  %v40659_v58 = vand.u32 4294901760, %v7064_v6  ;;  %v7516_v63 = vsel %vm632_vm2, %v4347_v2, 0 }
 0x3e9   :  { %v7584_v56 = vand.u32 4294901760, %v7516_v63  ;;  %v7628_v52 = vsub.f32 %v40671_v1, %v7627_v5 }
 0x3ea   :  { %36836 = vmatmul.mubr.f32.vlgmr.msra.gmra.mxu1 %v6682_v55  ;;  %v6683_v60 = vsub.f32 %v6681_v53, %v6682_v55  ;;  %v7133_v62 = vsub.f32 %v7064_v6, %v40659_v58 }
 0x3eb   :  { %36844 = vmatpush3.msra.mxu1 %v6645_v35  ;;  %36845 = vmatprep.mubr.msk.f32.mxu1 %vm39953_vm1, %v45057_v54  ;;  %v7585_v57 = vsub.f32 %v7516_v63, %v7584_v56  ;;  %v7629_v10 = vand.u32 4294901760, %v7628_v52 }
 0x3ec   :  { %36853 = vmatprep.subr.mxu1 %v45057_v54  ;;  %v6684_v61 = vand.u32 4294901760, %v6683_v60  ;;  %v7134_v4 = vand.u32 4294901760, %v7133_v62 }
 0x3ed   :  { %v7586_v12 = vand.u32 4294901760, %v7585_v57 }
 0x3ee   :  { %36821 = vmatmul.mubr.f32.vlgmr.msra.gmra.mxu0 %v6684_v61  ;;  %36846 = vmatmul.mubr.f32.vlgmr.msra.gmra.mxu1 %v6680_v48  ;;  %v7135_v8 = vsub.f32 %v7133_v62, %v7134_v4 }
 0x3ef   :  { %36829 = vmatpush3.msra.mxu0 %v6722_v36  ;;  %36854 = vmatpush3.msra.mxu1 %v7177_v0  ;;  %v7587_v13 = vsub.f32 %v7585_v57, %v7586_v12 }
 0x3f0   :  { %36830 = vmatprep.mubr.msk.f32.mxu0 %vm39953_vm1, %v45057_v54  ;;  %36838 = vmatprep.subr.mxu0 %v45057_v54  ;;  %v7136_v9 = vand.u32 4294901760, %v7135_v8 }
 0x3f1   :  { %36855 = vmatprep.mubr.msk.f32.mxu1 %vm39953_vm1, %v45057_v54  ;;  %36863 = vmatprep.subr.mxu1 %v45057_v54  ;;  %v7588_v14 = vand.u32 4294901760, %v7587_v13 }
 0x3f2   :  { %36831 = vmatmul.mubr.f32.vlgmr.msra.gmra.mxu0 %v6681_v53  ;;  %36856 = vmatmul.mubr.f32.vlgmr.msra.gmra.mxu1 %v40659_v58  ;;  %v40735_v53 = vmul.u32 4, %v40080_v39 }
 0x3f3   :  { %36839 = vmatpush3.msra.mxu0 %v6723_v41  ;;  %36864 = vmatpush3.msra.mxu1 %v7097_v42 }
 0x3f4   :  { %36840 = vmatprep.mubr.msk.f32.mxu0 %vm39953_vm1, %v45057_v54  ;;  %36848 = vmatprep.subr.mxu0 %v45057_v54  ;;  %vm39_vm3 = vcmp.eq.s32.totalorder %v40732_v51, %v40735_v53 }
 0x3f5   :  { %36865 = vmatprep.mubr.msk.f32.mxu1 %vm39953_vm1, %v45057_v54  ;;  %36873 = vmatprep.subr.mxu1 %v45057_v54  ;;  %v40740_v6 = vsel %vm39_vm3, 1.0, %v45057_v54 }
 0x3f6   :  { %36841 = vmatmul.mubr.f32.vlgmr.msra.gmra.mxu0 %v6680_v48  ;;  %36866 = vmatmul.mubr.f32.vlgmr.msra.gmra.mxu1 %v7134_v4  ;;  %45117 = vst [vmem:[#allocation7_spill] sm:$0xff] %v40740_v6  ;;  %v7970_v55 = vsel %vm7968_vm4, %v40740_v6, 0 }
 0x3f7   :  { %36849 = vmatpush3.msra.mxu0 %v7097_v42  ;;  %36874 = vmatpush3.msra.mxu1 %v7097_v42 }
 0x3f8   :  { %36850 = vmatprep.mubr.msk.f32.mxu0 %vm39953_vm1, %v45057_v54  ;;  %36858 = vmatprep.subr.mxu0 %v45057_v54 }
 0x3f9   :  { %36875 = vmatprep.mubr.msk.f32.mxu1 %vm39953_vm1, %v45057_v54  ;;  %36883 = vmatprep.subr.mxu1 %v45057_v54 }
 0x3fa   :  { %36851 = vmatmul.mubr.f32.vlgmr.msra.gmra.mxu0 %v7136_v9  ;;  %36876 = vmatmul.mubr.f32.vlgmr.msra.gmra.mxu1 %v40659_v58 }
 0x3fb   :  { %36859 = vmatpush3.msra.mxu0 %v40648_v45  ;;  %36884 = vmatpush3.msra.mxu1 %v7629_v10 }
 0x3fc   :  { %36860 = vmatprep.mubr.msk.f32.mxu0 %vm39953_vm1, %v45057_v54  ;;  %36868 = vmatprep.subr.mxu0 %v45057_v54 }
 0x3fd   :  { %36885 = vmatprep.mubr.msk.f32.mxu1 %vm39953_vm1, %v45057_v54  ;;  %36893 = vmatprep.subr.mxu1 %v45057_v54 }
 0x3fe   :  { %36861 = vmatmul.mubr.f32.vlgmr.msra.gmra.mxu0 %v7133_v62  ;;  %36886 = vmatmul.mubr.f32.vlgmr.msra.gmra.mxu1 %v7584_v56 }
 0x3ff   :  { %36869 = vmatpush3.msra.mxu0 %v7175_v49  ;;  %36894 = vmatpush3.msra.mxu1 %v40664_v30 }
 0x400   :  { %36870 = vmatprep.mubr.msk.f32.mxu0 %vm39953_vm1, %v45057_v54  ;;  %36878 = vmatprep.subr.mxu0 %v45057_v54 }
 0x401   :  { %36895 = vmatprep.mubr.msk.f32.mxu1 %vm39953_vm1, %v45057_v54  ;;  %36903 = vmatprep.subr.mxu1 %v45057_v54 }
 0x402   :  { %36871 = vmatmul.mubr.f32.vlgmr.msra.gmra.mxu0 %v40659_v58  ;;  %36896 = vmatmul.mubr.f32.vlgmr.msra.gmra.mxu1 %v7586_v12  ;;  %v40746_v58 = vsub.f32 %v7970_v55, %v7970_v55 }
 0x403   :  { %36879 = vmatpush3.msra.mxu0 %v40664_v30  ;;  %36904 = vmatpush3.msra.mxu1 %v40664_v30 }
 0x404   :  { %36880 = vmatprep.mubr.msk.f32.mxu0 %vm39953_vm1, %v45057_v54  ;;  %36888 = vmatprep.subr.mxu0 %v45057_v54  ;;  %45118 = vst [vmem:[#allocation8_spill] sm:$0xff] %v40746_v58  ;;  %v40749_v38 = vand.u32 4294901760, %v40746_v58 }
 0x405   :  { %36905 = vmatprep.mubr.msk.f32.mxu1 %vm39953_vm1, %v45057_v54 }
 0x406   :  { %36881 = vmatmul.mubr.f32.vlgmr.msra.gmra.mxu0 %v7588_v14  ;;  %36906 = vmatmul.mubr.f32.vlgmr.msra.gmra.mxu1 %v7584_v56  ;;  %45119 = vst [vmem:[#allocation9_spill] sm:$0xff] %v40749_v38  ;;  %v8051_v7 = vsub.f32 %v40746_v58, %v40749_v38 }
 0x407   :  { %36889 = vmatpush3.msra.mxu0 %v40671_v1  ;;  %36890 = vmatprep.mubr.msk.f32.mxu0 %vm39953_vm1, %v45057_v54 }
 0x408   :  { %36898 = vmatprep.subr.mxu0 %v45057_v54  ;;  %36943 = vmatprep.mubr.msk.f32.mxu1 %vm7968_vm4, %v40740_v6  ;;  %v40753_v30 = vand.u32 4294901760, %v8051_v7 }
 0x40a   :  { %36891 = vmatmul.mubr.f32.vlgmr.msra.gmra.mxu0 %v7585_v57  ;;  %45120 = vst [vmem:[#allocation10_spill] sm:$0xff] %v40753_v30 }
 0x40b   :  { %36899 = vmatpush3.msra.mxu0 %v7627_v5  ;;  %36900 = vmatprep.mubr.msk.f32.mxu0 %vm39953_vm1, %v45057_v54 }
 0x40e   :  { %36901 = vmatmul.mubr.f32.vlgmr.msra.gmra.mxu0 %v7584_v56 }
 0x40f   :  { %36924 = vmatprep.mubr.f32.mxu0 %v40753_v30 }
 0x43c   :  { %v4426_v16 = vpop.f32.mrf.mxu0  ;;  %v4502_v17 = vpop.f32.mrf.mxu1 }
 0x43d   :  { %v4503_v18 = vadd.f32 %v4502_v17, %v4426_v16 }
 0x43e   :  { %v36672_v19 = vpop.f32.mrf.mxu0  ;;  %v36677_v20 = vpop.f32.mrf.mxu1 }
 0x440   :  { %v4576_v11 = vpop.f32.mrf.mxu0 }
 0x441   :  { %v4577_v21 = vadd.f32 %v4576_v11, %v4503_v18  ;;  %v4650_v22 = vpop.f32.mrf.mxu1 }
 0x442   :  { %v36682_v23 = vpop.f32.mrf.mxu0 }
 0x443   :  { %v4651_v24 = vadd.f32 %v4650_v22, %v4577_v21  ;;  %v36687_v25 = vpop.f32.mrf.mxu1 }
 0x444   :  { %v4724_v3 = vpop.f32.mrf.mxu0 }
 0x445   :  { %v4725_v26 = vadd.f32 %v4724_v3, %v4651_v24  ;;  %v4796_v27 = vpop.f32.mrf.mxu1 }
 0x446   :  { %v36692_v28 = vpop.f32.mrf.mxu0 }
 0x447   :  { %v40727_v29 = vadd.f32 %v4796_v27, %v4725_v26  ;;  %v36697_v31 = vpop.f32.mrf.mxu1 }
 0x448   :  { %v4878_v32 = vpop.f32.mrf.mxu0 }
 0x449   :  { %v4954_v34 = vpop.f32.mrf.mxu1 }
 0x44a   :  { %v4955_v35 = vadd.f32 %v4954_v34, %v4878_v32  ;;  %v36702_v36 = vpop.f32.mrf.mxu0 }
 0x44b   :  { %v36707_v37 = vpop.f32.mrf.mxu1 }
 0x44c   :  { %v5028_v41 = vpop.f32.mrf.mxu0 }
 0x44d   :  { %v5029_v42 = vadd.f32 %v5028_v41, %v4955_v35  ;;  %v5102_v43 = vpop.f32.mrf.mxu1 }
 0x44e   :  { %v36712_v44 = vpop.f32.mrf.mxu0 }
 0x44f   :  { %v5103_v45 = vadd.f32 %v5102_v43, %v5029_v42  ;;  %v36717_v15 = vpop.f32.mrf.mxu1 }
 0x450   :  { %v5176_v33 = vpop.f32.mrf.mxu0 }
 0x451   :  { %v5177_v46 = vadd.f32 %v5176_v33, %v5103_v45  ;;  %v5248_v47 = vpop.f32.mrf.mxu1 }
 0x452   :  { %v36722_v48 = vpop.f32.mrf.mxu0 }
 0x453   :  { %v40729_v49 = vadd.f32 %v5248_v47, %v5177_v46  ;;  %v36727_v50 = vpop.f32.mrf.mxu1 }
 0x46d   :  { %v5406_v59 = vpop.f32.mrf.mxu1 }
 0x46f   :  { %v36737_v60 = vpop.f32.mrf.mxu1 }
 0x471   :  { %v5554_v61 = vpop.f32.mrf.mxu1 }
 0x473   :  { %v36747_v62 = vpop.f32.mrf.mxu1 }
 0x475   :  { %v5330_v0 = vpop.f32.mrf.mxu0  ;;  %v5700_v1 = vpop.f32.mrf.mxu1 }
 0x476   :  { %v5407_v2 = vadd.f32 %v5406_v59, %v5330_v0 }
 0x477   :  { %v36732_v4 = vpop.f32.mrf.mxu0  ;;  %v36757_v5 = vpop.f32.mrf.mxu1 }
 0x479   :  { %v5480_v63 = vpop.f32.mrf.mxu0  ;;  %v5858_v8 = vpop.f32.mrf.mxu1 }
 0x47a   :  { %v5481_v56 = vadd.f32 %v5480_v63, %v5407_v2 }
 0x47b   :  { %v36742_v52 = vpop.f32.mrf.mxu0  ;;  %v36767_v9 = vpop.f32.mrf.mxu1 }
 0x47c   :  { %v5555_v57 = vadd.f32 %v5554_v61, %v5481_v56 }
 0x47d   :  { %v5628_v10 = vpop.f32.mrf.mxu0  ;;  %v6006_v12 = vpop.f32.mrf.mxu1 }
 0x47e   :  { %v5629_v13 = vadd.f32 %v5628_v10, %v5555_v57 }
 0x47f   :  { %v36752_v14 = vpop.f32.mrf.mxu0  ;;  %v36777_v16 = vpop.f32.mrf.mxu1 }
 0x480   :  { %v40756_v17 = vadd.f32 %v5700_v1, %v5629_v13 }
 0x481   :  { %v5782_v18 = vpop.f32.mrf.mxu0  ;;  %v6152_v19 = vpop.f32.mrf.mxu1 }
 0x482   :  { %v5859_v20 = vadd.f32 %v5858_v8, %v5782_v18 }
 0x483   :  { %v36762_v11 = vpop.f32.mrf.mxu0  ;;  %v36787_v21 = vpop.f32.mrf.mxu1 }
 0x485   :  { %v5932_v22 = vpop.f32.mrf.mxu0  ;;  %v6310_v23 = vpop.f32.mrf.mxu1 }
 0x486   :  { %v5933_v24 = vadd.f32 %v5932_v22, %v5859_v20 }
 0x487   :  { %v36772_v25 = vpop.f32.mrf.mxu0  ;;  %v36797_v3 = vpop.f32.mrf.mxu1 }
 0x488   :  { %v6007_v26 = vadd.f32 %v6006_v12, %v5933_v24 }
 0x489   :  { %v6080_v27 = vpop.f32.mrf.mxu0  ;;  %v6458_v28 = vpop.f32.mrf.mxu1 }
 0x48a   :  { %v6081_v31 = vadd.f32 %v6080_v27, %v6007_v26 }
 0x48b   :  { %v36782_v32 = vpop.f32.mrf.mxu0  ;;  %v36807_v34 = vpop.f32.mrf.mxu1 }
 0x48c   :  { %v40758_v35 = vadd.f32 %v6152_v19, %v6081_v31  ;;  %v34_v31 = vadd.s32 8, %v40080_v39 }
 0x48d   :  { %v6234_v36 = vpop.f32.mrf.mxu0  ;;  %v6604_v37 = vpop.f32.mrf.mxu1 }
 0x48e   :  { %v6311_v41 = vadd.f32 %v6310_v23, %v6234_v36 }
 0x48f   :  { %v36792_v42 = vpop.f32.mrf.mxu0  ;;  %v36817_v43 = vpop.f32.mrf.mxu1 }
 0x491   :  { %v6384_v44 = vpop.f32.mrf.mxu0 }
 0x492   :  { %v6385_v45 = vadd.f32 %v6384_v44, %v6311_v41  ;;  %v40763_v44 = vmul.u32 4, %v34_v31 }
 0x493   :  { %v36802_v15 = vpop.f32.mrf.mxu0 }
 0x494   :  { %v6459_v33 = vadd.f32 %v6458_v28, %v6385_v45  ;;  %vm40_vm5 = vcmp.eq.s32.totalorder %v40732_v51, %v40763_v44 }
 0x495   :  { %v6532_v46 = vpop.f32.mrf.mxu0 }
 0x496   :  { %v6533_v47 = vadd.f32 %v6532_v46, %v6459_v33 }
 0x497   :  { %v36812_v48 = vpop.f32.mrf.mxu0 }
 0x498   :  { %v40760_v50 = vadd.f32 %v6604_v37, %v6533_v47 }
 0x4a6   :  { %v6762_v55 = vpop.f32.mrf.mxu1 }
 0x4a8   :  { %v36827_v7 = vpop.f32.mrf.mxu1 }
 0x4aa   :  { %v6910_v59 = vpop.f32.mrf.mxu1 }
 0x4ac   :  { %v36837_v60 = vpop.f32.mrf.mxu1 }
 0x4ae   :  { %v6686_v61 = vpop.f32.mrf.mxu0  ;;  %v7056_v62 = vpop.f32.mrf.mxu1 }
 0x4af   :  { %v6763_v14 = vadd.f32 %v6762_v55, %v6686_v61  ;;  %v40772_v61 = vsel %vm40_vm5, 1.0, %v45057_v54 }
 0x4b0   :  { %v36822_v0 = vpop.f32.mrf.mxu0  ;;  %v36847_v1 = vpop.f32.mrf.mxu1  ;;  %45121 = vst [vmem:[#allocation11_spill] sm:$0xff] %v40772_v61 }
 0x4b1   :  { %v40775_v0 = vand.u32 4294901760, %v40760_v50 }
 0x4b2   :  { %v6836_v2 = vpop.f32.mrf.mxu0  ;;  %v7214_v4 = vpop.f32.mrf.mxu1 }
 0x4b3   :  { %v6837_v20 = vadd.f32 %v6836_v2, %v6763_v14  ;;  %v40781_v2 = vand.u32 4294901760, %v40758_v35  ;;  %v40822_v14 = vand.u32 4294901760, %v40727_v29 }
 0x4b4   :  { %v36832_v5 = vpop.f32.mrf.mxu0  ;;  %v36857_v63 = vpop.f32.mrf.mxu1 }
 0x4b5   :  { %v6911_v3 = vadd.f32 %v6910_v59, %v6837_v20  ;;  %v7973_v63 = vsel %vm7968_vm4, %v40772_v61, 0 }
 0x4b6   :  { %v6984_v8 = vpop.f32.mrf.mxu0  ;;  %v7362_v56 = vpop.f32.mrf.mxu1 }
 0x4b7   :  { %v6985_v36 = vadd.f32 %v6984_v8, %v6911_v3  ;;  %v40791_v8 = vand.u32 4294901760, %v40756_v17 }
 0x4b8   :  { %v36842_v52 = vpop.f32.mrf.mxu0  ;;  %v36867_v9 = vpop.f32.mrf.mxu1 }
 0x4b9   :  { %v7057_v15 = vadd.f32 %v7056_v62, %v6985_v36 }
 0x4ba   :  { %v7138_v57 = vpop.f32.mrf.mxu0  ;;  %v7508_v10 = vpop.f32.mrf.mxu1 }
 0x4bb   :  { %v7215_v16 = vadd.f32 %v7214_v4, %v7138_v57  ;;  %v40769_v7 = vand.u32 4294901760, %v7057_v15  ;;  %v40805_v57 = vsub.f32 %v7973_v63, %v7973_v63 }
 0x4bc   :  { %v36852_v12 = vpop.f32.mrf.mxu0  ;;  %v36877_v13 = vpop.f32.mrf.mxu1 }
 0x4bd   :  { %v40784_v4 = vsub.f32 %v7057_v15, %v40769_v7  ;;  %45122 = vst [vmem:[#allocation12_spill] sm:$0xff] %v40805_v57  ;;  %v40812_v12 = vsub.f32 %v40758_v35, %v40781_v2  ;;  %v40839_v20 = vand.u32 4294901760, %v40805_v57  ;;  %v7964_v15 = vld [vmem:[%s45049_s2] sm:$0xff] }
 0x4be   :  { %v7288_v18 = vpop.f32.mrf.mxu0  ;;  %v7666_v19 = vpop.f32.mrf.mxu1 }
 0x4bf   :  { %v7289_v11 = vadd.f32 %v7288_v18, %v7215_v16  ;;  %v40827_v16 = vsub.f32 %v40756_v17, %v40791_v8  ;;  %45123 = vst [vmem:[#allocation13_spill] sm:$0xff] %v40839_v20 }
 0x4c0   :  { %v36862_v21 = vpop.f32.mrf.mxu0  ;;  %v36887_v22 = vpop.f32.mrf.mxu1 }
 0x4c1   :  { %v7363_v23 = vadd.f32 %v7362_v56, %v7289_v11  ;;  %v40795_v56 = vsub.f32 %v40760_v50, %v40775_v0  ;;  %v40815_v50 = vand.u32 4294901760, %v40784_v4  ;;  %v40846_v11 = vand.u32 4294901760, %v40812_v12 }
 0x4c2   :  { %v7436_v24 = vpop.f32.mrf.mxu0  ;;  %v7814_v25 = vpop.f32.mrf.mxu1 }
 0x4c3   :  { %v7437_v28 = vadd.f32 %v7436_v24, %v7363_v23  ;;  %v40830_v35 = vand.u32 4294901760, %v40795_v56  ;;  %v8102_v22 = vsub.f32 %v40784_v4, %v40815_v50  ;;  %v40856_v23 = vsub.f32 %v40727_v29, %v40822_v14 }
 0x4c4   :  { %v36872_v26 = vpop.f32.mrf.mxu0  ;;  %v36897_v27 = vpop.f32.mrf.mxu1  ;;  %v40859_v24 = vand.u32 4294901760, %v40827_v16  ;;  %v8061_v29 = vsub.f32 %v40805_v57, %v40839_v20 }
 0x4c5   :  { %v7509_v42 = vadd.f32 %v7508_v10, %v7437_v28  ;;  %v40808_v10 = vand.u32 4294901760, %v40729_v49  ;;  %v40876_v26 = vand.u32 4294901760, %v8102_v22  ;;  %v8116_v27 = vsub.f32 %v40812_v12, %v40846_v11 }
 0x4c6   :  { %v7590_v32 = vpop.f32.mrf.mxu0  ;;  %v7960_v34 = vpop.f32.mrf.mxu1  ;;  %v40883_v28 = vand.u32 4294901760, %v40856_v23 }
 0x4c7   :  { %v7667_v43 = vadd.f32 %v7666_v19, %v7590_v32  ;;  %v40765_v47 = vand.u32 4294901760, %v7509_v42  ;;  %v40843_v17 = vsub.f32 %v40729_v49, %v40808_v10  ;;  %v8123_v32 = vsub.f32 %v40827_v16, %v40859_v24 }
 0x4c8   :  { %v36882_v37 = vpop.f32.mrf.mxu0  ;;  %v36907_v41 = vpop.f32.mrf.mxu1  ;;  %v40897_v36 = vand.u32 4294901760, %v8116_v27 }
 0x4c9   :  { %v40778_v62 = vsub.f32 %v7509_v42, %v40765_v47  ;;  %v40872_v3 = vand.u32 4294901760, %v40843_v17  ;;  %v40905_v41 = vand.u32 4294901760, %v8123_v32  ;;  %v8137_v42 = vsub.f32 %v40856_v23, %v40883_v28 }
 0x4ca   :  { %v7740_v45 = vpop.f32.mrf.mxu0 }
 0x4cb   :  { %v7741_v33 = vadd.f32 %v7740_v45, %v7667_v43  ;;  %v40798_v52 = vand.u32 4294901760, %v40778_v62  ;;  %v8130_v37 = vsub.f32 %v40843_v17, %v40872_v3  ;;  %v40919_v45 = vand.u32 4294901760, %v8137_v42 }
 0x4cc   :  { %v36892_v46 = vpop.f32.mrf.mxu0 }
 0x4cd   :  { %v7815_v48 = vadd.f32 %v7814_v25, %v7741_v33  ;;  %v8095_v19 = vsub.f32 %v40778_v62, %v40798_v52  ;;  %v8109_v25 = vsub.f32 %v40795_v56, %v40830_v35  ;;  %v40913_v43 = vand.u32 4294901760, %v8130_v37 }
 0x4ce   :  { %v7888_v55 = vpop.f32.mrf.mxu0  ;;  %v8592_v33 = vand.u32 4294901760, %v7964_v15 }
 0x4cf   :  { %v7889_v59 = vadd.f32 %v7888_v55, %v7815_v48  ;;  %v40863_v49 = vand.u32 4294901760, %v8095_v19  ;;  %v40887_v31 = vand.u32 4294901760, %v8109_v25 }
 0x4d0   :  { %v36902_v60 = vpop.f32.mrf.mxu0  ;;  %v8679_v46 = vsub.f32 %v7964_v15, %v8592_v33 }
 0x4d1   :  { %v7961_v1 = vadd.f32 %v7960_v34, %v7889_v59  ;;  %v40893_v34 = vand.u32 4294901760, %v8061_v29 }
 0x4d2   :  { %v41001_v48 = vand.u32 4294901760, %v8679_v46 }
 0x4d3   :  { %v40786_v5 = vand.u32 4294901760, %v7961_v1  ;;  %45124 = vst [vmem:[#allocation14_spill] sm:$0xff] %v40893_v34 }
 0x4d4   :  { %v8681_v55 = vsub.f32 %v8679_v46, %v41001_v48 }
 0x4d5   :  { %v40801_v9 = vsub.f32 %v7961_v1, %v40786_v5  ;;  %36908 = vmatprep.subr.mxu0 %v40786_v5 }
 0x4d6   :  { %36909 = vmatpush3.msra.mxu0 %v40786_v5  ;;  %v8682_v59 = vand.u32 4294901760, %v8681_v55 }
 0x4d7   :  { %v40818_v13 = vand.u32 4294901760, %v40801_v9  ;;  %36910 = vmatprep.subr.mxu0 %v40765_v47 }
 0x4d8   :  { %36911 = vmatpush3.msra.mxu0 %v40765_v47 }
 0x4d9   :  { %36912 = vmatprep.subr.mxu0 %v40769_v7  ;;  %v8088_v18 = vsub.f32 %v40801_v9, %v40818_v13 }
 0x4da   :  { %36913 = vmatpush3.msra.mxu0 %v40769_v7 }
 0x4db   :  { %36914 = vmatprep.subr.mxu0 %v40775_v0  ;;  %v40849_v21 = vand.u32 4294901760, %v8088_v18 }
 0x4dc   :  { %36915 = vmatpush3.msra.mxu0 %v40775_v0 }
 0x4dd   :  { %36916 = vmatprep.subr.mxu0 %v40781_v2  ;;  %36927 = vmatprep.subr.mxu1 %v40849_v21 }
 0x4de   :  { %36917 = vmatpush3.msra.mxu0 %v40781_v2  ;;  %36928 = vmatpush3.msra.mxu1 %v40849_v21 }
 0x4df   :  { %36918 = vmatprep.subr.mxu0 %v40791_v8  ;;  %36929 = vmatprep.subr.mxu1 %v40863_v49 }
 0x4e0   :  { %36919 = vmatpush3.msra.mxu0 %v40791_v8  ;;  %36930 = vmatpush3.msra.mxu1 %v40863_v49 }
 0x4e1   :  { %36920 = vmatprep.subr.mxu0 %v40808_v10  ;;  %36931 = vmatprep.subr.mxu1 %v40876_v26 }
 0x4e2   :  { %36921 = vmatpush3.msra.mxu0 %v40808_v10  ;;  %36932 = vmatpush3.msra.mxu1 %v40876_v26 }
 0x4e3   :  { %36922 = vmatprep.subr.mxu0 %v40822_v14  ;;  %36933 = vmatprep.subr.mxu1 %v40887_v31 }
 0x4e4   :  { %36923 = vmatpush3.msra.mxu0 %v40822_v14  ;;  %36934 = vmatpush3.msra.mxu1 %v40887_v31 }
 0x4e5   :  { %36935 = vmatprep.subr.mxu1 %v40897_v36  ;;  %36946 = vmatprep.subr.mxu0 %v40801_v9 }
 0x4e6   :  { %36925 = vmatmul.mubr.f32.vlgmr.msra.gmra.mxu0 %v40893_v34  ;;  %36936 = vmatpush3.msra.mxu1 %v40897_v36 }
 0x4e7   :  { %36947 = vmatpush3.msra.mxu0 %v40801_v9  ;;  %36937 = vmatprep.subr.mxu1 %v40905_v41 }
 0x4e8   :  { %36948 = vmatprep.subr.mxu0 %v40778_v62  ;;  %36938 = vmatpush3.msra.mxu1 %v40905_v41 }
 0x4e9   :  { %36949 = vmatpush3.msra.mxu0 %v40778_v62  ;;  %36939 = vmatprep.subr.mxu1 %v40913_v43 }
 0x4ea   :  { %36950 = vmatprep.subr.mxu0 %v40784_v4  ;;  %36940 = vmatpush3.msra.mxu1 %v40913_v43 }
 0x4eb   :  { %36951 = vmatpush3.msra.mxu0 %v40784_v4  ;;  %36941 = vmatprep.subr.mxu1 %v40919_v45 }
 0x4ec   :  { %36952 = vmatprep.subr.mxu0 %v40795_v56  ;;  %36942 = vmatpush3.msra.mxu1 %v40919_v45 }
 0x4ed   :  { %36953 = vmatpush3.msra.mxu0 %v40795_v56  ;;  %36944 = vmatmul.mubr.msk.f32.vlgmr.msra.gmra.mxu1 %vm7968_vm4, %v40772_v61 }
 0x4ee   :  { %36954 = vmatprep.subr.mxu0 %v40812_v12  ;;  %36965 = vmatprep.subr.mxu1 %v40786_v5 }
 0x4ef   :  { %36955 = vmatpush3.msra.mxu0 %v40812_v12  ;;  %36966 = vmatpush3.msra.mxu1 %v40786_v5 }
 0x4f0   :  { %36956 = vmatprep.subr.mxu0 %v40827_v16  ;;  %36967 = vmatprep.subr.mxu1 %v40765_v47 }
 0x4f1   :  { %36957 = vmatpush3.msra.mxu0 %v40827_v16  ;;  %36968 = vmatpush3.msra.mxu1 %v40765_v47 }
 0x4f2   :  { %36958 = vmatprep.subr.mxu0 %v40843_v17  ;;  %36969 = vmatprep.subr.mxu1 %v40769_v7 }
 0x4f3   :  { %36959 = vmatpush3.msra.mxu0 %v40843_v17  ;;  %36970 = vmatpush3.msra.mxu1 %v40769_v7 }
 0x4f4   :  { %36960 = vmatprep.subr.mxu0 %v40856_v23  ;;  %36971 = vmatprep.subr.mxu1 %v40775_v0 }
 0x4f5   :  { %36961 = vmatpush3.msra.mxu0 %v40856_v23  ;;  %36962 = vmatprep.mubr.f32.mxu0 %v40746_v58 }
 0x4f6   :  { %36972 = vmatpush3.msra.mxu1 %v40775_v0  ;;  %36963 = vmatmul.mubr.f32.vlgmr.msra.gmra.mxu0 %v40805_v57 }
 0x4f7   :  { %36973 = vmatprep.subr.mxu1 %v40781_v2  ;;  %36984 = vmatprep.subr.mxu0 %v40818_v13 }
 0x4f8   :  { %36974 = vmatpush3.msra.mxu1 %v40781_v2  ;;  %36985 = vmatpush3.msra.mxu0 %v40818_v13 }
 0x4f9   :  { %36975 = vmatprep.subr.mxu1 %v40791_v8  ;;  %36986 = vmatprep.subr.mxu0 %v40798_v52 }
 0x4fa   :  { %36976 = vmatpush3.msra.mxu1 %v40791_v8  ;;  %36987 = vmatpush3.msra.mxu0 %v40798_v52 }
 0x4fb   :  { %36977 = vmatprep.subr.mxu1 %v40808_v10  ;;  %36988 = vmatprep.subr.mxu0 %v40815_v50 }
 0x4fc   :  { %36978 = vmatpush3.msra.mxu1 %v40808_v10  ;;  %36989 = vmatpush3.msra.mxu0 %v40815_v50 }
 0x4fd   :  { %36979 = vmatprep.subr.mxu1 %v40822_v14  ;;  %36990 = vmatprep.subr.mxu0 %v40830_v35 }
 0x4fe   :  { %36980 = vmatpush3.msra.mxu1 %v40822_v14  ;;  %36981 = vmatprep.mubr.f32.mxu1 %v40749_v38 }
 0x4ff   :  { %36991 = vmatpush3.msra.mxu0 %v40830_v35  ;;  %36982 = vmatmul.mubr.f32.vlgmr.msra.gmra.mxu1 %v40839_v20 }
 0x500   :  { %36992 = vmatprep.subr.mxu0 %v40846_v11  ;;  %37003 = vmatprep.subr.mxu1 %v40786_v5 }
 0x501   :  { %36993 = vmatpush3.msra.mxu0 %v40846_v11  ;;  %37004 = vmatpush3.msra.mxu1 %v40786_v5 }
 0x502   :  { %36994 = vmatprep.subr.mxu0 %v40859_v24  ;;  %37005 = vmatprep.subr.mxu1 %v40765_v47 }
 0x503   :  { %36995 = vmatpush3.msra.mxu0 %v40859_v24  ;;  %37006 = vmatpush3.msra.mxu1 %v40765_v47 }
 0x504   :  { %36996 = vmatprep.subr.mxu0 %v40872_v3  ;;  %37007 = vmatprep.subr.mxu1 %v40769_v7 }
 0x505   :  { %36997 = vmatpush3.msra.mxu0 %v40872_v3  ;;  %37008 = vmatpush3.msra.mxu1 %v40769_v7 }
 0x506   :  { %36998 = vmatprep.subr.mxu0 %v40883_v28  ;;  %37009 = vmatprep.subr.mxu1 %v40775_v0 }
 0x507   :  { %36999 = vmatpush3.msra.mxu0 %v40883_v28  ;;  %37000 = vmatprep.mubr.msk.f32.mxu0 %vm7968_vm4, %v40740_v6 }
 0x508   :  { %37010 = vmatpush3.msra.mxu1 %v40775_v0  ;;  %37001 = vmatmul.mubr.msk.f32.vlgmr.msra.gmra.mxu0 %vm7968_vm4, %v40772_v61 }
 0x509   :  { %37011 = vmatprep.subr.mxu1 %v40781_v2  ;;  %37019 = vmatprep.mubr.msk.f32.mxu1 %vm7968_vm4, %v40740_v6 }
 0x50a   :  { %37012 = vmatpush3.msra.mxu1 %v40781_v2  ;;  %37022 = vmatprep.subr.mxu0 %v8592_v33 }
 0x50b   :  { %37013 = vmatprep.subr.mxu1 %v40791_v8  ;;  %37023 = vmatpush3.msra.mxu0 %v8592_v33 }
 0x50c   :  { %37014 = vmatpush3.msra.mxu1 %v40791_v8  ;;  %37032 = vmatprep.subr.mxu0 %v8679_v46 }
 0x50d   :  { %37015 = vmatprep.subr.mxu1 %v40808_v10 }
 0x50e   :  { %37016 = vmatpush3.msra.mxu1 %v40808_v10 }
 0x50f   :  { %37017 = vmatprep.subr.mxu1 %v40822_v14 }
 0x510   :  { %37018 = vmatpush3.msra.mxu1 %v40822_v14 }
 0x511   :  { %37020 = vmatmul.mubr.msk.f32.vlgmr.msra.gmra.mxu1 %vm7968_vm4, %v40772_v61  ;;  %37027 = vmatprep.subr.mxu1 %v8682_v59 }
 0x512   :  { %37028 = vmatpush3.msra.mxu1 %v8682_v59 }
 0x513   :  { %37037 = vmatprep.subr.mxu1 %v8592_v33 }
 0x5a6   :  { %v36926_v60 = vpop.f32.mrf.mxu0 }
 0x5a8   :  { %v8054_v1 = vpop.f32.mrf.mxu0 }
 0x5ad   :  { %v36945_v63 = vpop.f32.mrf.mxu1 }
 0x5ae   :  { %v8182_v29 = vadd.f32 %v36945_v63, %v36926_v60 }
 0x5af   :  { %v8175_v19 = vpop.f32.mrf.mxu1 }
 0x5b0   :  { %v8176_v32 = vadd.f32 %v8175_v19, %v8054_v1 }
 0x5b6   :  { %v36964_v18 = vpop.f32.mrf.mxu0 }
 0x5b7   :  { %v8277_v37 = vadd.f32 %v36964_v18, %v8182_v29 }
 0x5b8   :  { %v8269_v22 = vpop.f32.mrf.mxu0 }
 0x5b9   :  { %v8270_v15 = vadd.f32 %v8269_v22, %v8176_v32 }
 0x5bf   :  { %v36983_v25 = vpop.f32.mrf.mxu1 }
 0x5c0   :  { %v8366_v40 = vadd.f32 %v36983_v25, %v8277_v37 }
 0x5c1   :  { %v8357_v42 = vpop.f32.mrf.mxu1 }
 0x5c2   :  { %v8358_v20 = vadd.f32 %v8357_v42, %v8270_v15  ;;  %v7965_v42 = vld [vmem:[%s45049_s2 + $0x8] sm:$0xff] }
 0x5c3   :  { %v41157_v15 = vand.u32 4294901760, %v7965_v42 }
 0x5c8   :  { %v37002_v27 = vpop.f32.mrf.mxu0 }
 0x5c9   :  { %v8467_v55 = vadd.f32 %v37002_v27, %v8366_v40 }
 0x5ca   :  { %v8460_v54 = vpop.f32.mrf.mxu0 }
 0x5cb   :  { %v8461_v59 = vadd.f32 %v8460_v54, %v8358_v20 }
 0x5d1   :  { %v37021_v38 = vpop.f32.mrf.mxu1 }
 0x5d2   :  { %v8552_v57 = vadd.f32 %v37021_v38, %v8467_v55  ;;  %v43_v38 = vadd.s32 1, %v40735_v53  ;;  %v41160_v55 = vsub.f32 %v7965_v42, %v41157_v15 }
 0x5d3   :  { %v8545_v58 = vpop.f32.mrf.mxu1 }
 0x5d4   :  { %v8559_v61 = vsel %vm632_vm2, %v8552_v57, 0  ;;  %v8546_v34 = vadd.f32 %v8545_v58, %v8461_v59  ;;  %v44_v58 = vadd.s32 1, %v40763_v44  ;;  %vm45_vm6 = vcmp.eq.s32.totalorder %v40732_v51, %v43_v38 }
 0x5d5   :  { %v8637_v30 = vand.u32 4294901760, %v8559_v61  ;;  %v41165_v59 = vand.u32 4294901760, %v41160_v55 }
 0x5d6   :  { %v8556_v6 = vsel %vm632_vm2, %v8546_v34, 0  ;;  %vm46_vm7 = vcmp.eq.s32.totalorder %v40732_v51, %v44_v58 }
 0x5d7   :  { %v8638_v60 = vsub.f32 %v8559_v61, %v8637_v30  ;;  %v8627_v63 = vand.u32 4294901760, %v8556_v6  ;;  %v45125_v61 = vmov 0.0  }
 0x5d8   :  { %v41014_v20 = vsel %vm45_vm6, 1.0, %v45125_v61  ;;  %v41019_v34 = vsel %vm46_vm7, 1.0, %v45125_v61 }
 0x5d9   :  { %v8628_v1 = vsub.f32 %v8556_v6, %v8627_v63  ;;  %37029 = vmatprep.mubr.f32.mxu1 %v8627_v63  ;;  %v8639_v18 = vand.u32 4294901760, %v8638_v60  ;;  %45126 = vst [vmem:[#allocation15_spill] sm:$0xff] %v41014_v20  ;;  %45127 = vst [vmem:[#allocation16_spill] sm:$0xff] %v41019_v34 }
 0x5da   :  { %37030 = vmatmul.mubr.f32.vlgmr.msra.gmra.mxu1 %v8637_v30 }
 0x5db   :  { %37038 = vmatpush3.msra.mxu1 %v8592_v33  ;;  %v8629_v19 = vand.u32 4294901760, %v8628_v1  ;;  %v8640_v40 = vsub.f32 %v8638_v60, %v8639_v18 }
 0x5dc   :  { %37047 = vmatprep.subr.mxu1 %v8592_v33 }
 0x5dd   :  { %37039 = vmatprep.mubr.f32.mxu1 %v8629_v19  ;;  %v8630_v54 = vsub.f32 %v8628_v1, %v8629_v19  ;;  %v8641_v6 = vand.u32 4294901760, %v8640_v40 }
 0x5de   :  { %37040 = vmatmul.mubr.f32.vlgmr.msra.gmra.mxu1 %v8639_v18 }
 0x5df   :  { %37048 = vmatpush3.msra.mxu1 %v8592_v33  ;;  %37049 = vmatprep.mubr.f32.mxu1 %v8627_v63  ;;  %v8631_v57 = vand.u32 4294901760, %v8630_v54  ;;  %v9057_v33 = vsel %vm7968_vm4, %v41014_v20, 0 }
 0x5e0   :  { %37071 = vmatprep.subr.mxu1 %v40849_v21 }
 0x5e1   :  { %37024 = vmatprep.mubr.f32.mxu0 %v8631_v57 }
 0x5e2   :  { %37025 = vmatmul.mubr.f32.vlgmr.msra.gmra.mxu0 %v8641_v6  ;;  %37050 = vmatmul.mubr.f32.vlgmr.msra.gmra.mxu1 %v8637_v30 }
 0x5e3   :  { %37072 = vmatpush3.msra.mxu1 %v40849_v21  ;;  %37033 = vmatpush3.msra.mxu0 %v8679_v46  ;;  %v9060_v46 = vsel %vm7968_vm4, %v41019_v34, 0 }
 0x5e4   :  { %37034 = vmatprep.mubr.f32.mxu0 %v8628_v1  ;;  %37073 = vmatprep.subr.mxu1 %v40863_v49  ;;  %v41037_v22 = vsub.f32 %v9060_v46, %v9060_v46 }
 0x5e5   :  { %37074 = vmatpush3.msra.mxu1 %v40863_v49  ;;  %37042 = vmatprep.subr.mxu0 %v41001_v48 }
 0x5e6   :  { %37075 = vmatprep.subr.mxu1 %v40876_v26  ;;  %37035 = vmatmul.mubr.f32.vlgmr.msra.gmra.mxu0 %v8638_v60  ;;  %45129 = vst [vmem:[#allocation18_spill] sm:$0xff] %v41037_v22  ;;  %v41051_v25 = vand.u32 4294901760, %v41037_v22  ;;  %v9768_v60 = vsub.f32 %v41160_v55, %v41165_v59 }
 0x5e7   :  { %37043 = vmatpush3.msra.mxu0 %v41001_v48  ;;  %37076 = vmatpush3.msra.mxu1 %v40876_v26  ;;  %v41033_v48 = vsub.f32 %v9057_v33, %v9057_v33 }
 0x5e8   :  { %37044 = vmatprep.mubr.f32.mxu0 %v8627_v63  ;;  %37052 = vmatprep.subr.mxu0 %v40786_v5  ;;  %45131 = vst [vmem:[#allocation20_spill] sm:$0xff] %v41051_v25  ;;  %v9148_v27 = vsub.f32 %v41037_v22, %v41051_v25  ;;  %v9769_v63 = vand.u32 4294901760, %v9768_v60 }
 0x5e9   :  { %37077 = vmatprep.subr.mxu1 %v40887_v31  ;;  %37087 = vmatprep.mubr.msk.f32.mxu1 %vm7968_vm4, %v41014_v20  ;;  %45128 = vst [vmem:[#allocation17_spill] sm:$0xff] %v41033_v48 }
 0x5ea   :  { %37078 = vmatpush3.msra.mxu1 %v40887_v31  ;;  %37045 = vmatmul.mubr.f32.vlgmr.msra.gmra.mxu0 %v8637_v30  ;;  %v41046_v30 = vand.u32 4294901760, %v41033_v48  ;;  %v41076_v37 = vand.u32 4294901760, %v9148_v27 }
 0x5eb   :  { %37079 = vmatprep.subr.mxu1 %v40897_v36  ;;  %37053 = vmatpush3.msra.mxu0 %v40786_v5 }
 0x5ec   :  { %37080 = vmatpush3.msra.mxu1 %v40897_v36  ;;  %37054 = vmatprep.subr.mxu0 %v40765_v47  ;;  %45130 = vst [vmem:[#allocation19_spill] sm:$0xff] %v41046_v30  ;;  %v9138_v29 = vsub.f32 %v41033_v48, %v41046_v30  ;;  %45133 = vst [vmem:[#allocation22_spill] sm:$0xff] %v41076_v37 }
 0x5ed   :  { %37081 = vmatprep.subr.mxu1 %v40905_v41  ;;  %37055 = vmatpush3.msra.mxu0 %v40765_v47 }
 0x5ee   :  { %37082 = vmatpush3.msra.mxu1 %v40905_v41  ;;  %37056 = vmatprep.subr.mxu0 %v40769_v7  ;;  %v41072_v32 = vand.u32 4294901760, %v9138_v29 }
 0x5ef   :  { %37083 = vmatprep.subr.mxu1 %v40913_v43  ;;  %37057 = vmatpush3.msra.mxu0 %v40769_v7 }
 0x5f0   :  { %37084 = vmatpush3.msra.mxu1 %v40913_v43  ;;  %37058 = vmatprep.subr.mxu0 %v40775_v0  ;;  %45132 = vst [vmem:[#allocation21_spill] sm:$0xff] %v41072_v32 }
 0x5f1   :  { %37085 = vmatprep.subr.mxu1 %v40919_v45  ;;  %37059 = vmatpush3.msra.mxu0 %v40775_v0 }
 0x5f2   :  { %37086 = vmatpush3.msra.mxu1 %v40919_v45  ;;  %37060 = vmatprep.subr.mxu0 %v40781_v2 }
 0x5f3   :  { %37109 = vmatprep.subr.mxu1 %v40786_v5  ;;  %37061 = vmatpush3.msra.mxu0 %v40781_v2 }
 0x5f4   :  { %37088 = vmatmul.mubr.msk.f32.vlgmr.msra.gmra.mxu1 %vm7968_vm4, %v41019_v34  ;;  %37062 = vmatprep.subr.mxu0 %v40791_v8 }
 0x5f5   :  { %37110 = vmatpush3.msra.mxu1 %v40786_v5  ;;  %37063 = vmatpush3.msra.mxu0 %v40791_v8 }
 0x5f6   :  { %37111 = vmatprep.subr.mxu1 %v40765_v47  ;;  %37064 = vmatprep.subr.mxu0 %v40808_v10 }
 0x5f7   :  { %37112 = vmatpush3.msra.mxu1 %v40765_v47  ;;  %37065 = vmatpush3.msra.mxu0 %v40808_v10 }
 0x5f8   :  { %37113 = vmatprep.subr.mxu1 %v40769_v7  ;;  %37066 = vmatprep.subr.mxu0 %v40822_v14 }
 0x5f9   :  { %37114 = vmatpush3.msra.mxu1 %v40769_v7  ;;  %37067 = vmatpush3.msra.mxu0 %v40822_v14 }
 0x5fa   :  { %37115 = vmatprep.subr.mxu1 %v40775_v0  ;;  %37068 = vmatprep.mubr.f32.mxu0 %v41072_v32 }
 0x5fb   :  { %37116 = vmatpush3.msra.mxu1 %v40775_v0  ;;  %37069 = vmatmul.mubr.f32.vlgmr.msra.gmra.mxu0 %v41076_v37 }
 0x5fc   :  { %37090 = vmatprep.subr.mxu0 %v40801_v9  ;;  %37117 = vmatprep.subr.mxu1 %v40781_v2 }
 0x5fd   :  { %37091 = vmatpush3.msra.mxu0 %v40801_v9  ;;  %37118 = vmatpush3.msra.mxu1 %v40781_v2 }
 0x5fe   :  { %37092 = vmatprep.subr.mxu0 %v40778_v62  ;;  %37119 = vmatprep.subr.mxu1 %v40791_v8 }
 0x5ff   :  { %37093 = vmatpush3.msra.mxu0 %v40778_v62  ;;  %37120 = vmatpush3.msra.mxu1 %v40791_v8 }
 0x600   :  { %37094 = vmatprep.subr.mxu0 %v40784_v4  ;;  %37121 = vmatprep.subr.mxu1 %v40808_v10 }
 0x601   :  { %37095 = vmatpush3.msra.mxu0 %v40784_v4  ;;  %37122 = vmatpush3.msra.mxu1 %v40808_v10 }
 0x602   :  { %37096 = vmatprep.subr.mxu0 %v40795_v56  ;;  %37123 = vmatprep.subr.mxu1 %v40822_v14 }
 0x603   :  { %37097 = vmatpush3.msra.mxu0 %v40795_v56  ;;  %37124 = vmatpush3.msra.mxu1 %v40822_v14 }
 0x604   :  { %37098 = vmatprep.subr.mxu0 %v40812_v12  ;;  %37125 = vmatprep.mubr.f32.mxu1 %v41046_v30 }
 0x605   :  { %37147 = vmatprep.subr.mxu1 %v40786_v5  ;;  %37099 = vmatpush3.msra.mxu0 %v40812_v12 }
 0x606   :  { %37126 = vmatmul.mubr.f32.vlgmr.msra.gmra.mxu1 %v41051_v25  ;;  %37100 = vmatprep.subr.mxu0 %v40827_v16 }
 0x607   :  { %37148 = vmatpush3.msra.mxu1 %v40786_v5  ;;  %37101 = vmatpush3.msra.mxu0 %v40827_v16 }
 0x608   :  { %37149 = vmatprep.subr.mxu1 %v40765_v47  ;;  %37102 = vmatprep.subr.mxu0 %v40843_v17 }
 0x609   :  { %37150 = vmatpush3.msra.mxu1 %v40765_v47  ;;  %37103 = vmatpush3.msra.mxu0 %v40843_v17 }
 0x60a   :  { %37151 = vmatprep.subr.mxu1 %v40769_v7  ;;  %37104 = vmatprep.subr.mxu0 %v40856_v23 }
 0x60b   :  { %37152 = vmatpush3.msra.mxu1 %v40769_v7  ;;  %37105 = vmatpush3.msra.mxu0 %v40856_v23 }
 0x60c   :  { %37153 = vmatprep.subr.mxu1 %v40775_v0  ;;  %37106 = vmatprep.mubr.f32.mxu0 %v41033_v48 }
 0x60d   :  { %37154 = vmatpush3.msra.mxu1 %v40775_v0  ;;  %37107 = vmatmul.mubr.f32.vlgmr.msra.gmra.mxu0 %v41037_v22 }
 0x60e   :  { %37128 = vmatprep.subr.mxu0 %v40818_v13  ;;  %37155 = vmatprep.subr.mxu1 %v40781_v2 }
 0x60f   :  { %37129 = vmatpush3.msra.mxu0 %v40818_v13  ;;  %37156 = vmatpush3.msra.mxu1 %v40781_v2 }
 0x610   :  { %37130 = vmatprep.subr.mxu0 %v40798_v52  ;;  %37157 = vmatprep.subr.mxu1 %v40791_v8 }
 0x611   :  { %37131 = vmatpush3.msra.mxu0 %v40798_v52  ;;  %37158 = vmatpush3.msra.mxu1 %v40791_v8 }
 0x612   :  { %37132 = vmatprep.subr.mxu0 %v40815_v50  ;;  %37159 = vmatprep.subr.mxu1 %v40808_v10 }
 0x613   :  { %37133 = vmatpush3.msra.mxu0 %v40815_v50  ;;  %37160 = vmatpush3.msra.mxu1 %v40808_v10 }
 0x614   :  { %37134 = vmatprep.subr.mxu0 %v40830_v35  ;;  %37161 = vmatprep.subr.mxu1 %v40822_v14 }
 0x615   :  { %37135 = vmatpush3.msra.mxu0 %v40830_v35  ;;  %37162 = vmatpush3.msra.mxu1 %v40822_v14 }
 0x616   :  { %37136 = vmatprep.subr.mxu0 %v40846_v11  ;;  %37144 = vmatprep.mubr.msk.f32.mxu0 %vm7968_vm4, %v41014_v20 }
 0x617   :  { %37137 = vmatpush3.msra.mxu0 %v40846_v11  ;;  %37163 = vmatprep.mubr.msk.f32.mxu1 %vm7968_vm4, %v41014_v20 }
 0x618   :  { %37138 = vmatprep.subr.mxu0 %v40859_v24  ;;  %37164 = vmatmul.mubr.msk.f32.vlgmr.msra.gmra.mxu1 %vm7968_vm4, %v41019_v34 }
 0x619   :  { %37139 = vmatpush3.msra.mxu0 %v40859_v24  ;;  %37171 = vmatprep.subr.mxu1 %v9769_v63 }
 0x61a   :  { %37140 = vmatprep.subr.mxu0 %v40872_v3  ;;  %37172 = vmatpush3.msra.mxu1 %v9769_v63 }
 0x61b   :  { %37141 = vmatpush3.msra.mxu0 %v40872_v3  ;;  %37181 = vmatprep.subr.mxu1 %v41157_v15 }
 0x61c   :  { %37142 = vmatprep.subr.mxu0 %v40883_v28 }
 0x61d   :  { %37143 = vmatpush3.msra.mxu0 %v40883_v28 }
 0x61e   :  { %37145 = vmatmul.mubr.msk.f32.vlgmr.msra.gmra.mxu0 %vm7968_vm4, %v41019_v34  ;;  %37166 = vmatprep.subr.mxu0 %v41157_v15 }
 0x61f   :  { %37167 = vmatpush3.msra.mxu0 %v41157_v15 }
 0x620   :  { %37176 = vmatprep.subr.mxu0 %v41160_v55 }
 0x69a   :  { %v37031_v1 = vpop.f32.mrf.mxu1 }
 0x69c   :  { %v41171_v18 = vpop.f32.mrf.mxu1 }
 0x69d   :  { %45134 = vst [vmem:[#allocation23_spill] sm:$0xff] %v41171_v18 }
 0x69e   :  { %v37041_v54 = vpop.f32.mrf.mxu1 }
 0x6a0   :  { %v41175_v6 = vpop.f32.mrf.mxu1 }
 0x6a1   :  { %45136 = vst [vmem:[#allocation25_spill] sm:$0xff] %v41175_v6 }
 0x6a2   :  { %v37026_v19 = vpop.f32.mrf.mxu0  ;;  %v37051_v42 = vpop.f32.mrf.mxu1 }
 0x6a3   :  { %v8726_v40 = vadd.f32 %v37031_v1, %v37026_v19 }
 0x6a4   :  { %v41173_v38 = vpop.f32.mrf.mxu0  ;;  %v41183_v48 = vpop.f32.mrf.mxu1 }
 0x6a5   :  { %45135 = vst [vmem:[#allocation24_spill] sm:$0xff] %v41173_v38  ;;  %45140 = vst [vmem:[#allocation29_spill] sm:$0xff] %v41183_v48 }
 0x6a6   :  { %v37036_v58 = vpop.f32.mrf.mxu0 }
 0x6a7   :  { %v8807_v57 = vadd.f32 %v37036_v58, %v8726_v40 }
 0x6a8   :  { %v41177_v33 = vpop.f32.mrf.mxu0 }
 0x6a9   :  { %45137 = vst [vmem:[#allocation26_spill] sm:$0xff] %v41177_v33  ;;  %v8889_v46 = vadd.f32 %v37041_v54, %v8807_v57 }
 0x6aa   :  { %v37046_v29 = vpop.f32.mrf.mxu0 }
 0x6ab   :  { %v8969_v27 = vadd.f32 %v37046_v29, %v8889_v46 }
 0x6ac   :  { %v41181_v63 = vpop.f32.mrf.mxu0 }
 0x6ad   :  { %v41179_v60 = vadd.f32 %v37051_v42, %v8969_v27  ;;  %45139 = vst [vmem:[#allocation28_spill] sm:$0xff] %v41181_v63 }
 0x6af   :  { %45138 = vst [vmem:[#allocation27_spill] sm:$0xff] %v41179_v60 }
 0x6b4   :  { %v37089_v1 = vpop.f32.mrf.mxu1 }
 0x6b6   :  { %v9262_v30 = vpop.f32.mrf.mxu1 }
 0x6bb   :  { %v37070_v22 = vpop.f32.mrf.mxu0 }
 0x6bc   :  { %v9269_v40 = vadd.f32 %v37089_v1, %v37070_v22 }
 0x6bd   :  { %v9141_v19 = vpop.f32.mrf.mxu0 }
 0x6be   :  { %v9263_v32 = vadd.f32 %v9262_v30, %v9141_v19 }
 0x6c6   :  { %v37127_v58 = vpop.f32.mrf.mxu1 }
 0x6c8   :  { %v9444_v57 = vpop.f32.mrf.mxu1 }
 0x6cd   :  { %v37108_v25 = vpop.f32.mrf.mxu0 }
 0x6ce   :  { %v9364_v34 = vadd.f32 %v37108_v25, %v9269_v40 }
 0x6cf   :  { %v9356_v37 = vpop.f32.mrf.mxu0 }
 0x6d0   :  { %v9357_v54 = vadd.f32 %v9356_v37, %v9263_v32  ;;  %v9453_v46 = vadd.f32 %v37127_v58, %v9364_v34 }
 0x6d2   :  { %v9445_v42 = vadd.f32 %v9444_v57, %v9357_v54 }
 0x6d8   :  { %v37165_v27 = vpop.f32.mrf.mxu1 }
 0x6da   :  { %v9632_v48 = vpop.f32.mrf.mxu1 }
 0x6de   :  { %v37146_v29 = vpop.f32.mrf.mxu0 }
 0x6df   :  { %v9554_v20 = vadd.f32 %v37146_v29, %v9453_v46  ;;  %v7966_v29 = vld [vmem:[%s45049_s2 + $0x10] sm:$0xff] }
 0x6e0   :  { %v9547_v63 = vpop.f32.mrf.mxu0 }
 0x6e1   :  { %v9639_v6 = vadd.f32 %v37165_v27, %v9554_v20  ;;  %v9548_v33 = vadd.f32 %v9547_v63, %v9445_v42  ;;  %v41342_v27 = vand.u32 4294901760, %v7966_v29 }
 0x6e3   :  { %v9646_v18 = vsel %vm632_vm2, %v9639_v6, 0  ;;  %v9633_v38 = vadd.f32 %v9632_v48, %v9548_v33  ;;  %v49_v6 = vadd.s32 2, %v40735_v53  ;;  %v50_v48 = vadd.s32 2, %v40763_v44 }
 0x6e4   :  { %v9724_v60 = vand.u32 4294901760, %v9646_v18  ;;  %v41345_v42 = vsub.f32 %v7966_v29, %v41342_v27 }
 0x6e5   :  { %v9643_v22 = vsel %vm632_vm2, %v9633_v38, 0  ;;  %vm51_vm8 = vcmp.eq.s32.totalorder %v40732_v51, %v49_v6  ;;  %vm52_vm9 = vcmp.eq.s32.totalorder %v40732_v51, %v50_v48  ;;  %v45087_v48 = vsub.s32 1, %v40080_v39 }
 0x6e6   :  { %v9725_v1 = vsub.f32 %v9646_v18, %v9724_v60  ;;  %v9714_v30 = vand.u32 4294901760, %v9643_v22  ;;  %v41204_v33 = vsel %vm52_vm9, 1.0, %v45125_v61 }
 0x6e7   :  { %45142 = vst [vmem:[#allocation31_spill] sm:$0xff] %v41204_v33  ;;  %v10143_v63 = vsel %vm7968_vm4, %v41204_v33, 0 }
 0x6e8   :  { %v9726_v25 = vand.u32 4294901760, %v9725_v1  ;;  %v9715_v32 = vsub.f32 %v9643_v22, %v9714_v30  ;;  %37173 = vmatprep.mubr.f32.mxu1 %v9714_v30  ;;  %v41222_v19 = vsub.f32 %v10143_v63, %v10143_v63  ;;  %v41350_v22 = vand.u32 4294901760, %v41345_v42 }
 0x6e9   :  { %37174 = vmatmul.mubr.f32.vlgmr.msra.gmra.mxu1 %v9724_v60 }
 0x6ea   :  { %37182 = vmatpush3.msra.mxu1 %v41157_v15  ;;  %v9716_v34 = vand.u32 4294901760, %v9715_v32  ;;  %v9727_v37 = vsub.f32 %v9725_v1, %v9726_v25  ;;  %45144 = vst [vmem:[#allocation33_spill] sm:$0xff] %v41222_v19  ;;  %v41236_v40 = vand.u32 4294901760, %v41222_v19 }
 0x6eb   :  { %37191 = vmatprep.subr.mxu1 %v41157_v15 }
 0x6ec   :  { %37183 = vmatprep.mubr.f32.mxu1 %v9716_v34  ;;  %v9717_v20 = vsub.f32 %v9715_v32, %v9716_v34  ;;  %v9728_v38 = vand.u32 4294901760, %v9727_v37  ;;  %45146 = vst [vmem:[#allocation35_spill] sm:$0xff] %v41236_v40  ;;  %v10231_v54 = vsub.f32 %v41222_v19, %v41236_v40 }
 0x6ed   :  { %37184 = vmatmul.mubr.f32.vlgmr.msra.gmra.mxu1 %v9726_v25 }
 0x6ee   :  { %37192 = vmatpush3.msra.mxu1 %v41157_v15  ;;  %37193 = vmatprep.mubr.f32.mxu1 %v9714_v30  ;;  %v9718_v18 = vand.u32 4294901760, %v9717_v20  ;;  %v41199_v15 = vsel %vm51_vm8, 1.0, %v45125_v61  ;;  %v41261_v46 = vand.u32 4294901760, %v10231_v54 }
 0x6ef   :  { %37215 = vmatprep.subr.mxu1 %v40849_v21  ;;  %45141 = vst [vmem:[#allocation30_spill] sm:$0xff] %v41199_v15 }
 0x6f0   :  { %37168 = vmatprep.mubr.f32.mxu0 %v9718_v18  ;;  %45148 = vst [vmem:[#allocation37_spill] sm:$0xff] %v41261_v46 }
 0x6f1   :  { %37169 = vmatmul.mubr.f32.vlgmr.msra.gmra.mxu0 %v9728_v38  ;;  %37194 = vmatmul.mubr.f32.vlgmr.msra.gmra.mxu1 %v9724_v60 }
 0x6f2   :  { %37216 = vmatpush3.msra.mxu1 %v40849_v21  ;;  %37177 = vmatpush3.msra.mxu0 %v41160_v55  ;;  %v10140_v55 = vsel %vm7968_vm4, %v41199_v15, 0 }
 0x6f3   :  { %37178 = vmatprep.mubr.f32.mxu0 %v9715_v32  ;;  %37217 = vmatprep.subr.mxu1 %v40863_v49 }
 0x6f4   :  { %37218 = vmatpush3.msra.mxu1 %v40863_v49  ;;  %37186 = vmatprep.subr.mxu0 %v41165_v59 }
 0x6f5   :  { %37219 = vmatprep.subr.mxu1 %v40876_v26  ;;  %37179 = vmatmul.mubr.f32.vlgmr.msra.gmra.mxu0 %v9725_v1  ;;  %v10851_v1 = vsub.f32 %v41345_v42, %v41350_v22 }
 0x6f6   :  { %37187 = vmatpush3.msra.mxu0 %v41165_v59  ;;  %37220 = vmatpush3.msra.mxu1 %v40876_v26  ;;  %v41218_v59 = vsub.f32 %v10140_v55, %v10140_v55 }
 0x6f7   :  { %37188 = vmatprep.mubr.f32.mxu0 %v9714_v30  ;;  %37196 = vmatprep.subr.mxu0 %v40786_v5  ;;  %v10852_v30 = vand.u32 4294901760, %v10851_v1 }
 0x6f8   :  { %37221 = vmatprep.subr.mxu1 %v40887_v31  ;;  %37231 = vmatprep.mubr.msk.f32.mxu1 %vm7968_vm4, %v41199_v15  ;;  %45143 = vst [vmem:[#allocation32_spill] sm:$0xff] %v41218_v59 }
 0x6f9   :  { %37222 = vmatpush3.msra.mxu1 %v40887_v31  ;;  %37189 = vmatmul.mubr.f32.vlgmr.msra.gmra.mxu0 %v9724_v60  ;;  %v41231_v60 = vand.u32 4294901760, %v41218_v59 }
 0x6fa   :  { %37223 = vmatprep.subr.mxu1 %v40897_v36  ;;  %37197 = vmatpush3.msra.mxu0 %v40786_v5 }
 0x6fb   :  { %37224 = vmatpush3.msra.mxu1 %v40897_v36  ;;  %37198 = vmatprep.subr.mxu0 %v40765_v47  ;;  %45145 = vst [vmem:[#allocation34_spill] sm:$0xff] %v41231_v60  ;;  %v10221_v58 = vsub.f32 %v41218_v59, %v41231_v60 }
 0x6fc   :  { %37225 = vmatprep.subr.mxu1 %v40905_v41  ;;  %37199 = vmatpush3.msra.mxu0 %v40765_v47 }
 0x6fd   :  { %37226 = vmatpush3.msra.mxu1 %v40905_v41  ;;  %37200 = vmatprep.subr.mxu0 %v40769_v7  ;;  %v41257_v57 = vand.u32 4294901760, %v10221_v58  ;;  %v41368_v58 = vld [vmem:[%s45052_s5] sm:$0xff] }
 0x6fe   :  { %37227 = vmatprep.subr.mxu1 %v40913_v43  ;;  %37201 = vmatpush3.msra.mxu0 %v40769_v7  ;;  %45153 = vst [vmem:[#allocation42_spill] sm:$0xff] %v41368_v58  ;;  %v41373_v54 = vrot.slane %v41368_v58, %v45087_v48 }
 0x6ff   :  { %37228 = vmatpush3.msra.mxu1 %v40913_v43  ;;  %37202 = vmatprep.subr.mxu0 %v40775_v0  ;;  %45147 = vst [vmem:[#allocation36_spill] sm:$0xff] %v41257_v57 }
 0x700   :  { %37229 = vmatprep.subr.mxu1 %v40919_v45  ;;  %37203 = vmatpush3.msra.mxu0 %v40775_v0  ;;  %45154 = vst [vmem:[#allocation43_spill] sm:$0xff] %v41373_v54 }
 0x701   :  { %37230 = vmatpush3.msra.mxu1 %v40919_v45  ;;  %37204 = vmatprep.subr.mxu0 %v40781_v2 }
 0x702   :  { %37253 = vmatprep.subr.mxu1 %v40786_v5  ;;  %37205 = vmatpush3.msra.mxu0 %v40781_v2 }
 0x703   :  { %37232 = vmatmul.mubr.msk.f32.vlgmr.msra.gmra.mxu1 %vm7968_vm4, %v41204_v33  ;;  %37206 = vmatprep.subr.mxu0 %v40791_v8 }
 0x704   :  { %37254 = vmatpush3.msra.mxu1 %v40786_v5  ;;  %37207 = vmatpush3.msra.mxu0 %v40791_v8 }
 0x705   :  { %37255 = vmatprep.subr.mxu1 %v40765_v47  ;;  %37208 = vmatprep.subr.mxu0 %v40808_v10 }
 0x706   :  { %37256 = vmatpush3.msra.mxu1 %v40765_v47  ;;  %37209 = vmatpush3.msra.mxu0 %v40808_v10 }
 0x707   :  { %37257 = vmatprep.subr.mxu1 %v40769_v7  ;;  %37210 = vmatprep.subr.mxu0 %v40822_v14 }
 0x708   :  { %37258 = vmatpush3.msra.mxu1 %v40769_v7  ;;  %37211 = vmatpush3.msra.mxu0 %v40822_v14 }
 0x709   :  { %37259 = vmatprep.subr.mxu1 %v40775_v0  ;;  %37212 = vmatprep.mubr.f32.mxu0 %v41257_v57 }
 0x70a   :  { %37260 = vmatpush3.msra.mxu1 %v40775_v0  ;;  %37213 = vmatmul.mubr.f32.vlgmr.msra.gmra.mxu0 %v41261_v46 }
 0x70b   :  { %37234 = vmatprep.subr.mxu0 %v40801_v9  ;;  %37261 = vmatprep.subr.mxu1 %v40781_v2 }
 0x70c   :  { %37235 = vmatpush3.msra.mxu0 %v40801_v9  ;;  %37262 = vmatpush3.msra.mxu1 %v40781_v2 }
 0x70d   :  { %37236 = vmatprep.subr.mxu0 %v40778_v62  ;;  %37263 = vmatprep.subr.mxu1 %v40791_v8 }
 0x70e   :  { %37237 = vmatpush3.msra.mxu0 %v40778_v62  ;;  %37264 = vmatpush3.msra.mxu1 %v40791_v8 }
 0x70f   :  { %37238 = vmatprep.subr.mxu0 %v40784_v4  ;;  %37265 = vmatprep.subr.mxu1 %v40808_v10 }
 0x710   :  { %37239 = vmatpush3.msra.mxu0 %v40784_v4  ;;  %37266 = vmatpush3.msra.mxu1 %v40808_v10 }
 0x711   :  { %37240 = vmatprep.subr.mxu0 %v40795_v56  ;;  %37267 = vmatprep.subr.mxu1 %v40822_v14 }
 0x712   :  { %37241 = vmatpush3.msra.mxu0 %v40795_v56  ;;  %37268 = vmatpush3.msra.mxu1 %v40822_v14 }
 0x713   :  { %37242 = vmatprep.subr.mxu0 %v40812_v12  ;;  %37269 = vmatprep.mubr.f32.mxu1 %v41231_v60 }
 0x714   :  { %37291 = vmatprep.subr.mxu1 %v40786_v5  ;;  %37243 = vmatpush3.msra.mxu0 %v40812_v12 }
 0x715   :  { %37270 = vmatmul.mubr.f32.vlgmr.msra.gmra.mxu1 %v41236_v40  ;;  %37244 = vmatprep.subr.mxu0 %v40827_v16 }
 0x716   :  { %37292 = vmatpush3.msra.mxu1 %v40786_v5  ;;  %37245 = vmatpush3.msra.mxu0 %v40827_v16 }
 0x717   :  { %37293 = vmatprep.subr.mxu1 %v40765_v47  ;;  %37246 = vmatprep.subr.mxu0 %v40843_v17 }
 0x718   :  { %37294 = vmatpush3.msra.mxu1 %v40765_v47  ;;  %37247 = vmatpush3.msra.mxu0 %v40843_v17 }
 0x719   :  { %37295 = vmatprep.subr.mxu1 %v40769_v7  ;;  %37248 = vmatprep.subr.mxu0 %v40856_v23 }
 0x71a   :  { %37296 = vmatpush3.msra.mxu1 %v40769_v7  ;;  %37249 = vmatpush3.msra.mxu0 %v40856_v23 }
 0x71b   :  { %37297 = vmatprep.subr.mxu1 %v40775_v0  ;;  %37250 = vmatprep.mubr.f32.mxu0 %v41218_v59 }
 0x71c   :  { %37298 = vmatpush3.msra.mxu1 %v40775_v0  ;;  %37251 = vmatmul.mubr.f32.vlgmr.msra.gmra.mxu0 %v41222_v19 }
 0x71d   :  { %37272 = vmatprep.subr.mxu0 %v40818_v13  ;;  %37299 = vmatprep.subr.mxu1 %v40781_v2 }
 0x71e   :  { %37273 = vmatpush3.msra.mxu0 %v40818_v13  ;;  %37300 = vmatpush3.msra.mxu1 %v40781_v2 }
 0x71f   :  { %37274 = vmatprep.subr.mxu0 %v40798_v52  ;;  %37301 = vmatprep.subr.mxu1 %v40791_v8 }
 0x720   :  { %37275 = vmatpush3.msra.mxu0 %v40798_v52  ;;  %37302 = vmatpush3.msra.mxu1 %v40791_v8 }
 0x721   :  { %37276 = vmatprep.subr.mxu0 %v40815_v50  ;;  %37303 = vmatprep.subr.mxu1 %v40808_v10 }
 0x722   :  { %37277 = vmatpush3.msra.mxu0 %v40815_v50  ;;  %37304 = vmatpush3.msra.mxu1 %v40808_v10 }
 0x723   :  { %37278 = vmatprep.subr.mxu0 %v40830_v35  ;;  %37305 = vmatprep.subr.mxu1 %v40822_v14 }
 0x724   :  { %37279 = vmatpush3.msra.mxu0 %v40830_v35  ;;  %37306 = vmatpush3.msra.mxu1 %v40822_v14 }
 0x725   :  { %37280 = vmatprep.subr.mxu0 %v40846_v11  ;;  %37288 = vmatprep.mubr.msk.f32.mxu0 %vm7968_vm4, %v41199_v15 }
 0x726   :  { %37281 = vmatpush3.msra.mxu0 %v40846_v11  ;;  %37307 = vmatprep.mubr.msk.f32.mxu1 %vm7968_vm4, %v41199_v15 }
 0x727   :  { %37282 = vmatprep.subr.mxu0 %v40859_v24  ;;  %37308 = vmatmul.mubr.msk.f32.vlgmr.msra.gmra.mxu1 %vm7968_vm4, %v41204_v33 }
 0x728   :  { %37283 = vmatpush3.msra.mxu0 %v40859_v24  ;;  %37315 = vmatprep.subr.mxu1 %v10852_v30 }
 0x729   :  { %37284 = vmatprep.subr.mxu0 %v40872_v3  ;;  %37316 = vmatpush3.msra.mxu1 %v10852_v30 }
 0x72a   :  { %37285 = vmatpush3.msra.mxu0 %v40872_v3  ;;  %37325 = vmatprep.subr.mxu1 %v41342_v27 }
 0x72b   :  { %37286 = vmatprep.subr.mxu0 %v40883_v28 }
 0x72c   :  { %37287 = vmatpush3.msra.mxu0 %v40883_v28 }
 0x72d   :  { %37289 = vmatmul.mubr.msk.f32.vlgmr.msra.gmra.mxu0 %vm7968_vm4, %v41204_v33  ;;  %37310 = vmatprep.subr.mxu0 %v41342_v27 }
 0x72e   :  { %37311 = vmatpush3.msra.mxu0 %v41342_v27 }
 0x72f   :  { %37320 = vmatprep.subr.mxu0 %v41345_v42 }
 0x7a9   :  { %v37175_v25 = vpop.f32.mrf.mxu1 }
 0x7ab   :  { %v41356_v32 = vpop.f32.mrf.mxu1 }
 0x7ac   :  { %45149 = vst [vmem:[#allocation38_spill] sm:$0xff] %v41356_v32 }
 0x7ad   :  { %v37185_v20 = vpop.f32.mrf.mxu1 }
 0x7af   :  { %v41361_v55 = vpop.f32.mrf.mxu1 }
 0x7b0   :  { %45151 = vst [vmem:[#allocation40_spill] sm:$0xff] %v41361_v55 }
 0x7b1   :  { %v37170_v34 = vpop.f32.mrf.mxu0 }
 0x7b2   :  { %v9813_v37 = vadd.f32 %v37175_v25, %v37170_v34  ;;  %v37195_v25 = vpop.f32.mrf.mxu1  ;;  %v45155_v34 = vld [vmem:[#allocation27_spill] sm:$0xff] }
 0x7b3   :  { %v41358_v6 = vpop.f32.mrf.mxu0 }
 0x7b4   :  { %45150 = vst [vmem:[#allocation39_spill] sm:$0xff] %v41358_v6  ;;  %v41381_v60 = vpop.f32.mrf.mxu1 }
 0x7b5   :  { %v37180_v18 = vpop.f32.mrf.mxu0  ;;  %45157 = vst [vmem:[#allocation44_spill] sm:$0xff] %v41381_v60 }
 0x7b6   :  { %v9894_v38 = vadd.f32 %v37180_v18, %v9813_v37  ;;  %v9055_v37 = vadd.f32 %v41373_v54, %v45155_v34 }
 0x7b7   :  { %v41363_v63 = vpop.f32.mrf.mxu0 }
 0x7b8   :  { %45152 = vst [vmem:[#allocation41_spill] sm:$0xff] %v41363_v63  ;;  %v9976_v29 = vadd.f32 %v37185_v20, %v9894_v38 }
 0x7b9   :  { %v37190_v1 = vpop.f32.mrf.mxu0 }
 0x7ba   :  { %v10056_v30 = vadd.f32 %v37190_v1, %v9976_v29 }
 0x7bb   :  { %v41379_v59 = vpop.f32.mrf.mxu0 }
 0x7bc   :  { %v10134_v18 = vadd.f32 %v37195_v25, %v10056_v30  ;;  %45156 = vst [vmem:[#allocation27_spill] sm:$0xff] %v41379_v59 }
 0x7be   :  { %v41377_v19 = vadd.f32 %v10134_v18, %v9055_v37 }
 0x7c3   :  { %v37233_v46 = vpop.f32.mrf.mxu1 }
 0x7c5   :  { %v10345_v48 = vpop.f32.mrf.mxu1 }
 0x7ca   :  { %v37214_v40 = vpop.f32.mrf.mxu0 }
 0x7cb   :  { %v10352_v15 = vadd.f32 %v37233_v46, %v37214_v40 }
 0x7cc   :  { %v10224_v57 = vpop.f32.mrf.mxu0 }
 0x7cd   :  { %v10346_v29 = vadd.f32 %v10345_v48, %v10224_v57 }
 0x7d5   :  { %v37271_v20 = vpop.f32.mrf.mxu1 }
 0x7d7   :  { %v10527_v39 = vpop.f32.mrf.mxu1 }
 0x7dc   :  { %v37252_v33 = vpop.f32.mrf.mxu0 }
 0x7dd   :  { %v10447_v1 = vadd.f32 %v37252_v33, %v10352_v15 }
 0x7de   :  { %v10439_v38 = vpop.f32.mrf.mxu0 }
 0x7df   :  { %v10440_v58 = vadd.f32 %v10439_v38, %v10346_v29  ;;  %v10536_v34 = vadd.f32 %v37271_v20, %v10447_v1 }
 0x7e1   :  { %v10528_v37 = vadd.f32 %v10527_v39, %v10440_v58 }
 0x7e7   :  { %v37309_v25 = vpop.f32.mrf.mxu1 }
 0x7e9   :  { %v10715_v60 = vpop.f32.mrf.mxu1 }
 0x7ed   :  { %v37290_v30 = vpop.f32.mrf.mxu0 }
 0x7ee   :  { %v10637_v18 = vadd.f32 %v37290_v30, %v10536_v34 }
 0x7ef   :  { %v10630_v54 = vpop.f32.mrf.mxu0 }
 0x7f0   :  { %v10722_v59 = vadd.f32 %v37309_v25, %v10637_v18  ;;  %v10631_v55 = vadd.f32 %v10630_v54, %v10528_v37 }
 0x7f2   :  { %v10729_v63 = vsel %vm632_vm2, %v10722_v59, 0  ;;  %v10716_v32 = vadd.f32 %v10715_v60, %v10631_v55  ;;  %v55_v59 = vadd.s32 3, %v40735_v53  ;;  %v56_v60 = vadd.s32 3, %v40763_v44 }
 0x7f3   :  { %v10807_v6 = vand.u32 4294901760, %v10729_v63 }
 0x7f4   :  { %v10726_v40 = vsel %vm632_vm2, %v10716_v32, 0  ;;  %vm57_vm10 = vcmp.eq.s32.totalorder %v40732_v51, %v55_v59  ;;  %vm58_vm11 = vcmp.eq.s32.totalorder %v40732_v51, %v56_v60 }
 0x7f5   :  { %v10808_v46 = vsub.f32 %v10729_v63, %v10807_v6  ;;  %v10797_v57 = vand.u32 4294901760, %v10726_v40  ;;  %v41397_v53 = vsel %vm57_vm10, 1.0, %v45125_v61  ;;  %v41402_v44 = vsel %vm58_vm11, 1.0, %v45125_v61 }
 0x7f7   :  { %v10809_v15 = vand.u32 4294901760, %v10808_v46  ;;  %v10798_v33 = vsub.f32 %v10726_v40, %v10797_v57  ;;  %37317 = vmatprep.mubr.f32.mxu1 %v10797_v57 }
 0x7f8   :  { %37318 = vmatmul.mubr.f32.vlgmr.msra.gmra.mxu1 %v10807_v6 }
 0x7f9   :  { %37326 = vmatpush3.msra.mxu1 %v41342_v27  ;;  %v10799_v39 = vand.u32 4294901760, %v10798_v33  ;;  %v10810_v48 = vsub.f32 %v10808_v46, %v10809_v15 }
 0x7fa   :  { %37335 = vmatprep.subr.mxu1 %v41342_v27 }
 0x7fb   :  { %37327 = vmatprep.mubr.f32.mxu1 %v10799_v39  ;;  %v10800_v58 = vsub.f32 %v10798_v33, %v10799_v39  ;;  %v10811_v55 = vand.u32 4294901760, %v10810_v48 }
 0x7fc   :  { %37328 = vmatmul.mubr.f32.vlgmr.msra.gmra.mxu1 %v10809_v15 }
 0x7fd   :  { %37336 = vmatpush3.msra.mxu1 %v41342_v27  ;;  %37337 = vmatprep.mubr.f32.mxu1 %v10797_v57  ;;  %v10801_v32 = vand.u32 4294901760, %v10800_v58 }
 0x7fe   :  { %37359 = vmatprep.subr.mxu1 %v40849_v21 }
 0x7ff   :  { %37312 = vmatprep.mubr.f32.mxu0 %v10801_v32 }
 0x800   :  { %37313 = vmatmul.mubr.f32.vlgmr.msra.gmra.mxu0 %v10811_v55  ;;  %37338 = vmatmul.mubr.f32.vlgmr.msra.gmra.mxu1 %v10807_v6 }
 0x801   :  { %37360 = vmatpush3.msra.mxu1 %v40849_v21  ;;  %37321 = vmatpush3.msra.mxu0 %v41345_v42  ;;  %v11223_v21 = vsel %vm7968_vm4, %v41397_v53, 0 }
 0x802   :  { %37322 = vmatprep.mubr.f32.mxu0 %v10798_v33  ;;  %37361 = vmatprep.subr.mxu1 %v40863_v49  ;;  %v41416_v27 = vsub.f32 %v11223_v21, %v11223_v21 }
 0x803   :  { %37362 = vmatpush3.msra.mxu1 %v40863_v49  ;;  %37330 = vmatprep.subr.mxu0 %v41350_v22  ;;  %v11226_v49 = vsel %vm7968_vm4, %v41402_v44, 0 }
 0x804   :  { %37363 = vmatprep.subr.mxu1 %v40876_v26  ;;  %37323 = vmatmul.mubr.f32.vlgmr.msra.gmra.mxu0 %v10808_v46  ;;  %45158 = vst [vmem:[#allocation45_spill] sm:$0xff] %v41416_v27 }
 0x805   :  { %37331 = vmatpush3.msra.mxu0 %v41350_v22  ;;  %37364 = vmatpush3.msra.mxu1 %v40876_v26  ;;  %v41420_v26 = vsub.f32 %v11226_v49, %v11226_v49 }
 0x806   :  { %37332 = vmatprep.mubr.f32.mxu0 %v10797_v57  ;;  %37340 = vmatprep.subr.mxu0 %v40786_v5 }
 0x807   :  { %37365 = vmatprep.subr.mxu1 %v40887_v31  ;;  %37375 = vmatprep.mubr.msk.f32.mxu1 %vm7968_vm4, %v41397_v53  ;;  %45159 = vst [vmem:[#allocation46_spill] sm:$0xff] %v41420_v26  ;;  %v41434_v42 = vand.u32 4294901760, %v41420_v26 }
 0x808   :  { %37366 = vmatpush3.msra.mxu1 %v40887_v31  ;;  %37333 = vmatmul.mubr.f32.vlgmr.msra.gmra.mxu0 %v10807_v6  ;;  %v41429_v31 = vand.u32 4294901760, %v41416_v27 }
 0x809   :  { %37367 = vmatprep.subr.mxu1 %v40897_v36  ;;  %37341 = vmatpush3.msra.mxu0 %v40786_v5  ;;  %45161 = vst [vmem:[#allocation48_spill] sm:$0xff] %v41434_v42 }
 0x80a   :  { %37368 = vmatpush3.msra.mxu1 %v40897_v36  ;;  %37342 = vmatprep.subr.mxu0 %v40765_v47  ;;  %45160 = vst [vmem:[#allocation47_spill] sm:$0xff] %v41429_v31  ;;  %v11304_v36 = vsub.f32 %v41416_v27, %v41429_v31 }
 0x80b   :  { %37369 = vmatprep.subr.mxu1 %v40905_v41  ;;  %37343 = vmatpush3.msra.mxu0 %v40765_v47 }
 0x80c   :  { %37370 = vmatpush3.msra.mxu1 %v40905_v41  ;;  %37344 = vmatprep.subr.mxu0 %v40769_v7  ;;  %v11314_v41 = vsub.f32 %v41420_v26, %v41434_v42 }
 0x80d   :  { %37371 = vmatprep.subr.mxu1 %v40913_v43  ;;  %37345 = vmatpush3.msra.mxu0 %v40769_v7 }
 0x80e   :  { %37372 = vmatpush3.msra.mxu1 %v40913_v43  ;;  %37346 = vmatprep.subr.mxu0 %v40775_v0  ;;  %v41455_v43 = vand.u32 4294901760, %v11304_v36 }
 0x80f   :  { %37373 = vmatprep.subr.mxu1 %v40919_v45  ;;  %37347 = vmatpush3.msra.mxu0 %v40775_v0 }
 0x810   :  { %37374 = vmatpush3.msra.mxu1 %v40919_v45  ;;  %37348 = vmatprep.subr.mxu0 %v40781_v2  ;;  %v41459_v45 = vand.u32 4294901760, %v11314_v41 }
 0x811   :  { %37397 = vmatprep.subr.mxu1 %v40786_v5  ;;  %37349 = vmatpush3.msra.mxu0 %v40781_v2 }
 0x812   :  { %37376 = vmatmul.mubr.msk.f32.vlgmr.msra.gmra.mxu1 %vm7968_vm4, %v41402_v44  ;;  %37350 = vmatprep.subr.mxu0 %v40791_v8  ;;  %45162 = vst [vmem:[#allocation49_spill] sm:$0xff] %v41459_v45 }
 0x813   :  { %37398 = vmatpush3.msra.mxu1 %v40786_v5  ;;  %37351 = vmatpush3.msra.mxu0 %v40791_v8 }
 0x814   :  { %37399 = vmatprep.subr.mxu1 %v40765_v47  ;;  %37352 = vmatprep.subr.mxu0 %v40808_v10 }
 0x815   :  { %37400 = vmatpush3.msra.mxu1 %v40765_v47  ;;  %37353 = vmatpush3.msra.mxu0 %v40808_v10 }
 0x816   :  { %37401 = vmatprep.subr.mxu1 %v40769_v7  ;;  %37354 = vmatprep.subr.mxu0 %v40822_v14 }
 0x817   :  { %37402 = vmatpush3.msra.mxu1 %v40769_v7  ;;  %37355 = vmatpush3.msra.mxu0 %v40822_v14 }
 0x818   :  { %37403 = vmatprep.subr.mxu1 %v40775_v0  ;;  %37356 = vmatprep.mubr.f32.mxu0 %v41455_v43 }
 0x819   :  { %37404 = vmatpush3.msra.mxu1 %v40775_v0  ;;  %37357 = vmatmul.mubr.f32.vlgmr.msra.gmra.mxu0 %v41459_v45 }
 0x81a   :  { %37378 = vmatprep.subr.mxu0 %v40801_v9  ;;  %37405 = vmatprep.subr.mxu1 %v40781_v2 }
 0x81b   :  { %37379 = vmatpush3.msra.mxu0 %v40801_v9  ;;  %37406 = vmatpush3.msra.mxu1 %v40781_v2 }
 0x81c   :  { %37380 = vmatprep.subr.mxu0 %v40778_v62  ;;  %37407 = vmatprep.subr.mxu1 %v40791_v8 }
 0x81d   :  { %37381 = vmatpush3.msra.mxu0 %v40778_v62  ;;  %37408 = vmatpush3.msra.mxu1 %v40791_v8 }
 0x81e   :  { %37382 = vmatprep.subr.mxu0 %v40784_v4  ;;  %37409 = vmatprep.subr.mxu1 %v40808_v10 }
 0x81f   :  { %37383 = vmatpush3.msra.mxu0 %v40784_v4  ;;  %37410 = vmatpush3.msra.mxu1 %v40808_v10 }
 0x820   :  { %37384 = vmatprep.subr.mxu0 %v40795_v56  ;;  %37411 = vmatprep.subr.mxu1 %v40822_v14 }
 0x821   :  { %37385 = vmatpush3.msra.mxu0 %v40795_v56  ;;  %37412 = vmatpush3.msra.mxu1 %v40822_v14 }
 0x822   :  { %37386 = vmatprep.subr.mxu0 %v40812_v12  ;;  %37413 = vmatprep.mubr.f32.mxu1 %v41429_v31 }
 0x823   :  { %37435 = vmatprep.subr.mxu1 %v40786_v5  ;;  %37387 = vmatpush3.msra.mxu0 %v40812_v12 }
 0x824   :  { %37414 = vmatmul.mubr.f32.vlgmr.msra.gmra.mxu1 %v41434_v42  ;;  %37388 = vmatprep.subr.mxu0 %v40827_v16 }
 0x825   :  { %37436 = vmatpush3.msra.mxu1 %v40786_v5  ;;  %37389 = vmatpush3.msra.mxu0 %v40827_v16 }
 0x826   :  { %37437 = vmatprep.subr.mxu1 %v40765_v47  ;;  %37390 = vmatprep.subr.mxu0 %v40843_v17 }
 0x827   :  { %37438 = vmatpush3.msra.mxu1 %v40765_v47  ;;  %37391 = vmatpush3.msra.mxu0 %v40843_v17  ;;  %v7967_v47 = vld [vmem:[%s45049_s2 + $0x18] sm:$0xff] }
 0x828   :  { %37439 = vmatprep.subr.mxu1 %v40769_v7  ;;  %37392 = vmatprep.subr.mxu0 %v40856_v23 }
 0x829   :  { %37440 = vmatpush3.msra.mxu1 %v40769_v7  ;;  %37393 = vmatpush3.msra.mxu0 %v40856_v23  ;;  %v41540_v7 = vand.u32 4294901760, %v7967_v47 }
 0x82a   :  { %37441 = vmatprep.subr.mxu1 %v40775_v0  ;;  %37394 = vmatprep.mubr.f32.mxu0 %v41416_v27 }
 0x82b   :  { %37442 = vmatpush3.msra.mxu1 %v40775_v0  ;;  %37395 = vmatmul.mubr.f32.vlgmr.msra.gmra.mxu0 %v41420_v26  ;;  %v41543_v0 = vsub.f32 %v7967_v47, %v41540_v7 }
 0x82c   :  { %37416 = vmatprep.subr.mxu0 %v40818_v13  ;;  %37443 = vmatprep.subr.mxu1 %v40781_v2 }
 0x82d   :  { %37417 = vmatpush3.msra.mxu0 %v40818_v13  ;;  %37444 = vmatpush3.msra.mxu1 %v40781_v2  ;;  %v41548_v62 = vand.u32 4294901760, %v41543_v0 }
 0x82e   :  { %37418 = vmatprep.subr.mxu0 %v40798_v52  ;;  %37445 = vmatprep.subr.mxu1 %v40791_v8 }
 0x82f   :  { %37419 = vmatpush3.msra.mxu0 %v40798_v52  ;;  %37446 = vmatpush3.msra.mxu1 %v40791_v8  ;;  %v11934_v2 = vsub.f32 %v41543_v0, %v41548_v62 }
 0x830   :  { %37420 = vmatprep.subr.mxu0 %v40815_v50  ;;  %37447 = vmatprep.subr.mxu1 %v40808_v10 }
 0x831   :  { %37421 = vmatpush3.msra.mxu0 %v40815_v50  ;;  %37448 = vmatpush3.msra.mxu1 %v40808_v10  ;;  %v11935_v4 = vand.u32 4294901760, %v11934_v2 }
 0x832   :  { %37422 = vmatprep.subr.mxu0 %v40830_v35  ;;  %37449 = vmatprep.subr.mxu1 %v40822_v14 }
 0x833   :  { %37423 = vmatpush3.msra.mxu0 %v40830_v35  ;;  %37450 = vmatpush3.msra.mxu1 %v40822_v14 }
 0x834   :  { %37424 = vmatprep.subr.mxu0 %v40846_v11  ;;  %37432 = vmatprep.mubr.msk.f32.mxu0 %vm7968_vm4, %v41397_v53 }
 0x835   :  { %37425 = vmatpush3.msra.mxu0 %v40846_v11  ;;  %37451 = vmatprep.mubr.msk.f32.mxu1 %vm7968_vm4, %v41397_v53 }
 0x836   :  { %37426 = vmatprep.subr.mxu0 %v40859_v24  ;;  %37452 = vmatmul.mubr.msk.f32.vlgmr.msra.gmra.mxu1 %vm7968_vm4, %v41402_v44 }
 0x837   :  { %37427 = vmatpush3.msra.mxu0 %v40859_v24  ;;  %37459 = vmatprep.subr.mxu1 %v11935_v4 }
 0x838   :  { %37428 = vmatprep.subr.mxu0 %v40872_v3  ;;  %37460 = vmatpush3.msra.mxu1 %v11935_v4 }
 0x839   :  { %37429 = vmatpush3.msra.mxu0 %v40872_v3  ;;  %37469 = vmatprep.subr.mxu1 %v41540_v7 }
 0x83a   :  { %37430 = vmatprep.subr.mxu0 %v40883_v28 }
 0x83b   :  { %37431 = vmatpush3.msra.mxu0 %v40883_v28 }
 0x83c   :  { %37433 = vmatmul.mubr.msk.f32.vlgmr.msra.gmra.mxu0 %vm7968_vm4, %v41402_v44  ;;  %37454 = vmatprep.subr.mxu0 %v41540_v7 }
 0x83d   :  { %37455 = vmatpush3.msra.mxu0 %v41540_v7 }
 0x83e   :  { %37464 = vmatprep.subr.mxu0 %v41543_v0 }
 0x8b8   :  { %v37319_v5 = vpop.f32.mrf.mxu1 }
 0x8ba   :  { %v41554_v8 = vpop.f32.mrf.mxu1 }
 0x8bc   :  { %v37329_v9 = vpop.f32.mrf.mxu1 }
 0x8be   :  { %v41558_v13 = vpop.f32.mrf.mxu1 }
 0x8c0   :  { %v37314_v56 = vpop.f32.mrf.mxu0  ;;  %v37339_v11 = vpop.f32.mrf.mxu1 }
 0x8c1   :  { %v10896_v52 = vadd.f32 %v37319_v5, %v37314_v56  ;;  %v45163_v56 = vld [vmem:[#allocation24_spill] sm:$0xff] }
 0x8c2   :  { %v41556_v10 = vpop.f32.mrf.mxu0  ;;  %v41567_v22 = vpop.f32.mrf.mxu1 }
 0x8c4   :  { %v37324_v12 = vpop.f32.mrf.mxu0 }
 0x8c5   :  { %v10977_v50 = vadd.f32 %v37324_v12, %v10896_v52  ;;  %v45164_v52 = vld [vmem:[#allocation23_spill] sm:$0xff] }
 0x8c6   :  { %v41560_v14 = vpop.f32.mrf.mxu0 }
 0x8c7   :  { %v11059_v16 = vadd.f32 %v37329_v9, %v10977_v50  ;;  %v8720_v9 = vadd.f32 %v45164_v52, %v45163_v56  ;;  %v45165_v50 = vld [vmem:[#allocation26_spill] sm:$0xff] }
 0x8c8   :  { %v37334_v35 = vpop.f32.mrf.mxu0 }
 0x8c9   :  { %v11139_v17 = vadd.f32 %v37334_v35, %v11059_v16  ;;  %v45166_v16 = vld [vmem:[#allocation39_spill] sm:$0xff]  ;;  %v45167_v35 = vld [vmem:[#allocation38_spill] sm:$0xff] }
 0x8ca   :  { %v41565_v3 = vpop.f32.mrf.mxu0 }
 0x8cb   :  { %v11217_v23 = vadd.f32 %v37339_v11, %v11139_v17  ;;  %v9807_v17 = vadd.f32 %v45167_v35, %v45166_v16  ;;  %v45168_v11 = vld [vmem:[#allocation41_spill] sm:$0xff] }
 0x8cd   :  { %v41563_v24 = vadd.f32 %v11217_v23, %v41377_v19  ;;  %v9887_v23 = vadd.f32 %v45168_v11, %v9807_v17 }
 0x8d2   :  { %v37377_v6 = vpop.f32.mrf.mxu1 }
 0x8d4   :  { %v11428_v20 = vpop.f32.mrf.mxu1 }
 0x8d9   :  { %v37358_v28 = vpop.f32.mrf.mxu0 }
 0x8da   :  { %v11435_v38 = vadd.f32 %v37377_v6, %v37358_v28  ;;  %v45169_v6 = vld [vmem:[#allocation25_spill] sm:$0xff] }
 0x8db   :  { %v11307_v63 = vpop.f32.mrf.mxu0 }
 0x8dc   :  { %v11429_v34 = vadd.f32 %v11428_v20, %v11307_v63 }
 0x8e4   :  { %v37415_v29 = vpop.f32.mrf.mxu1 }
 0x8e6   :  { %v11610_v37 = vpop.f32.mrf.mxu1 }
 0x8eb   :  { %v37396_v54 = vpop.f32.mrf.mxu0 }
 0x8ec   :  { %v11530_v30 = vadd.f32 %v37396_v54, %v11435_v38  ;;  %v45170_v54 = vld [vmem:[#allocation40_spill] sm:$0xff] }
 0x8ed   :  { %v11522_v1 = vpop.f32.mrf.mxu0  ;;  %v9968_v20 = vadd.f32 %v45170_v54, %v9887_v23 }
 0x8ee   :  { %v11523_v25 = vadd.f32 %v11522_v1, %v11429_v34  ;;  %v11619_v18 = vadd.f32 %v37415_v29, %v11530_v30  ;;  %v45171_v1 = vld [vmem:[#allocation28_spill] sm:$0xff] }
 0x8f0   :  { %v11611_v46 = vadd.f32 %v11610_v37, %v11523_v25  ;;  %v45172_v37 = vld [vmem:[#allocation27_spill] sm:$0xff] }
 0x8f6   :  { %v37453_v19 = vpop.f32.mrf.mxu1 }
 0x8f8   :  { %v11798_v48 = vpop.f32.mrf.mxu1 }
 0x8fc   :  { %v37434_v40 = vpop.f32.mrf.mxu0 }
 0x8fd   :  { %v11720_v57 = vadd.f32 %v37434_v40, %v11619_v18  ;;  %v10050_v18 = vadd.f32 %v45172_v37, %v9968_v20  ;;  %v12349_v20 = vld [vmem:[%s45050_s3 + $0x18] sm:$0xff] }
 0x8fe   :  { %v11713_v15 = vpop.f32.mrf.mxu0 }
 0x8ff   :  { %v11805_v33 = vadd.f32 %v37453_v19, %v11720_v57  ;;  %v11714_v39 = vadd.f32 %v11713_v15, %v11611_v46 }
 0x901   :  { %v11812_v58 = vsel %vm632_vm2, %v11805_v33, 0  ;;  %v11799_v59 = vadd.f32 %v11798_v48, %v11714_v39  ;;  %v45174_v39 = vld [vmem:[#allocation44_spill] sm:$0xff] }
 0x902   :  { %v11890_v60 = vand.u32 4294901760, %v11812_v58  ;;  %v10128_v48 = vadd.f32 %v45174_v39, %v10050_v18 }
 0x903   :  { %v11809_v32 = vsel %vm632_vm2, %v11799_v59, 0 }
 0x904   :  { %v11891_v55 = vsub.f32 %v11812_v58, %v11890_v60  ;;  %v11880_v21 = vand.u32 4294901760, %v11809_v32 }
 0x906   :  { %v11892_v49 = vand.u32 4294901760, %v11891_v55  ;;  %v11881_v36 = vsub.f32 %v11809_v32, %v11880_v21  ;;  %37461 = vmatprep.mubr.f32.mxu1 %v11880_v21 }
 0x907   :  { %37462 = vmatmul.mubr.f32.vlgmr.msra.gmra.mxu1 %v11890_v60 }
 0x908   :  { %37470 = vmatpush3.msra.mxu1 %v41540_v7  ;;  %v11882_v41 = vand.u32 4294901760, %v11881_v36  ;;  %v11893_v47 = vsub.f32 %v11891_v55, %v11892_v49 }
 0x909   :  { %37479 = vmatprep.subr.mxu1 %v41540_v7 }
 0x90a   :  { %37471 = vmatprep.mubr.f32.mxu1 %v11882_v41  ;;  %v11883_v2 = vsub.f32 %v11881_v36, %v11882_v41  ;;  %v11894_v5 = vand.u32 4294901760, %v11893_v47 }
 0x90b   :  { %37472 = vmatmul.mubr.f32.vlgmr.msra.gmra.mxu1 %v11892_v49 }
 0x90c   :  { %37481 = vmatprep.mubr.f32.mxu1 %v11880_v21  ;;  %v11884_v4 = vand.u32 4294901760, %v11883_v2  ;;  %37480 = vmatpush3.msra.mxu1 %v41540_v7  ;;  %v8800_v7 = vadd.f32 %v45165_v50, %v8720_v9  ;;  %v39925_v9 = vld [vmem:[%s45047_s0 + $0x8] sm:$0xff] }
 0x90e   :  { %37456 = vmatprep.mubr.f32.mxu0 %v11884_v4  ;;  %v8881_v63 = vadd.f32 %v45169_v6, %v8800_v7 }
 0x90f   :  { %37457 = vmatmul.mubr.f32.vlgmr.msra.gmra.mxu0 %v11894_v5  ;;  %37482 = vmatmul.mubr.f32.vlgmr.msra.gmra.mxu1 %v11890_v60 }
 0x910   :  { %37465 = vmatpush3.msra.mxu0 %v41543_v0  ;;  %37466 = vmatprep.mubr.f32.mxu0 %v11881_v36  ;;  %v10890_v0 = vadd.f32 %v41554_v8, %v41556_v10  ;;  %v8963_v34 = vadd.f32 %v45171_v1, %v8881_v63  ;;  %v45173_v8 = vld [vmem:[#allocation29_spill] sm:$0xff] }
 0x911   :  { %37474 = vmatprep.subr.mxu0 %v41548_v62 }
 0x912   :  { %v9041_v10 = vadd.f32 %v45173_v8, %v8963_v34 }
 0x913   :  { %37467 = vmatmul.mubr.f32.vlgmr.msra.gmra.mxu0 %v11891_v55 }
 0x914   :  { %37475 = vmatpush3.msra.mxu0 %v41548_v62  ;;  %37476 = vmatprep.mubr.f32.mxu0 %v11880_v21  ;;  %v10970_v62 = vadd.f32 %v41560_v14, %v10890_v0 }
 0x916   :  { %v11051_v30 = vadd.f32 %v41558_v13, %v10970_v62  ;;  %v45175_v13 = vld [vmem:[#allocation43_spill] sm:$0xff] }
 0x917   :  { %37477 = vmatmul.mubr.f32.vlgmr.msra.gmra.mxu0 %v11890_v60  ;;  %v9054_v55 = vadd.f32 %v45175_v13, %v9041_v10 }
 0x918   :  { %v11133_v57 = vadd.f32 %v41565_v3, %v11051_v30  ;;  %v12347_v30 = vld [vmem:[%s45050_s3 + $0x8] sm:$0xff] }
 0x919   :  { %v10137_v47 = vadd.f32 %v10128_v48, %v9054_v55  ;;  %v41635_v18 = vand.u32 4294901760, %v12347_v30 }
 0x91a   :  { %v11211_v21 = vadd.f32 %v41567_v22, %v11133_v57  ;;  %v39926_v22 = vld [vmem:[%s45047_s0] sm:$0xff] }
 0x91b   :  { %v41648_v8 = vsub.f32 %v12347_v30, %v41635_v18 }
 0x91c   :  { %v11220_v5 = vadd.f32 %v11211_v21, %v10137_v47  ;;  %v45176_v47 = vld [vmem:[#allocation5_spill] sm:$0xff] }
 0x9c7   :  { %v37463_v12 = vpop.f32.mrf.mxu1 }
 0x9c9   :  { %v11972_v28 = vpop.f32.mrf.mxu1 }
 0x9cb   :  { %v37473_v38 = vpop.f32.mrf.mxu1 }
 0x9cd   :  { %v12133_v19 = vpop.f32.mrf.mxu1 }
 0x9cf   :  { %v37458_v29 = vpop.f32.mrf.mxu0  ;;  %v37483_v60 = vpop.f32.mrf.mxu1 }
 0x9d0   :  { %v11979_v40 = vadd.f32 %v37463_v12, %v37458_v29  ;;  %v12348_v29 = vld [vmem:[%s45050_s3 + $0x10] sm:$0xff] }
 0x9d1   :  { %v11886_v25 = vpop.f32.mrf.mxu0  ;;  %v12293_v3 = vpop.f32.mrf.mxu1  ;;  %v41622_v34 = vand.u32 4294901760, %v12348_v29 }
 0x9d2   :  { %v11973_v15 = vadd.f32 %v11972_v28, %v11886_v25 }
 0x9d3   :  { %v37468_v46 = vpop.f32.mrf.mxu0  ;;  %v41633_v37 = vsub.f32 %v12348_v29, %v41622_v34 }
 0x9d4   :  { %v12060_v14 = vadd.f32 %v37468_v46, %v11979_v40  ;;  %v12346_v40 = vld [vmem:[%s45050_s3] sm:$0xff] }
 0x9d5   :  { %v12052_v33 = vpop.f32.mrf.mxu0  ;;  %v41645_v46 = vand.u32 4294901760, %v41633_v37  ;;  %v41651_v10 = vand.u32 4294901760, %v12346_v40 }
 0x9d6   :  { %v12053_v58 = vadd.f32 %v12052_v33, %v11973_v15  ;;  %v12142_v59 = vadd.f32 %v37473_v38, %v12060_v14  ;;  %v41614_v38 = vand.u32 4294901760, %v12349_v20  ;;  %v41657_v14 = vand.u32 4294901760, %v41648_v8 }
 0x9d7   :  { %v37478_v32 = vpop.f32.mrf.mxu0  ;;  %v12484_v15 = vsub.f32 %v41633_v37, %v41645_v46  ;;  %v41660_v33 = vsub.f32 %v12346_v40, %v41651_v10 }
 0x9d8   :  { %v12222_v49 = vadd.f32 %v37478_v32, %v12142_v59  ;;  %v12134_v36 = vadd.f32 %v12133_v19, %v12053_v58  ;;  %v41620_v1 = vsub.f32 %v12349_v20, %v41614_v38  ;;  %37484 = vmatprep.subr.mxu0 %v41614_v38  ;;  %v12491_v48 = vsub.f32 %v41648_v8, %v41657_v14 }
 0x9d9   :  { %v12215_v41 = vpop.f32.mrf.mxu0  ;;  %37485 = vmatpush3.msra.mxu0 %v41614_v38  ;;  %v12485_v39 = vand.u32 4294901760, %v12484_v15  ;;  %v41667_v58 = vand.u32 4294901760, %v41660_v33 }
 0x9da   :  { %v12300_v2 = vadd.f32 %v37483_v60, %v12222_v49  ;;  %v12216_v4 = vadd.f32 %v12215_v41, %v12134_v36  ;;  %v41630_v25 = vand.u32 4294901760, %v41620_v1  ;;  %37486 = vmatprep.subr.mxu0 %v41622_v34  ;;  %v12492_v59 = vand.u32 4294901760, %v12491_v48 }
 0x9db   :  { %37487 = vmatpush3.msra.mxu0 %v41622_v34  ;;  %v12498_v60 = vsub.f32 %v41660_v33, %v41667_v58 }
 0x9dc   :  { %v12294_v56 = vadd.f32 %v12293_v3, %v12216_v4  ;;  %v12304_v52 = vadd.f32 %v12300_v2, %v41563_v24  ;;  %v12477_v19 = vsub.f32 %v41620_v1, %v41630_v25  ;;  %37488 = vmatprep.subr.mxu0 %v41635_v18  ;;  %v45100_v2 = vsub.s32 2, %v45176_v47  ;;  %v45177_v3 = vld [vmem:[#allocation42_spill] sm:$0xff] }
 0x9dd   :  { %37489 = vmatpush3.msra.mxu0 %v41635_v18  ;;  %v12499_v32 = vand.u32 4294901760, %v12498_v60  ;;  %v45099_v4 = vsub.s32 3, %v45176_v47  ;;  %v12892_v60 = vld [vmem:[%s45051_s4 + $0x10] sm:$0xff] }
 0x9de   :  { %v12306_v12 = vadd.f32 %v39925_v9, %v12304_v52  ;;  %v12303_v50 = vadd.f32 %v12294_v56, %v11220_v5  ;;  %v12478_v57 = vand.u32 4294901760, %v12477_v19  ;;  %37490 = vmatprep.subr.mxu0 %v41651_v10  ;;  %v12337_v5 = vrot.slane %v45177_v3, %v45100_v2 }
 0x9df   :  { %37491 = vmatpush3.msra.mxu0 %v41651_v10  ;;  %v12343_v9 = vrot.slane %v45177_v3, %v45099_v4 }
 0x9e0   :  { %v12310_v7 = vsel %vm94_vm0, %v12306_v12, 0.0  ;;  %v12305_v16 = vadd.f32 %v39926_v22, %v12303_v50  ;;  %37495 = vmatprep.subr.mxu1 %v12478_v57  ;;  %37506 = vmatprep.subr.mxu0 %v41620_v1 }
 0x9e1   :  { %12311 = vadd.xlane.f32.xlu0 %v12310_v7  ;;  %37496 = vmatpush3.msra.mxu1 %v12478_v57 }
 0x9e2   :  { %v12307_v35 = vsel %vm94_vm0, %v12305_v16, 0.0  ;;  %37497 = vmatprep.subr.mxu1 %v12485_v39 }
 0x9e3   :  { %12308 = vadd.xlane.f32.xlu1 %v12307_v35  ;;  %37498 = vmatpush3.msra.mxu1 %v12485_v39 }
 0x9e4   :  { %37499 = vmatprep.subr.mxu1 %v12492_v59 }
 0x9e5   :  { %37500 = vmatpush3.msra.mxu1 %v12492_v59 }
 0x9e6   :  { %37501 = vmatprep.subr.mxu1 %v12499_v32 }
 0x9e7   :  { %37502 = vmatpush3.msra.mxu1 %v12499_v32 }
 0x9e8   :  { %37517 = vmatprep.subr.mxu1 %v41614_v38 }
 0xa6a   :  { %v12312_v17 = vpop.xlane.xlu0 %12311 }
 0xa6b   :  { %v12315_v11 = vmul.f32 0.03125, %v12312_v17 }
 0xa6c   :  { %v12309_v24 = vpop.xlane.xlu1 %12308 }
 0xa6d   :  { %v12314_v23 = vmul.f32 0.03125, %v12309_v24  ;;  %v41605_v0 = vsub.f32 %v12306_v12, %v12315_v11 }
 0xa6f   :  { %v12316_v28 = vsub.f32 %v12305_v16, %v12314_v23  ;;  %v12319_v62 = vmul.f32 %v41605_v0, %v41605_v0 }
 0xa71   :  { %v12318_v6 = vmul.f32 %v12316_v28, %v12316_v28  ;;  %v12323_v54 = vsel %vm94_vm0, %v12319_v62, 0.0 }
 0xa73   :  { %v12320_v63 = vsel %vm94_vm0, %v12318_v6, 0.0 }
 0xa74   :  { %12321 = vadd.xlane.f32.xlu0 %v12320_v63 }
 0xa78   :  { %12324 = vadd.xlane.f32.xlu0 %v12323_v54 }
 0xafd   :  { %v12322_v13 = vpop.xlane.xlu0 %12321 }
 0xafe   :  { %v12326_v55 = vmul.f32 0.03125, %v12322_v13 }
 0xb00   :  { %v12328_v21 = vadd.f32 1e-05, %v12326_v55 }
 0xb01   :  { %v12325_v49 = vpop.xlane.xlu0 %12324 }
 0xb02   :  { %39876 = vrsqrt.f32 %v12328_v21  ;;  %v12327_v36 = vmul.f32 0.03125, %v12325_v49  ;;  %v41786_v21 = vand.u32 4294901760, %v12892_v60 }
 0xb04   :  { %v12329_v41 = vadd.f32 1e-05, %v12327_v36  ;;  %v12891_v36 = vld [vmem:[%s45051_s4 + $0x8] sm:$0xff] }
 0xb06   :  { %39878 = vrsqrt.f32 %v12329_v41 }
 0xb0f   :  { %v39877_v56 = vpop.eup %39876 }
 0xb10   :  { %v12332_v52 = vmul.f32 %v39877_v56, %v12316_v28  ;;  %v41800_v56 = vand.u32 4294901760, %v12891_v36 }
 0xb12   :  { %v12338_v12 = vmul.f32 %v12337_v5, %v12332_v52 }
 0xb13   :  { %v39879_v50 = vpop.eup %39878 }
 0xb14   :  { %v12333_v7 = vmul.f32 %v39879_v50, %v41605_v0  ;;  %v41682_v22 = vadd.f32 %v12343_v9, %v12338_v12 }
 0xb16   :  { %v12339_v16 = vmul.f32 %v12337_v5, %v12333_v7  ;;  %v12355_v35 = vsel %vm94_vm0, %v41682_v22, 0  ;;  %v41798_v5 = vsub.f32 %v12892_v60, %v41786_v21  ;;  %v41814_v7 = vsub.f32 %v12891_v36, %v41800_v56 }
 0xb17   :  { %v12429_v17 = vand.u32 4294901760, %v12355_v35 }
 0xb18   :  { %v41686_v11 = vadd.f32 %v12343_v9, %v12339_v16  ;;  %v12890_v9 = vld [vmem:[%s45051_s4] sm:$0xff]  ;;  %v41811_v50 = vand.u32 4294901760, %v41798_v5 }
 0xb19   :  { %37503 = vmatprep.mubr.f32.mxu1 %v12429_v17  ;;  %v12430_v24 = vsub.f32 %v12355_v35, %v12429_v17  ;;  %v41816_v16 = vand.u32 4294901760, %v12890_v9 }
 0xb1a   :  { %v12358_v23 = vsel %vm94_vm0, %v41686_v11, 0 }
 0xb1b   :  { %v12439_v28 = vand.u32 4294901760, %v12358_v23  ;;  %v12431_v6 = vand.u32 4294901760, %v12430_v24 }
 0xb1d   :  { %v12440_v63 = vsub.f32 %v12358_v23, %v12439_v28  ;;  %37504 = vmatmul.mubr.f32.vlgmr.msra.gmra.mxu1 %v12439_v28  ;;  %v12432_v62 = vsub.f32 %v12430_v24, %v12431_v6  ;;  %v41828_v23 = vsub.f32 %v12890_v9, %v41816_v16 }
 0xb1e   :  { %37518 = vmatpush3.msra.mxu1 %v41614_v38  ;;  %37525 = vmatprep.mubr.f32.mxu1 %v12431_v6 }
 0xb1f   :  { %37519 = vmatprep.subr.mxu1 %v41622_v34  ;;  %v12433_v0 = vand.u32 4294901760, %v12432_v62  ;;  %v12441_v54 = vand.u32 4294901760, %v12440_v63  ;;  %v41835_v62 = vand.u32 4294901760, %v41828_v23 }
 0xb20   :  { %37520 = vmatpush3.msra.mxu1 %v41622_v34 }
 0xb21   :  { %37521 = vmatprep.subr.mxu1 %v41635_v18  ;;  %37492 = vmatprep.mubr.f32.mxu0 %v12433_v0  ;;  %v12442_v20 = vsub.f32 %v12440_v63, %v12441_v54 }
 0xb22   :  { %37522 = vmatpush3.msra.mxu1 %v41635_v18 }
 0xb23   :  { %37523 = vmatprep.subr.mxu1 %v41651_v10  ;;  %v12443_v29 = vand.u32 4294901760, %v12442_v20 }
 0xb24   :  { %37524 = vmatpush3.msra.mxu1 %v41651_v10 }
 0xb25   :  { %37526 = vmatmul.mubr.f32.vlgmr.msra.gmra.mxu1 %v12441_v54  ;;  %37539 = vmatprep.subr.mxu1 %v41614_v38  ;;  %v13070_v54 = vsub.f32 %v41828_v23, %v41835_v62 }
 0xb26   :  { %37493 = vmatmul.mubr.f32.vlgmr.msra.gmra.mxu0 %v12443_v29  ;;  %37540 = vmatpush3.msra.mxu1 %v41614_v38  ;;  %v12897_v38 = vld [vmem:[%s45051_s4 + $0x38] sm:$0xff]  ;;  %v45095_v29 = vsub.s32 4, %v45176_v47 }
 0xb27   :  { %37507 = vmatpush3.msra.mxu0 %v41620_v1  ;;  %37547 = vmatprep.mubr.f32.mxu1 %v12429_v17  ;;  %v41723_v1 = vand.u32 4294901760, %v12897_v38  ;;  %v13071_v20 = vand.u32 4294901760, %v13070_v54 }
 0xb28   :  { %37508 = vmatprep.subr.mxu0 %v41633_v37  ;;  %37514 = vmatprep.mubr.f32.mxu0 %v12430_v24  ;;  %v41825_v24 = vand.u32 4294901760, %v41814_v7 }
 0xb29   :  { %37541 = vmatprep.subr.mxu1 %v41622_v34  ;;  %37509 = vmatpush3.msra.mxu0 %v41633_v37  ;;  %v41729_v30 = vsub.f32 %v12897_v38, %v41723_v1  ;;  %v12895_v37 = vld [vmem:[%s45051_s4 + $0x28] sm:$0xff] }
 0xb2a   :  { %37542 = vmatpush3.msra.mxu1 %v41622_v34  ;;  %37510 = vmatprep.subr.mxu0 %v41648_v8  ;;  %v12896_v34 = vld [vmem:[%s45051_s4 + $0x30] sm:$0xff]  ;;  %v41744_v19 = vand.u32 4294901760, %v12895_v37 }
 0xb2b   :  { %37543 = vmatprep.subr.mxu1 %v41635_v18  ;;  %37511 = vmatpush3.msra.mxu0 %v41648_v8 }
 0xb2c   :  { %37544 = vmatpush3.msra.mxu1 %v41635_v18  ;;  %37512 = vmatprep.subr.mxu0 %v41660_v33  ;;  %v41739_v18 = vand.u32 4294901760, %v41729_v30  ;;  %v41757_v57 = vsub.f32 %v12895_v37, %v41744_v19 }
 0xb2d   :  { %37545 = vmatprep.subr.mxu1 %v41651_v10  ;;  %37513 = vmatpush3.msra.mxu0 %v41660_v33 }
 0xb2e   :  { %37546 = vmatpush3.msra.mxu1 %v41651_v10  ;;  %37515 = vmatmul.mubr.f32.vlgmr.msra.gmra.mxu0 %v12440_v63  ;;  %v13021_v8 = vsub.f32 %v41729_v30, %v41739_v18  ;;  %v41769_v48 = vand.u32 4294901760, %v41757_v57  ;;  %v13063_v63 = vsub.f32 %v41814_v7, %v41825_v24 }
 0xb2f   :  { %37528 = vmatprep.subr.mxu0 %v41630_v25  ;;  %37548 = vmatmul.mubr.f32.vlgmr.msra.gmra.mxu1 %v12439_v28 }
 0xb30   :  { %37529 = vmatpush3.msra.mxu0 %v41630_v25  ;;  %37536 = vmatprep.mubr.f32.mxu0 %v12429_v17  ;;  %v41731_v25 = vand.u32 4294901760, %v12896_v34  ;;  %v13022_v33 = vand.u32 4294901760, %v13021_v8  ;;  %v13035_v13 = vsub.f32 %v41757_v57, %v41769_v48  ;;  %v13056_v17 = vsub.f32 %v41798_v5, %v41811_v50 }
 0xb31   :  { %37530 = vmatprep.subr.mxu0 %v41645_v46  ;;  %v13064_v0 = vand.u32 4294901760, %v13063_v63 }
 0xb32   :  { %37531 = vmatpush3.msra.mxu0 %v41645_v46  ;;  %v41742_v40 = vsub.f32 %v12896_v34, %v41731_v25  ;;  %v12894_v46 = vld [vmem:[%s45051_s4 + $0x20] sm:$0xff]  ;;  %37569 = vmatprep.subr.mxu1 %v13022_v33  ;;  %v13036_v41 = vand.u32 4294901760, %v13035_v13  ;;  %v13057_v6 = vand.u32 4294901760, %v13056_v17 }
 0xb33   :  { %37532 = vmatprep.subr.mxu0 %v41657_v14  ;;  %v41759_v15 = vand.u32 4294901760, %v12894_v46  ;;  %37570 = vmatpush3.msra.mxu1 %v13022_v33  ;;  %v41846_v34 = vld [vmem:[%s45052_s5] sm:$0xff] }
 0xb34   :  { %37533 = vmatpush3.msra.mxu0 %v41657_v14  ;;  %v41754_v10 = vand.u32 4294901760, %v41742_v40  ;;  %v12893_v14 = vld [vmem:[%s45051_s4 + $0x18] sm:$0xff]  ;;  %v12353_v37 = vrot.slane %v41846_v34, %v45095_v29 }
 0xb35   :  { %37534 = vmatprep.subr.mxu0 %v41667_v58  ;;  %v41775_v59 = vand.u32 4294901760, %v12893_v14 }
 0xb36   :  { %37535 = vmatpush3.msra.mxu0 %v41667_v58  ;;  %v13028_v39 = vsub.f32 %v41742_v40, %v41754_v10  ;;  %v41772_v58 = vsub.f32 %v12894_v46, %v41759_v15 }
 0xb37   :  { %37537 = vmatmul.mubr.f32.vlgmr.msra.gmra.mxu0 %v12439_v28  ;;  %37550 = vmatprep.subr.mxu0 %v41723_v1  ;;  %v41789_v49 = vsub.f32 %v12893_v14, %v41775_v59 }
 0xb38   :  { %37551 = vmatpush3.msra.mxu0 %v41723_v1  ;;  %v13029_v32 = vand.u32 4294901760, %v13028_v39  ;;  %v41784_v55 = vand.u32 4294901760, %v41772_v58 }
 0xb39   :  { %37552 = vmatprep.subr.mxu0 %v41731_v25  ;;  %v41804_v52 = vand.u32 4294901760, %v41789_v49 }
 0xb3a   :  { %37553 = vmatpush3.msra.mxu0 %v41731_v25  ;;  %37571 = vmatprep.subr.mxu1 %v13029_v32  ;;  %v13042_v3 = vsub.f32 %v41772_v58, %v41784_v55 }
 0xb3b   :  { %37554 = vmatprep.subr.mxu0 %v41744_v19  ;;  %37572 = vmatpush3.msra.mxu1 %v13029_v32  ;;  %v13049_v35 = vsub.f32 %v41789_v49, %v41804_v52 }
 0xb3c   :  { %37555 = vmatpush3.msra.mxu0 %v41744_v19  ;;  %37573 = vmatprep.subr.mxu1 %v13036_v41  ;;  %v13043_v12 = vand.u32 4294901760, %v13042_v3 }
 0xb3d   :  { %37556 = vmatprep.subr.mxu0 %v41759_v15  ;;  %37574 = vmatpush3.msra.mxu1 %v13036_v41  ;;  %v13050_v28 = vand.u32 4294901760, %v13049_v35 }
 0xb3e   :  { %37557 = vmatpush3.msra.mxu0 %v41759_v15  ;;  %37575 = vmatprep.subr.mxu1 %v13043_v12 }
 0xb3f   :  { %37558 = vmatprep.subr.mxu0 %v41775_v59  ;;  %37576 = vmatpush3.msra.mxu1 %v13043_v12 }
 0xb40   :  { %37559 = vmatpush3.msra.mxu0 %v41775_v59  ;;  %37577 = vmatprep.subr.mxu1 %v13050_v28 }
 0xb41   :  { %37560 = vmatprep.subr.mxu0 %v41786_v21  ;;  %37578 = vmatpush3.msra.mxu1 %v13050_v28 }
 0xb42   :  { %37561 = vmatpush3.msra.mxu0 %v41786_v21  ;;  %37579 = vmatprep.subr.mxu1 %v13057_v6 }
 0xb43   :  { %37562 = vmatprep.subr.mxu0 %v41800_v56  ;;  %37580 = vmatpush3.msra.mxu1 %v13057_v6 }
 0xb44   :  { %37563 = vmatpush3.msra.mxu0 %v41800_v56  ;;  %37581 = vmatprep.subr.mxu1 %v13064_v0 }
 0xb45   :  { %37564 = vmatprep.subr.mxu0 %v41816_v16  ;;  %37582 = vmatpush3.msra.mxu1 %v13064_v0 }
 0xb46   :  { %37565 = vmatpush3.msra.mxu0 %v41816_v16  ;;  %37583 = vmatprep.subr.mxu1 %v13071_v20 }
 0xb47   :  { %37588 = vmatprep.subr.mxu0 %v41729_v30  ;;  %37584 = vmatpush3.msra.mxu1 %v13071_v20 }
 0xb48   :  { %37607 = vmatprep.subr.mxu1 %v41723_v1 }
 0xbdd   :  { %v37505_v46 = vpop.f32.mrf.mxu1 }
 0xbdf   :  { %v12536_v60 = vpop.f32.mrf.mxu1 }
 0xbe5   :  { %v37527_v13 = vpop.f32.mrf.mxu1 }
 0xbe6   :  { %v37494_v38 = vpop.f32.mrf.mxu0 }
 0xbe7   :  { %v12446_v14 = vadd.f32 %v37494_v38, %v12353_v37  ;;  %v12706_v12 = vpop.f32.mrf.mxu1 }
 0xbe8   :  { %v12435_v8 = vpop.f32.mrf.mxu0 }
 0xbe9   :  { %v12436_v33 = vadd.f32 %v12435_v8, %v12353_v37  ;;  %v12543_v32 = vadd.f32 %v37505_v46, %v12446_v14 }
 0xbeb   :  { %v12537_v3 = vadd.f32 %v12536_v60, %v12436_v33 }
 0xbee   :  { %v37516_v39 = vpop.f32.mrf.mxu0 }
 0xbef   :  { %v12630_v41 = vadd.f32 %v37516_v39, %v12543_v32  ;;  %v37549_v17 = vpop.f32.mrf.mxu1 }
 0xbf0   :  { %v12622_v36 = vpop.f32.mrf.mxu0 }
 0xbf1   :  { %v12623_v9 = vadd.f32 %v12622_v36, %v12537_v3  ;;  %v12715_v35 = vadd.f32 %v37527_v13, %v12630_v41  ;;  %v12878_v29 = vpop.f32.mrf.mxu1 }
 0xbf3   :  { %v12707_v63 = vadd.f32 %v12706_v12, %v12623_v9 }
 0xbf7   :  { %v37538_v28 = vpop.f32.mrf.mxu0 }
 0xbf8   :  { %v12804_v6 = vadd.f32 %v37538_v28, %v12715_v35 }
 0xbf9   :  { %v12797_v0 = vpop.f32.mrf.mxu0 }
 0xbfa   :  { %v12885_v54 = vadd.f32 %v37549_v17, %v12804_v6  ;;  %v12798_v20 = vadd.f32 %v12797_v0, %v12707_v63 }
 0xbfc   :  { %v12889_v38 = vmax.f32 %v12885_v54, 0.0  ;;  %v12879_v37 = vadd.f32 %v12878_v29, %v12798_v20 }
 0xbfe   :  { %v12906_v8 = vsel %vm7968_vm4, %v12889_v38, 0  ;;  %v12888_v46 = vmax.f32 %v12879_v37, 0.0 }
 0xbff   :  { %v41852_v14 = vand.u32 4294901760, %v12906_v8 }
 0xc00   :  { %v12903_v33 = vsel %vm7968_vm4, %v12888_v46, 0 }
 0xc01   :  { %v12992_v39 = vsub.f32 %v12906_v8, %v41852_v14  ;;  %v12981_v60 = vand.u32 4294901760, %v12903_v33 }
 0xc03   :  { %v12993_v32 = vand.u32 4294901760, %v12992_v39  ;;  %v12982_v13 = vsub.f32 %v12903_v33, %v12981_v60  ;;  %37585 = vmatprep.mubr.f32.mxu1 %v12981_v60  ;;  %v34640_v33 = vld [vmem:[%s45048_s1 + $0x38] sm:$0xff] }
 0xc04   :  { %37586 = vmatmul.mubr.f32.vlgmr.msra.gmra.mxu1 %v41852_v14 }
 0xc05   :  { %37608 = vmatpush3.msra.mxu1 %v41723_v1  ;;  %v12983_v36 = vand.u32 4294901760, %v12982_v13  ;;  %v12994_v41 = vsub.f32 %v12992_v39, %v12993_v32 }
 0xc06   :  { %37609 = vmatprep.subr.mxu1 %v41731_v25 }
 0xc07   :  { %37610 = vmatpush3.msra.mxu1 %v41731_v25  ;;  %37623 = vmatprep.mubr.f32.mxu1 %v12983_v36  ;;  %v12984_v29 = vsub.f32 %v12982_v13, %v12983_v36  ;;  %v12995_v9 = vand.u32 4294901760, %v12994_v41  ;;  %v34638_v36 = vld [vmem:[%s45048_s1 + $0x28] sm:$0xff] }
 0xc08   :  { %37611 = vmatprep.subr.mxu1 %v41744_v19 }
 0xc09   :  { %37612 = vmatpush3.msra.mxu1 %v41744_v19  ;;  %v12985_v3 = vand.u32 4294901760, %v12984_v29 }
 0xc0a   :  { %37613 = vmatprep.subr.mxu1 %v41759_v15 }
 0xc0b   :  { %37614 = vmatpush3.msra.mxu1 %v41759_v15  ;;  %37566 = vmatprep.mubr.f32.mxu0 %v12985_v3  ;;  %v41963_v3 = vand.u32 4294901760, %v34638_v36 }
 0xc0c   :  { %37615 = vmatprep.subr.mxu1 %v41775_v59  ;;  %37567 = vmatmul.mubr.f32.vlgmr.msra.gmra.mxu0 %v12995_v9  ;;  %v34637_v9 = vld [vmem:[%s45048_s1 + $0x20] sm:$0xff] }
 0xc0d   :  { %37589 = vmatpush3.msra.mxu0 %v41729_v30  ;;  %37616 = vmatpush3.msra.mxu1 %v41775_v59 }
 0xc0e   :  { %37590 = vmatprep.subr.mxu0 %v41742_v40  ;;  %37604 = vmatprep.mubr.f32.mxu0 %v12982_v13 }
 0xc0f   :  { %37617 = vmatprep.subr.mxu1 %v41786_v21  ;;  %37591 = vmatpush3.msra.mxu0 %v41742_v40 }
 0xc10   :  { %37618 = vmatpush3.msra.mxu1 %v41786_v21  ;;  %37592 = vmatprep.subr.mxu0 %v41757_v57 }
 0xc11   :  { %37619 = vmatprep.subr.mxu1 %v41800_v56  ;;  %37593 = vmatpush3.msra.mxu0 %v41757_v57 }
 0xc12   :  { %37620 = vmatpush3.msra.mxu1 %v41800_v56  ;;  %37594 = vmatprep.subr.mxu0 %v41772_v58 }
 0xc13   :  { %37621 = vmatprep.subr.mxu1 %v41816_v16  ;;  %37595 = vmatpush3.msra.mxu0 %v41772_v58 }
 0xc14   :  { %37622 = vmatpush3.msra.mxu1 %v41816_v16  ;;  %37596 = vmatprep.subr.mxu0 %v41789_v49 }
 0xc15   :  { %37624 = vmatmul.mubr.f32.vlgmr.msra.gmra.mxu1 %v12993_v32  ;;  %37645 = vmatprep.subr.mxu1 %v41723_v1 }
 0xc16   :  { %37597 = vmatpush3.msra.mxu0 %v41789_v49  ;;  %37646 = vmatpush3.msra.mxu1 %v41723_v1  ;;  %v45098_v1 = vsub.s32 5, %v45176_v47 }
 0xc17   :  { %37661 = vmatprep.mubr.f32.mxu1 %v12981_v60  ;;  %37598 = vmatprep.subr.mxu0 %v41798_v5 }
 0xc18   :  { %37647 = vmatprep.subr.mxu1 %v41731_v25  ;;  %37599 = vmatpush3.msra.mxu0 %v41798_v5 }
 0xc19   :  { %37648 = vmatpush3.msra.mxu1 %v41731_v25  ;;  %37600 = vmatprep.subr.mxu0 %v41814_v7  ;;  %v12901_v25 = vrot.slane %v41846_v34, %v45098_v1 }
 0xc1a   :  { %37649 = vmatprep.subr.mxu1 %v41744_v19  ;;  %37601 = vmatpush3.msra.mxu0 %v41814_v7 }
 0xc1b   :  { %37650 = vmatpush3.msra.mxu1 %v41744_v19  ;;  %37602 = vmatprep.subr.mxu0 %v41828_v23 }
 0xc1c   :  { %37651 = vmatprep.subr.mxu1 %v41759_v15  ;;  %37603 = vmatpush3.msra.mxu0 %v41828_v23 }
 0xc1d   :  { %37652 = vmatpush3.msra.mxu1 %v41759_v15  ;;  %37605 = vmatmul.mubr.f32.vlgmr.msra.gmra.mxu0 %v12992_v39  ;;  %v41942_v39 = vand.u32 4294901760, %v34640_v33 }
 0xc1e   :  { %37626 = vmatprep.subr.mxu0 %v41739_v18  ;;  %37653 = vmatprep.subr.mxu1 %v41775_v59 }
 0xc1f   :  { %37627 = vmatpush3.msra.mxu0 %v41739_v18  ;;  %37642 = vmatprep.mubr.f32.mxu0 %v12981_v60  ;;  %v34639_v60 = vld [vmem:[%s45048_s1 + $0x30] sm:$0xff]  ;;  %v41948_v32 = vsub.f32 %v34640_v33, %v41942_v39 }
 0xc20   :  { %37654 = vmatpush3.msra.mxu1 %v41775_v59  ;;  %37628 = vmatprep.subr.mxu0 %v41754_v10  ;;  %v41950_v13 = vand.u32 4294901760, %v34639_v60 }
 0xc21   :  { %37655 = vmatprep.subr.mxu1 %v41786_v21  ;;  %37629 = vmatpush3.msra.mxu0 %v41754_v10  ;;  %v41958_v41 = vand.u32 4294901760, %v41948_v32 }
 0xc22   :  { %37656 = vmatpush3.msra.mxu1 %v41786_v21  ;;  %37630 = vmatprep.subr.mxu0 %v41769_v48  ;;  %v41961_v29 = vsub.f32 %v34639_v60, %v41950_v13 }
 0xc23   :  { %37657 = vmatprep.subr.mxu1 %v41800_v56  ;;  %37631 = vmatpush3.msra.mxu0 %v41769_v48 }
 0xc24   :  { %37658 = vmatpush3.msra.mxu1 %v41800_v56  ;;  %37632 = vmatprep.subr.mxu0 %v41784_v55 }
 0xc25   :  { %37659 = vmatprep.subr.mxu1 %v41816_v16  ;;  %37633 = vmatpush3.msra.mxu0 %v41784_v55 }
 0xc26   :  { %37660 = vmatpush3.msra.mxu1 %v41816_v16  ;;  %37634 = vmatprep.subr.mxu0 %v41804_v52 }
 0xc27   :  { %37662 = vmatmul.mubr.f32.vlgmr.msra.gmra.mxu1 %v41852_v14  ;;  %37635 = vmatpush3.msra.mxu0 %v41804_v52 }
 0xc28   :  { %37636 = vmatprep.subr.mxu0 %v41811_v50 }
 0xc29   :  { %37637 = vmatpush3.msra.mxu0 %v41811_v50 }
 0xc2a   :  { %37638 = vmatprep.subr.mxu0 %v41825_v24 }
 0xc2b   :  { %37639 = vmatpush3.msra.mxu0 %v41825_v24 }
 0xc2c   :  { %37640 = vmatprep.subr.mxu0 %v41835_v62 }
 0xc2d   :  { %37641 = vmatpush3.msra.mxu0 %v41835_v62 }
 0xc2e   :  { %37643 = vmatmul.mubr.f32.vlgmr.msra.gmra.mxu0 %v41852_v14  ;;  %37664 = vmatprep.subr.mxu0 %v41942_v39 }
 0xc2f   :  { %37665 = vmatpush3.msra.mxu0 %v41942_v39 }
 0xc30   :  { %37666 = vmatprep.subr.mxu0 %v41950_v13 }
 0xc31   :  { %37667 = vmatpush3.msra.mxu0 %v41950_v13 }
 0xc32   :  { %37668 = vmatprep.subr.mxu0 %v41963_v3 }
 0xc33   :  { %37669 = vmatpush3.msra.mxu0 %v41963_v3 }
 0xcc4   :  { %v37587_v18 = vpop.f32.mrf.mxu1 }
 0xcc6   :  { %v13108_v15 = vpop.f32.mrf.mxu1 }
 0xccc   :  { %v37568_v30 = vpop.f32.mrf.mxu0 }
 0xccd   :  { %v12998_v19 = vadd.f32 %v37568_v30, %v12901_v25  ;;  %v13662_v30 = vsub.f32 %v41948_v32, %v41958_v41 }
 0xcce   :  { %v12987_v40 = vpop.f32.mrf.mxu0 }
 0xccf   :  { %v12988_v57 = vadd.f32 %v12987_v40, %v12901_v25  ;;  %v13115_v48 = vadd.f32 %v37587_v18, %v12998_v19  ;;  %v41973_v25 = vand.u32 4294901760, %v41961_v29  ;;  %v41976_v18 = vsub.f32 %v34638_v36, %v41963_v3 }
 0xcd0   :  { %v41979_v40 = vand.u32 4294901760, %v34637_v9  ;;  %v13663_v19 = vand.u32 4294901760, %v13662_v30 }
 0xcd1   :  { %v13109_v21 = vadd.f32 %v13108_v15, %v12988_v57  ;;  %v41985_v57 = vand.u32 4294901760, %v41976_v18 }
 0xcd2   :  { %v41988_v15 = vsub.f32 %v34637_v9, %v41979_v40  ;;  %37670 = vmatprep.subr.mxu0 %v41979_v40  ;;  %37675 = vmatprep.subr.mxu1 %v13663_v19 }
 0xcd3   :  { %37671 = vmatpush3.msra.mxu0 %v41979_v40  ;;  %37676 = vmatpush3.msra.mxu1 %v13663_v19 }
 0xcd4   :  { %37686 = vmatprep.subr.mxu0 %v41948_v32 }
 0xcd5   :  { %v37625_v58 = vpop.f32.mrf.mxu1 }
 0xcd7   :  { %v13290_v5 = vpop.f32.mrf.mxu1 }
 0xcdd   :  { %v37606_v10 = vpop.f32.mrf.mxu0 }
 0xcde   :  { %v13210_v55 = vadd.f32 %v37606_v10, %v13115_v48  ;;  %v13669_v10 = vsub.f32 %v41961_v29, %v41973_v25 }
 0xcdf   :  { %v13202_v59 = vpop.f32.mrf.mxu0 }
 0xce0   :  { %v13203_v49 = vadd.f32 %v13202_v59, %v13109_v21  ;;  %v13299_v56 = vadd.f32 %v37625_v58, %v13210_v55  ;;  %v13670_v48 = vand.u32 4294901760, %v13669_v10  ;;  %v13676_v58 = vsub.f32 %v41976_v18, %v41985_v57 }
 0xce1   :  { %v41995_v59 = vand.u32 4294901760, %v41988_v15 }
 0xce2   :  { %v13291_v16 = vadd.f32 %v13290_v5, %v13203_v49  ;;  %37677 = vmatprep.subr.mxu1 %v13670_v48  ;;  %v13677_v55 = vand.u32 4294901760, %v13676_v58 }
 0xce3   :  { %37678 = vmatpush3.msra.mxu1 %v13670_v48  ;;  %v13683_v21 = vsub.f32 %v41988_v15, %v41995_v59 }
 0xce4   :  { %37679 = vmatprep.subr.mxu1 %v13677_v55 }
 0xce5   :  { %37680 = vmatpush3.msra.mxu1 %v13677_v55  ;;  %v13684_v49 = vand.u32 4294901760, %v13683_v21 }
 0xce7   :  { %v37663_v52 = vpop.f32.mrf.mxu1  ;;  %37681 = vmatprep.subr.mxu1 %v13684_v49 }
 0xce8   :  { %37682 = vmatpush3.msra.mxu1 %v13684_v49 }
 0xce9   :  { %v13478_v62 = vpop.f32.mrf.mxu1  ;;  %37697 = vmatprep.subr.mxu1 %v41942_v39 }
 0xcee   :  { %v37644_v50 = vpop.f32.mrf.mxu0 }
 0xcef   :  { %v13400_v7 = vadd.f32 %v37644_v50, %v13299_v56 }
 0xcf0   :  { %v13393_v24 = vpop.f32.mrf.mxu0 }
 0xcf1   :  { %v13394_v23 = vadd.f32 %v13393_v24, %v13291_v16  ;;  %v13485_v12 = vadd.f32 %v37663_v52, %v13400_v7  ;;  %v45097_v24 = vsub.s32 6, %v45176_v47 }
 0xcf3   :  { %v13479_v35 = vadd.f32 %v13478_v62, %v13394_v23  ;;  %v13489_v6 = vadd.f32 %v13485_v12, %v41686_v11  ;;  %v45096_v23 = vsub.s32 7, %v45176_v47  ;;  %v13519_v62 = vrot.slane %v41846_v34, %v45097_v24 }
 0xcf5   :  { %v13488_v17 = vadd.f32 %v13479_v35, %v41682_v22  ;;  %v13493_v63 = vsel %vm94_vm0, %v13489_v6, 0.0 }
 0xcf7   :  { %v13490_v28 = vsel %vm94_vm0, %v13488_v17, 0.0 }
 0xcf8   :  { %13491 = vadd.xlane.f32.xlu0 %v13490_v28 }
 0xcfc   :  { %13494 = vadd.xlane.f32.xlu0 %v13493_v63 }
 0xd81   :  { %v13492_v0 = vpop.xlane.xlu0 %13491 }
 0xd82   :  { %v13496_v54 = vmul.f32 0.03125, %v13492_v0 }
 0xd84   :  { %v41929_v20 = vsub.f32 %v13488_v17, %v13496_v54  ;;  %v13525_v17 = vrot.slane %v41846_v34, %v45096_v23 }
 0xd85   :  { %v13495_v38 = vpop.xlane.xlu0 %13494 }
 0xd86   :  { %v13497_v37 = vmul.f32 0.03125, %v13495_v38  ;;  %v13500_v8 = vmul.f32 %v41929_v20, %v41929_v20 }
 0xd88   :  { %v41933_v46 = vsub.f32 %v13489_v6, %v13497_v37  ;;  %v13502_v22 = vsel %vm94_vm0, %v13500_v8, 0.0 }
 0xd89   :  { %13503 = vadd.xlane.f32.xlu0 %v13502_v22 }
 0xd8a   :  { %v13501_v11 = vmul.f32 %v41933_v46, %v41933_v46 }
 0xd8c   :  { %v13505_v14 = vsel %vm94_vm0, %v13501_v11, 0.0 }
 0xd8d   :  { %13506 = vadd.xlane.f32.xlu0 %v13505_v14 }
 0xe12   :  { %v13504_v5 = vpop.xlane.xlu0 %13503 }
 0xe13   :  { %v13508_v56 = vmul.f32 0.03125, %v13504_v5 }
 0xe15   :  { %v13510_v52 = vadd.f32 1e-05, %v13508_v56 }
 0xe16   :  { %v13507_v50 = vpop.xlane.xlu0 %13506 }
 0xe17   :  { %39880 = vrsqrt.f32 %v13510_v52  ;;  %v13509_v7 = vmul.f32 0.03125, %v13507_v50 }
 0xe19   :  { %v13511_v16 = vadd.f32 1e-05, %v13509_v7 }
 0xe1b   :  { %39882 = vrsqrt.f32 %v13511_v16 }
 0xe24   :  { %v39881_v12 = vpop.eup %39880 }
 0xe25   :  { %v13514_v35 = vmul.f32 %v39881_v12, %v41929_v20 }
 0xe27   :  { %v13520_v28 = vmul.f32 %v13519_v62, %v13514_v35 }
 0xe28   :  { %v39883_v6 = vpop.eup %39882 }
 0xe29   :  { %v13515_v63 = vmul.f32 %v39883_v6, %v41933_v46  ;;  %v42011_v0 = vadd.f32 %v13525_v17, %v13520_v28 }
 0xe2b   :  { %45178 = vst [vmem:[#allocation24_spill] sm:$0xff] %v42011_v0  ;;  %v13521_v54 = vmul.f32 %v13519_v62, %v13515_v63  ;;  %v13540_v38 = vsel %vm94_vm0, %v42011_v0, 0 }
 0xe2c   :  { %v13614_v37 = vand.u32 4294901760, %v13540_v38 }
 0xe2d   :  { %v42015_v8 = vadd.f32 %v13525_v17, %v13521_v54 }
 0xe2e   :  { %37683 = vmatprep.mubr.f32.mxu1 %v13614_v37  ;;  %v13615_v22 = vsub.f32 %v13540_v38, %v13614_v37 }
 0xe2f   :  { %45179 = vst [vmem:[#allocation23_spill] sm:$0xff] %v42015_v8  ;;  %v13543_v20 = vsel %vm94_vm0, %v42015_v8, 0 }
 0xe30   :  { %v13624_v11 = vand.u32 4294901760, %v13543_v20  ;;  %v13616_v34 = vand.u32 4294901760, %v13615_v22 }
 0xe32   :  { %v13625_v14 = vsub.f32 %v13543_v20, %v13624_v11  ;;  %37684 = vmatmul.mubr.f32.vlgmr.msra.gmra.mxu1 %v13624_v11  ;;  %v13617_v33 = vsub.f32 %v13615_v22, %v13616_v34 }
 0xe33   :  { %37698 = vmatpush3.msra.mxu1 %v41942_v39  ;;  %37705 = vmatprep.mubr.f32.mxu1 %v13616_v34 }
 0xe34   :  { %37699 = vmatprep.subr.mxu1 %v41950_v13  ;;  %v13618_v46 = vand.u32 4294901760, %v13617_v33  ;;  %v13626_v60 = vand.u32 4294901760, %v13625_v14 }
 0xe35   :  { %37700 = vmatpush3.msra.mxu1 %v41950_v13 }
 0xe36   :  { %37701 = vmatprep.subr.mxu1 %v41963_v3  ;;  %37672 = vmatprep.mubr.f32.mxu0 %v13618_v46  ;;  %v13627_v36 = vsub.f32 %v13625_v14, %v13626_v60 }
 0xe37   :  { %37702 = vmatpush3.msra.mxu1 %v41963_v3 }
 0xe38   :  { %37703 = vmatprep.subr.mxu1 %v41979_v40  ;;  %v13628_v9 = vand.u32 4294901760, %v13627_v36 }
 0xe39   :  { %37704 = vmatpush3.msra.mxu1 %v41979_v40 }
 0xe3a   :  { %37706 = vmatmul.mubr.f32.vlgmr.msra.gmra.mxu1 %v13626_v60  ;;  %37719 = vmatprep.subr.mxu1 %v41942_v39 }
 0xe3b   :  { %37673 = vmatmul.mubr.f32.vlgmr.msra.gmra.mxu0 %v13628_v9  ;;  %37720 = vmatpush3.msra.mxu1 %v41942_v39 }
 0xe3c   :  { %37687 = vmatpush3.msra.mxu0 %v41948_v32  ;;  %37727 = vmatprep.mubr.f32.mxu1 %v13614_v37  ;;  %v34636_v32 = vld [vmem:[%s45052_s5 + $0x8] sm:$0xff] }
 0xe3d   :  { %37688 = vmatprep.subr.mxu0 %v41961_v29  ;;  %37694 = vmatprep.mubr.f32.mxu0 %v13615_v22 }
 0xe3e   :  { %37721 = vmatprep.subr.mxu1 %v41950_v13  ;;  %37689 = vmatpush3.msra.mxu0 %v41961_v29  ;;  %v45180_v29 = vsub.s32 0, %v45176_v47 }
 0xe3f   :  { %37722 = vmatpush3.msra.mxu1 %v41950_v13  ;;  %37690 = vmatprep.subr.mxu0 %v41976_v18 }
 0xe40   :  { %37723 = vmatprep.subr.mxu1 %v41963_v3  ;;  %37691 = vmatpush3.msra.mxu0 %v41976_v18 }
 0xe41   :  { %37724 = vmatpush3.msra.mxu1 %v41963_v3  ;;  %37692 = vmatprep.subr.mxu0 %v41988_v15  ;;  %v13538_v3 = vrot.slane %v34636_v32, %v45180_v29 }
 0xe42   :  { %37725 = vmatprep.subr.mxu1 %v41979_v40  ;;  %37693 = vmatpush3.msra.mxu0 %v41988_v15 }
 0xe43   :  { %37726 = vmatpush3.msra.mxu1 %v41979_v40  ;;  %37695 = vmatmul.mubr.f32.vlgmr.msra.gmra.mxu0 %v13625_v14 }
 0xe44   :  { %37708 = vmatprep.subr.mxu0 %v41958_v41  ;;  %37728 = vmatmul.mubr.f32.vlgmr.msra.gmra.mxu1 %v13624_v11 }
 0xe45   :  { %37709 = vmatpush3.msra.mxu0 %v41958_v41  ;;  %37716 = vmatprep.mubr.f32.mxu0 %v13614_v37 }
 0xe46   :  { %37710 = vmatprep.subr.mxu0 %v41973_v25  ;;  %37735 = vmatprep.subr.mxu1 %v45125_v61 }
 0xe47   :  { %37711 = vmatpush3.msra.mxu0 %v41973_v25  ;;  %37737 = vmatprep.mubr.msk.f32.mxu1 %vm39953_vm1, %v45125_v61 }
 0xe48   :  { %37712 = vmatprep.subr.mxu0 %v41985_v57 }
 0xe49   :  { %37713 = vmatpush3.msra.mxu0 %v41985_v57 }
 0xe4a   :  { %37714 = vmatprep.subr.mxu0 %v41995_v59 }
 0xe4b   :  { %37715 = vmatpush3.msra.mxu0 %v41995_v59 }
 0xe4c   :  { %37717 = vmatmul.mubr.f32.vlgmr.msra.gmra.mxu0 %v13624_v11  ;;  %37730 = vmatprep.subr.mxu0 %v45125_v61 }
 0xe4d   :  { %37732 = vmatprep.mubr.msk.f32.mxu0 %vm39953_vm1, %v45125_v61 }
 0xef2   :  { %v37685_v13 = vpop.f32.mrf.mxu1 }
 0xef4   :  { %v13721_v18 = vpop.f32.mrf.mxu1 }
 0xefa   :  { %v37707_v40 = vpop.f32.mrf.mxu1 }
 0xefb   :  { %v37674_v39 = vpop.f32.mrf.mxu0 }
 0xefc   :  { %v13891_v15 = vpop.f32.mrf.mxu1  ;;  %v13631_v59 = vadd.f32 %v37674_v39, %v13538_v3 }
 0xefd   :  { %v13620_v41 = vpop.f32.mrf.mxu0 }
 0xefe   :  { %v13621_v30 = vadd.f32 %v13620_v41, %v13538_v3  ;;  %v13728_v56 = vadd.f32 %v37685_v13, %v13631_v59 }
 0xf00   :  { %v13722_v10 = vadd.f32 %v13721_v18, %v13621_v30 }
 0xf03   :  { %v37696_v25 = vpop.f32.mrf.mxu0 }
 0xf04   :  { %v37729_v48 = vpop.f32.mrf.mxu1  ;;  %v13815_v50 = vadd.f32 %v37696_v25, %v13728_v56 }
 0xf05   :  { %v13807_v19 = vpop.f32.mrf.mxu0 }
 0xf06   :  { %v13808_v57 = vadd.f32 %v13807_v19, %v13722_v10  ;;  %v14063_v5 = vpop.f32.mrf.mxu1  ;;  %v13900_v7 = vadd.f32 %v37707_v40, %v13815_v50 }
 0xf08   :  { %v13892_v55 = vadd.f32 %v13891_v15, %v13808_v57 }
 0xf0c   :  { %v37718_v58 = vpop.f32.mrf.mxu0 }
 0xf0d   :  { %v13989_v16 = vadd.f32 %v37718_v58, %v13900_v7 }
 0xf0e   :  { %v13982_v21 = vpop.f32.mrf.mxu0 }
 0xf0f   :  { %v13983_v49 = vadd.f32 %v13982_v21, %v13892_v55  ;;  %v42074_v62 = vadd.f32 %v37729_v48, %v13989_v16 }
 0xf11   :  { %v42060_v52 = vadd.f32 %v14063_v5, %v13983_v49 }
 0xf13   :  { %14528 = vrot.lane.b32.xlu0 %v42060_v52, %s39957_s22  ;;  %14074 = vrot.lane.b32.xlu1 %v42060_v52, %s39955_s20  ;;  %v14076_v12 = vsel %vm632_vm2, %v42060_v52, 0 }
 0xf14   :  { %v42094_v35 = vand.u32 4294901760, %v14076_v12 }
 0xf16   :  { %v14147_v17 = vsub.f32 %v14076_v12, %v42094_v35 }
 0xf17   :  { %14980 = vrot.lane.b32.xlu0 %v42060_v52, %s39959_s24  ;;  %14526 = vrot.lane.b32.xlu1 %v42060_v52, %s39954_s19 }
 0xf18   :  { %v14148_v28 = vand.u32 4294901760, %v14147_v17 }
 0xf1a   :  { %v14149_v38 = vsub.f32 %v14147_v17, %v14148_v28 }
 0xf1b   :  { %15434 = vrot.lane.b32.xlu0 %v42060_v52, %s39960_s25  ;;  %14982 = vrot.lane.b32.xlu1 %v42060_v52, %s39956_s21 }
 0xf1c   :  { %v14150_v14 = vand.u32 4294901760, %v14149_v38 }
 0xf1f   :  { %16343 = vrot.lane.b32.xlu0 %v42074_v62, %s39957_s22  ;;  %15436 = vrot.lane.b32.xlu1 %v42060_v52, %s39958_s23 }
 0xf23   :  { %16797 = vrot.lane.b32.xlu0 %v42074_v62, %s39956_s21  ;;  %15889 = vrot.lane.b32.xlu1 %v42074_v62, %s39955_s20 }
 0xf27   :  { %17251 = vrot.lane.b32.xlu0 %v42074_v62, %s39958_s23  ;;  %16341 = vrot.lane.b32.xlu1 %v42074_v62, %s39954_s19 }
 0xf2b   :  { %16795 = vrot.lane.b32.xlu1 %v42074_v62, %s39959_s24 }
 0xf2f   :  { %17249 = vrot.lane.b32.xlu1 %v42074_v62, %s39960_s25 }
 0xf85   :  { %v14529_v6 = vpop.permute.xlu0 %14528  ;;  %v14075_v63 = vpop.permute.xlu1 %14074 }
 0xf86   :  { %v14078_v54 = vsel %vm632_vm2, %v14075_v63, 0  ;;  %v14532_v22 = vsel %vm632_vm2, %v14529_v6, 0 }
 0xf87   :  { %v14111_v37 = vand.u32 4294901760, %v14078_v54  ;;  %v42101_v33 = vand.u32 4294901760, %v14532_v22 }
 0xf89   :  { %v14188_v20 = vsub.f32 %v14078_v54, %v14111_v37  ;;  %37731 = vmatpush3.xpose.msra.mxu0 %v14111_v37  ;;  %v14527_v11 = vpop.permute.xlu1 %14526  ;;  %v14981_v9 = vpop.permute.xlu0 %14980  ;;  %v14642_v32 = vsub.f32 %v14532_v22, %v42101_v33  ;;  %v15891_v54 = vsel %vm632_vm2, %v42074_v62, 0 }
 0xf8a   :  { %v14530_v34 = vsel %vm632_vm2, %v14527_v11, 0  ;;  %37740 = vmatprep.subr.mxu0 %v45125_v61  ;;  %v14984_v29 = vsel %vm632_vm2, %v14981_v9, 0 }
 0xf8b   :  { %v14189_v46 = vand.u32 4294901760, %v14188_v20  ;;  %v42103_v60 = vand.u32 4294901760, %v14530_v34  ;;  %v14643_v25 = vand.u32 4294901760, %v14642_v32  ;;  %v42118_v18 = vand.u32 4294901760, %v14984_v29 }
 0xf8c   :  { %37733 = vmatmul.mubr.f32.vlgmr.msra.gmra.mxu0 %v14150_v14 }
 0xf8d   :  { %v14190_v36 = vsub.f32 %v14188_v20, %v14189_v46  ;;  %v42106_v39 = vsub.f32 %v14530_v34, %v42103_v60  ;;  %37741 = vmatpush3.xpose.msra.mxu0 %v14188_v20  ;;  %37742 = vmatprep.mubr.msk.f32.mxu0 %vm39953_vm1, %v45125_v61  ;;  %v14983_v3 = vpop.permute.xlu1 %14982  ;;  %v14644_v10 = vsub.f32 %v14642_v32, %v14643_v25  ;;  %v15435_v48 = vpop.permute.xlu0 %15434  ;;  %v42195_v20 = vand.u32 4294901760, %v15891_v54 }
 0xf8e   :  { %37750 = vmatprep.subr.mxu0 %v45125_v61  ;;  %v14986_v40 = vsel %vm632_vm2, %v14983_v3, 0  ;;  %v42130_v57 = vsub.f32 %v14984_v29, %v42118_v18  ;;  %v15438_v21 = vsel %vm632_vm2, %v15435_v48, 0 }
 0xf8f   :  { %v14191_v13 = vand.u32 4294901760, %v14190_v36  ;;  %v14602_v41 = vand.u32 4294901760, %v42106_v39  ;;  %v42132_v15 = vand.u32 4294901760, %v14986_v40  ;;  %v14645_v58 = vand.u32 4294901760, %v14644_v10 }
 0xf90   :  { %37743 = vmatmul.mubr.f32.vlgmr.msra.gmra.mxu0 %v14147_v17  ;;  %v15056_v59 = vand.u32 4294901760, %v42130_v57  ;;  %v42152_v56 = vand.u32 4294901760, %v15438_v21 }
 0xf91   :  { %37736 = vmatpush3.xpose.msra.mxu1 %v14191_v13  ;;  %37751 = vmatpush3.xpose.msra.mxu0 %v14189_v46  ;;  %v14603_v30 = vsub.f32 %v42106_v39, %v14602_v41  ;;  %v15096_v55 = vsub.f32 %v14986_v40, %v42132_v15  ;;  %v15437_v49 = vpop.permute.xlu1 %15436  ;;  %v42211_v46 = vsub.f32 %v15891_v54, %v42195_v20  ;;  %v16344_v13 = vpop.permute.xlu0 %16343 }
 0xf92   :  { %37752 = vmatprep.mubr.msk.f32.mxu0 %vm39953_vm1, %v45125_v61  ;;  %37745 = vmatprep.subr.mxu1 %v45125_v61  ;;  %v15057_v5 = vsub.f32 %v42130_v57, %v15056_v59  ;;  %v15440_v7 = vsel %vm632_vm2, %v15437_v49, 0  ;;  %v42166_v12 = vsub.f32 %v15438_v21, %v42152_v56 }
 0xf93   :  { %37760 = vmatprep.subr.mxu0 %v45125_v61  ;;  %v14604_v19 = vand.u32 4294901760, %v14603_v30  ;;  %v15097_v50 = vand.u32 4294901760, %v15096_v55  ;;  %v42168_v17 = vand.u32 4294901760, %v15440_v7  ;;  %v16347_v30 = vsel %vm632_vm2, %v16344_v13, 0 }
 0xf94   :  { %37738 = vmatmul.mubr.f32.vlgmr.msra.gmra.mxu1 %v42094_v35  ;;  %37753 = vmatmul.mubr.f32.vlgmr.msra.gmra.mxu0 %v42094_v35  ;;  %v15058_v16 = vand.u32 4294901760, %v15057_v5 }
 0xf95   :  { %37746 = vmatpush3.xpose.msra.mxu1 %v14111_v37  ;;  %37761 = vmatpush3.xpose.msra.mxu0 %v42101_v33  ;;  %v15550_v63 = vsub.f32 %v15440_v7, %v42168_v17  ;;  %v15890_v38 = vpop.permute.xlu1 %15889 }
 0xf96   :  { %37747 = vmatprep.mubr.msk.f32.mxu1 %vm39953_vm1, %v45125_v61  ;;  %37762 = vmatprep.mubr.msk.f32.mxu0 %vm39953_vm1, %v45125_v61  ;;  %v15893_v11 = vsel %vm632_vm2, %v15890_v38, 0 }
 0xf97   :  { %37755 = vmatprep.subr.mxu1 %v45125_v61  ;;  %37770 = vmatprep.subr.mxu0 %v45125_v61  ;;  %v15551_v22 = vand.u32 4294901760, %v15550_v63 }
 0xf98   :  { %37748 = vmatmul.mubr.f32.vlgmr.msra.gmra.mxu1 %v14148_v28  ;;  %37763 = vmatmul.mubr.f32.vlgmr.msra.gmra.mxu0 %v14604_v19  ;;  %v15510_v28 = vand.u32 4294901760, %v42166_v12 }
 0xf99   :  { %37756 = vmatpush3.xpose.msra.mxu1 %v14111_v37  ;;  %37771 = vmatpush3.xpose.msra.mxu0 %v14642_v32  ;;  %v15552_v14 = vsub.f32 %v15550_v63, %v15551_v22 }
 0xf9a   :  { %37757 = vmatprep.mubr.msk.f32.mxu1 %vm39953_vm1, %v45125_v61  ;;  %37772 = vmatprep.mubr.msk.f32.mxu0 %vm39953_vm1, %v45125_v61  ;;  %v15511_v37 = vsub.f32 %v42166_v12, %v15510_v28 }
 0xf9b   :  { %37765 = vmatprep.subr.mxu1 %v45125_v61  ;;  %37780 = vmatprep.subr.mxu0 %v45125_v61  ;;  %v15553_v36 = vand.u32 4294901760, %v15552_v14 }
 0xf9c   :  { %37758 = vmatmul.mubr.f32.vlgmr.msra.gmra.mxu1 %v42094_v35  ;;  %37773 = vmatmul.mubr.f32.vlgmr.msra.gmra.mxu0 %v42106_v39  ;;  %v15098_v35 = vsub.f32 %v15096_v55, %v15097_v50  ;;  %v15512_v34 = vand.u32 4294901760, %v15511_v37  ;;  %v15963_v39 = vand.u32 4294901760, %v42211_v46 }
 0xf9d   :  { %37766 = vmatpush3.xpose.msra.mxu1 %v14645_v58  ;;  %37781 = vmatpush3.xpose.msra.mxu0 %v14643_v25  ;;  %v42246_v25 = vand.u32 4294901760, %v16347_v30 }
 0xf9e   :  { %37767 = vmatprep.mubr.msk.f32.mxu1 %vm39953_vm1, %v45125_v61  ;;  %37782 = vmatprep.mubr.msk.f32.mxu0 %vm39953_vm1, %v45125_v61  ;;  %v15099_v6 = vand.u32 4294901760, %v15098_v35  ;;  %v15964_v3 = vsub.f32 %v42211_v46, %v15963_v39 }
 0xf9f   :  { %37775 = vmatprep.subr.mxu1 %v45125_v61  ;;  %37790 = vmatprep.subr.mxu0 %v45125_v61 }
 0xfa0   :  { %37768 = vmatmul.mubr.f32.vlgmr.msra.gmra.mxu1 %v42103_v60  ;;  %37783 = vmatmul.mubr.f32.vlgmr.msra.gmra.mxu0 %v42103_v60  ;;  %v15965_v19 = vand.u32 4294901760, %v15964_v3 }
 0xfa1   :  { %37776 = vmatpush3.xpose.msra.mxu1 %v42101_v33  ;;  %37791 = vmatpush3.xpose.msra.mxu0 %v42132_v15 }
 0xfa2   :  { %37777 = vmatprep.mubr.msk.f32.mxu1 %vm39953_vm1, %v45125_v61  ;;  %37792 = vmatprep.mubr.msk.f32.mxu0 %vm39953_vm1, %v45125_v61 }
 0xfa3   :  { %37785 = vmatprep.subr.mxu1 %v45125_v61  ;;  %37800 = vmatprep.subr.mxu0 %v45125_v61 }
 0xfa4   :  { %37778 = vmatmul.mubr.f32.vlgmr.msra.gmra.mxu1 %v14602_v41  ;;  %37793 = vmatmul.mubr.f32.vlgmr.msra.gmra.mxu0 %v15058_v16 }
 0xfa5   :  { %37786 = vmatpush3.xpose.msra.mxu1 %v42101_v33  ;;  %37801 = vmatpush3.xpose.msra.mxu0 %v15096_v55  ;;  %v42205_v33 = vand.u32 4294901760, %v15893_v11 }
 0xfa6   :  { %37787 = vmatprep.mubr.msk.f32.mxu1 %vm39953_vm1, %v45125_v61  ;;  %37802 = vmatprep.mubr.msk.f32.mxu0 %vm39953_vm1, %v45125_v61 }
 0xfa7   :  { %37795 = vmatprep.subr.mxu1 %v45125_v61  ;;  %37810 = vmatprep.subr.mxu0 %v45125_v61  ;;  %v16003_v9 = vsub.f32 %v15893_v11, %v42205_v33 }
 0xfa8   :  { %37788 = vmatmul.mubr.f32.vlgmr.msra.gmra.mxu1 %v42103_v60  ;;  %37803 = vmatmul.mubr.f32.vlgmr.msra.gmra.mxu0 %v42130_v57  ;;  %v16342_v60 = vpop.permute.xlu1 %16341  ;;  %v16457_v57 = vsub.f32 %v16347_v30, %v42246_v25 }
 0xfa9   :  { %37796 = vmatpush3.xpose.msra.mxu1 %v15099_v6  ;;  %37811 = vmatpush3.xpose.msra.mxu0 %v15097_v50  ;;  %v16345_v32 = vsel %vm632_vm2, %v16342_v60, 0  ;;  %v16004_v41 = vand.u32 4294901760, %v16003_v9 }
 0xfaa   :  { %37797 = vmatprep.mubr.msk.f32.mxu1 %vm39953_vm1, %v45125_v61  ;;  %37812 = vmatprep.mubr.msk.f32.mxu0 %vm39953_vm1, %v45125_v61  ;;  %v42230_v29 = vand.u32 4294901760, %v16345_v32  ;;  %v16458_v55 = vand.u32 4294901760, %v16457_v57 }
 0xfab   :  { %37805 = vmatprep.subr.mxu1 %v45125_v61  ;;  %37820 = vmatprep.subr.mxu0 %v45125_v61 }
 0xfac   :  { %37798 = vmatmul.mubr.f32.vlgmr.msra.gmra.mxu1 %v42118_v18  ;;  %37813 = vmatmul.mubr.f32.vlgmr.msra.gmra.mxu0 %v42118_v18  ;;  %v42249_v40 = vsub.f32 %v16345_v32, %v42230_v29  ;;  %v16796_v10 = vpop.permute.xlu1 %16795 }
 0xfad   :  { %37806 = vmatpush3.xpose.msra.mxu1 %v42132_v15  ;;  %37821 = vmatpush3.xpose.msra.mxu0 %v42168_v17  ;;  %v16799_v58 = vsel %vm632_vm2, %v16796_v10, 0 }
 0xfae   :  { %37807 = vmatprep.mubr.msk.f32.mxu1 %vm39953_vm1, %v45125_v61  ;;  %37822 = vmatprep.mubr.msk.f32.mxu0 %vm39953_vm1, %v45125_v61  ;;  %v16417_v48 = vand.u32 4294901760, %v42249_v40  ;;  %v42274_v49 = vand.u32 4294901760, %v16799_v58 }
 0xfaf   :  { %37815 = vmatprep.subr.mxu1 %v45125_v61  ;;  %37830 = vmatprep.subr.mxu0 %v45125_v61 }
 0xfb0   :  { %37808 = vmatmul.mubr.f32.vlgmr.msra.gmra.mxu1 %v15056_v59  ;;  %37823 = vmatmul.mubr.f32.vlgmr.msra.gmra.mxu0 %v15512_v34  ;;  %v16798_v59 = vpop.permute.xlu0 %16797  ;;  %v16418_v21 = vsub.f32 %v42249_v40, %v16417_v48  ;;  %v42290_v16 = vsub.f32 %v16799_v58, %v42274_v49 }
 0xfb1   :  { %37816 = vmatpush3.xpose.msra.mxu1 %v42132_v15  ;;  %37831 = vmatpush3.xpose.msra.mxu0 %v15550_v63  ;;  %v16801_v5 = vsel %vm632_vm2, %v16798_v59, 0 }
 0xfb2   :  { %37817 = vmatprep.mubr.msk.f32.mxu1 %vm39953_vm1, %v45125_v61  ;;  %37832 = vmatprep.mubr.msk.f32.mxu0 %vm39953_vm1, %v45125_v61  ;;  %v42287_v50 = vand.u32 4294901760, %v16801_v5  ;;  %v16419_v7 = vand.u32 4294901760, %v16418_v21 }
 0xfb3   :  { %37825 = vmatprep.subr.mxu1 %v45125_v61  ;;  %37840 = vmatprep.subr.mxu0 %v45125_v61 }
 0xfb4   :  { %37818 = vmatmul.mubr.f32.vlgmr.msra.gmra.mxu1 %v42118_v18  ;;  %37833 = vmatmul.mubr.f32.vlgmr.msra.gmra.mxu0 %v42166_v12  ;;  %v16005_v18 = vsub.f32 %v16003_v9, %v16004_v41  ;;  %v17250_v12 = vpop.permute.xlu1 %17249  ;;  %v17252_v63 = vpop.permute.xlu0 %17251 }
 0xfb5   :  { %37826 = vmatpush3.xpose.msra.mxu1 %v15553_v36  ;;  %37841 = vmatpush3.xpose.msra.mxu0 %v15551_v22  ;;  %v17253_v6 = vsel %vm632_vm2, %v17250_v12, 0  ;;  %v17255_v22 = vsel %vm632_vm2, %v17252_v63, 0 }
 0xfb6   :  { %37827 = vmatprep.mubr.msk.f32.mxu1 %vm39953_vm1, %v45125_v61  ;;  %37842 = vmatprep.mubr.msk.f32.mxu0 %vm39953_vm1, %v45125_v61  ;;  %v16006_v15 = vand.u32 4294901760, %v16005_v18  ;;  %v42313_v37 = vand.u32 4294901760, %v17253_v6  ;;  %v17288_v11 = vand.u32 4294901760, %v17255_v22 }
 0xfb7   :  { %37835 = vmatprep.subr.mxu1 %v45125_v61  ;;  %37850 = vmatprep.subr.mxu0 %v45125_v61 }
 0xfb8   :  { %37828 = vmatmul.mubr.f32.vlgmr.msra.gmra.mxu1 %v42152_v56  ;;  %37843 = vmatmul.mubr.f32.vlgmr.msra.gmra.mxu0 %v42152_v56  ;;  %v17324_v14 = vsub.f32 %v17253_v6, %v42313_v37 }
 0xfb9   :  { %37836 = vmatpush3.xpose.msra.mxu1 %v42168_v17  ;;  %37851 = vmatpush3.xpose.msra.mxu0 %v42205_v33 }
 0xfba   :  { %37837 = vmatprep.mubr.msk.f32.mxu1 %vm39953_vm1, %v45125_v61  ;;  %37852 = vmatprep.mubr.msk.f32.mxu0 %vm39953_vm1, %v45125_v61  ;;  %v17325_v60 = vand.u32 4294901760, %v17324_v14 }
 0xfbb   :  { %37845 = vmatprep.subr.mxu1 %v45125_v61  ;;  %37860 = vmatprep.subr.mxu0 %v45125_v61 }
 0xfbc   :  { %37838 = vmatmul.mubr.f32.vlgmr.msra.gmra.mxu1 %v15510_v28  ;;  %37853 = vmatmul.mubr.f32.vlgmr.msra.gmra.mxu0 %v15965_v19  ;;  %v16871_v28 = vand.u32 4294901760, %v42290_v16 }
 0xfbd   :  { %37846 = vmatpush3.xpose.msra.mxu1 %v42168_v17  ;;  %37861 = vmatpush3.xpose.msra.mxu0 %v16003_v9  ;;  %v16911_v17 = vsub.f32 %v16801_v5, %v42287_v50  ;;  %v17326_v9 = vsub.f32 %v17324_v14, %v17325_v60 }
 0xfbe   :  { %37847 = vmatprep.mubr.msk.f32.mxu1 %vm39953_vm1, %v45125_v61  ;;  %37862 = vmatprep.mubr.msk.f32.mxu0 %vm39953_vm1, %v45125_v61  ;;  %v16872_v38 = vsub.f32 %v42290_v16, %v16871_v28 }
 0xfbf   :  { %37855 = vmatprep.subr.mxu1 %v45125_v61  ;;  %37870 = vmatprep.subr.mxu0 %v45125_v61  ;;  %v16912_v54 = vand.u32 4294901760, %v16911_v17  ;;  %v17327_v32 = vand.u32 4294901760, %v17326_v9 }
 0xfc0   :  { %37848 = vmatmul.mubr.f32.vlgmr.msra.gmra.mxu1 %v42152_v56  ;;  %37863 = vmatmul.mubr.f32.vlgmr.msra.gmra.mxu0 %v42211_v46  ;;  %v16459_v56 = vsub.f32 %v16457_v57, %v16458_v55  ;;  %v16873_v34 = vand.u32 4294901760, %v16872_v38  ;;  %v17365_v46 = vsub.f32 %v17255_v22, %v17288_v11 }
 0xfc1   :  { %37856 = vmatpush3.xpose.msra.mxu1 %v16006_v15  ;;  %37871 = vmatpush3.xpose.msra.mxu0 %v16004_v41 }
 0xfc2   :  { %37857 = vmatprep.mubr.msk.f32.mxu1 %vm39953_vm1, %v45125_v61  ;;  %37872 = vmatprep.mubr.msk.f32.mxu0 %vm39953_vm1, %v45125_v61  ;;  %v16460_v35 = vand.u32 4294901760, %v16459_v56  ;;  %v17366_v36 = vand.u32 4294901760, %v17365_v46 }
 0xfc3   :  { %37865 = vmatprep.subr.mxu1 %v45125_v61  ;;  %37880 = vmatprep.subr.mxu0 %v45125_v61 }
 0xfc4   :  { %37858 = vmatmul.mubr.f32.vlgmr.msra.gmra.mxu1 %v42195_v20  ;;  %37873 = vmatmul.mubr.f32.vlgmr.msra.gmra.mxu0 %v42195_v20 }
 0xfc5   :  { %37866 = vmatpush3.xpose.msra.mxu1 %v42205_v33  ;;  %37881 = vmatpush3.xpose.msra.mxu0 %v42246_v25 }
 0xfc6   :  { %37867 = vmatprep.mubr.msk.f32.mxu1 %vm39953_vm1, %v45125_v61  ;;  %37882 = vmatprep.mubr.msk.f32.mxu0 %vm39953_vm1, %v45125_v61 }
 0xfc7   :  { %37875 = vmatprep.subr.mxu1 %v45125_v61  ;;  %37890 = vmatprep.subr.mxu0 %v45125_v61 }
 0xfc8   :  { %37868 = vmatmul.mubr.f32.vlgmr.msra.gmra.mxu1 %v15963_v39  ;;  %37883 = vmatmul.mubr.f32.vlgmr.msra.gmra.mxu0 %v16419_v7  ;;  %v17367_v39 = vsub.f32 %v17365_v46, %v17366_v36 }
 0xfc9   :  { %37876 = vmatpush3.xpose.msra.mxu1 %v42205_v33  ;;  %37891 = vmatpush3.xpose.msra.mxu0 %v16457_v57 }
 0xfca   :  { %37877 = vmatprep.mubr.msk.f32.mxu1 %vm39953_vm1, %v45125_v61  ;;  %37892 = vmatprep.mubr.msk.f32.mxu0 %vm39953_vm1, %v45125_v61  ;;  %v17368_v13 = vand.u32 4294901760, %v17367_v39 }
 0xfcb   :  { %37885 = vmatprep.subr.mxu1 %v45125_v61  ;;  %37900 = vmatprep.subr.mxu0 %v45125_v61 }
 0xfcc   :  { %37878 = vmatmul.mubr.f32.vlgmr.msra.gmra.mxu1 %v42195_v20  ;;  %37893 = vmatmul.mubr.f32.vlgmr.msra.gmra.mxu0 %v42249_v40  ;;  %v16913_v20 = vsub.f32 %v16911_v17, %v16912_v54 }
 0xfcd   :  { %37886 = vmatpush3.xpose.msra.mxu1 %v16460_v35  ;;  %37901 = vmatpush3.xpose.msra.mxu0 %v16458_v55 }
 0xfce   :  { %37887 = vmatprep.mubr.msk.f32.mxu1 %vm39953_vm1, %v45125_v61  ;;  %37902 = vmatprep.mubr.msk.f32.mxu0 %vm39953_vm1, %v45125_v61  ;;  %v16914_v33 = vand.u32 4294901760, %v16913_v20 }
 0xfcf   :  { %37895 = vmatprep.subr.mxu1 %v45125_v61  ;;  %37910 = vmatprep.subr.mxu0 %v45125_v61 }
 0xfd0   :  { %37888 = vmatmul.mubr.f32.vlgmr.msra.gmra.mxu1 %v42230_v29  ;;  %37903 = vmatmul.mubr.f32.vlgmr.msra.gmra.mxu0 %v42230_v29 }
 0xfd1   :  { %37896 = vmatpush3.xpose.msra.mxu1 %v42246_v25  ;;  %37911 = vmatpush3.xpose.msra.mxu0 %v42287_v50 }
 0xfd2   :  { %37897 = vmatprep.mubr.msk.f32.mxu1 %vm39953_vm1, %v45125_v61  ;;  %37912 = vmatprep.mubr.msk.f32.mxu0 %vm39953_vm1, %v45125_v61 }
 0xfd3   :  { %37905 = vmatprep.subr.mxu1 %v45125_v61  ;;  %37920 = vmatprep.subr.mxu0 %v45125_v61 }
 0xfd4   :  { %37898 = vmatmul.mubr.f32.vlgmr.msra.gmra.mxu1 %v16417_v48  ;;  %37913 = vmatmul.mubr.f32.vlgmr.msra.gmra.mxu0 %v16873_v34 }
 0xfd5   :  { %37906 = vmatpush3.xpose.msra.mxu1 %v42246_v25  ;;  %37921 = vmatpush3.xpose.msra.mxu0 %v16911_v17 }
 0xfd6   :  { %37907 = vmatprep.mubr.msk.f32.mxu1 %vm39953_vm1, %v45125_v61  ;;  %37922 = vmatprep.mubr.msk.f32.mxu0 %vm39953_vm1, %v45125_v61 }
 0xfd7   :  { %37915 = vmatprep.subr.mxu1 %v45125_v61  ;;  %37930 = vmatprep.subr.mxu0 %v45125_v61 }
 0xfd8   :  { %37908 = vmatmul.mubr.f32.vlgmr.msra.gmra.mxu1 %v42230_v29  ;;  %37923 = vmatmul.mubr.f32.vlgmr.msra.gmra.mxu0 %v42290_v16 }
 0xfd9   :  { %37916 = vmatpush3.xpose.msra.mxu1 %v16914_v33  ;;  %37931 = vmatpush3.xpose.msra.mxu0 %v16912_v54 }
 0xfda   :  { %37917 = vmatprep.mubr.msk.f32.mxu1 %vm39953_vm1, %v45125_v61  ;;  %37932 = vmatprep.mubr.msk.f32.mxu0 %vm39953_vm1, %v45125_v61 }
 0xfdb   :  { %37925 = vmatprep.subr.mxu1 %v45125_v61  ;;  %37940 = vmatprep.subr.mxu0 %v45125_v61 }
 0xfdc   :  { %37918 = vmatmul.mubr.f32.vlgmr.msra.gmra.mxu1 %v42274_v49  ;;  %37933 = vmatmul.mubr.f32.vlgmr.msra.gmra.mxu0 %v42274_v49 }
 0xfdd   :  { %37926 = vmatpush3.xpose.msra.mxu1 %v42287_v50  ;;  %37941 = vmatpush3.xpose.msra.mxu0 %v17288_v11 }
 0xfde   :  { %37927 = vmatprep.mubr.msk.f32.mxu1 %vm39953_vm1, %v45125_v61  ;;  %37942 = vmatprep.mubr.msk.f32.mxu0 %vm39953_vm1, %v45125_v61 }
 0xfdf   :  { %37935 = vmatprep.subr.mxu1 %v45125_v61  ;;  %37950 = vmatprep.subr.mxu0 %v45125_v61 }
 0xfe0   :  { %37928 = vmatmul.mubr.f32.vlgmr.msra.gmra.mxu1 %v16871_v28  ;;  %37943 = vmatmul.mubr.f32.vlgmr.msra.gmra.mxu0 %v17327_v32 }
 0xfe1   :  { %37936 = vmatpush3.xpose.msra.mxu1 %v42287_v50  ;;  %37951 = vmatpush3.xpose.msra.mxu0 %v17365_v46 }
 0xfe2   :  { %37937 = vmatprep.mubr.msk.f32.mxu1 %vm39953_vm1, %v45125_v61  ;;  %37952 = vmatprep.mubr.msk.f32.mxu0 %vm39953_vm1, %v45125_v61 }
 0xfe3   :  { %37945 = vmatprep.subr.mxu1 %v45125_v61  ;;  %37960 = vmatprep.subr.mxu0 %v45125_v61 }
 0xfe4   :  { %37938 = vmatmul.mubr.f32.vlgmr.msra.gmra.mxu1 %v42274_v49  ;;  %37953 = vmatmul.mubr.f32.vlgmr.msra.gmra.mxu0 %v17324_v14 }
 0xfe5   :  { %37946 = vmatpush3.xpose.msra.mxu1 %v17368_v13  ;;  %37961 = vmatpush3.xpose.msra.mxu0 %v17366_v36 }
 0xfe6   :  { %37947 = vmatprep.mubr.msk.f32.mxu1 %vm39953_vm1, %v45125_v61  ;;  %37962 = vmatprep.mubr.msk.f32.mxu0 %vm39953_vm1, %v45125_v61 }
 0xfe7   :  { %37955 = vmatprep.subr.mxu1 %v45125_v61  ;;  %37970 = vmatprep.subr.mxu0 %v45125_v61 }
 0xfe8   :  { %37948 = vmatmul.mubr.f32.vlgmr.msra.gmra.mxu1 %v42313_v37  ;;  %37963 = vmatmul.mubr.f32.vlgmr.msra.gmra.mxu0 %v42313_v37 }
 0xfe9   :  { %37956 = vmatpush3.xpose.msra.mxu1 %v17288_v11  ;;  %37957 = vmatprep.mubr.msk.f32.mxu1 %vm39953_vm1, %v45125_v61 }
 0xfea   :  { %37965 = vmatprep.subr.mxu1 %v45125_v61  ;;  %37972 = vmatprep.mubr.msk.f32.mxu0 %vm39953_vm1, %v45125_v61 }
 0xfec   :  { %37958 = vmatmul.mubr.f32.vlgmr.msra.gmra.mxu1 %v17325_v60 }
 0xfed   :  { %37966 = vmatpush3.xpose.msra.mxu1 %v17288_v11  ;;  %37967 = vmatprep.mubr.msk.f32.mxu1 %vm39953_vm1, %v45125_v61 }
 0xfee   :  { %37975 = vmatprep.subr.mxu1 %v45125_v61 }
 0xff0   :  { %37968 = vmatmul.mubr.f32.vlgmr.msra.gmra.mxu1 %v42313_v37 }
 0xff1   :  { %37977 = vmatprep.mubr.msk.f32.mxu1 %vm39953_vm1, %v45125_v61 }
0x104c   :  { %v14152_v41 = vpop.f32.mrf.mxu0 }
0x104e   :  { %v37734_v29 = vpop.f32.mrf.mxu0 }
0x1050   :  { %v14302_v3 = vpop.f32.mrf.mxu0 }
0x1052   :  { %v37744_v30 = vpop.f32.mrf.mxu0 }
0x1054   :  { %v14228_v25 = vpop.f32.mrf.mxu1  ;;  %v14450_v18 = vpop.f32.mrf.mxu0 }
0x1055   :  { %v14229_v40 = vadd.f32 %v14228_v25, %v14152_v41 }
0x1056   :  { %v37739_v19 = vpop.f32.mrf.mxu1  ;;  %v37754_v10 = vpop.f32.mrf.mxu0 }
0x1057   :  { %v14303_v57 = vadd.f32 %v14302_v3, %v14229_v40 }
0x1058   :  { %v14376_v15 = vpop.f32.mrf.mxu1  ;;  %v14606_v48 = vpop.f32.mrf.mxu0 }
0x1059   :  { %v14377_v58 = vadd.f32 %v14376_v15, %v14303_v57 }
0x105a   :  { %v37749_v59 = vpop.f32.mrf.mxu1  ;;  %v37764_v55 = vpop.f32.mrf.mxu0 }
0x105b   :  { %v14451_v21 = vadd.f32 %v14450_v18, %v14377_v58 }
0x105c   :  { %v14522_v49 = vpop.f32.mrf.mxu1  ;;  %v14756_v56 = vpop.f32.mrf.mxu0 }
0x105d   :  { %v42384_v5 = vadd.f32 %v14522_v49, %v14451_v21 }
0x105e   :  { %v37759_v50 = vpop.f32.mrf.mxu1  ;;  %v37774_v7 = vpop.f32.mrf.mxu0 }
0x105f   :  { %v17703_v16 = vsel %vm632_vm2, %v42384_v5, -inf }
0x1060   :  { %v14682_v12 = vpop.f32.mrf.mxu1  ;;  %17704 = vmax.xlane.f32.xlu0 %v17703_v16  ;;  %v14904_v17 = vpop.f32.mrf.mxu0 }
0x1061   :  { %v14683_v35 = vadd.f32 %v14682_v12, %v14606_v48 }
0x1062   :  { %v37769_v28 = vpop.f32.mrf.mxu1  ;;  %v37784_v6 = vpop.f32.mrf.mxu0 }
0x1063   :  { %v14757_v63 = vadd.f32 %v14756_v56, %v14683_v35 }
0x1064   :  { %v14830_v54 = vpop.f32.mrf.mxu1  ;;  %v15060_v37 = vpop.f32.mrf.mxu0 }
0x1065   :  { %v14831_v38 = vadd.f32 %v14830_v54, %v14757_v63 }
0x1066   :  { %v37779_v22 = vpop.f32.mrf.mxu1  ;;  %v37794_v20 = vpop.f32.mrf.mxu0 }
0x1067   :  { %v14905_v11 = vadd.f32 %v14904_v17, %v14831_v38 }
0x1068   :  { %v14976_v34 = vpop.f32.mrf.mxu1  ;;  %v15210_v33 = vpop.f32.mrf.mxu0 }
0x1069   :  { %v42388_v14 = vadd.f32 %v14976_v34, %v14905_v11 }
0x106a   :  { %v37789_v46 = vpop.f32.mrf.mxu1  ;;  %v37804_v60 = vpop.f32.mrf.mxu0 }
0x106b   :  { %v17706_v36 = vsel %vm632_vm2, %v42388_v14, -inf }
0x106c   :  { %v15136_v9 = vpop.f32.mrf.mxu1  ;;  %17707 = vmax.xlane.f32.xlu1 %v17706_v36  ;;  %v15358_v32 = vpop.f32.mrf.mxu0 }
0x106d   :  { %v15137_v39 = vadd.f32 %v15136_v9, %v15060_v37 }
0x106e   :  { %v37799_v13 = vpop.f32.mrf.mxu1  ;;  %v37814_v41 = vpop.f32.mrf.mxu0 }
0x106f   :  { %v15211_v29 = vadd.f32 %v15210_v33, %v15137_v39 }
0x1070   :  { %v15284_v3 = vpop.f32.mrf.mxu1  ;;  %v15514_v25 = vpop.f32.mrf.mxu0 }
0x1071   :  { %v15285_v30 = vadd.f32 %v15284_v3, %v15211_v29 }
0x1072   :  { %v37809_v18 = vpop.f32.mrf.mxu1  ;;  %v37824_v40 = vpop.f32.mrf.mxu0 }
0x1073   :  { %v15359_v19 = vadd.f32 %v15358_v32, %v15285_v30 }
0x1074   :  { %v15430_v10 = vpop.f32.mrf.mxu1  ;;  %v15664_v15 = vpop.f32.mrf.mxu0 }
0x1075   :  { %v42392_v57 = vadd.f32 %v15430_v10, %v15359_v19 }
0x1076   :  { %v37819_v48 = vpop.f32.mrf.mxu1  ;;  %v37834_v58 = vpop.f32.mrf.mxu0 }
0x1077   :  { %v17709_v59 = vsel %vm632_vm2, %v42392_v57, -inf }
0x1078   :  { %v15590_v55 = vpop.f32.mrf.mxu1  ;;  %17710 = vmax.xlane.f32.xlu0 %v17709_v59  ;;  %v15812_v49 = vpop.f32.mrf.mxu0 }
0x1079   :  { %v15591_v21 = vadd.f32 %v15590_v55, %v15514_v25 }
0x107a   :  { %v37829_v56 = vpop.f32.mrf.mxu1  ;;  %v37844_v50 = vpop.f32.mrf.mxu0 }
0x107b   :  { %v15665_v7 = vadd.f32 %v15664_v15, %v15591_v21 }
0x107c   :  { %v15738_v16 = vpop.f32.mrf.mxu1  ;;  %v15967_v35 = vpop.f32.mrf.mxu0 }
0x107d   :  { %v15739_v12 = vadd.f32 %v15738_v16, %v15665_v7 }
0x107e   :  { %v37839_v17 = vpop.f32.mrf.mxu1  ;;  %v37854_v28 = vpop.f32.mrf.mxu0 }
0x107f   :  { %v15813_v6 = vadd.f32 %v15812_v49, %v15739_v12 }
0x1080   :  { %v15884_v63 = vpop.f32.mrf.mxu1  ;;  %v16117_v38 = vpop.f32.mrf.mxu0 }
0x1081   :  { %v42396_v54 = vadd.f32 %v15884_v63, %v15813_v6 }
0x1082   :  { %v37849_v37 = vpop.f32.mrf.mxu1  ;;  %v37864_v22 = vpop.f32.mrf.mxu0 }
0x1083   :  { %v17712_v20 = vsel %vm632_vm2, %v42396_v54, -inf }
0x1084   :  { %v16043_v11 = vpop.f32.mrf.mxu1  ;;  %17713 = vmax.xlane.f32.xlu0 %v17712_v20  ;;  %v16265_v33 = vpop.f32.mrf.mxu0 }
0x1085   :  { %v16044_v34 = vadd.f32 %v16043_v11, %v15967_v35 }
0x1086   :  { %v37859_v46 = vpop.f32.mrf.mxu1  ;;  %v37874_v60 = vpop.f32.mrf.mxu0 }
0x1087   :  { %v16118_v36 = vadd.f32 %v16117_v38, %v16044_v34 }
0x1088   :  { %v16191_v9 = vpop.f32.mrf.mxu1  ;;  %v16421_v32 = vpop.f32.mrf.mxu0 }
0x1089   :  { %v16192_v39 = vadd.f32 %v16191_v9, %v16118_v36 }
0x108a   :  { %v37869_v13 = vpop.f32.mrf.mxu1  ;;  %v37884_v41 = vpop.f32.mrf.mxu0 }
0x108b   :  { %v16266_v29 = vadd.f32 %v16265_v33, %v16192_v39 }
0x108c   :  { %v16337_v3 = vpop.f32.mrf.mxu1  ;;  %v16571_v25 = vpop.f32.mrf.mxu0 }
0x108d   :  { %v42400_v30 = vadd.f32 %v16337_v3, %v16266_v29 }
0x108e   :  { %v37879_v18 = vpop.f32.mrf.mxu1  ;;  %v37894_v40 = vpop.f32.mrf.mxu0 }
0x108f   :  { %v17715_v19 = vsel %vm632_vm2, %v42400_v30, -inf }
0x1090   :  { %v16497_v10 = vpop.f32.mrf.mxu1  ;;  %17716 = vmax.xlane.f32.xlu1 %v17715_v19  ;;  %v16719_v48 = vpop.f32.mrf.mxu0 }
0x1091   :  { %v16498_v15 = vadd.f32 %v16497_v10, %v16421_v32 }
0x1092   :  { %v37889_v58 = vpop.f32.mrf.mxu1  ;;  %v37904_v59 = vpop.f32.mrf.mxu0 }
0x1093   :  { %v16572_v55 = vadd.f32 %v16571_v25, %v16498_v15 }
0x1094   :  { %v16645_v21 = vpop.f32.mrf.mxu1  ;;  %v16875_v56 = vpop.f32.mrf.mxu0 }
0x1095   :  { %v16646_v49 = vadd.f32 %v16645_v21, %v16572_v55 }
0x1096   :  { %v37899_v50 = vpop.f32.mrf.mxu1  ;;  %v37914_v7 = vpop.f32.mrf.mxu0 }
0x1097   :  { %v16720_v16 = vadd.f32 %v16719_v48, %v16646_v49 }
0x1098   :  { %v16791_v12 = vpop.f32.mrf.mxu1  ;;  %v17025_v17 = vpop.f32.mrf.mxu0 }
0x1099   :  { %v42404_v35 = vadd.f32 %v16791_v12, %v16720_v16 }
0x109a   :  { %v37909_v28 = vpop.f32.mrf.mxu1  ;;  %v37924_v6 = vpop.f32.mrf.mxu0 }
0x109b   :  { %v17718_v63 = vsel %vm632_vm2, %v42404_v35, -inf }
0x109c   :  { %v16951_v38 = vpop.f32.mrf.mxu1  ;;  %17719 = vmax.xlane.f32.xlu0 %v17718_v63  ;;  %v17173_v22 = vpop.f32.mrf.mxu0 }
0x109d   :  { %v16952_v37 = vadd.f32 %v16951_v38, %v16875_v56 }
0x109e   :  { %v37919_v20 = vpop.f32.mrf.mxu1  ;;  %v37934_v11 = vpop.f32.mrf.mxu0 }
0x109f   :  { %v17026_v34 = vadd.f32 %v17025_v17, %v16952_v37 }
0x10a0   :  { %v17099_v33 = vpop.f32.mrf.mxu1  ;;  %v17329_v60 = vpop.f32.mrf.mxu0 }
0x10a1   :  { %v17100_v46 = vadd.f32 %v17099_v33, %v17026_v34 }
0x10a2   :  { %v37929_v36 = vpop.f32.mrf.mxu1  ;;  %v37944_v9 = vpop.f32.mrf.mxu0 }
0x10a3   :  { %v17174_v39 = vadd.f32 %v17173_v22, %v17100_v46 }
0x10a4   :  { %v17245_v32 = vpop.f32.mrf.mxu1  ;;  %v17479_v41 = vpop.f32.mrf.mxu0 }
0x10a5   :  { %v42408_v13 = vadd.f32 %v17245_v32, %v17174_v39 }
0x10a6   :  { %v37939_v29 = vpop.f32.mrf.mxu1  ;;  %v37954_v3 = vpop.f32.mrf.mxu0 }
0x10a7   :  { %v17721_v25 = vsel %vm632_vm2, %v42408_v13, -inf }
0x10a8   :  { %v17405_v18 = vpop.f32.mrf.mxu1  ;;  %17722 = vmax.xlane.f32.xlu1 %v17721_v25  ;;  %v17627_v19 = vpop.f32.mrf.mxu0 }
0x10a9   :  { %v17406_v40 = vadd.f32 %v17405_v18, %v17329_v60 }
0x10aa   :  { %v37949_v10 = vpop.f32.mrf.mxu1  ;;  %v37964_v15 = vpop.f32.mrf.mxu0 }
0x10ab   :  { %v17480_v48 = vadd.f32 %v17479_v41, %v17406_v40 }
0x10ac   :  { %v17553_v58 = vpop.f32.mrf.mxu1 }
0x10ad   :  { %v17554_v59 = vadd.f32 %v17553_v58, %v17480_v48 }
0x10ae   :  { %v37959_v55 = vpop.f32.mrf.mxu1 }
0x10af   :  { %v17628_v21 = vadd.f32 %v17627_v19, %v17554_v59 }
0x10b0   :  { %v17699_v49 = vpop.f32.mrf.mxu1 }
0x10b1   :  { %v17700_v56 = vadd.f32 %v17699_v49, %v17628_v21 }
0x10b2   :  { %v37969_v50 = vpop.f32.mrf.mxu1 }
0x10b3   :  { %v17724_v7 = vsel %vm632_vm2, %v17700_v56, -inf }
0x10b4   :  { %17725 = vmax.xlane.f32.xlu0 %v17724_v7 }
0x10e9   :  { %v17705_v16 = vpop.xlane.xlu0 %17704 }
0x10ea   :  { %v17727_v12 = vsub.f32 %v42384_v5, %v17705_v16 }
0x10ec   :  { %v17735_v17 = vmul.f32 1.442695, %v17727_v12 }
0x10ee   :  { %39884 = vpow2.f32 %v17735_v17 }
0x10f5   :  { %v17708_v28 = vpop.xlane.xlu1 %17707 }
0x10f6   :  { %v17728_v6 = vsub.f32 %v42388_v14, %v17708_v28 }
0x10f8   :  { %v17737_v63 = vmul.f32 1.442695, %v17728_v6 }
0x10fa   :  { %39886 = vpow2.f32 %v17737_v63 }
0x10fb   :  { %v39885_v38 = vpop.eup %39884 }
0x10fc   :  { %v17751_v37 = vsel %vm632_vm2, %v39885_v38, 0.0 }
0x10fd   :  { %17752 = vadd.xlane.f32.xlu1 %v17751_v37 }
0x1101   :  { %v17711_v5 = vpop.xlane.xlu0 %17710 }
0x1102   :  { %v17729_v14 = vsub.f32 %v42392_v57, %v17711_v5 }
0x1104   :  { %v17739_v34 = vmul.f32 1.442695, %v17729_v14 }
0x1106   :  { %39888 = vpow2.f32 %v17739_v34 }
0x1107   :  { %v42416_v22 = vpop.eup %39886 }
0x1108   :  { %v17754_v20 = vsel %vm632_vm2, %v42416_v22, 0.0 }
0x1109   :  { %17755 = vadd.xlane.f32.xlu0 %v17754_v20 }
0x110d   :  { %v17714_v11 = vpop.xlane.xlu0 %17713 }
0x110e   :  { %18243 = vrot.lane.b32.xlu1 %v42060_v52, %s39961_s26  ;;  %v17730_v33 = vsub.f32 %v42396_v54, %v17714_v11 }
0x1110   :  { %v17741_v60 = vmul.f32 1.442695, %v17730_v33 }
0x1112   :  { %18695 = vrot.lane.b32.xlu1 %v42060_v52, %s39962_s27  ;;  %39890 = vpow2.f32 %v17741_v60 }
0x1113   :  { %v42429_v39 = vpop.eup %39888 }
0x1114   :  { %v17757_v57 = vsel %vm632_vm2, %v42429_v39, 0.0 }
0x1119   :  { %v17717_v46 = vpop.xlane.xlu1 %17716 }
0x111a   :  { %v17731_v36 = vsub.f32 %v42400_v30, %v17717_v46 }
0x111c   :  { %v17743_v9 = vmul.f32 1.442695, %v17731_v36 }
0x111e   :  { %39892 = vpow2.f32 %v17743_v9 }
0x111f   :  { %17791 = vrot.lane.b32.xlu0 %v42060_v52, %s39963_s28  ;;  %v42433_v32 = vpop.eup %39890 }
0x1120   :  { %v17760_v41 = vsel %vm632_vm2, %v42433_v32, 0.0 }
0x1125   :  { %v17720_v29 = vpop.xlane.xlu0 %17719 }
0x1126   :  { %v17732_v3 = vsub.f32 %v42404_v35, %v17720_v29 }
0x1128   :  { %v17745_v19 = vmul.f32 1.442695, %v17732_v3 }
0x112a   :  { %39894 = vpow2.f32 %v17745_v19 }
0x112b   :  { %v42437_v54 = vpop.eup %39892 }
0x112c   :  { %v17763_v30 = vsel %vm632_vm2, %v42437_v54, 0.0 }
0x1131   :  { %v17723_v25 = vpop.xlane.xlu1 %17722 }
0x1132   :  { %v17733_v40 = vsub.f32 %v42408_v13, %v17723_v25 }
0x1134   :  { %v17747_v15 = vmul.f32 1.442695, %v17733_v40 }
0x1136   :  { %17758 = vadd.xlane.f32.xlu1 %v17757_v57  ;;  %39896 = vpow2.f32 %v17747_v15 }
0x1137   :  { %v42447_v58 = vpop.eup %39894 }
0x113a   :  { %17761 = vadd.xlane.f32.xlu1 %v17760_v41 }
0x113d   :  { %v17726_v18 = vpop.xlane.xlu0 %17725 }
0x113e   :  { %17764 = vadd.xlane.f32.xlu0 %v17763_v30  ;;  %v17734_v10 = vsub.f32 %v17700_v56, %v17726_v18 }
0x1140   :  { %v17749_v48 = vmul.f32 1.442695, %v17734_v10 }
0x1142   :  { %39898 = vpow2.f32 %v17749_v48 }
0x1143   :  { %v42449_v59 = vpop.eup %39896 }
0x1144   :  { %v17769_v35 = vsel %vm632_vm2, %v42449_v59, 0.0 }
0x114b   :  { %19599 = vrot.lane.b32.xlu1 %v42074_v62, %s39963_s28 }
0x114f   :  { %v42453_v55 = vpop.eup %39898 }
0x1150   :  { %v17772_v13 = vsel %vm632_vm2, %v42453_v55, 0.0 }
0x1154   :  { %19147 = vrot.lane.b32.xlu0 %v42060_v52, %s39964_s29  ;;  %v17766_v52 = vsel %vm632_vm2, %v42447_v58, 0.0 }
0x116f   :  { %17767 = vadd.xlane.f32.xlu1 %v17766_v52 }
0x1173   :  { %17770 = vadd.xlane.f32.xlu1 %v17769_v35  ;;  %17773 = vadd.xlane.f32.xlu0 %v17772_v13 }
0x1184   :  { %20051 = vrot.lane.b32.xlu1 %v42074_v62, %s39961_s26 }
0x1186   :  { %v17753_v21 = vpop.xlane.xlu1 %17752 }
0x1187   :  { %39900 = vrcp.f32 %v17753_v21 }
0x1188   :  { %20503 = vrot.lane.b32.xlu1 %v42074_v62, %s39962_s27 }
0x118a   :  { %v18244_v12 = vpop.permute.xlu1 %18243 }
0x118b   :  { %v18280_v63 = vand.u32 4294901760, %v18244_v12 }
0x118c   :  { %20955 = vrot.lane.b32.xlu1 %v42074_v62, %s39964_s29 }
0x118d   :  { %v18357_v62 = vsub.f32 %v18244_v12, %v18280_v63 }
0x118e   :  { %v18696_v36 = vpop.permute.xlu1 %18695 }
0x118f   :  { %v18358_v60 = vand.u32 4294901760, %v18357_v62  ;;  %v42475_v41 = vand.u32 4294901760, %v18696_v36 }
0x1191   :  { %v42484_v25 = vsub.f32 %v18696_v36, %v42475_v41 }
0x1192   :  { %v17756_v49 = vpop.xlane.xlu0 %17755 }
0x1193   :  { %39902 = vrcp.f32 %v17756_v49  ;;  %v18810_v19 = vand.u32 4294901760, %v42484_v25 }
0x1194   :  { %v39901_v56 = vpop.eup %39900 }
0x1195   :  { %v17776_v50 = vmul.f32 %v39901_v56, %v39885_v38  ;;  %v18811_v10 = vsub.f32 %v42484_v25, %v18810_v19 }
0x1196   :  { %v17792_v7 = vpop.permute.xlu0 %17791 }
0x1197   :  { %v17795_v16 = vsel %vm632_vm2, %v17776_v50, 0  ;;  %v17828_v17 = vand.u32 4294901760, %v17792_v7  ;;  %v18812_v15 = vand.u32 4294901760, %v18811_v10 }
0x1198   :  { %v17863_v28 = vand.u32 4294901760, %v17795_v16 }
0x1199   :  { %v17905_v6 = vsub.f32 %v17792_v7, %v17828_v17  ;;  %37971 = vmatpush3.msra.mxu0 %v17828_v17 }
0x119a   :  { %37980 = vmatprep.subr.mxu0 %v45125_v61  ;;  %v17864_v37 = vsub.f32 %v17795_v16, %v17863_v28 }
0x119b   :  { %v17906_v20 = vand.u32 4294901760, %v17905_v6 }
0x119c   :  { %v17865_v5 = vand.u32 4294901760, %v17864_v37 }
0x119d   :  { %v17907_v14 = vsub.f32 %v17905_v6, %v17906_v20 }
0x119e   :  { %v17866_v11 = vsub.f32 %v17864_v37, %v17865_v5 }
0x119f   :  { %v17908_v34 = vand.u32 4294901760, %v17907_v14 }
0x11a0   :  { %v39903_v33 = vpop.eup %39902  ;;  %v17867_v38 = vand.u32 4294901760, %v17866_v11 }
0x11a1   :  { %v17778_v46 = vmul.f32 %v39903_v33, %v42416_v22  ;;  %37976 = vmatpush3.msra.mxu1 %v17908_v34  ;;  %v18359_v22 = vsub.f32 %v18357_v62, %v18358_v60 }
0x11a2   :  { %37973 = vmatmul.mubr.f32.vlgmr.msra.gmra.mxu0 %v17867_v38  ;;  %37978 = vmatmul.mubr.f32.vlgmr.msra.gmra.mxu1 %v17863_v28 }
0x11a3   :  { %v18247_v9 = vsel %vm632_vm2, %v17778_v46, 0  ;;  %37981 = vmatpush3.msra.mxu0 %v17905_v6  ;;  %37985 = vmatprep.subr.mxu1 %v45125_v61  ;;  %v18360_v3 = vand.u32 4294901760, %v18359_v22 }
0x11a4   :  { %v18315_v57 = vand.u32 4294901760, %v18247_v9  ;;  %37986 = vmatpush3.msra.mxu1 %v17828_v17  ;;  %37982 = vmatprep.mubr.msk.f32.mxu0 %vm39953_vm1, %v45125_v61 }
0x11a5   :  { %37987 = vmatprep.mubr.msk.f32.mxu1 %vm39953_vm1, %v45125_v61  ;;  %37990 = vmatprep.subr.mxu0 %v45125_v61 }
0x11a6   :  { %37995 = vmatprep.subr.mxu1 %v45125_v61  ;;  %37983 = vmatmul.mubr.f32.vlgmr.msra.gmra.mxu0 %v17864_v37  ;;  %v18316_v30 = vsub.f32 %v18247_v9, %v18315_v57 }
0x11a7   :  { %37988 = vmatmul.mubr.f32.vlgmr.msra.gmra.mxu1 %v17865_v5  ;;  %37991 = vmatpush3.msra.mxu0 %v17906_v20 }
0x11a8   :  { %37996 = vmatpush3.msra.mxu1 %v17828_v17  ;;  %37992 = vmatprep.mubr.msk.f32.mxu0 %vm39953_vm1, %v45125_v61  ;;  %v18317_v29 = vand.u32 4294901760, %v18316_v30 }
0x11a9   :  { %37997 = vmatprep.mubr.msk.f32.mxu1 %vm39953_vm1, %v45125_v61  ;;  %38000 = vmatprep.subr.mxu0 %v45125_v61 }
0x11aa   :  { %38005 = vmatprep.subr.mxu1 %v45125_v61  ;;  %37993 = vmatmul.mubr.f32.vlgmr.msra.gmra.mxu0 %v17863_v28  ;;  %v18318_v18 = vsub.f32 %v18316_v30, %v18317_v29 }
0x11ab   :  { %37998 = vmatmul.mubr.f32.vlgmr.msra.gmra.mxu1 %v17863_v28  ;;  %38001 = vmatpush3.msra.mxu0 %v18280_v63 }
0x11ac   :  { %38006 = vmatpush3.msra.mxu1 %v18360_v3  ;;  %38002 = vmatprep.mubr.msk.f32.mxu0 %vm39953_vm1, %v45125_v61  ;;  %v18319_v40 = vand.u32 4294901760, %v18318_v18 }
0x11ad   :  { %38007 = vmatprep.mubr.msk.f32.mxu1 %vm39953_vm1, %v45125_v61  ;;  %38010 = vmatprep.subr.mxu0 %v45125_v61 }
0x11ae   :  { %38015 = vmatprep.subr.mxu1 %v45125_v61  ;;  %38003 = vmatmul.mubr.f32.vlgmr.msra.gmra.mxu0 %v18319_v40 }
0x11af   :  { %38008 = vmatmul.mubr.f32.vlgmr.msra.gmra.mxu1 %v18315_v57  ;;  %38011 = vmatpush3.msra.mxu0 %v18357_v62 }
0x11b0   :  { %38016 = vmatpush3.msra.mxu1 %v18280_v63  ;;  %38012 = vmatprep.mubr.msk.f32.mxu0 %vm39953_vm1, %v45125_v61 }
0x11b1   :  { %38017 = vmatprep.mubr.msk.f32.mxu1 %vm39953_vm1, %v45125_v61  ;;  %38020 = vmatprep.subr.mxu0 %v45125_v61 }
0x11b2   :  { %38025 = vmatprep.subr.mxu1 %v45125_v61  ;;  %38013 = vmatmul.mubr.f32.vlgmr.msra.gmra.mxu0 %v18316_v30 }
0x11b3   :  { %38018 = vmatmul.mubr.f32.vlgmr.msra.gmra.mxu1 %v18317_v29  ;;  %38021 = vmatpush3.msra.mxu0 %v18358_v60 }
0x11b4   :  { %38026 = vmatpush3.msra.mxu1 %v18280_v63  ;;  %38022 = vmatprep.mubr.msk.f32.mxu0 %vm39953_vm1, %v45125_v61 }
0x11b5   :  { %38027 = vmatprep.mubr.msk.f32.mxu1 %vm39953_vm1, %v45125_v61  ;;  %38030 = vmatprep.subr.mxu0 %v45125_v61 }
0x11b6   :  { %38035 = vmatprep.subr.mxu1 %v45125_v61  ;;  %38023 = vmatmul.mubr.f32.vlgmr.msra.gmra.mxu0 %v18315_v57 }
0x11b7   :  { %38028 = vmatmul.mubr.f32.vlgmr.msra.gmra.mxu1 %v18315_v57  ;;  %38031 = vmatpush3.msra.mxu0 %v42475_v41 }
0x11b8   :  { %38036 = vmatpush3.msra.mxu1 %v18812_v15  ;;  %38037 = vmatprep.mubr.msk.f32.mxu1 %vm39953_vm1, %v45125_v61 }
0x11b9   :  { %38045 = vmatprep.subr.mxu1 %v45125_v61  ;;  %38032 = vmatprep.mubr.msk.f32.mxu0 %vm39953_vm1, %v45125_v61 }
0x11ba   :  { %38040 = vmatprep.subr.mxu0 %v45125_v61 }
0x11bf   :  { %v17759_v48 = vpop.xlane.xlu1 %17758 }
0x11c0   :  { %39904 = vrcp.f32 %v17759_v48 }
0x11c3   :  { %v17762_v52 = vpop.xlane.xlu1 %17761 }
0x11c4   :  { %39906 = vrcp.f32 %v17762_v52 }
0x11c7   :  { %v17765_v35 = vpop.xlane.xlu0 %17764  ;;  %v19600_v6 = vpop.permute.xlu1 %19599 }
0x11c8   :  { %39908 = vrcp.f32 %v17765_v35  ;;  %v42529_v5 = vand.u32 4294901760, %v19600_v6 }
0x11ca   :  { %v42540_v33 = vsub.f32 %v19600_v6, %v42529_v5 }
0x11cb   :  { %v19148_v13 = vpop.permute.xlu0 %19147 }
0x11cc   :  { %v19184_v21 = vand.u32 4294901760, %v19148_v13  ;;  %v19714_v36 = vand.u32 4294901760, %v42540_v33 }
0x11cd   :  { %v39905_v49 = vpop.eup %39904 }
0x11ce   :  { %v17780_v56 = vmul.f32 %v39905_v49, %v42429_v39  ;;  %v42517_v50 = vsub.f32 %v19148_v13, %v19184_v21  ;;  %v19715_v22 = vsub.f32 %v42540_v33, %v19714_v36 }
0x11d0   :  { %v18699_v7 = vsel %vm632_vm2, %v17780_v56, 0  ;;  %v19262_v28 = vand.u32 4294901760, %v42517_v50  ;;  %v19716_v29 = vand.u32 4294901760, %v19715_v22 }
0x11d1   :  { %v39907_v16 = vpop.eup %39906  ;;  %v18767_v12 = vand.u32 4294901760, %v18699_v7 }
0x11d2   :  { %v17782_v17 = vmul.f32 %v39907_v16, %v42433_v32  ;;  %v19263_v32 = vsub.f32 %v42517_v50, %v19262_v28 }
0x11d3   :  { %v18768_v63 = vsub.f32 %v18699_v7, %v18767_v12  ;;  %38038 = vmatmul.mubr.f32.vlgmr.msra.gmra.mxu1 %v18767_v12 }
0x11d4   :  { %38046 = vmatpush3.msra.mxu1 %v42475_v41  ;;  %38047 = vmatprep.mubr.msk.f32.mxu1 %vm39953_vm1, %v45125_v61  ;;  %v19151_v39 = vsel %vm632_vm2, %v17782_v17, 0  ;;  %v19264_v46 = vand.u32 4294901760, %v19263_v32 }
0x11d5   :  { %38055 = vmatprep.subr.mxu1 %v45125_v61  ;;  %v18769_v37 = vand.u32 4294901760, %v18768_v63  ;;  %v42527_v20 = vand.u32 4294901760, %v19151_v39  ;;  %v39909_v14 = vpop.eup %39908 }
0x11d6   :  { %v17784_v38 = vmul.f32 %v39909_v14, %v42437_v54 }
0x11d7   :  { %38048 = vmatmul.mubr.f32.vlgmr.msra.gmra.mxu1 %v18769_v37  ;;  %v18770_v62 = vsub.f32 %v18768_v63, %v18769_v37  ;;  %v19220_v34 = vsub.f32 %v19151_v39, %v42527_v20 }
0x11d8   :  { %38056 = vmatpush3.msra.mxu1 %v42475_v41  ;;  %38057 = vmatprep.mubr.msk.f32.mxu1 %vm39953_vm1, %v45125_v61  ;;  %v19603_v54 = vsel %vm632_vm2, %v17784_v38, 0 }
0x11d9   :  { %38065 = vmatprep.subr.mxu1 %v45125_v61  ;;  %v18771_v11 = vand.u32 4294901760, %v18770_v62  ;;  %v19221_v60 = vand.u32 4294901760, %v19220_v34  ;;  %v19671_v57 = vand.u32 4294901760, %v19603_v54 }
0x11db   :  { %38033 = vmatmul.mubr.f32.vlgmr.msra.gmra.mxu0 %v18771_v11  ;;  %38058 = vmatmul.mubr.f32.vlgmr.msra.gmra.mxu1 %v18767_v12  ;;  %v19222_v9 = vsub.f32 %v19220_v34, %v19221_v60  ;;  %v19672_v30 = vsub.f32 %v19603_v54, %v19671_v57 }
0x11dc   :  { %38041 = vmatpush3.msra.mxu0 %v42484_v25  ;;  %38066 = vmatpush3.msra.mxu1 %v19264_v46 }
0x11dd   :  { %38042 = vmatprep.mubr.msk.f32.mxu0 %vm39953_vm1, %v45125_v61  ;;  %38050 = vmatprep.subr.mxu0 %v45125_v61  ;;  %v19223_v41 = vand.u32 4294901760, %v19222_v9  ;;  %v19673_v3 = vand.u32 4294901760, %v19672_v30 }
0x11de   :  { %38067 = vmatprep.mubr.msk.f32.mxu1 %vm39953_vm1, %v45125_v61  ;;  %38075 = vmatprep.subr.mxu1 %v45125_v61 }
0x11df   :  { %38043 = vmatmul.mubr.f32.vlgmr.msra.gmra.mxu0 %v18768_v63  ;;  %38068 = vmatmul.mubr.f32.vlgmr.msra.gmra.mxu1 %v42527_v20  ;;  %v19674_v25 = vsub.f32 %v19672_v30, %v19673_v3 }
0x11e0   :  { %38051 = vmatpush3.msra.mxu0 %v18810_v19  ;;  %38076 = vmatpush3.msra.mxu1 %v19184_v21 }
0x11e1   :  { %38052 = vmatprep.mubr.msk.f32.mxu0 %vm39953_vm1, %v45125_v61  ;;  %38060 = vmatprep.subr.mxu0 %v45125_v61  ;;  %v19675_v18 = vand.u32 4294901760, %v19674_v25 }
0x11e2   :  { %38077 = vmatprep.mubr.msk.f32.mxu1 %vm39953_vm1, %v45125_v61  ;;  %38085 = vmatprep.subr.mxu1 %v45125_v61 }
0x11e3   :  { %38053 = vmatmul.mubr.f32.vlgmr.msra.gmra.mxu0 %v18767_v12  ;;  %38078 = vmatmul.mubr.f32.vlgmr.msra.gmra.mxu1 %v19221_v60 }
0x11e4   :  { %38061 = vmatpush3.msra.mxu0 %v19184_v21  ;;  %38086 = vmatpush3.msra.mxu1 %v19184_v21 }
0x11e5   :  { %38062 = vmatprep.mubr.msk.f32.mxu0 %vm39953_vm1, %v45125_v61  ;;  %38070 = vmatprep.subr.mxu0 %v45125_v61 }
0x11e6   :  { %38087 = vmatprep.mubr.msk.f32.mxu1 %vm39953_vm1, %v45125_v61  ;;  %38095 = vmatprep.subr.mxu1 %v45125_v61 }
0x11e7   :  { %38063 = vmatmul.mubr.f32.vlgmr.msra.gmra.mxu0 %v19223_v41  ;;  %38088 = vmatmul.mubr.f32.vlgmr.msra.gmra.mxu1 %v42527_v20 }
0x11e8   :  { %38071 = vmatpush3.msra.mxu0 %v42517_v50  ;;  %38096 = vmatpush3.msra.mxu1 %v19716_v29 }
0x11e9   :  { %38072 = vmatprep.mubr.msk.f32.mxu0 %vm39953_vm1, %v45125_v61  ;;  %38080 = vmatprep.subr.mxu0 %v45125_v61 }
0x11ea   :  { %38097 = vmatprep.mubr.msk.f32.mxu1 %vm39953_vm1, %v45125_v61  ;;  %38105 = vmatprep.subr.mxu1 %v45125_v61 }
0x11eb   :  { %38073 = vmatmul.mubr.f32.vlgmr.msra.gmra.mxu0 %v19220_v34  ;;  %38098 = vmatmul.mubr.f32.vlgmr.msra.gmra.mxu1 %v19671_v57 }
0x11ec   :  { %38081 = vmatpush3.msra.mxu0 %v19262_v28  ;;  %38106 = vmatpush3.msra.mxu1 %v42529_v5 }
0x11ed   :  { %38082 = vmatprep.mubr.msk.f32.mxu0 %vm39953_vm1, %v45125_v61  ;;  %38090 = vmatprep.subr.mxu0 %v45125_v61 }
0x11ee   :  { %38107 = vmatprep.mubr.msk.f32.mxu1 %vm39953_vm1, %v45125_v61  ;;  %38115 = vmatprep.subr.mxu1 %v45125_v61 }
0x11ef   :  { %38083 = vmatmul.mubr.f32.vlgmr.msra.gmra.mxu0 %v42527_v20  ;;  %38108 = vmatmul.mubr.f32.vlgmr.msra.gmra.mxu1 %v19673_v3 }
0x11f0   :  { %38091 = vmatpush3.msra.mxu0 %v42529_v5  ;;  %38116 = vmatpush3.msra.mxu1 %v42529_v5 }
0x11f1   :  { %38092 = vmatprep.mubr.msk.f32.mxu0 %vm39953_vm1, %v45125_v61  ;;  %38100 = vmatprep.subr.mxu0 %v45125_v61 }
0x11f2   :  { %38117 = vmatprep.mubr.msk.f32.mxu1 %vm39953_vm1, %v45125_v61  ;;  %38125 = vmatprep.subr.mxu1 %v45125_v61 }
0x11f3   :  { %38093 = vmatmul.mubr.f32.vlgmr.msra.gmra.mxu0 %v19675_v18  ;;  %38118 = vmatmul.mubr.f32.vlgmr.msra.gmra.mxu1 %v19671_v57  ;;  %v45181_v18 = vld [vmem:[#allocation7_spill] sm:$0xff] }
0x11f4   :  { %38101 = vmatpush3.msra.mxu0 %v42540_v33  ;;  %38102 = vmatprep.mubr.msk.f32.mxu0 %vm39953_vm1, %v45125_v61 }
0x11f5   :  { %38110 = vmatprep.subr.mxu0 %v45125_v61  ;;  %38127 = vmatprep.mubr.msk.f32.mxu1 %vm39953_vm1, %v45125_v61 }
0x11f7   :  { %38103 = vmatmul.mubr.f32.vlgmr.msra.gmra.mxu0 %v19672_v30 }
0x11f8   :  { %38111 = vmatpush3.msra.mxu0 %v19714_v36  ;;  %v17768_v40 = vpop.xlane.xlu1 %17767  ;;  %38112 = vmatprep.mubr.msk.f32.mxu0 %vm39953_vm1, %v45125_v61 }
0x11f9   :  { %39910 = vrcp.f32 %v17768_v40  ;;  %38120 = vmatprep.subr.mxu0 %v45125_v61  ;;  %v45182_v40 = vld [vmem:[#allocation10_spill] sm:$0xff] }
0x11fb   :  { %38113 = vmatmul.mubr.f32.vlgmr.msra.gmra.mxu0 %v19671_v57 }
0x11fc   :  { %v17771_v19 = vpop.xlane.xlu1 %17770  ;;  %38122 = vmatprep.mubr.msk.f32.mxu0 %vm39953_vm1, %v45125_v61  ;;  %v17774_v10 = vpop.xlane.xlu0 %17773 }
0x11fd   :  { %39912 = vrcp.f32 %v17771_v19 }
0x11fe   :  { %39914 = vrcp.f32 %v17774_v10 }
0x1200   :  { %v20052_v15 = vpop.permute.xlu1 %20051 }
0x1201   :  { %v20088_v48 = vand.u32 4294901760, %v20052_v15 }
0x1203   :  { %v20165_v52 = vsub.f32 %v20052_v15, %v20088_v48  ;;  %38121 = vmatpush3.msra.mxu0 %v20088_v48 }
0x1204   :  { %v20504_v35 = vpop.permute.xlu1 %20503  ;;  %38130 = vmatprep.subr.mxu0 %v45125_v61 }
0x1205   :  { %v20166_v13 = vand.u32 4294901760, %v20165_v52  ;;  %v20540_v21 = vand.u32 4294901760, %v20504_v35 }
0x1206   :  { %v39911_v49 = vpop.eup %39910 }
0x1207   :  { %v17786_v56 = vmul.f32 %v39911_v49, %v42447_v58  ;;  %v20167_v50 = vsub.f32 %v20165_v52, %v20166_v13  ;;  %v42607_v7 = vsub.f32 %v20504_v35, %v20540_v21 }
0x1208   :  { %v20956_v39 = vpop.permute.xlu1 %20955 }
0x1209   :  { %v20168_v16 = vand.u32 4294901760, %v20167_v50  ;;  %v20055_v12 = vsel %vm632_vm2, %v17786_v56, 0  ;;  %v20618_v63 = vand.u32 4294901760, %v42607_v7  ;;  %v42622_v32 = vand.u32 4294901760, %v20956_v39 }
0x120a   :  { %v39913_v17 = vpop.eup %39912  ;;  %v20123_v28 = vand.u32 4294901760, %v20055_v12 }
0x120b   :  { %v17788_v6 = vmul.f32 %v39913_v17, %v42449_v59  ;;  %38126 = vmatpush3.msra.mxu1 %v20168_v16  ;;  %v20619_v59 = vsub.f32 %v42607_v7, %v20618_v63  ;;  %v39915_v14 = vpop.eup %39914  ;;  %v42630_v46 = vsub.f32 %v20956_v39, %v42622_v32 }
0x120c   :  { %v20124_v37 = vsub.f32 %v20055_v12, %v20123_v28  ;;  %38128 = vmatmul.mubr.f32.vlgmr.msra.gmra.mxu1 %v20123_v28  ;;  %38135 = vmatprep.subr.mxu1 %v45125_v61  ;;  %v17790_v33 = vmul.f32 %v39915_v14, %v42453_v55 }
0x120d   :  { %38136 = vmatpush3.msra.mxu1 %v20088_v48  ;;  %38137 = vmatprep.mubr.msk.f32.mxu1 %vm39953_vm1, %v45125_v61  ;;  %v20507_v58 = vsel %vm632_vm2, %v17788_v6, 0  ;;  %v20620_v38 = vand.u32 4294901760, %v20619_v59  ;;  %v21070_v36 = vand.u32 4294901760, %v42630_v46 }
0x120e   :  { %38145 = vmatprep.subr.mxu1 %v45125_v61  ;;  %v20125_v20 = vand.u32 4294901760, %v20124_v37  ;;  %v42617_v5 = vand.u32 4294901760, %v20507_v58  ;;  %v20959_v55 = vsel %vm632_vm2, %v17790_v33, 0 }
0x120f   :  { %v21027_v9 = vand.u32 4294901760, %v20959_v55  ;;  %v21071_v57 = vsub.f32 %v42630_v46, %v21070_v36 }
0x1210   :  { %38138 = vmatmul.mubr.f32.vlgmr.msra.gmra.mxu1 %v20125_v20  ;;  %v20126_v62 = vsub.f32 %v20124_v37, %v20125_v20  ;;  %v20576_v34 = vsub.f32 %v20507_v58, %v42617_v5 }
0x1211   :  { %38146 = vmatpush3.msra.mxu1 %v20088_v48  ;;  %38147 = vmatprep.mubr.msk.f32.mxu1 %vm39953_vm1, %v45125_v61  ;;  %v21028_v41 = vsub.f32 %v20959_v55, %v21027_v9  ;;  %v21072_v30 = vand.u32 4294901760, %v21071_v57 }
0x1212   :  { %38155 = vmatprep.subr.mxu1 %v45125_v61  ;;  %v20127_v11 = vand.u32 4294901760, %v20126_v62  ;;  %v20577_v60 = vand.u32 4294901760, %v20576_v34 }
0x1213   :  { %v21029_v29 = vand.u32 4294901760, %v21028_v41 }
0x1214   :  { %38123 = vmatmul.mubr.f32.vlgmr.msra.gmra.mxu0 %v20127_v11  ;;  %38148 = vmatmul.mubr.f32.vlgmr.msra.gmra.mxu1 %v20123_v28  ;;  %v20578_v54 = vsub.f32 %v20576_v34, %v20577_v60 }
0x1215   :  { %38131 = vmatpush3.msra.mxu0 %v20165_v52  ;;  %38156 = vmatpush3.msra.mxu1 %v20620_v38  ;;  %v21030_v3 = vsub.f32 %v21028_v41, %v21029_v29 }
0x1216   :  { %38132 = vmatprep.mubr.msk.f32.mxu0 %vm39953_vm1, %v45125_v61  ;;  %38140 = vmatprep.subr.mxu0 %v45125_v61  ;;  %v20579_v22 = vand.u32 4294901760, %v20578_v54 }
0x1217   :  { %38157 = vmatprep.mubr.msk.f32.mxu1 %vm39953_vm1, %v45125_v61  ;;  %38165 = vmatprep.subr.mxu1 %v45125_v61  ;;  %v21031_v25 = vand.u32 4294901760, %v21030_v3 }
0x1218   :  { %38133 = vmatmul.mubr.f32.vlgmr.msra.gmra.mxu0 %v20124_v37  ;;  %38158 = vmatmul.mubr.f32.vlgmr.msra.gmra.mxu1 %v42617_v5 }
0x1219   :  { %38141 = vmatpush3.msra.mxu0 %v20166_v13  ;;  %38166 = vmatpush3.msra.mxu1 %v20540_v21 }
0x121a   :  { %38142 = vmatprep.mubr.msk.f32.mxu0 %vm39953_vm1, %v45125_v61  ;;  %38150 = vmatprep.subr.mxu0 %v45125_v61 }
0x121b   :  { %38167 = vmatprep.mubr.msk.f32.mxu1 %vm39953_vm1, %v45125_v61  ;;  %38175 = vmatprep.subr.mxu1 %v45125_v61 }
0x121c   :  { %38143 = vmatmul.mubr.f32.vlgmr.msra.gmra.mxu0 %v20123_v28  ;;  %38168 = vmatmul.mubr.f32.vlgmr.msra.gmra.mxu1 %v20577_v60 }
0x121d   :  { %38151 = vmatpush3.msra.mxu0 %v20540_v21  ;;  %38176 = vmatpush3.msra.mxu1 %v20540_v21 }
0x121e   :  { %38152 = vmatprep.mubr.msk.f32.mxu0 %vm39953_vm1, %v45125_v61  ;;  %38160 = vmatprep.subr.mxu0 %v45125_v61 }
0x121f   :  { %38177 = vmatprep.mubr.msk.f32.mxu1 %vm39953_vm1, %v45125_v61  ;;  %38185 = vmatprep.subr.mxu1 %v45125_v61 }
0x1220   :  { %38153 = vmatmul.mubr.f32.vlgmr.msra.gmra.mxu0 %v20579_v22  ;;  %38178 = vmatmul.mubr.f32.vlgmr.msra.gmra.mxu1 %v42617_v5 }
0x1221   :  { %38161 = vmatpush3.msra.mxu0 %v42607_v7  ;;  %38186 = vmatpush3.msra.mxu1 %v21072_v30 }
0x1222   :  { %38162 = vmatprep.mubr.msk.f32.mxu0 %vm39953_vm1, %v45125_v61  ;;  %38170 = vmatprep.subr.mxu0 %v45125_v61 }
0x1223   :  { %38187 = vmatprep.mubr.msk.f32.mxu1 %vm39953_vm1, %v45125_v61  ;;  %38195 = vmatprep.subr.mxu1 %v45125_v61 }
0x1224   :  { %38163 = vmatmul.mubr.f32.vlgmr.msra.gmra.mxu0 %v20576_v34  ;;  %38188 = vmatmul.mubr.f32.vlgmr.msra.gmra.mxu1 %v21027_v9 }
0x1225   :  { %38171 = vmatpush3.msra.mxu0 %v20618_v63  ;;  %38196 = vmatpush3.msra.mxu1 %v42622_v32 }
0x1226   :  { %38172 = vmatprep.mubr.msk.f32.mxu0 %vm39953_vm1, %v45125_v61  ;;  %38180 = vmatprep.subr.mxu0 %v45125_v61 }
0x1227   :  { %38197 = vmatprep.mubr.msk.f32.mxu1 %vm39953_vm1, %v45125_v61  ;;  %38205 = vmatprep.subr.mxu1 %v45125_v61 }
0x1228   :  { %38173 = vmatmul.mubr.f32.vlgmr.msra.gmra.mxu0 %v42617_v5  ;;  %38198 = vmatmul.mubr.f32.vlgmr.msra.gmra.mxu1 %v21029_v29 }
0x1229   :  { %38181 = vmatpush3.msra.mxu0 %v42622_v32  ;;  %38206 = vmatpush3.msra.mxu1 %v42622_v32 }
0x122a   :  { %38182 = vmatprep.mubr.msk.f32.mxu0 %vm39953_vm1, %v45125_v61  ;;  %38190 = vmatprep.subr.mxu0 %v45125_v61 }
0x122b   :  { %38207 = vmatprep.mubr.msk.f32.mxu1 %vm39953_vm1, %v45125_v61 }
0x122c   :  { %38183 = vmatmul.mubr.f32.vlgmr.msra.gmra.mxu0 %v21031_v25  ;;  %38208 = vmatmul.mubr.f32.vlgmr.msra.gmra.mxu1 %v21027_v9 }
0x122d   :  { %38191 = vmatpush3.msra.mxu0 %v42630_v46  ;;  %38192 = vmatprep.mubr.msk.f32.mxu0 %vm39953_vm1, %v45125_v61 }
0x122e   :  { %38200 = vmatprep.subr.mxu0 %v45125_v61  ;;  %38245 = vmatprep.mubr.msk.f32.mxu1 %vm7968_vm4, %v45181_v18 }
0x1230   :  { %38193 = vmatmul.mubr.f32.vlgmr.msra.gmra.mxu0 %v21028_v41 }
0x1231   :  { %38201 = vmatpush3.msra.mxu0 %v21070_v36  ;;  %38202 = vmatprep.mubr.msk.f32.mxu0 %vm39953_vm1, %v45125_v61 }
0x1234   :  { %38203 = vmatmul.mubr.f32.vlgmr.msra.gmra.mxu0 %v21027_v9 }
0x1235   :  { %38226 = vmatprep.mubr.f32.mxu0 %v45182_v40 }
0x1262   :  { %v17869_v19 = vpop.f32.mrf.mxu0  ;;  %v17945_v10 = vpop.f32.mrf.mxu1 }
0x1263   :  { %v17946_v15 = vadd.f32 %v17945_v10, %v17869_v19 }
0x1264   :  { %v37974_v48 = vpop.f32.mrf.mxu0  ;;  %v37979_v52 = vpop.f32.mrf.mxu1 }
0x1266   :  { %v18019_v35 = vpop.f32.mrf.mxu0 }
0x1267   :  { %v18020_v13 = vadd.f32 %v18019_v35, %v17946_v15  ;;  %v18093_v21 = vpop.f32.mrf.mxu1 }
0x1268   :  { %v37984_v49 = vpop.f32.mrf.mxu0 }
0x1269   :  { %v18094_v56 = vadd.f32 %v18093_v21, %v18020_v13  ;;  %v37989_v50 = vpop.f32.mrf.mxu1 }
0x126a   :  { %v18167_v7 = vpop.f32.mrf.mxu0 }
0x126b   :  { %v18168_v16 = vadd.f32 %v18167_v7, %v18094_v56  ;;  %v18239_v12 = vpop.f32.mrf.mxu1 }
0x126c   :  { %v37994_v17 = vpop.f32.mrf.mxu0 }
0x126d   :  { %v42688_v28 = vadd.f32 %v18239_v12, %v18168_v16  ;;  %v37999_v6 = vpop.f32.mrf.mxu1 }
0x126e   :  { %v18321_v63 = vpop.f32.mrf.mxu0 }
0x126f   :  { %v18397_v39 = vpop.f32.mrf.mxu1 }
0x1270   :  { %v18398_v37 = vadd.f32 %v18397_v39, %v18321_v63  ;;  %v38004_v58 = vpop.f32.mrf.mxu0 }
0x1271   :  { %v38009_v20 = vpop.f32.mrf.mxu1 }
0x1272   :  { %v18471_v5 = vpop.f32.mrf.mxu0 }
0x1273   :  { %v18472_v59 = vadd.f32 %v18471_v5, %v18398_v37  ;;  %v18545_v32 = vpop.f32.mrf.mxu1 }
0x1274   :  { %v38014_v14 = vpop.f32.mrf.mxu0 }
0x1275   :  { %v18546_v62 = vadd.f32 %v18545_v32, %v18472_v59  ;;  %v38019_v11 = vpop.f32.mrf.mxu1 }
0x1276   :  { %v18619_v34 = vpop.f32.mrf.mxu0 }
0x1277   :  { %v18620_v33 = vadd.f32 %v18619_v34, %v18546_v62  ;;  %v18691_v38 = vpop.f32.mrf.mxu1 }
0x1278   :  { %v38024_v46 = vpop.f32.mrf.mxu0 }
0x1279   :  { %v42690_v60 = vadd.f32 %v18691_v38, %v18620_v33  ;;  %v38029_v36 = vpop.f32.mrf.mxu1 }
0x1293   :  { %v18849_v55 = vpop.f32.mrf.mxu1 }
0x1295   :  { %v38039_v54 = vpop.f32.mrf.mxu1 }
0x1297   :  { %v18997_v9 = vpop.f32.mrf.mxu1 }
0x1299   :  { %v38049_v57 = vpop.f32.mrf.mxu1 }
0x129b   :  { %v18773_v22 = vpop.f32.mrf.mxu0  ;;  %v19143_v41 = vpop.f32.mrf.mxu1 }
0x129c   :  { %v18850_v30 = vadd.f32 %v18849_v55, %v18773_v22 }
0x129d   :  { %v38034_v29 = vpop.f32.mrf.mxu0  ;;  %v38059_v3 = vpop.f32.mrf.mxu1 }
0x129f   :  { %v18923_v25 = vpop.f32.mrf.mxu0  ;;  %v19301_v40 = vpop.f32.mrf.mxu1 }
0x12a0   :  { %v18924_v19 = vadd.f32 %v18923_v25, %v18850_v30 }
0x12a1   :  { %v38044_v10 = vpop.f32.mrf.mxu0  ;;  %v38069_v15 = vpop.f32.mrf.mxu1 }
0x12a2   :  { %v18998_v48 = vadd.f32 %v18997_v9, %v18924_v19 }
0x12a3   :  { %v19071_v52 = vpop.f32.mrf.mxu0  ;;  %v19449_v35 = vpop.f32.mrf.mxu1 }
0x12a4   :  { %v19072_v13 = vadd.f32 %v19071_v52, %v18998_v48 }
0x12a5   :  { %v38054_v21 = vpop.f32.mrf.mxu0  ;;  %v38079_v49 = vpop.f32.mrf.mxu1 }
0x12a6   :  { %v42692_v56 = vadd.f32 %v19143_v41, %v19072_v13 }
0x12a7   :  { %v19225_v50 = vpop.f32.mrf.mxu0  ;;  %v19595_v7 = vpop.f32.mrf.mxu1 }
0x12a8   :  { %v19302_v16 = vadd.f32 %v19301_v40, %v19225_v50 }
0x12a9   :  { %v38064_v12 = vpop.f32.mrf.mxu0  ;;  %v38089_v17 = vpop.f32.mrf.mxu1 }
0x12ab   :  { %v19375_v6 = vpop.f32.mrf.mxu0  ;;  %v19753_v63 = vpop.f32.mrf.mxu1 }
0x12ac   :  { %v19376_v39 = vadd.f32 %v19375_v6, %v19302_v16 }
0x12ad   :  { %v38074_v37 = vpop.f32.mrf.mxu0  ;;  %v38099_v58 = vpop.f32.mrf.mxu1 }
0x12ae   :  { %v19450_v20 = vadd.f32 %v19449_v35, %v19376_v39 }
0x12af   :  { %v19523_v5 = vpop.f32.mrf.mxu0  ;;  %v19901_v59 = vpop.f32.mrf.mxu1 }
0x12b0   :  { %v19524_v32 = vadd.f32 %v19523_v5, %v19450_v20 }
0x12b1   :  { %v38084_v14 = vpop.f32.mrf.mxu0  ;;  %v38109_v62 = vpop.f32.mrf.mxu1 }
0x12b2   :  { %v42694_v11 = vadd.f32 %v19595_v7, %v19524_v32 }
0x12b3   :  { %v19677_v34 = vpop.f32.mrf.mxu0  ;;  %v20047_v33 = vpop.f32.mrf.mxu1 }
0x12b4   :  { %v19754_v38 = vadd.f32 %v19753_v63, %v19677_v34 }
0x12b5   :  { %v38094_v46 = vpop.f32.mrf.mxu0  ;;  %v38119_v36 = vpop.f32.mrf.mxu1 }
0x12b7   :  { %v19827_v55 = vpop.f32.mrf.mxu0 }
0x12b8   :  { %v19828_v54 = vadd.f32 %v19827_v55, %v19754_v38 }
0x12b9   :  { %v38104_v9 = vpop.f32.mrf.mxu0 }
0x12ba   :  { %v19902_v57 = vadd.f32 %v19901_v59, %v19828_v54 }
0x12bb   :  { %v19975_v22 = vpop.f32.mrf.mxu0 }
0x12bc   :  { %v19976_v41 = vadd.f32 %v19975_v22, %v19902_v57 }
0x12bd   :  { %v38114_v30 = vpop.f32.mrf.mxu0 }
0x12be   :  { %v20048_v29 = vadd.f32 %v20047_v33, %v19976_v41 }
0x12cc   :  { %v20205_v3 = vpop.f32.mrf.mxu1 }
0x12ce   :  { %v38129_v25 = vpop.f32.mrf.mxu1 }
0x12d0   :  { %v20353_v40 = vpop.f32.mrf.mxu1 }
0x12d2   :  { %v38139_v19 = vpop.f32.mrf.mxu1 }
0x12d4   :  { %v20129_v10 = vpop.f32.mrf.mxu0  ;;  %v20499_v15 = vpop.f32.mrf.mxu1 }
0x12d5   :  { %v20206_v37 = vadd.f32 %v20205_v3, %v20129_v10 }
0x12d6   :  { %v38124_v48 = vpop.f32.mrf.mxu0  ;;  %v38149_v52 = vpop.f32.mrf.mxu1 }
0x12d8   :  { %v20279_v35 = vpop.f32.mrf.mxu0  ;;  %v20657_v13 = vpop.f32.mrf.mxu1 }
0x12d9   :  { %v20280_v59 = vadd.f32 %v20279_v35, %v20206_v37 }
0x12da   :  { %v38134_v21 = vpop.f32.mrf.mxu0  ;;  %v38159_v49 = vpop.f32.mrf.mxu1 }
0x12db   :  { %v20354_v46 = vadd.f32 %v20353_v40, %v20280_v59 }
0x12dc   :  { %v20427_v50 = vpop.f32.mrf.mxu0  ;;  %v20805_v7 = vpop.f32.mrf.mxu1 }
0x12dd   :  { %v20428_v22 = vadd.f32 %v20427_v50, %v20354_v46 }
0x12de   :  { %v38144_v16 = vpop.f32.mrf.mxu0  ;;  %v38169_v12 = vpop.f32.mrf.mxu1 }
0x12df   :  { %v20500_v10 = vadd.f32 %v20499_v15, %v20428_v22  ;;  %v42700_v16 = vand.u32 4294901760, %v20048_v29 }
0x12e0   :  { %v20581_v17 = vpop.f32.mrf.mxu0  ;;  %v20951_v6 = vpop.f32.mrf.mxu1 }
0x12e1   :  { %v20658_v58 = vadd.f32 %v20657_v13, %v20581_v17  ;;  %v42698_v49 = vand.u32 4294901760, %v20500_v10  ;;  %v42706_v17 = vand.u32 4294901760, %v42694_v11 }
0x12e2   :  { %v38154_v63 = vpop.f32.mrf.mxu0  ;;  %v38179_v39 = vpop.f32.mrf.mxu1 }
0x12e3   :  { %v42709_v15 = vsub.f32 %v20500_v10, %v42698_v49  ;;  %v42714_v63 = vand.u32 4294901760, %v42692_v56  ;;  %v42717_v39 = vsub.f32 %v20048_v29, %v42700_v16 }
0x12e4   :  { %v20731_v20 = vpop.f32.mrf.mxu0  ;;  %v21109_v5 = vpop.f32.mrf.mxu1 }
0x12e5   :  { %v20732_v32 = vadd.f32 %v20731_v20, %v20658_v58  ;;  %v42728_v20 = vand.u32 4294901760, %v42690_v60  ;;  %v42735_v29 = vand.u32 4294901760, %v42709_v15 }
0x12e6   :  { %v38164_v14 = vpop.f32.mrf.mxu0  ;;  %v38189_v62 = vpop.f32.mrf.mxu1 }
0x12e7   :  { %v20806_v34 = vadd.f32 %v20805_v7, %v20732_v32  ;;  %v42742_v32 = vand.u32 4294901760, %v42688_v28  ;;  %v42747_v14 = vsub.f32 %v42692_v56, %v42714_v63  ;;  %v21539_v46 = vsub.f32 %v42709_v15, %v42735_v29 }
0x12e8   :  { %v20879_v33 = vpop.f32.mrf.mxu0  ;;  %v21257_v38 = vpop.f32.mrf.mxu1 }
0x12e9   :  { %v20880_v54 = vadd.f32 %v20879_v33, %v20806_v34  ;;  %v42760_v33 = vsub.f32 %v42690_v60, %v42728_v20 }
0x12ea   :  { %v38174_v36 = vpop.f32.mrf.mxu0  ;;  %v38199_v55 = vpop.f32.mrf.mxu1 }
0x12eb   :  { %v20952_v3 = vadd.f32 %v20951_v6, %v20880_v54  ;;  %v42773_v36 = vsub.f32 %v42688_v28, %v42742_v32  ;;  %v42776_v55 = vand.u32 4294901760, %v42747_v14  ;;  %v42791_v28 = vand.u32 4294901760, %v21539_v46 }
0x12ec   :  { %v21033_v9 = vpop.f32.mrf.mxu0  ;;  %v21403_v57 = vpop.f32.mrf.mxu1 }
0x12ed   :  { %v21110_v25 = vadd.f32 %v21109_v5, %v21033_v9  ;;  %v42696_v35 = vand.u32 4294901760, %v20952_v3  ;;  %v42732_v5 = vsub.f32 %v42694_v11, %v42706_v17  ;;  %v42750_v11 = vand.u32 4294901760, %v42717_v39 }
0x12ee   :  { %v38184_v41 = vpop.f32.mrf.mxu0  ;;  %v38209_v30 = vpop.f32.mrf.mxu1  ;;  %v42787_v9 = vand.u32 4294901760, %v42760_v33  ;;  %v42798_v22 = vand.u32 4294901760, %v42773_v36 }
0x12ef   :  { %v42703_v50 = vsub.f32 %v20952_v3, %v42696_v35  ;;  %v42763_v56 = vand.u32 4294901760, %v42732_v5  ;;  %v21546_v54 = vsub.f32 %v42717_v39, %v42750_v11  ;;  %v21560_v30 = vsub.f32 %v42747_v14, %v42776_v55 }
0x12f0   :  { %v21183_v19 = vpop.f32.mrf.mxu0  ;;  %v21574_v10 = vsub.f32 %v42773_v36, %v42798_v22 }
0x12f1   :  { %v21184_v48 = vadd.f32 %v21183_v19, %v21110_v25  ;;  %v42720_v37 = vand.u32 4294901760, %v42703_v50  ;;  %v42802_v41 = vand.u32 4294901760, %v21546_v54  ;;  %v21567_v25 = vsub.f32 %v42760_v33, %v42787_v9 }
0x12f2   :  { %v38194_v52 = vpop.f32.mrf.mxu0  ;;  %v42818_v19 = vand.u32 4294901760, %v21560_v30 }
0x12f3   :  { %v21258_v13 = vadd.f32 %v21257_v38, %v21184_v48  ;;  %v21532_v34 = vsub.f32 %v42703_v50, %v42720_v37  ;;  %v45183_v48 = vld [vmem:[#allocation14_spill] sm:$0xff]  ;;  %v42826_v52 = vand.u32 4294901760, %v21567_v25 }
0x12f4   :  { %v21331_v21 = vpop.f32.mrf.mxu0 }
0x12f5   :  { %v21332_v40 = vadd.f32 %v21331_v21, %v21258_v13  ;;  %v42780_v60 = vand.u32 4294901760, %v21532_v34  ;;  %v42832_v13 = vand.u32 4294901760, %v21574_v10  ;;  %v45184_v21 = vld [vmem:[#allocation11_spill] sm:$0xff] }
0x12f6   :  { %v38204_v7 = vpop.f32.mrf.mxu0 }
0x12f7   :  { %v21404_v12 = vadd.f32 %v21403_v57, %v21332_v40  ;;  %v21553_v57 = vsub.f32 %v42732_v5, %v42763_v56  ;;  %v45185_v40 = vld [vmem:[#allocation8_spill] sm:$0xff] }
0x12f8   :  { %v45186_v7 = vld [vmem:[#allocation12_spill] sm:$0xff] }
0x12f9   :  { %v42711_v6 = vand.u32 4294901760, %v21404_v12  ;;  %v42810_v3 = vand.u32 4294901760, %v21553_v57 }
0x12fb   :  { %v42723_v58 = vsub.f32 %v21404_v12, %v42711_v6  ;;  %38210 = vmatprep.subr.mxu0 %v42711_v6  ;;  %v45187_v12 = vld [vmem:[#allocation9_spill] sm:$0xff] }
0x12fc   :  { %38211 = vmatpush3.msra.mxu0 %v42711_v6 }
0x12fd   :  { %v42738_v59 = vand.u32 4294901760, %v42723_v58  ;;  %38212 = vmatprep.subr.mxu0 %v42696_v35 }
0x12fe   :  { %38213 = vmatpush3.msra.mxu0 %v42696_v35 }
0x12ff   :  { %38214 = vmatprep.subr.mxu0 %v42698_v49  ;;  %v21525_v62 = vsub.f32 %v42723_v58, %v42738_v59 }
0x1300   :  { %38215 = vmatpush3.msra.mxu0 %v42698_v49 }
0x1301   :  { %38216 = vmatprep.subr.mxu0 %v42700_v16  ;;  %v42766_v38 = vand.u32 4294901760, %v21525_v62  ;;  %v45188_v62 = vld [vmem:[#allocation13_spill] sm:$0xff] }
0x1302   :  { %38217 = vmatpush3.msra.mxu0 %v42700_v16 }
0x1303   :  { %38218 = vmatprep.subr.mxu0 %v42706_v17  ;;  %38229 = vmatprep.subr.mxu1 %v42766_v38 }
0x1304   :  { %38219 = vmatpush3.msra.mxu0 %v42706_v17  ;;  %38230 = vmatpush3.msra.mxu1 %v42766_v38 }
0x1305   :  { %38220 = vmatprep.subr.mxu0 %v42714_v63  ;;  %38231 = vmatprep.subr.mxu1 %v42780_v60 }
0x1306   :  { %38221 = vmatpush3.msra.mxu0 %v42714_v63  ;;  %38232 = vmatpush3.msra.mxu1 %v42780_v60 }
0x1307   :  { %38222 = vmatprep.subr.mxu0 %v42728_v20  ;;  %38233 = vmatprep.subr.mxu1 %v42791_v28 }
0x1308   :  { %38223 = vmatpush3.msra.mxu0 %v42728_v20  ;;  %38234 = vmatpush3.msra.mxu1 %v42791_v28 }
0x1309   :  { %38224 = vmatprep.subr.mxu0 %v42742_v32  ;;  %38235 = vmatprep.subr.mxu1 %v42802_v41 }
0x130a   :  { %38225 = vmatpush3.msra.mxu0 %v42742_v32  ;;  %38236 = vmatpush3.msra.mxu1 %v42802_v41 }
0x130b   :  { %38237 = vmatprep.subr.mxu1 %v42810_v3  ;;  %38248 = vmatprep.subr.mxu0 %v42723_v58 }
0x130c   :  { %38227 = vmatmul.mubr.f32.vlgmr.msra.gmra.mxu0 %v45183_v48  ;;  %38238 = vmatpush3.msra.mxu1 %v42810_v3 }
0x130d   :  { %38249 = vmatpush3.msra.mxu0 %v42723_v58  ;;  %38239 = vmatprep.subr.mxu1 %v42818_v19 }
0x130e   :  { %38250 = vmatprep.subr.mxu0 %v42703_v50  ;;  %38240 = vmatpush3.msra.mxu1 %v42818_v19 }
0x130f   :  { %38251 = vmatpush3.msra.mxu0 %v42703_v50  ;;  %38241 = vmatprep.subr.mxu1 %v42826_v52 }
0x1310   :  { %38252 = vmatprep.subr.mxu0 %v42709_v15  ;;  %38242 = vmatpush3.msra.mxu1 %v42826_v52 }
0x1311   :  { %38253 = vmatpush3.msra.mxu0 %v42709_v15  ;;  %38243 = vmatprep.subr.mxu1 %v42832_v13 }
0x1312   :  { %38254 = vmatprep.subr.mxu0 %v42717_v39  ;;  %38244 = vmatpush3.msra.mxu1 %v42832_v13 }
0x1313   :  { %38255 = vmatpush3.msra.mxu0 %v42717_v39  ;;  %38246 = vmatmul.mubr.msk.f32.vlgmr.msra.gmra.mxu1 %vm7968_vm4, %v45184_v21 }
0x1314   :  { %38256 = vmatprep.subr.mxu0 %v42732_v5  ;;  %38267 = vmatprep.subr.mxu1 %v42711_v6 }
0x1315   :  { %38257 = vmatpush3.msra.mxu0 %v42732_v5  ;;  %38268 = vmatpush3.msra.mxu1 %v42711_v6 }
0x1316   :  { %38258 = vmatprep.subr.mxu0 %v42747_v14  ;;  %38269 = vmatprep.subr.mxu1 %v42696_v35 }
0x1317   :  { %38259 = vmatpush3.msra.mxu0 %v42747_v14  ;;  %38270 = vmatpush3.msra.mxu1 %v42696_v35 }
0x1318   :  { %38260 = vmatprep.subr.mxu0 %v42760_v33  ;;  %38271 = vmatprep.subr.mxu1 %v42698_v49 }
0x1319   :  { %38261 = vmatpush3.msra.mxu0 %v42760_v33  ;;  %38272 = vmatpush3.msra.mxu1 %v42698_v49 }
0x131a   :  { %38262 = vmatprep.subr.mxu0 %v42773_v36  ;;  %38273 = vmatprep.subr.mxu1 %v42700_v16 }
0x131b   :  { %38263 = vmatpush3.msra.mxu0 %v42773_v36  ;;  %38264 = vmatprep.mubr.f32.mxu0 %v45185_v40 }
0x131c   :  { %38274 = vmatpush3.msra.mxu1 %v42700_v16  ;;  %38265 = vmatmul.mubr.f32.vlgmr.msra.gmra.mxu0 %v45186_v7 }
0x131d   :  { %38275 = vmatprep.subr.mxu1 %v42706_v17  ;;  %38286 = vmatprep.subr.mxu0 %v42738_v59 }
0x131e   :  { %38276 = vmatpush3.msra.mxu1 %v42706_v17  ;;  %38287 = vmatpush3.msra.mxu0 %v42738_v59 }
0x131f   :  { %38277 = vmatprep.subr.mxu1 %v42714_v63  ;;  %38288 = vmatprep.subr.mxu0 %v42720_v37 }
0x1320   :  { %38278 = vmatpush3.msra.mxu1 %v42714_v63  ;;  %38289 = vmatpush3.msra.mxu0 %v42720_v37 }
0x1321   :  { %38279 = vmatprep.subr.mxu1 %v42728_v20  ;;  %38290 = vmatprep.subr.mxu0 %v42735_v29 }
0x1322   :  { %38280 = vmatpush3.msra.mxu1 %v42728_v20  ;;  %38291 = vmatpush3.msra.mxu0 %v42735_v29 }
0x1323   :  { %38281 = vmatprep.subr.mxu1 %v42742_v32  ;;  %38292 = vmatprep.subr.mxu0 %v42750_v11 }
0x1324   :  { %38282 = vmatpush3.msra.mxu1 %v42742_v32  ;;  %38283 = vmatprep.mubr.f32.mxu1 %v45187_v12 }
0x1325   :  { %38293 = vmatpush3.msra.mxu0 %v42750_v11  ;;  %38284 = vmatmul.mubr.f32.vlgmr.msra.gmra.mxu1 %v45188_v62 }
0x1326   :  { %38294 = vmatprep.subr.mxu0 %v42763_v56  ;;  %38305 = vmatprep.subr.mxu1 %v42711_v6 }
0x1327   :  { %38295 = vmatpush3.msra.mxu0 %v42763_v56  ;;  %38306 = vmatpush3.msra.mxu1 %v42711_v6 }
0x1328   :  { %38296 = vmatprep.subr.mxu0 %v42776_v55  ;;  %38307 = vmatprep.subr.mxu1 %v42696_v35 }
0x1329   :  { %38297 = vmatpush3.msra.mxu0 %v42776_v55  ;;  %38308 = vmatpush3.msra.mxu1 %v42696_v35 }
0x132a   :  { %38298 = vmatprep.subr.mxu0 %v42787_v9  ;;  %38309 = vmatprep.subr.mxu1 %v42698_v49 }
0x132b   :  { %38299 = vmatpush3.msra.mxu0 %v42787_v9  ;;  %38310 = vmatpush3.msra.mxu1 %v42698_v49 }
0x132c   :  { %38300 = vmatprep.subr.mxu0 %v42798_v22  ;;  %38311 = vmatprep.subr.mxu1 %v42700_v16 }
0x132d   :  { %38301 = vmatpush3.msra.mxu0 %v42798_v22  ;;  %38302 = vmatprep.mubr.msk.f32.mxu0 %vm7968_vm4, %v45181_v18 }
0x132e   :  { %38312 = vmatpush3.msra.mxu1 %v42700_v16  ;;  %38303 = vmatmul.mubr.msk.f32.vlgmr.msra.gmra.mxu0 %vm7968_vm4, %v45184_v21 }
0x132f   :  { %38313 = vmatprep.subr.mxu1 %v42706_v17  ;;  %38321 = vmatprep.mubr.msk.f32.mxu1 %vm7968_vm4, %v45181_v18  ;;  %v34641_v18 = vld [vmem:[%s45049_s2 + $0x20] sm:$0xff] }
0x1330   :  { %38314 = vmatpush3.msra.mxu1 %v42706_v17  ;;  %v22029_v34 = vand.u32 4294901760, %v34641_v18 }
0x1331   :  { %38315 = vmatprep.subr.mxu1 %v42714_v63 }
0x1332   :  { %38316 = vmatpush3.msra.mxu1 %v42714_v63  ;;  %v22116_v46 = vsub.f32 %v34641_v18, %v22029_v34  ;;  %38324 = vmatprep.subr.mxu0 %v22029_v34 }
0x1333   :  { %38317 = vmatprep.subr.mxu1 %v42728_v20  ;;  %38325 = vmatpush3.msra.mxu0 %v22029_v34 }
0x1334   :  { %38318 = vmatpush3.msra.mxu1 %v42728_v20  ;;  %v22117_v54 = vand.u32 4294901760, %v22116_v46  ;;  %38334 = vmatprep.subr.mxu0 %v22116_v46 }
0x1335   :  { %38319 = vmatprep.subr.mxu1 %v42742_v32 }
0x1336   :  { %38320 = vmatpush3.msra.mxu1 %v42742_v32  ;;  %v22118_v57 = vsub.f32 %v22116_v46, %v22117_v54 }
0x1337   :  { %38322 = vmatmul.mubr.msk.f32.vlgmr.msra.gmra.mxu1 %vm7968_vm4, %v45184_v21 }
0x1338   :  { %v22119_v30 = vand.u32 4294901760, %v22118_v57 }
0x133a   :  { %38329 = vmatprep.subr.mxu1 %v22119_v30 }
0x133b   :  { %38330 = vmatpush3.msra.mxu1 %v22119_v30 }
0x133c   :  { %38339 = vmatprep.subr.mxu1 %v22029_v34 }
0x13cc   :  { %v38228_v25 = vpop.f32.mrf.mxu0 }
0x13ce   :  { %v21491_v10 = vpop.f32.mrf.mxu0 }
0x13d3   :  { %v38247_v48 = vpop.f32.mrf.mxu1 }
0x13d4   :  { %v21619_v62 = vadd.f32 %v38247_v48, %v38228_v25 }
0x13d5   :  { %v21612_v21 = vpop.f32.mrf.mxu1 }
0x13d6   :  { %v21613_v24 = vadd.f32 %v21612_v21, %v21491_v10 }
0x13dc   :  { %v38266_v40 = vpop.f32.mrf.mxu0 }
0x13dd   :  { %v21714_v18 = vadd.f32 %v38266_v40, %v21619_v62 }
0x13de   :  { %v21706_v7 = vpop.f32.mrf.mxu0 }
0x13df   :  { %v21707_v4 = vadd.f32 %v21706_v7, %v21613_v24 }
0x13e5   :  { %v38285_v12 = vpop.f32.mrf.mxu1 }
0x13e6   :  { %v21803_v2 = vadd.f32 %v38285_v12, %v21714_v18 }
0x13e7   :  { %v21794_v1 = vpop.f32.mrf.mxu1 }
0x13e8   :  { %v21795_v61 = vadd.f32 %v21794_v1, %v21707_v4  ;;  %v45194_v1 = vld [vmem:[#allocation20_spill] sm:$0xff] }
0x13ee   :  { %v38304_v23 = vpop.f32.mrf.mxu0 }
0x13ef   :  { %v21904_v57 = vadd.f32 %v38304_v23, %v21803_v2  ;;  %v45193_v2 = vld [vmem:[#allocation19_spill] sm:$0xff]  ;;  %v45195_v23 = vld [vmem:[#allocation17_spill] sm:$0xff] }
0x13f0   :  { %v21897_v51 = vpop.f32.mrf.mxu0 }
0x13f1   :  { %v21898_v30 = vadd.f32 %v21897_v51, %v21795_v61 }
0x13f7   :  { %v38323_v0 = vpop.f32.mrf.mxu1 }
0x13f8   :  { %v21989_v8 = vadd.f32 %v38323_v0, %v21904_v57  ;;  %v45196_v0 = vld [vmem:[#allocation18_spill] sm:$0xff] }
0x13f9   :  { %v21982_v26 = vpop.f32.mrf.mxu1 }
0x13fa   :  { %v21996_v27 = vsel %vm632_vm2, %v21989_v8, 0  ;;  %v21983_v42 = vadd.f32 %v21982_v26, %v21898_v30  ;;  %v34642_v8 = vld [vmem:[%s45049_s2 + $0x28] sm:$0xff] }
0x13fb   :  { %v22074_v31 = vand.u32 4294901760, %v21996_v27 }
0x13fc   :  { %v21993_v45 = vsel %vm632_vm2, %v21983_v42, 0  ;;  %v45191_v42 = vld [vmem:[#allocation21_spill] sm:$0xff] }
0x13fd   :  { %v22075_v25 = vsub.f32 %v21996_v27, %v22074_v31  ;;  %v22064_v48 = vand.u32 4294901760, %v21993_v45  ;;  %v45189_v27 = vld [vmem:[#allocation15_spill] sm:$0xff] }
0x13ff   :  { %v22076_v10 = vand.u32 4294901760, %v22075_v25  ;;  %v22065_v40 = vsub.f32 %v21993_v45, %v22064_v48  ;;  %38331 = vmatprep.mubr.f32.mxu1 %v22064_v48  ;;  %v45192_v45 = vld [vmem:[#allocation22_spill] sm:$0xff] }
0x1400   :  { %38332 = vmatmul.mubr.f32.vlgmr.msra.gmra.mxu1 %v22074_v31 }
0x1401   :  { %38340 = vmatpush3.msra.mxu1 %v22029_v34  ;;  %v22066_v24 = vand.u32 4294901760, %v22065_v40  ;;  %v22077_v4 = vsub.f32 %v22075_v25, %v22076_v10 }
0x1402   :  { %38349 = vmatprep.subr.mxu1 %v22029_v34 }
0x1403   :  { %38341 = vmatprep.mubr.f32.mxu1 %v22066_v24  ;;  %v22067_v51 = vsub.f32 %v22065_v40, %v22066_v24  ;;  %v22078_v26 = vand.u32 4294901760, %v22077_v4 }
0x1404   :  { %38342 = vmatmul.mubr.f32.vlgmr.msra.gmra.mxu1 %v22076_v10 }
0x1405   :  { %38350 = vmatpush3.msra.mxu1 %v22029_v34  ;;  %38351 = vmatprep.mubr.f32.mxu1 %v22064_v48  ;;  %v22068_v61 = vand.u32 4294901760, %v22067_v51  ;;  %v43033_v34 = vand.u32 4294901760, %v34642_v8 }
0x1406   :  { %38373 = vmatprep.subr.mxu1 %v42766_v38 }
0x1407   :  { %38326 = vmatprep.mubr.f32.mxu0 %v22068_v61 }
0x1408   :  { %38327 = vmatmul.mubr.f32.vlgmr.msra.gmra.mxu0 %v22078_v26  ;;  %38352 = vmatmul.mubr.f32.vlgmr.msra.gmra.mxu1 %v22074_v31 }
0x1409   :  { %38374 = vmatpush3.msra.mxu1 %v42766_v38  ;;  %38335 = vmatpush3.msra.mxu0 %v22116_v46  ;;  %v43036_v46 = vsub.f32 %v34642_v8, %v43033_v34 }
0x140a   :  { %38336 = vmatprep.mubr.f32.mxu0 %v22065_v40  ;;  %38375 = vmatprep.subr.mxu1 %v42780_v60 }
0x140b   :  { %38376 = vmatpush3.msra.mxu1 %v42780_v60  ;;  %38344 = vmatprep.subr.mxu0 %v22117_v54 }
0x140c   :  { %38377 = vmatprep.subr.mxu1 %v42791_v28  ;;  %38337 = vmatmul.mubr.f32.vlgmr.msra.gmra.mxu0 %v22075_v25 }
0x140d   :  { %38345 = vmatpush3.msra.mxu0 %v22117_v54  ;;  %38378 = vmatpush3.msra.mxu1 %v42791_v28  ;;  %v43041_v54 = vand.u32 4294901760, %v43036_v46 }
0x140e   :  { %38346 = vmatprep.mubr.f32.mxu0 %v22064_v48  ;;  %38354 = vmatprep.subr.mxu0 %v42711_v6 }
0x140f   :  { %38379 = vmatprep.subr.mxu1 %v42802_v41  ;;  %38389 = vmatprep.mubr.msk.f32.mxu1 %vm7968_vm4, %v45189_v27  ;;  %v23199_v21 = vsub.f32 %v43036_v46, %v43041_v54 }
0x1410   :  { %38380 = vmatpush3.msra.mxu1 %v42802_v41  ;;  %38347 = vmatmul.mubr.f32.vlgmr.msra.gmra.mxu0 %v22074_v31  ;;  %v45190_v31 = vld [vmem:[#allocation16_spill] sm:$0xff] }
0x1411   :  { %38381 = vmatprep.subr.mxu1 %v42810_v3  ;;  %38355 = vmatpush3.msra.mxu0 %v42711_v6  ;;  %v23200_v7 = vand.u32 4294901760, %v23199_v21 }
0x1412   :  { %38382 = vmatpush3.msra.mxu1 %v42810_v3  ;;  %38356 = vmatprep.subr.mxu0 %v42696_v35 }
0x1413   :  { %38383 = vmatprep.subr.mxu1 %v42818_v19  ;;  %38357 = vmatpush3.msra.mxu0 %v42696_v35 }
0x1414   :  { %38384 = vmatpush3.msra.mxu1 %v42818_v19  ;;  %38358 = vmatprep.subr.mxu0 %v42698_v49 }
0x1415   :  { %38385 = vmatprep.subr.mxu1 %v42826_v52  ;;  %38359 = vmatpush3.msra.mxu0 %v42698_v49 }
0x1416   :  { %38386 = vmatpush3.msra.mxu1 %v42826_v52  ;;  %38360 = vmatprep.subr.mxu0 %v42700_v16 }
0x1417   :  { %38387 = vmatprep.subr.mxu1 %v42832_v13  ;;  %38361 = vmatpush3.msra.mxu0 %v42700_v16 }
0x1418   :  { %38388 = vmatpush3.msra.mxu1 %v42832_v13  ;;  %38362 = vmatprep.subr.mxu0 %v42706_v17 }
0x1419   :  { %38411 = vmatprep.subr.mxu1 %v42711_v6  ;;  %38363 = vmatpush3.msra.mxu0 %v42706_v17 }
0x141a   :  { %38390 = vmatmul.mubr.msk.f32.vlgmr.msra.gmra.mxu1 %vm7968_vm4, %v45190_v31  ;;  %38364 = vmatprep.subr.mxu0 %v42714_v63 }
0x141b   :  { %38412 = vmatpush3.msra.mxu1 %v42711_v6  ;;  %38365 = vmatpush3.msra.mxu0 %v42714_v63 }
0x141c   :  { %38413 = vmatprep.subr.mxu1 %v42696_v35  ;;  %38366 = vmatprep.subr.mxu0 %v42728_v20 }
0x141d   :  { %38414 = vmatpush3.msra.mxu1 %v42696_v35  ;;  %38367 = vmatpush3.msra.mxu0 %v42728_v20 }
0x141e   :  { %38415 = vmatprep.subr.mxu1 %v42698_v49  ;;  %38368 = vmatprep.subr.mxu0 %v42742_v32 }
0x141f   :  { %38416 = vmatpush3.msra.mxu1 %v42698_v49  ;;  %38369 = vmatpush3.msra.mxu0 %v42742_v32 }
0x1420   :  { %38417 = vmatprep.subr.mxu1 %v42700_v16  ;;  %38370 = vmatprep.mubr.f32.mxu0 %v45191_v42 }
0x1421   :  { %38418 = vmatpush3.msra.mxu1 %v42700_v16  ;;  %38371 = vmatmul.mubr.f32.vlgmr.msra.gmra.mxu0 %v45192_v45 }
0x1422   :  { %38392 = vmatprep.subr.mxu0 %v42723_v58  ;;  %38419 = vmatprep.subr.mxu1 %v42706_v17 }
0x1423   :  { %38393 = vmatpush3.msra.mxu0 %v42723_v58  ;;  %38420 = vmatpush3.msra.mxu1 %v42706_v17 }
0x1424   :  { %38394 = vmatprep.subr.mxu0 %v42703_v50  ;;  %38421 = vmatprep.subr.mxu1 %v42714_v63 }
0x1425   :  { %38395 = vmatpush3.msra.mxu0 %v42703_v50  ;;  %38422 = vmatpush3.msra.mxu1 %v42714_v63 }
0x1426   :  { %38396 = vmatprep.subr.mxu0 %v42709_v15  ;;  %38423 = vmatprep.subr.mxu1 %v42728_v20 }
0x1427   :  { %38397 = vmatpush3.msra.mxu0 %v42709_v15  ;;  %38424 = vmatpush3.msra.mxu1 %v42728_v20 }
0x1428   :  { %38398 = vmatprep.subr.mxu0 %v42717_v39  ;;  %38425 = vmatprep.subr.mxu1 %v42742_v32 }
0x1429   :  { %38399 = vmatpush3.msra.mxu0 %v42717_v39  ;;  %38426 = vmatpush3.msra.mxu1 %v42742_v32 }
0x142a   :  { %38400 = vmatprep.subr.mxu0 %v42732_v5  ;;  %38427 = vmatprep.mubr.f32.mxu1 %v45193_v2 }
0x142b   :  { %38449 = vmatprep.subr.mxu1 %v42711_v6  ;;  %38401 = vmatpush3.msra.mxu0 %v42732_v5 }
0x142c   :  { %38428 = vmatmul.mubr.f32.vlgmr.msra.gmra.mxu1 %v45194_v1  ;;  %38402 = vmatprep.subr.mxu0 %v42747_v14 }
0x142d   :  { %38450 = vmatpush3.msra.mxu1 %v42711_v6  ;;  %38403 = vmatpush3.msra.mxu0 %v42747_v14 }
0x142e   :  { %38451 = vmatprep.subr.mxu1 %v42696_v35  ;;  %38404 = vmatprep.subr.mxu0 %v42760_v33 }
0x142f   :  { %38452 = vmatpush3.msra.mxu1 %v42696_v35  ;;  %38405 = vmatpush3.msra.mxu0 %v42760_v33 }
0x1430   :  { %38453 = vmatprep.subr.mxu1 %v42698_v49  ;;  %38406 = vmatprep.subr.mxu0 %v42773_v36 }
0x1431   :  { %38454 = vmatpush3.msra.mxu1 %v42698_v49  ;;  %38407 = vmatpush3.msra.mxu0 %v42773_v36 }
0x1432   :  { %38455 = vmatprep.subr.mxu1 %v42700_v16  ;;  %38408 = vmatprep.mubr.f32.mxu0 %v45195_v23 }
0x1433   :  { %38456 = vmatpush3.msra.mxu1 %v42700_v16  ;;  %38409 = vmatmul.mubr.f32.vlgmr.msra.gmra.mxu0 %v45196_v0 }
0x1434   :  { %38430 = vmatprep.subr.mxu0 %v42738_v59  ;;  %38457 = vmatprep.subr.mxu1 %v42706_v17 }
0x1435   :  { %38431 = vmatpush3.msra.mxu0 %v42738_v59  ;;  %38458 = vmatpush3.msra.mxu1 %v42706_v17 }
0x1436   :  { %38432 = vmatprep.subr.mxu0 %v42720_v37  ;;  %38459 = vmatprep.subr.mxu1 %v42714_v63 }
0x1437   :  { %38433 = vmatpush3.msra.mxu0 %v42720_v37  ;;  %38460 = vmatpush3.msra.mxu1 %v42714_v63 }
0x1438   :  { %38434 = vmatprep.subr.mxu0 %v42735_v29  ;;  %38461 = vmatprep.subr.mxu1 %v42728_v20 }
0x1439   :  { %38435 = vmatpush3.msra.mxu0 %v42735_v29  ;;  %38462 = vmatpush3.msra.mxu1 %v42728_v20 }
0x143a   :  { %38436 = vmatprep.subr.mxu0 %v42750_v11  ;;  %38463 = vmatprep.subr.mxu1 %v42742_v32 }
0x143b   :  { %38437 = vmatpush3.msra.mxu0 %v42750_v11  ;;  %38464 = vmatpush3.msra.mxu1 %v42742_v32 }
0x143c   :  { %38438 = vmatprep.subr.mxu0 %v42763_v56  ;;  %38446 = vmatprep.mubr.msk.f32.mxu0 %vm7968_vm4, %v45189_v27 }
0x143d   :  { %38439 = vmatpush3.msra.mxu0 %v42763_v56  ;;  %38465 = vmatprep.mubr.msk.f32.mxu1 %vm7968_vm4, %v45189_v27 }
0x143e   :  { %38440 = vmatprep.subr.mxu0 %v42776_v55  ;;  %38466 = vmatmul.mubr.msk.f32.vlgmr.msra.gmra.mxu1 %vm7968_vm4, %v45190_v31 }
0x143f   :  { %38441 = vmatpush3.msra.mxu0 %v42776_v55  ;;  %38473 = vmatprep.subr.mxu1 %v23200_v7 }
0x1440   :  { %38442 = vmatprep.subr.mxu0 %v42787_v9  ;;  %38474 = vmatpush3.msra.mxu1 %v23200_v7 }
0x1441   :  { %38443 = vmatpush3.msra.mxu0 %v42787_v9  ;;  %38483 = vmatprep.subr.mxu1 %v43033_v34 }
0x1442   :  { %38444 = vmatprep.subr.mxu0 %v42798_v22 }
0x1443   :  { %38445 = vmatpush3.msra.mxu0 %v42798_v22 }
0x1444   :  { %38447 = vmatmul.mubr.msk.f32.vlgmr.msra.gmra.mxu0 %vm7968_vm4, %v45190_v31  ;;  %38468 = vmatprep.subr.mxu0 %v43033_v34 }
0x1445   :  { %38469 = vmatpush3.msra.mxu0 %v43033_v34 }
0x1446   :  { %38478 = vmatprep.subr.mxu0 %v43036_v46 }
0x14c0   :  { %v38333_v12 = vpop.f32.mrf.mxu1 }
0x14c2   :  { %v43047_v62 = vpop.f32.mrf.mxu1 }
0x14c3   :  { %45197 = vst [vmem:[#allocation26_spill] sm:$0xff] %v43047_v62 }
0x14c4   :  { %v38343_v30 = vpop.f32.mrf.mxu1 }
0x14c6   :  { %v43051_v40 = vpop.f32.mrf.mxu1 }
0x14c7   :  { %45199 = vst [vmem:[#allocation38_spill] sm:$0xff] %v43051_v40 }
0x14c8   :  { %v38328_v18 = vpop.f32.mrf.mxu0  ;;  %v38353_v26 = vpop.f32.mrf.mxu1 }
0x14c9   :  { %v22163_v57 = vadd.f32 %v38333_v12, %v38328_v18 }
0x14ca   :  { %v43049_v25 = vpop.f32.mrf.mxu0  ;;  %v43059_v45 = vpop.f32.mrf.mxu1 }
0x14cb   :  { %45198 = vst [vmem:[#allocation39_spill] sm:$0xff] %v43049_v25  ;;  %45202 = vst [vmem:[#allocation40_spill] sm:$0xff] %v43059_v45 }
0x14cc   :  { %v38338_v48 = vpop.f32.mrf.mxu0 }
0x14cd   :  { %v22244_v10 = vadd.f32 %v38338_v48, %v22163_v57 }
0x14ce   :  { %v43053_v24 = vpop.f32.mrf.mxu0 }
0x14cf   :  { %45200 = vst [vmem:[#allocation41_spill] sm:$0xff] %v43053_v24  ;;  %v22326_v4 = vadd.f32 %v38343_v30, %v22244_v10 }
0x14d0   :  { %v38348_v51 = vpop.f32.mrf.mxu0 }
0x14d1   :  { %v22406_v61 = vadd.f32 %v38348_v51, %v22326_v4 }
0x14d2   :  { %v43057_v31 = vpop.f32.mrf.mxu0 }
0x14d3   :  { %v43055_v27 = vadd.f32 %v38353_v26, %v22406_v61  ;;  %45201 = vst [vmem:[#allocation25_spill] sm:$0xff] %v43057_v31 }
0x14da   :  { %v38391_v2 = vpop.f32.mrf.mxu1 }
0x14dc   :  { %v22693_v0 = vpop.f32.mrf.mxu1 }
0x14e1   :  { %v38372_v42 = vpop.f32.mrf.mxu0 }
0x14e2   :  { %v22700_v8 = vadd.f32 %v38391_v2, %v38372_v42 }
0x14e3   :  { %v22572_v1 = vpop.f32.mrf.mxu0 }
0x14e4   :  { %v22694_v12 = vadd.f32 %v22693_v0, %v22572_v1 }
0x14ec   :  { %v38429_v21 = vpop.f32.mrf.mxu1 }
0x14ee   :  { %v22875_v30 = vpop.f32.mrf.mxu1 }
0x14f3   :  { %v38410_v23 = vpop.f32.mrf.mxu0 }
0x14f4   :  { %v22795_v18 = vadd.f32 %v38410_v23, %v22700_v8 }
0x14f5   :  { %v22787_v7 = vpop.f32.mrf.mxu0 }
0x14f6   :  { %v22788_v57 = vadd.f32 %v22787_v7, %v22694_v12  ;;  %v22884_v48 = vadd.f32 %v38429_v21, %v22795_v18  ;;  %v45210_v12 = vld [vmem:[#allocation33_spill] sm:$0xff]  ;;  %v34643_v18 = vld [vmem:[%s45049_s2 + $0x30] sm:$0xff] }
0x14f8   :  { %v22876_v51 = vadd.f32 %v22875_v30, %v22788_v57  ;;  %v43186_v57 = vand.u32 4294901760, %v34643_v18 }
0x14fa   :  { %v43189_v30 = vsub.f32 %v34643_v18, %v43186_v57 }
0x14fe   :  { %v38467_v4 = vpop.f32.mrf.mxu1 }
0x1500   :  { %v23063_v45 = vpop.f32.mrf.mxu1 }
0x1504   :  { %v38448_v10 = vpop.f32.mrf.mxu0 }
0x1505   :  { %v22985_v61 = vadd.f32 %v38448_v10, %v22884_v48  ;;  %v43194_v48 = vand.u32 4294901760, %v43189_v30 }
0x1506   :  { %v22978_v26 = vpop.f32.mrf.mxu0 }
0x1507   :  { %v23070_v31 = vadd.f32 %v38467_v4, %v22985_v61  ;;  %v22979_v40 = vadd.f32 %v22978_v26, %v22876_v51  ;;  %v24276_v10 = vsub.f32 %v43189_v30, %v43194_v48 }
0x1509   :  { %v23077_v24 = vsel %vm632_vm2, %v23070_v31, 0  ;;  %v23064_v62 = vadd.f32 %v23063_v45, %v22979_v40  ;;  %v45208_v31 = vld [vmem:[#allocation35_spill] sm:$0xff]  ;;  %v45209_v45 = vld [vmem:[#allocation32_spill] sm:$0xff]  ;;  %v24277_v4 = vand.u32 4294901760, %v24276_v10 }
0x150a   :  { %v23155_v25 = vand.u32 4294901760, %v23077_v24 }
0x150b   :  { %v23074_v42 = vsel %vm632_vm2, %v23064_v62, 0 }
0x150c   :  { %v23156_v2 = vsub.f32 %v23077_v24, %v23155_v25  ;;  %v23145_v1 = vand.u32 4294901760, %v23074_v42  ;;  %v45207_v24 = vld [vmem:[#allocation34_spill] sm:$0xff] }
0x150e   :  { %v23157_v23 = vand.u32 4294901760, %v23156_v2  ;;  %v23146_v0 = vsub.f32 %v23074_v42, %v23145_v1  ;;  %38475 = vmatprep.mubr.f32.mxu1 %v23145_v1 }
0x150f   :  { %38476 = vmatmul.mubr.f32.vlgmr.msra.gmra.mxu1 %v23155_v25 }
0x1510   :  { %38484 = vmatpush3.msra.mxu1 %v43033_v34  ;;  %v23147_v8 = vand.u32 4294901760, %v23146_v0  ;;  %v23158_v21 = vsub.f32 %v23156_v2, %v23157_v23 }
0x1511   :  { %38493 = vmatprep.subr.mxu1 %v43033_v34 }
0x1512   :  { %38485 = vmatprep.mubr.f32.mxu1 %v23147_v8  ;;  %v23148_v7 = vsub.f32 %v23146_v0, %v23147_v8  ;;  %v23159_v62 = vand.u32 4294901760, %v23158_v21 }
0x1513   :  { %38486 = vmatmul.mubr.f32.vlgmr.msra.gmra.mxu1 %v23157_v23 }
0x1514   :  { %38494 = vmatpush3.msra.mxu1 %v43033_v34  ;;  %38495 = vmatprep.mubr.f32.mxu1 %v23145_v1  ;;  %v23149_v40 = vand.u32 4294901760, %v23148_v7  ;;  %v45203_v34 = vld [vmem:[#allocation30_spill] sm:$0xff] }
0x1515   :  { %38517 = vmatprep.subr.mxu1 %v42766_v38  ;;  %v43211_v7 = vld [vmem:[%s45052_s5 + $0x8] sm:$0xff] }
0x1516   :  { %38470 = vmatprep.mubr.f32.mxu0 %v23149_v40  ;;  %45214 = vst [vmem:[#allocation44_spill] sm:$0xff] %v43211_v7  ;;  %v45215_v40 = vsub.s32 1, %v45176_v47 }
0x1517   :  { %38471 = vmatmul.mubr.f32.vlgmr.msra.gmra.mxu0 %v23159_v62  ;;  %38496 = vmatmul.mubr.f32.vlgmr.msra.gmra.mxu1 %v23155_v25 }
0x1518   :  { %38518 = vmatpush3.msra.mxu1 %v42766_v38  ;;  %38479 = vmatpush3.msra.mxu0 %v43036_v46  ;;  %v45204_v46 = vld [vmem:[#allocation31_spill] sm:$0xff]  ;;  %v43216_v62 = vrot.slane %v43211_v7, %v45215_v40 }
0x1519   :  { %38480 = vmatprep.mubr.f32.mxu0 %v23146_v0  ;;  %38519 = vmatprep.subr.mxu1 %v42780_v60 }
0x151a   :  { %38520 = vmatpush3.msra.mxu1 %v42780_v60  ;;  %38488 = vmatprep.subr.mxu0 %v43041_v54  ;;  %45216 = vst [vmem:[#allocation43_spill] sm:$0xff] %v43216_v62 }
0x151b   :  { %38521 = vmatprep.subr.mxu1 %v42791_v28  ;;  %38481 = vmatmul.mubr.f32.vlgmr.msra.gmra.mxu0 %v23156_v2 }
0x151c   :  { %38489 = vmatpush3.msra.mxu0 %v43041_v54  ;;  %38522 = vmatpush3.msra.mxu1 %v42791_v28  ;;  %v45205_v54 = vld [vmem:[#allocation36_spill] sm:$0xff] }
0x151d   :  { %38490 = vmatprep.mubr.f32.mxu0 %v23145_v1  ;;  %38498 = vmatprep.subr.mxu0 %v42711_v6 }
0x151e   :  { %38523 = vmatprep.subr.mxu1 %v42802_v41  ;;  %38533 = vmatprep.mubr.msk.f32.mxu1 %vm7968_vm4, %v45203_v34 }
0x151f   :  { %38524 = vmatpush3.msra.mxu1 %v42802_v41  ;;  %38491 = vmatmul.mubr.f32.vlgmr.msra.gmra.mxu0 %v23155_v25  ;;  %v45206_v25 = vld [vmem:[#allocation37_spill] sm:$0xff] }
0x1520   :  { %38525 = vmatprep.subr.mxu1 %v42810_v3  ;;  %38499 = vmatpush3.msra.mxu0 %v42711_v6 }
0x1521   :  { %38526 = vmatpush3.msra.mxu1 %v42810_v3  ;;  %38500 = vmatprep.subr.mxu0 %v42696_v35 }
0x1522   :  { %38527 = vmatprep.subr.mxu1 %v42818_v19  ;;  %38501 = vmatpush3.msra.mxu0 %v42696_v35 }
0x1523   :  { %38528 = vmatpush3.msra.mxu1 %v42818_v19  ;;  %38502 = vmatprep.subr.mxu0 %v42698_v49 }
0x1524   :  { %38529 = vmatprep.subr.mxu1 %v42826_v52  ;;  %38503 = vmatpush3.msra.mxu0 %v42698_v49 }
0x1525   :  { %38530 = vmatpush3.msra.mxu1 %v42826_v52  ;;  %38504 = vmatprep.subr.mxu0 %v42700_v16 }
0x1526   :  { %38531 = vmatprep.subr.mxu1 %v42832_v13  ;;  %38505 = vmatpush3.msra.mxu0 %v42700_v16 }
0x1527   :  { %38532 = vmatpush3.msra.mxu1 %v42832_v13  ;;  %38506 = vmatprep.subr.mxu0 %v42706_v17 }
0x1528   :  { %38555 = vmatprep.subr.mxu1 %v42711_v6  ;;  %38507 = vmatpush3.msra.mxu0 %v42706_v17 }
0x1529   :  { %38534 = vmatmul.mubr.msk.f32.vlgmr.msra.gmra.mxu1 %vm7968_vm4, %v45204_v46  ;;  %38508 = vmatprep.subr.mxu0 %v42714_v63 }
0x152a   :  { %38556 = vmatpush3.msra.mxu1 %v42711_v6  ;;  %38509 = vmatpush3.msra.mxu0 %v42714_v63 }
0x152b   :  { %38557 = vmatprep.subr.mxu1 %v42696_v35  ;;  %38510 = vmatprep.subr.mxu0 %v42728_v20 }
0x152c   :  { %38558 = vmatpush3.msra.mxu1 %v42696_v35  ;;  %38511 = vmatpush3.msra.mxu0 %v42728_v20 }
0x152d   :  { %38559 = vmatprep.subr.mxu1 %v42698_v49  ;;  %38512 = vmatprep.subr.mxu0 %v42742_v32 }
0x152e   :  { %38560 = vmatpush3.msra.mxu1 %v42698_v49  ;;  %38513 = vmatpush3.msra.mxu0 %v42742_v32 }
0x152f   :  { %38561 = vmatprep.subr.mxu1 %v42700_v16  ;;  %38514 = vmatprep.mubr.f32.mxu0 %v45205_v54 }
0x1530   :  { %38562 = vmatpush3.msra.mxu1 %v42700_v16  ;;  %38515 = vmatmul.mubr.f32.vlgmr.msra.gmra.mxu0 %v45206_v25 }
0x1531   :  { %38536 = vmatprep.subr.mxu0 %v42723_v58  ;;  %38563 = vmatprep.subr.mxu1 %v42706_v17 }
0x1532   :  { %38537 = vmatpush3.msra.mxu0 %v42723_v58  ;;  %38564 = vmatpush3.msra.mxu1 %v42706_v17 }
0x1533   :  { %38538 = vmatprep.subr.mxu0 %v42703_v50  ;;  %38565 = vmatprep.subr.mxu1 %v42714_v63 }
0x1534   :  { %38539 = vmatpush3.msra.mxu0 %v42703_v50  ;;  %38566 = vmatpush3.msra.mxu1 %v42714_v63 }
0x1535   :  { %38540 = vmatprep.subr.mxu0 %v42709_v15  ;;  %38567 = vmatprep.subr.mxu1 %v42728_v20 }
0x1536   :  { %38541 = vmatpush3.msra.mxu0 %v42709_v15  ;;  %38568 = vmatpush3.msra.mxu1 %v42728_v20 }
0x1537   :  { %38542 = vmatprep.subr.mxu0 %v42717_v39  ;;  %38569 = vmatprep.subr.mxu1 %v42742_v32 }
0x1538   :  { %38543 = vmatpush3.msra.mxu0 %v42717_v39  ;;  %38570 = vmatpush3.msra.mxu1 %v42742_v32 }
0x1539   :  { %38544 = vmatprep.subr.mxu0 %v42732_v5  ;;  %38571 = vmatprep.mubr.f32.mxu1 %v45207_v24  ;;  %v22492_v24 = vadd.f32 %v43216_v62, %v43055_v27 }
0x153a   :  { %38593 = vmatprep.subr.mxu1 %v42711_v6  ;;  %38545 = vmatpush3.msra.mxu0 %v42732_v5 }
0x153b   :  { %38572 = vmatmul.mubr.f32.vlgmr.msra.gmra.mxu1 %v45208_v31  ;;  %38546 = vmatprep.subr.mxu0 %v42747_v14 }
0x153c   :  { %38594 = vmatpush3.msra.mxu1 %v42711_v6  ;;  %38547 = vmatpush3.msra.mxu0 %v42747_v14 }
0x153d   :  { %38595 = vmatprep.subr.mxu1 %v42696_v35  ;;  %38548 = vmatprep.subr.mxu0 %v42760_v33 }
0x153e   :  { %38596 = vmatpush3.msra.mxu1 %v42696_v35  ;;  %38549 = vmatpush3.msra.mxu0 %v42760_v33 }
0x153f   :  { %38597 = vmatprep.subr.mxu1 %v42698_v49  ;;  %38550 = vmatprep.subr.mxu0 %v42773_v36 }
0x1540   :  { %38598 = vmatpush3.msra.mxu1 %v42698_v49  ;;  %38551 = vmatpush3.msra.mxu0 %v42773_v36 }
0x1541   :  { %38599 = vmatprep.subr.mxu1 %v42700_v16  ;;  %38552 = vmatprep.mubr.f32.mxu0 %v45209_v45 }
0x1542   :  { %38600 = vmatpush3.msra.mxu1 %v42700_v16  ;;  %38553 = vmatmul.mubr.f32.vlgmr.msra.gmra.mxu0 %v45210_v12 }
0x1543   :  { %38574 = vmatprep.subr.mxu0 %v42738_v59  ;;  %38601 = vmatprep.subr.mxu1 %v42706_v17 }
0x1544   :  { %38575 = vmatpush3.msra.mxu0 %v42738_v59  ;;  %38602 = vmatpush3.msra.mxu1 %v42706_v17 }
0x1545   :  { %38576 = vmatprep.subr.mxu0 %v42720_v37  ;;  %38603 = vmatprep.subr.mxu1 %v42714_v63 }
0x1546   :  { %38577 = vmatpush3.msra.mxu0 %v42720_v37  ;;  %38604 = vmatpush3.msra.mxu1 %v42714_v63 }
0x1547   :  { %38578 = vmatprep.subr.mxu0 %v42735_v29  ;;  %38605 = vmatprep.subr.mxu1 %v42728_v20 }
0x1548   :  { %38579 = vmatpush3.msra.mxu0 %v42735_v29  ;;  %38606 = vmatpush3.msra.mxu1 %v42728_v20 }
0x1549   :  { %38580 = vmatprep.subr.mxu0 %v42750_v11  ;;  %38607 = vmatprep.subr.mxu1 %v42742_v32 }
0x154a   :  { %38581 = vmatpush3.msra.mxu0 %v42750_v11  ;;  %38608 = vmatpush3.msra.mxu1 %v42742_v32 }
0x154b   :  { %38582 = vmatprep.subr.mxu0 %v42763_v56  ;;  %38590 = vmatprep.mubr.msk.f32.mxu0 %vm7968_vm4, %v45203_v34 }
0x154c   :  { %38583 = vmatpush3.msra.mxu0 %v42763_v56  ;;  %38609 = vmatprep.mubr.msk.f32.mxu1 %vm7968_vm4, %v45203_v34 }
0x154d   :  { %38584 = vmatprep.subr.mxu0 %v42776_v55  ;;  %38610 = vmatmul.mubr.msk.f32.vlgmr.msra.gmra.mxu1 %vm7968_vm4, %v45204_v46 }
0x154e   :  { %38585 = vmatpush3.msra.mxu0 %v42776_v55  ;;  %38617 = vmatprep.subr.mxu1 %v24277_v4 }
0x154f   :  { %38586 = vmatprep.subr.mxu0 %v42787_v9  ;;  %38618 = vmatpush3.msra.mxu1 %v24277_v4 }
0x1550   :  { %38587 = vmatpush3.msra.mxu0 %v42787_v9  ;;  %38627 = vmatprep.subr.mxu1 %v43186_v57 }
0x1551   :  { %38588 = vmatprep.subr.mxu0 %v42798_v22 }
0x1552   :  { %38589 = vmatpush3.msra.mxu0 %v42798_v22 }
0x1553   :  { %38591 = vmatmul.mubr.msk.f32.vlgmr.msra.gmra.mxu0 %vm7968_vm4, %v45204_v46  ;;  %38612 = vmatprep.subr.mxu0 %v43186_v57 }
0x1554   :  { %38613 = vmatpush3.msra.mxu0 %v43186_v57 }
0x1555   :  { %38622 = vmatprep.subr.mxu0 %v43189_v30 }
0x15cf   :  { %v38477_v51 = vpop.f32.mrf.mxu1 }
0x15d1   :  { %v43200_v61 = vpop.f32.mrf.mxu1 }
0x15d2   :  { %45211 = vst [vmem:[#allocation28_spill] sm:$0xff] %v43200_v61 }
0x15d3   :  { %v38487_v2 = vpop.f32.mrf.mxu1 }
0x15d5   :  { %v43204_v8 = vpop.f32.mrf.mxu1 }
0x15d6   :  { %45212 = vst [vmem:[#allocation27_spill] sm:$0xff] %v43204_v8 }
0x15d7   :  { %v38472_v26 = vpop.f32.mrf.mxu0  ;;  %v38497_v25 = vpop.f32.mrf.mxu1 }
0x15d8   :  { %v23244_v42 = vadd.f32 %v38477_v51, %v38472_v26 }
0x15d9   :  { %v43202_v1 = vpop.f32.mrf.mxu0  ;;  %v43224_v10 = vpop.f32.mrf.mxu1 }
0x15da   :  { %45218 = vst [vmem:[#allocation7_spill] sm:$0xff] %v43224_v10 }
0x15db   :  { %v38482_v23 = vpop.f32.mrf.mxu0 }
0x15dc   :  { %v23325_v0 = vadd.f32 %v38482_v23, %v23244_v42 }
0x15dd   :  { %v43206_v21 = vpop.f32.mrf.mxu0 }
0x15de   :  { %45213 = vst [vmem:[#allocation29_spill] sm:$0xff] %v43206_v21  ;;  %v23407_v34 = vadd.f32 %v38487_v2, %v23325_v0 }
0x15df   :  { %v38492_v46 = vpop.f32.mrf.mxu0 }
0x15e0   :  { %v23487_v54 = vadd.f32 %v38492_v46, %v23407_v34 }
0x15e1   :  { %v43222_v12 = vpop.f32.mrf.mxu0 }
0x15e2   :  { %v23565_v31 = vadd.f32 %v38497_v25, %v23487_v54  ;;  %45217 = vst [vmem:[#allocation42_spill] sm:$0xff] %v43222_v12 }
0x15e4   :  { %v43220_v45 = vadd.f32 %v23565_v31, %v22492_v24 }
0x15e9   :  { %v38535_v4 = vpop.f32.mrf.mxu1 }
0x15eb   :  { %v23770_v42 = vpop.f32.mrf.mxu1 }
0x15f0   :  { %v38516_v18 = vpop.f32.mrf.mxu0 }
0x15f1   :  { %v23777_v23 = vadd.f32 %v38535_v4, %v38516_v18 }
0x15f2   :  { %v23649_v51 = vpop.f32.mrf.mxu0 }
0x15f3   :  { %v23771_v40 = vadd.f32 %v23770_v42, %v23649_v51 }
0x15fb   :  { %v38573_v2 = vpop.f32.mrf.mxu1 }
0x15fd   :  { %v23952_v7 = vpop.f32.mrf.mxu1 }
0x1602   :  { %v38554_v26 = vpop.f32.mrf.mxu0 }
0x1603   :  { %v23872_v34 = vadd.f32 %v38554_v26, %v23777_v23 }
0x1604   :  { %v23864_v0 = vpop.f32.mrf.mxu0 }
0x1605   :  { %v23865_v46 = vadd.f32 %v23864_v0, %v23771_v40  ;;  %v23961_v27 = vadd.f32 %v38573_v2, %v23872_v34 }
0x1607   :  { %v23953_v24 = vadd.f32 %v23952_v7, %v23865_v46 }
0x160d   :  { %v38611_v25 = vpop.f32.mrf.mxu1 }
0x160f   :  { %v24140_v10 = vpop.f32.mrf.mxu1 }
0x1613   :  { %v38592_v54 = vpop.f32.mrf.mxu0 }
0x1614   :  { %v24062_v31 = vadd.f32 %v38592_v54, %v23961_v27 }
0x1615   :  { %v24055_v47 = vpop.f32.mrf.mxu0 }
0x1616   :  { %v24147_v62 = vadd.f32 %v38611_v25, %v24062_v31  ;;  %v24056_v12 = vadd.f32 %v24055_v47, %v23953_v24 }
0x1618   :  { %v24154_v8 = vsel %vm632_vm2, %v24147_v62, 0  ;;  %v24141_v21 = vadd.f32 %v24140_v10, %v24056_v12 }
0x1619   :  { %v24232_v61 = vand.u32 4294901760, %v24154_v8 }
0x161a   :  { %v24151_v18 = vsel %vm632_vm2, %v24141_v21, 0 }
0x161b   :  { %v24233_v4 = vsub.f32 %v24154_v8, %v24232_v61  ;;  %v24222_v51 = vand.u32 4294901760, %v24151_v18 }
0x161d   :  { %v24234_v26 = vand.u32 4294901760, %v24233_v4  ;;  %v24223_v42 = vsub.f32 %v24151_v18, %v24222_v51  ;;  %38619 = vmatprep.mubr.f32.mxu1 %v24222_v51 }
0x161e   :  { %38620 = vmatmul.mubr.f32.vlgmr.msra.gmra.mxu1 %v24232_v61 }
0x161f   :  { %38628 = vmatpush3.msra.mxu1 %v43186_v57  ;;  %v24224_v7 = vand.u32 4294901760, %v24223_v42  ;;  %v24235_v23 = vsub.f32 %v24233_v4, %v24234_v26 }
0x1620   :  { %38637 = vmatprep.subr.mxu1 %v43186_v57 }
0x1621   :  { %38629 = vmatprep.mubr.f32.mxu1 %v24224_v7  ;;  %v24225_v47 = vsub.f32 %v24223_v42, %v24224_v7  ;;  %v24236_v21 = vand.u32 4294901760, %v24235_v23 }
0x1622   :  { %38630 = vmatmul.mubr.f32.vlgmr.msra.gmra.mxu1 %v24234_v26 }
0x1623   :  { %38638 = vmatpush3.msra.mxu1 %v43186_v57  ;;  %38639 = vmatprep.mubr.f32.mxu1 %v24222_v51  ;;  %v24226_v62 = vand.u32 4294901760, %v24225_v47 }
0x1624   :  { %38661 = vmatprep.subr.mxu1 %v42766_v38 }
0x1625   :  { %38614 = vmatprep.mubr.f32.mxu0 %v24226_v62 }
0x1626   :  { %38615 = vmatmul.mubr.f32.vlgmr.msra.gmra.mxu0 %v24236_v21  ;;  %38640 = vmatmul.mubr.f32.vlgmr.msra.gmra.mxu1 %v24232_v61 }
0x1627   :  { %38662 = vmatpush3.msra.mxu1 %v42766_v38  ;;  %38623 = vmatpush3.msra.mxu0 %v43189_v30  ;;  %v45219_v38 = vld [vmem:[#allocation49_spill] sm:$0xff] }
0x1628   :  { %38624 = vmatprep.mubr.f32.mxu0 %v24223_v42  ;;  %38663 = vmatprep.subr.mxu1 %v42780_v60 }
0x1629   :  { %38664 = vmatpush3.msra.mxu1 %v42780_v60  ;;  %38632 = vmatprep.subr.mxu0 %v43194_v48 }
0x162a   :  { %38665 = vmatprep.subr.mxu1 %v42791_v28  ;;  %38625 = vmatmul.mubr.f32.vlgmr.msra.gmra.mxu0 %v24233_v4 }
0x162b   :  { %38633 = vmatpush3.msra.mxu0 %v43194_v48  ;;  %38666 = vmatpush3.msra.mxu1 %v42791_v28 }
0x162c   :  { %38634 = vmatprep.mubr.f32.mxu0 %v24222_v51  ;;  %38642 = vmatprep.subr.mxu0 %v42711_v6 }
0x162d   :  { %38667 = vmatprep.subr.mxu1 %v42802_v41  ;;  %38677 = vmatprep.mubr.msk.f32.mxu1 %vm7968_vm4, %v41397_v53 }
0x162e   :  { %38668 = vmatpush3.msra.mxu1 %v42802_v41  ;;  %38635 = vmatmul.mubr.f32.vlgmr.msra.gmra.mxu0 %v24232_v61 }
0x162f   :  { %38669 = vmatprep.subr.mxu1 %v42810_v3  ;;  %38643 = vmatpush3.msra.mxu0 %v42711_v6 }
0x1630   :  { %38670 = vmatpush3.msra.mxu1 %v42810_v3  ;;  %38644 = vmatprep.subr.mxu0 %v42696_v35 }
0x1631   :  { %38671 = vmatprep.subr.mxu1 %v42818_v19  ;;  %38645 = vmatpush3.msra.mxu0 %v42696_v35 }
0x1632   :  { %38672 = vmatpush3.msra.mxu1 %v42818_v19  ;;  %38646 = vmatprep.subr.mxu0 %v42698_v49 }
0x1633   :  { %38673 = vmatprep.subr.mxu1 %v42826_v52  ;;  %38647 = vmatpush3.msra.mxu0 %v42698_v49 }
0x1634   :  { %38674 = vmatpush3.msra.mxu1 %v42826_v52  ;;  %38648 = vmatprep.subr.mxu0 %v42700_v16 }
0x1635   :  { %38675 = vmatprep.subr.mxu1 %v42832_v13  ;;  %38649 = vmatpush3.msra.mxu0 %v42700_v16 }
0x1636   :  { %38676 = vmatpush3.msra.mxu1 %v42832_v13  ;;  %38650 = vmatprep.subr.mxu0 %v42706_v17 }
0x1637   :  { %38699 = vmatprep.subr.mxu1 %v42711_v6  ;;  %38651 = vmatpush3.msra.mxu0 %v42706_v17 }
0x1638   :  { %38678 = vmatmul.mubr.msk.f32.vlgmr.msra.gmra.mxu1 %vm7968_vm4, %v41402_v44  ;;  %38652 = vmatprep.subr.mxu0 %v42714_v63 }
0x1639   :  { %38700 = vmatpush3.msra.mxu1 %v42711_v6  ;;  %38653 = vmatpush3.msra.mxu0 %v42714_v63 }
0x163a   :  { %38701 = vmatprep.subr.mxu1 %v42696_v35  ;;  %38654 = vmatprep.subr.mxu0 %v42728_v20 }
0x163b   :  { %38702 = vmatpush3.msra.mxu1 %v42696_v35  ;;  %38655 = vmatpush3.msra.mxu0 %v42728_v20 }
0x163c   :  { %38703 = vmatprep.subr.mxu1 %v42698_v49  ;;  %38656 = vmatprep.subr.mxu0 %v42742_v32 }
0x163d   :  { %38704 = vmatpush3.msra.mxu1 %v42698_v49  ;;  %38657 = vmatpush3.msra.mxu0 %v42742_v32 }
0x163e   :  { %38705 = vmatprep.subr.mxu1 %v42700_v16  ;;  %38658 = vmatprep.mubr.f32.mxu0 %v41455_v43  ;;  %v45220_v43 = vld [vmem:[#allocation47_spill] sm:$0xff] }
0x163f   :  { %38706 = vmatpush3.msra.mxu1 %v42700_v16  ;;  %38659 = vmatmul.mubr.f32.vlgmr.msra.gmra.mxu0 %v45219_v38  ;;  %v45224_v38 = vld [vmem:[#allocation39_spill] sm:$0xff] }
0x1640   :  { %38680 = vmatprep.subr.mxu0 %v42723_v58  ;;  %38707 = vmatprep.subr.mxu1 %v42706_v17 }
0x1641   :  { %38681 = vmatpush3.msra.mxu0 %v42723_v58  ;;  %38708 = vmatpush3.msra.mxu1 %v42706_v17 }
0x1642   :  { %38682 = vmatprep.subr.mxu0 %v42703_v50  ;;  %38709 = vmatprep.subr.mxu1 %v42714_v63 }
0x1643   :  { %38683 = vmatpush3.msra.mxu0 %v42703_v50  ;;  %38710 = vmatpush3.msra.mxu1 %v42714_v63  ;;  %v45221_v50 = vld [vmem:[#allocation48_spill] sm:$0xff] }
0x1644   :  { %38684 = vmatprep.subr.mxu0 %v42709_v15  ;;  %38711 = vmatprep.subr.mxu1 %v42728_v20 }
0x1645   :  { %38685 = vmatpush3.msra.mxu0 %v42709_v15  ;;  %38712 = vmatpush3.msra.mxu1 %v42728_v20  ;;  %v45222_v15 = vld [vmem:[#allocation45_spill] sm:$0xff] }
0x1646   :  { %38686 = vmatprep.subr.mxu0 %v42717_v39  ;;  %38713 = vmatprep.subr.mxu1 %v42742_v32 }
0x1647   :  { %38687 = vmatpush3.msra.mxu0 %v42717_v39  ;;  %38714 = vmatpush3.msra.mxu1 %v42742_v32 }
0x1648   :  { %38688 = vmatprep.subr.mxu0 %v42732_v5  ;;  %38715 = vmatprep.mubr.f32.mxu1 %v45220_v43  ;;  %v45225_v43 = vld [vmem:[#allocation26_spill] sm:$0xff] }
0x1649   :  { %38737 = vmatprep.subr.mxu1 %v42711_v6  ;;  %38689 = vmatpush3.msra.mxu0 %v42732_v5 }
0x164a   :  { %38716 = vmatmul.mubr.f32.vlgmr.msra.gmra.mxu1 %v45221_v50  ;;  %38690 = vmatprep.subr.mxu0 %v42747_v14  ;;  %v22157_v50 = vadd.f32 %v45225_v43, %v45224_v38 }
0x164b   :  { %38738 = vmatpush3.msra.mxu1 %v42711_v6  ;;  %38691 = vmatpush3.msra.mxu0 %v42747_v14  ;;  %v45223_v6 = vld [vmem:[#allocation46_spill] sm:$0xff] }
0x164c   :  { %38739 = vmatprep.subr.mxu1 %v42696_v35  ;;  %38692 = vmatprep.subr.mxu0 %v42760_v33 }
0x164d   :  { %38740 = vmatpush3.msra.mxu1 %v42696_v35  ;;  %38693 = vmatpush3.msra.mxu0 %v42760_v33 }
0x164e   :  { %38741 = vmatprep.subr.mxu1 %v42698_v49  ;;  %38694 = vmatprep.subr.mxu0 %v42773_v36 }
0x164f   :  { %38742 = vmatpush3.msra.mxu1 %v42698_v49  ;;  %38695 = vmatpush3.msra.mxu0 %v42773_v36 }
0x1650   :  { %38743 = vmatprep.subr.mxu1 %v42700_v16  ;;  %38696 = vmatprep.mubr.f32.mxu0 %v45222_v15 }
0x1651   :  { %38744 = vmatpush3.msra.mxu1 %v42700_v16  ;;  %38697 = vmatmul.mubr.f32.vlgmr.msra.gmra.mxu0 %v45223_v6  ;;  %v45226_v6 = vld [vmem:[#allocation41_spill] sm:$0xff] }
0x1652   :  { %38718 = vmatprep.subr.mxu0 %v42738_v59  ;;  %38745 = vmatprep.subr.mxu1 %v42706_v17 }
0x1653   :  { %38719 = vmatpush3.msra.mxu0 %v42738_v59  ;;  %38746 = vmatpush3.msra.mxu1 %v42706_v17 }
0x1654   :  { %38720 = vmatprep.subr.mxu0 %v42720_v37  ;;  %38747 = vmatprep.subr.mxu1 %v42714_v63 }
0x1655   :  { %38721 = vmatpush3.msra.mxu0 %v42720_v37  ;;  %38748 = vmatpush3.msra.mxu1 %v42714_v63 }
0x1656   :  { %38722 = vmatprep.subr.mxu0 %v42735_v29  ;;  %38749 = vmatprep.subr.mxu1 %v42728_v20 }
0x1657   :  { %38723 = vmatpush3.msra.mxu0 %v42735_v29  ;;  %38750 = vmatpush3.msra.mxu1 %v42728_v20 }
0x1658   :  { %38724 = vmatprep.subr.mxu0 %v42750_v11  ;;  %38751 = vmatprep.subr.mxu1 %v42742_v32 }
0x1659   :  { %38725 = vmatpush3.msra.mxu0 %v42750_v11  ;;  %38752 = vmatpush3.msra.mxu1 %v42742_v32 }
0x165a   :  { %38726 = vmatprep.subr.mxu0 %v42763_v56  ;;  %38734 = vmatprep.mubr.msk.f32.mxu0 %vm7968_vm4, %v41397_v53 }
0x165b   :  { %38727 = vmatpush3.msra.mxu0 %v42763_v56  ;;  %38753 = vmatprep.mubr.msk.f32.mxu1 %vm7968_vm4, %v41397_v53  ;;  %v34644_v53 = vld [vmem:[%s45049_s2 + $0x38] sm:$0xff] }
0x165c   :  { %38728 = vmatprep.subr.mxu0 %v42776_v55  ;;  %38754 = vmatmul.mubr.msk.f32.vlgmr.msra.gmra.mxu1 %vm7968_vm4, %v41402_v44  ;;  %v43351_v35 = vand.u32 4294901760, %v34644_v53 }
0x165d   :  { %38729 = vmatpush3.msra.mxu0 %v42776_v55 }
0x165e   :  { %38730 = vmatprep.subr.mxu0 %v42787_v9  ;;  %v43354_v49 = vsub.f32 %v34644_v53, %v43351_v35  ;;  %v22237_v53 = vadd.f32 %v45226_v6, %v22157_v50 }
0x165f   :  { %38731 = vmatpush3.msra.mxu0 %v42787_v9 }
0x1660   :  { %38732 = vmatprep.subr.mxu0 %v42798_v22  ;;  %v43359_v16 = vand.u32 4294901760, %v43354_v49 }
0x1661   :  { %38733 = vmatpush3.msra.mxu0 %v42798_v22 }
0x1662   :  { %38735 = vmatmul.mubr.msk.f32.vlgmr.msra.gmra.mxu0 %vm7968_vm4, %v41402_v44  ;;  %38756 = vmatprep.subr.mxu0 %v43351_v35  ;;  %v25353_v44 = vsub.f32 %v43354_v49, %v43359_v16 }
0x1663   :  { %38757 = vmatpush3.msra.mxu0 %v43351_v35 }
0x1664   :  { %38766 = vmatprep.subr.mxu0 %v43354_v49  ;;  %v25354_v17 = vand.u32 4294901760, %v25353_v44 }
0x1666   :  { %38761 = vmatprep.subr.mxu1 %v25354_v17 }
0x1667   :  { %38762 = vmatpush3.msra.mxu1 %v25354_v17  ;;  %v45228_v17 = vld [vmem:[#allocation29_spill] sm:$0xff] }
0x1668   :  { %38771 = vmatprep.subr.mxu1 %v43351_v35 }
0x16de   :  { %v38621_v63 = vpop.f32.mrf.mxu1 }
0x16e0   :  { %v43365_v39 = vpop.f32.mrf.mxu1 }
0x16e2   :  { %v38631_v20 = vpop.f32.mrf.mxu1 }
0x16e4   :  { %v43369_v32 = vpop.f32.mrf.mxu1 }
0x16e6   :  { %v38616_v37 = vpop.f32.mrf.mxu0  ;;  %v38641_v36 = vpop.f32.mrf.mxu1 }
0x16e7   :  { %v24321_v58 = vadd.f32 %v38621_v63, %v38616_v37 }
0x16e8   :  { %v43367_v5 = vpop.f32.mrf.mxu0  ;;  %v43378_v22 = vpop.f32.mrf.mxu1 }
0x16ea   :  { %v38626_v29 = vpop.f32.mrf.mxu0 }
0x16eb   :  { %v24402_v59 = vadd.f32 %v38626_v29, %v24321_v58  ;;  %v45229_v58 = vld [vmem:[#allocation38_spill] sm:$0xff]  ;;  %v45230_v29 = vld [vmem:[#allocation27_spill] sm:$0xff] }
0x16ec   :  { %v43371_v14 = vpop.f32.mrf.mxu0 }
0x16ed   :  { %v24484_v11 = vadd.f32 %v38631_v20, %v24402_v59  ;;  %v22318_v20 = vadd.f32 %v45229_v58, %v22237_v53 }
0x16ee   :  { %v38636_v33 = vpop.f32.mrf.mxu0 }
0x16ef   :  { %v24564_v56 = vadd.f32 %v38636_v33, %v24484_v11 }
0x16f0   :  { %v43376_v9 = vpop.f32.mrf.mxu0 }
0x16f1   :  { %v24642_v55 = vadd.f32 %v38641_v36, %v24564_v56  ;;  %v45231_v56 = vld [vmem:[#allocation25_spill] sm:$0xff] }
0x16f2   :  { %v22400_v36 = vadd.f32 %v45231_v56, %v22318_v20 }
0x16f3   :  { %v43374_v60 = vadd.f32 %v24642_v55, %v43220_v45 }
0x16f8   :  { %v38679_v41 = vpop.f32.mrf.mxu1 }
0x16fa   :  { %v24847_v52 = vpop.f32.mrf.mxu1 }
0x16ff   :  { %v38660_v28 = vpop.f32.mrf.mxu0 }
0x1700   :  { %v24854_v13 = vadd.f32 %v38679_v41, %v38660_v28 }
0x1701   :  { %v24726_v3 = vpop.f32.mrf.mxu0 }
0x1702   :  { %v24848_v48 = vadd.f32 %v24847_v52, %v24726_v3 }
0x170a   :  { %v38717_v57 = vpop.f32.mrf.mxu1 }
0x170c   :  { %v25029_v12 = vpop.f32.mrf.mxu1 }
0x1711   :  { %v38698_v19 = vpop.f32.mrf.mxu0 }
0x1712   :  { %v24949_v61 = vadd.f32 %v38698_v19, %v24854_v13 }
0x1713   :  { %v24941_v30 = vpop.f32.mrf.mxu0 }
0x1714   :  { %v24942_v8 = vadd.f32 %v24941_v30, %v24848_v48  ;;  %v25038_v10 = vadd.f32 %v38717_v57, %v24949_v61  ;;  %v45234_v48 = vld [vmem:[#allocation7_spill] sm:$0xff] }
0x1716   :  { %v25030_v0 = vadd.f32 %v25029_v12, %v24942_v8 }
0x171c   :  { %v38755_v45 = vpop.f32.mrf.mxu1 }
0x171e   :  { %v25217_v54 = vpop.f32.mrf.mxu1 }
0x1722   :  { %v38736_v2 = vpop.f32.mrf.mxu0 }
0x1723   :  { %v25139_v40 = vadd.f32 %v38736_v2, %v25038_v10 }
0x1724   :  { %v25132_v34 = vpop.f32.mrf.mxu0 }
0x1725   :  { %v25224_v46 = vadd.f32 %v38755_v45, %v25139_v40  ;;  %v25133_v27 = vadd.f32 %v25132_v34, %v25030_v0 }
0x1727   :  { %v25231_v25 = vsel %vm632_vm2, %v25224_v46, 0  ;;  %v25218_v24 = vadd.f32 %v25217_v54, %v25133_v27 }
0x1728   :  { %v25309_v31 = vand.u32 4294901760, %v25231_v25 }
0x1729   :  { %v25228_v18 = vsel %vm632_vm2, %v25218_v24, 0 }
0x172a   :  { %v25310_v4 = vsub.f32 %v25231_v25, %v25309_v31  ;;  %v25299_v51 = vand.u32 4294901760, %v25228_v18 }
0x172c   :  { %v25311_v26 = vand.u32 4294901760, %v25310_v4  ;;  %v25300_v42 = vsub.f32 %v25228_v18, %v25299_v51  ;;  %38763 = vmatprep.mubr.f32.mxu1 %v25299_v51 }
0x172d   :  { %38764 = vmatmul.mubr.f32.vlgmr.msra.gmra.mxu1 %v25309_v31 }
0x172e   :  { %38772 = vmatpush3.msra.mxu1 %v43351_v35  ;;  %v25301_v7 = vand.u32 4294901760, %v25300_v42  ;;  %v25312_v23 = vsub.f32 %v25310_v4, %v25311_v26 }
0x172f   :  { %38781 = vmatprep.subr.mxu1 %v43351_v35 }
0x1730   :  { %38773 = vmatprep.mubr.f32.mxu1 %v25301_v7  ;;  %v25302_v47 = vsub.f32 %v25300_v42, %v25301_v7  ;;  %v25313_v21 = vand.u32 4294901760, %v25312_v23  ;;  %v45237_v7 = vld [vmem:[#allocation24_spill] sm:$0xff] }
0x1731   :  { %38774 = vmatmul.mubr.f32.vlgmr.msra.gmra.mxu1 %v25311_v26 }
0x1732   :  { %38783 = vmatprep.mubr.f32.mxu1 %v25299_v51  ;;  %v25303_v62 = vand.u32 4294901760, %v25302_v47  ;;  %38782 = vmatpush3.msra.mxu1 %v43351_v35  ;;  %v45227_v35 = vld [vmem:[#allocation28_spill] sm:$0xff] }
0x1733   :  { %v23238_v44 = vadd.f32 %v45227_v35, %v43202_v1  ;;  %v45232_v1 = vld [vmem:[#allocation42_spill] sm:$0xff]  ;;  %v34672_v35 = vld [vmem:[%s45050_s3 + $0x38] sm:$0xff] }
0x1734   :  { %38758 = vmatprep.mubr.f32.mxu0 %v25303_v62 }
0x1735   :  { %38759 = vmatmul.mubr.f32.vlgmr.msra.gmra.mxu0 %v25313_v21  ;;  %38784 = vmatmul.mubr.f32.vlgmr.msra.gmra.mxu1 %v25309_v31  ;;  %v23318_v63 = vadd.f32 %v45228_v17, %v23238_v44  ;;  %v43421_v44 = vand.u32 4294901760, %v34672_v35  ;;  %v34671_v17 = vld [vmem:[%s45050_s3 + $0x30] sm:$0xff] }
0x1736   :  { %38767 = vmatpush3.msra.mxu0 %v43354_v49  ;;  %38768 = vmatprep.mubr.f32.mxu0 %v25300_v42  ;;  %v24315_v49 = vadd.f32 %v43365_v39, %v43367_v5  ;;  %v45233_v39 = vld [vmem:[#allocation40_spill] sm:$0xff] }
0x1737   :  { %38776 = vmatprep.subr.mxu0 %v43359_v16  ;;  %v23399_v59 = vadd.f32 %v45230_v29, %v23318_v63  ;;  %v22478_v5 = vadd.f32 %v45233_v39, %v22400_v36  ;;  %v43427_v63 = vsub.f32 %v34672_v35, %v43421_v44  ;;  %v34669_v29 = vld [vmem:[%s45050_s3 + $0x20] sm:$0xff] }
0x1738   :  { %v43458_v56 = vand.u32 4294901760, %v34669_v29 }
0x1739   :  { %38769 = vmatmul.mubr.f32.vlgmr.msra.gmra.mxu0 %v25310_v4  ;;  %v23481_v41 = vadd.f32 %v45232_v1, %v23399_v59  ;;  %v45236_v4 = vld [vmem:[#allocation23_spill] sm:$0xff]  ;;  %v43437_v58 = vand.u32 4294901760, %v43427_v63 }
0x173a   :  { %38777 = vmatpush3.msra.mxu0 %v43359_v16  ;;  %38778 = vmatprep.mubr.f32.mxu0 %v25299_v51  ;;  %v24395_v16 = vadd.f32 %v43371_v14, %v24315_v49  ;;  %v43429_v49 = vand.u32 4294901760, %v34671_v17  ;;  %v43467_v1 = vsub.f32 %v34669_v29, %v43458_v56 }
0x173b   :  { %v23559_v61 = vadd.f32 %v45234_v48, %v23481_v41  ;;  %38786 = vmatprep.subr.mxu0 %v43421_v44  ;;  %v25896_v59 = vsub.f32 %v43427_v63, %v43437_v58 }
0x173c   :  { %v24476_v55 = vadd.f32 %v43369_v32, %v24395_v16  ;;  %v45235_v32 = vld [vmem:[#allocation43_spill] sm:$0xff]  ;;  %v43440_v20 = vsub.f32 %v34671_v17, %v43429_v49 }
0x173d   :  { %38779 = vmatmul.mubr.f32.vlgmr.msra.gmra.mxu0 %v25309_v31  ;;  %v22491_v45 = vadd.f32 %v45235_v32, %v22478_v5  ;;  %v25897_v36 = vand.u32 4294901760, %v25896_v59 }
0x173e   :  { %v24558_v13 = vadd.f32 %v43376_v9, %v24476_v55  ;;  %38787 = vmatpush3.msra.mxu0 %v43421_v44 }
0x173f   :  { %v23568_v27 = vadd.f32 %v23559_v61, %v22491_v45  ;;  %38788 = vmatprep.subr.mxu0 %v43429_v49  ;;  %38797 = vmatprep.subr.mxu1 %v25897_v36 }
0x1740   :  { %v24636_v0 = vadd.f32 %v43378_v22, %v24558_v13  ;;  %38789 = vmatpush3.msra.mxu0 %v43429_v49  ;;  %38798 = vmatpush3.msra.mxu1 %v25897_v36 }
0x1742   :  { %v24645_v24 = vadd.f32 %v24636_v0, %v23568_v27 }
0x17ed   :  { %v38765_v15 = vpop.f32.mrf.mxu1 }
0x17ef   :  { %v25391_v37 = vpop.f32.mrf.mxu1 }
0x17f1   :  { %v38775_v11 = vpop.f32.mrf.mxu1 }
0x17f3   :  { %v25552_v19 = vpop.f32.mrf.mxu1 }
0x17f5   :  { %v38760_v33 = vpop.f32.mrf.mxu0  ;;  %v38785_v10 = vpop.f32.mrf.mxu1 }
0x17f6   :  { %v25398_v3 = vadd.f32 %v38765_v15, %v38760_v33 }
0x17f7   :  { %v25305_v28 = vpop.f32.mrf.mxu0  ;;  %v25712_v9 = vpop.f32.mrf.mxu1 }
0x17f8   :  { %v25392_v57 = vadd.f32 %v25391_v37, %v25305_v28  ;;  %v34670_v37 = vld [vmem:[%s45050_s3 + $0x28] sm:$0xff] }
0x17f9   :  { %v38770_v52 = vpop.f32.mrf.mxu0  ;;  %v43442_v16 = vand.u32 4294901760, %v34670_v37 }
0x17fa   :  { %v25479_v14 = vadd.f32 %v38770_v52, %v25398_v3 }
0x17fb   :  { %v25471_v30 = vpop.f32.mrf.mxu0  ;;  %v43455_v33 = vsub.f32 %v34670_v37, %v43442_v16  ;;  %38790 = vmatprep.subr.mxu0 %v43442_v16 }
0x17fc   :  { %v25472_v8 = vadd.f32 %v25471_v30, %v25392_v57  ;;  %v25561_v12 = vadd.f32 %v38775_v11, %v25479_v14  ;;  %v43452_v11 = vand.u32 4294901760, %v43440_v20  ;;  %38791 = vmatpush3.msra.mxu0 %v43442_v16 }
0x17fd   :  { %v38780_v2 = vpop.f32.mrf.mxu0  ;;  %v43464_v28 = vand.u32 4294901760, %v43455_v33  ;;  %38792 = vmatprep.subr.mxu0 %v43458_v56 }
0x17fe   :  { %v25641_v40 = vadd.f32 %v38780_v2, %v25561_v12  ;;  %v25553_v34 = vadd.f32 %v25552_v19, %v25472_v8  ;;  %v25903_v55 = vsub.f32 %v43440_v20, %v43452_v11  ;;  %38793 = vmatpush3.msra.mxu0 %v43458_v56  ;;  %v43474_v19 = vand.u32 4294901760, %v43467_v1  ;;  %v45238_v8 = vld [vmem:[#allocation5_spill] sm:$0xff] }
0x17ff   :  { %v25634_v46 = vpop.f32.mrf.mxu0  ;;  %v25910_v3 = vsub.f32 %v43455_v33, %v43464_v28  ;;  %38808 = vmatprep.subr.mxu0 %v43427_v63  ;;  %v45239_v12 = vsub.s32 2, %v45238_v8  ;;  %v45241_v0 = vsub.s32 3, %v45238_v8 }
0x1800   :  { %v25719_v54 = vadd.f32 %v38785_v10, %v25641_v40  ;;  %v25635_v25 = vadd.f32 %v25634_v46, %v25553_v34  ;;  %v25904_v41 = vand.u32 4294901760, %v25903_v55  ;;  %v25917_v39 = vsub.f32 %v43467_v1, %v43474_v19  ;;  %v45240_v10 = vld [vmem:[#allocation44_spill] sm:$0xff] }
0x1801   :  { %v25911_v52 = vand.u32 4294901760, %v25910_v3  ;;  %v25755_v2 = vrot.slane %v45240_v10, %v45239_v12  ;;  %v25761_v40 = vrot.slane %v45240_v10, %v45241_v0 }
0x1802   :  { %v25713_v31 = vadd.f32 %v25712_v9, %v25635_v25  ;;  %v25723_v18 = vadd.f32 %v25719_v54, %v43374_v60  ;;  %38799 = vmatprep.subr.mxu1 %v25904_v41  ;;  %v25918_v5 = vand.u32 4294901760, %v25917_v39 }
0x1803   :  { %38800 = vmatpush3.msra.mxu1 %v25904_v41  ;;  %v34674_v41 = vld [vmem:[%s45051_s4 + $0x48] sm:$0xff] }
0x1804   :  { %v25725_v51 = vadd.f32 %v25723_v18, %v45236_v4  ;;  %v25722_v26 = vadd.f32 %v25713_v31, %v24645_v24  ;;  %38801 = vmatprep.subr.mxu1 %v25911_v52  ;;  %v43605_v39 = vand.u32 4294901760, %v34674_v41 }
0x1805   :  { %38802 = vmatpush3.msra.mxu1 %v25911_v52 }
0x1806   :  { %v25729_v42 = vsel %vm94_vm0, %v25725_v51, 0.0  ;;  %v25724_v23 = vadd.f32 %v25722_v26, %v45237_v7  ;;  %38803 = vmatprep.subr.mxu1 %v25918_v5 }
0x1807   :  { %25730 = vadd.xlane.f32.xlu0 %v25729_v42  ;;  %38804 = vmatpush3.msra.mxu1 %v25918_v5 }
0x1808   :  { %v25726_v22 = vsel %vm94_vm0, %v25724_v23, 0.0  ;;  %38819 = vmatprep.subr.mxu1 %v43421_v44 }
0x1809   :  { %25727 = vadd.xlane.f32.xlu1 %v25726_v22 }
0x1890   :  { %v25731_v47 = vpop.xlane.xlu0 %25730 }
0x1891   :  { %v25733_v62 = vmul.f32 0.03125, %v25731_v47 }
0x1892   :  { %v25728_v21 = vpop.xlane.xlu1 %25727 }
0x1893   :  { %v25732_v38 = vmul.f32 0.03125, %v25728_v21  ;;  %v43412_v43 = vsub.f32 %v25725_v51, %v25733_v62  ;;  %v34680_v21 = vld [vmem:[%s45051_s4 + $0x78] sm:$0xff] }
0x1895   :  { %v25734_v50 = vsub.f32 %v25724_v23, %v25732_v38  ;;  %v25737_v6 = vmul.f32 %v43412_v43, %v43412_v43  ;;  %v43528_v38 = vand.u32 4294901760, %v34680_v21 }
0x1897   :  { %v25736_v15 = vmul.f32 %v25734_v50, %v25734_v50  ;;  %v25741_v53 = vsel %vm94_vm0, %v25737_v6, 0.0 }
0x1899   :  { %v25738_v60 = vsel %vm94_vm0, %v25736_v15, 0.0 }
0x189a   :  { %25739 = vadd.xlane.f32.xlu0 %v25738_v60  ;;  %v34678_v60 = vld [vmem:[%s45051_s4 + $0x68] sm:$0xff] }
0x189b   :  { %v43549_v35 = vand.u32 4294901760, %v34678_v60 }
0x189e   :  { %25742 = vadd.xlane.f32.xlu0 %v25741_v53 }
0x1923   :  { %v25740_v13 = vpop.xlane.xlu0 %25739 }
0x1924   :  { %v25744_v57 = vmul.f32 0.03125, %v25740_v13  ;;  %v34673_v13 = vld [vmem:[%s45051_s4 + $0x40] sm:$0xff] }
0x1926   :  { %v25746_v14 = vadd.f32 1e-05, %v25744_v57 }
0x1927   :  { %v25743_v30 = vpop.xlane.xlu0 %25742 }
0x1928   :  { %39916 = vrsqrt.f32 %v25746_v14  ;;  %v25745_v48 = vmul.f32 0.03125, %v25743_v30  ;;  %v43619_v30 = vsub.f32 %v34674_v41, %v43605_v39 }
0x192a   :  { %v25747_v61 = vadd.f32 1e-05, %v25745_v48  ;;  %v43621_v48 = vand.u32 4294901760, %v34673_v13 }
0x192c   :  { %39918 = vrsqrt.f32 %v25747_v61 }
0x1935   :  { %v39917_v32 = vpop.eup %39916 }
0x1936   :  { %v25750_v45 = vmul.f32 %v39917_v32, %v25734_v50  ;;  %v43534_v50 = vsub.f32 %v34680_v21, %v43528_v38  ;;  %v43633_v32 = vsub.f32 %v34673_v13, %v43621_v48 }
0x1938   :  { %v25756_v34 = vmul.f32 %v25755_v2, %v25750_v45  ;;  %v43544_v6 = vand.u32 4294901760, %v43534_v50 }
0x1939   :  { %v39919_v46 = vpop.eup %39918 }
0x193a   :  { %v25751_v27 = vmul.f32 %v39919_v46, %v43412_v43  ;;  %v43487_v54 = vadd.f32 %v25761_v40, %v25756_v34  ;;  %v34679_v43 = vld [vmem:[%s45051_s4 + $0x70] sm:$0xff]  ;;  %v26441_v17 = vsub.f32 %v43534_v50, %v43544_v6  ;;  %v43640_v34 = vand.u32 4294901760, %v43633_v32 }
0x193b   :  { %v43536_v15 = vand.u32 4294901760, %v34679_v43 }
0x193c   :  { %v25757_v25 = vmul.f32 %v25755_v2, %v25751_v27  ;;  %v25774_v9 = vsel %vm94_vm0, %v43487_v54, 0  ;;  %v43630_v2 = vand.u32 4294901760, %v43619_v30  ;;  %v26490_v27 = vsub.f32 %v43633_v32, %v43640_v34 }
0x193d   :  { %v25848_v24 = vand.u32 4294901760, %v25774_v9  ;;  %v43547_v53 = vsub.f32 %v34679_v43, %v43536_v15 }
0x193e   :  { %v43491_v31 = vadd.f32 %v25761_v40, %v25757_v25  ;;  %v26483_v40 = vsub.f32 %v43619_v30, %v43630_v2  ;;  %v26491_v25 = vand.u32 4294901760, %v26490_v27 }
0x193f   :  { %38805 = vmatprep.mubr.f32.mxu1 %v25848_v24  ;;  %v25849_v18 = vsub.f32 %v25774_v9, %v25848_v24 }
0x1940   :  { %v25777_v4 = vsel %vm94_vm0, %v43491_v31, 0  ;;  %v26484_v46 = vand.u32 4294901760, %v26483_v40 }
0x1941   :  { %v25858_v51 = vand.u32 4294901760, %v25777_v4  ;;  %v25850_v26 = vand.u32 4294901760, %v25849_v18 }
0x1943   :  { %v25859_v42 = vsub.f32 %v25777_v4, %v25858_v51  ;;  %38806 = vmatmul.mubr.f32.vlgmr.msra.gmra.mxu1 %v25858_v51  ;;  %v25851_v7 = vsub.f32 %v25849_v18, %v25850_v26 }
0x1944   :  { %38820 = vmatpush3.msra.mxu1 %v43421_v44  ;;  %38827 = vmatprep.mubr.f32.mxu1 %v25850_v26 }
0x1945   :  { %38821 = vmatprep.subr.mxu1 %v43429_v49  ;;  %v25852_v23 = vand.u32 4294901760, %v25851_v7  ;;  %v25860_v22 = vand.u32 4294901760, %v25859_v42 }
0x1946   :  { %38822 = vmatpush3.msra.mxu1 %v43429_v49 }
0x1947   :  { %38823 = vmatprep.subr.mxu1 %v43442_v16  ;;  %38794 = vmatprep.mubr.f32.mxu0 %v25852_v23  ;;  %v25861_v47 = vsub.f32 %v25859_v42, %v25860_v22 }
0x1948   :  { %38824 = vmatpush3.msra.mxu1 %v43442_v16 }
0x1949   :  { %38825 = vmatprep.subr.mxu1 %v43458_v56  ;;  %v25862_v62 = vand.u32 4294901760, %v25861_v47 }
0x194a   :  { %38826 = vmatpush3.msra.mxu1 %v43458_v56 }
0x194b   :  { %38828 = vmatmul.mubr.f32.vlgmr.msra.gmra.mxu1 %v25860_v22  ;;  %38841 = vmatprep.subr.mxu1 %v43421_v44 }
0x194c   :  { %38795 = vmatmul.mubr.f32.vlgmr.msra.gmra.mxu0 %v25862_v62  ;;  %38842 = vmatpush3.msra.mxu1 %v43421_v44  ;;  %v34677_v44 = vld [vmem:[%s45051_s4 + $0x60] sm:$0xff] }
0x194d   :  { %38809 = vmatpush3.msra.mxu0 %v43427_v63  ;;  %38849 = vmatprep.mubr.f32.mxu1 %v25848_v24  ;;  %v43559_v63 = vand.u32 4294901760, %v43547_v53  ;;  %v43564_v37 = vand.u32 4294901760, %v34677_v44 }
0x194e   :  { %38810 = vmatprep.subr.mxu0 %v43440_v20  ;;  %38816 = vmatprep.mubr.f32.mxu0 %v25849_v18 }
0x194f   :  { %38843 = vmatprep.subr.mxu1 %v43429_v49  ;;  %38811 = vmatpush3.msra.mxu0 %v43440_v20  ;;  %v26442_v20 = vand.u32 4294901760, %v26441_v17  ;;  %v43577_v59 = vsub.f32 %v34677_v44, %v43564_v37 }
0x1950   :  { %38844 = vmatpush3.msra.mxu1 %v43429_v49  ;;  %38812 = vmatprep.subr.mxu0 %v43455_v33  ;;  %v43562_v49 = vsub.f32 %v34678_v60, %v43549_v35 }
0x1951   :  { %38845 = vmatprep.subr.mxu1 %v43442_v16  ;;  %38813 = vmatpush3.msra.mxu0 %v43455_v33  ;;  %v34675_v33 = vld [vmem:[%s45051_s4 + $0x50] sm:$0xff]  ;;  %v43589_v55 = vand.u32 4294901760, %v43577_v59 }
0x1952   :  { %38846 = vmatpush3.msra.mxu1 %v43442_v16  ;;  %38814 = vmatprep.subr.mxu0 %v43467_v1  ;;  %v26448_v16 = vsub.f32 %v43547_v53, %v43559_v63  ;;  %v43574_v29 = vand.u32 4294901760, %v43562_v49 }
0x1953   :  { %38847 = vmatprep.subr.mxu1 %v43458_v56  ;;  %38815 = vmatpush3.msra.mxu0 %v43467_v1 }
0x1954   :  { %38848 = vmatpush3.msra.mxu1 %v43458_v56  ;;  %38817 = vmatmul.mubr.f32.vlgmr.msra.gmra.mxu0 %v25859_v42  ;;  %v26449_v56 = vand.u32 4294901760, %v26448_v16  ;;  %v26455_v36 = vsub.f32 %v43562_v49, %v43574_v29 }
0x1955   :  { %38830 = vmatprep.subr.mxu0 %v43437_v58  ;;  %38850 = vmatmul.mubr.f32.vlgmr.msra.gmra.mxu1 %v25858_v51 }
0x1956   :  { %38831 = vmatpush3.msra.mxu0 %v43437_v58  ;;  %38838 = vmatprep.mubr.f32.mxu0 %v25848_v24  ;;  %v34676_v58 = vld [vmem:[%s45051_s4 + $0x58] sm:$0xff]  ;;  %v26456_v3 = vand.u32 4294901760, %v26455_v36  ;;  %v45242_v24 = vsub.s32 4, %v45238_v8 }
0x1957   :  { %38832 = vmatprep.subr.mxu0 %v43452_v11  ;;  %38871 = vmatprep.subr.mxu1 %v26442_v20 }
0x1958   :  { %38833 = vmatpush3.msra.mxu0 %v43452_v11  ;;  %v43580_v11 = vand.u32 4294901760, %v34676_v58  ;;  %38872 = vmatpush3.msra.mxu1 %v26442_v20  ;;  %v25772_v18 = vrot.slane %v45240_v10, %v45242_v24 }
0x1959   :  { %38834 = vmatprep.subr.mxu0 %v43464_v28  ;;  %38873 = vmatprep.subr.mxu1 %v26449_v56 }
0x195a   :  { %38835 = vmatpush3.msra.mxu0 %v43464_v28  ;;  %v43591_v28 = vand.u32 4294901760, %v34675_v33  ;;  %v43594_v1 = vsub.f32 %v34676_v58, %v43580_v11  ;;  %38874 = vmatpush3.msra.mxu1 %v26449_v56 }
0x195b   :  { %38836 = vmatprep.subr.mxu0 %v43474_v19  ;;  %38875 = vmatprep.subr.mxu1 %v26456_v3 }
0x195c   :  { %38837 = vmatpush3.msra.mxu0 %v43474_v19  ;;  %v26462_v19 = vsub.f32 %v43577_v59, %v43589_v55  ;;  %v43603_v52 = vsub.f32 %v34675_v33, %v43591_v28  ;;  %v43609_v5 = vand.u32 4294901760, %v43594_v1  ;;  %38876 = vmatpush3.msra.mxu1 %v26456_v3 }
0x195d   :  { %38839 = vmatmul.mubr.f32.vlgmr.msra.gmra.mxu0 %v25858_v51  ;;  %38852 = vmatprep.subr.mxu0 %v43528_v38 }
0x195e   :  { %38853 = vmatpush3.msra.mxu0 %v43528_v38  ;;  %v26463_v57 = vand.u32 4294901760, %v26462_v19  ;;  %v43616_v14 = vand.u32 4294901760, %v43603_v52  ;;  %v26469_v61 = vsub.f32 %v43594_v1, %v43609_v5 }
0x195f   :  { %38854 = vmatprep.subr.mxu0 %v43536_v15 }
0x1960   :  { %38855 = vmatpush3.msra.mxu0 %v43536_v15  ;;  %38877 = vmatprep.subr.mxu1 %v26463_v57  ;;  %v26476_v12 = vsub.f32 %v43603_v52, %v43616_v14  ;;  %v26470_v45 = vand.u32 4294901760, %v26469_v61 }
0x1961   :  { %38856 = vmatprep.subr.mxu0 %v43549_v35  ;;  %38878 = vmatpush3.msra.mxu1 %v26463_v57 }
0x1962   :  { %38857 = vmatpush3.msra.mxu0 %v43549_v35  ;;  %v26477_v0 = vand.u32 4294901760, %v26476_v12  ;;  %38879 = vmatprep.subr.mxu1 %v26470_v45 }
0x1963   :  { %38858 = vmatprep.subr.mxu0 %v43564_v37  ;;  %38880 = vmatpush3.msra.mxu1 %v26470_v45 }
0x1964   :  { %38859 = vmatpush3.msra.mxu0 %v43564_v37  ;;  %38881 = vmatprep.subr.mxu1 %v26477_v0 }
0x1965   :  { %38860 = vmatprep.subr.mxu0 %v43580_v11  ;;  %38882 = vmatpush3.msra.mxu1 %v26477_v0 }
0x1966   :  { %38861 = vmatpush3.msra.mxu0 %v43580_v11  ;;  %38883 = vmatprep.subr.mxu1 %v26484_v46 }
0x1967   :  { %38862 = vmatprep.subr.mxu0 %v43591_v28  ;;  %38884 = vmatpush3.msra.mxu1 %v26484_v46 }
0x1968   :  { %38863 = vmatpush3.msra.mxu0 %v43591_v28  ;;  %38885 = vmatprep.subr.mxu1 %v26491_v25 }
0x1969   :  { %38864 = vmatprep.subr.mxu0 %v43605_v39  ;;  %38886 = vmatpush3.msra.mxu1 %v26491_v25 }
0x196a   :  { %38865 = vmatpush3.msra.mxu0 %v43605_v39  ;;  %38909 = vmatprep.subr.mxu1 %v43528_v38 }
0x196b   :  { %38866 = vmatprep.subr.mxu0 %v43621_v48 }
0x196c   :  { %38867 = vmatpush3.msra.mxu0 %v43621_v48 }
0x196d   :  { %38890 = vmatprep.subr.mxu0 %v43534_v50 }
0x1a03   :  { %v38807_v4 = vpop.f32.mrf.mxu1 }
0x1a05   :  { %v25955_v23 = vpop.f32.mrf.mxu1 }
0x1a0b   :  { %v38829_v47 = vpop.f32.mrf.mxu1 }
0x1a0c   :  { %v38796_v9 = vpop.f32.mrf.mxu0 }
0x1a0d   :  { %v25865_v26 = vadd.f32 %v38796_v9, %v25772_v18  ;;  %v26125_v44 = vpop.f32.mrf.mxu1 }
0x1a0e   :  { %v25854_v51 = vpop.f32.mrf.mxu0 }
0x1a0f   :  { %v25855_v42 = vadd.f32 %v25854_v51, %v25772_v18  ;;  %v25962_v22 = vadd.f32 %v38807_v4, %v25865_v26 }
0x1a11   :  { %v25956_v43 = vadd.f32 %v25955_v23, %v25855_v42 }
0x1a14   :  { %v38818_v7 = vpop.f32.mrf.mxu0 }
0x1a15   :  { %v26049_v21 = vadd.f32 %v38818_v7, %v25962_v22  ;;  %v38851_v58 = vpop.f32.mrf.mxu1 }
0x1a16   :  { %v26041_v62 = vpop.f32.mrf.mxu0 }
0x1a17   :  { %v26042_v60 = vadd.f32 %v26041_v62, %v25956_v43  ;;  %v26134_v17 = vadd.f32 %v38829_v47, %v26049_v21  ;;  %v26297_v41 = vpop.f32.mrf.mxu1 }
0x1a19   :  { %v26126_v33 = vadd.f32 %v26125_v44, %v26042_v60 }
0x1a1d   :  { %v38840_v20 = vpop.f32.mrf.mxu0 }
0x1a1e   :  { %v26223_v16 = vadd.f32 %v38840_v20, %v26134_v17 }
0x1a1f   :  { %v26216_v56 = vpop.f32.mrf.mxu0 }
0x1a20   :  { %v26304_v10 = vadd.f32 %v38851_v58, %v26223_v16  ;;  %v26217_v36 = vadd.f32 %v26216_v56, %v26126_v33 }
0x1a22   :  { %v26308_v3 = vmax.f32 %v26304_v10, 0.0  ;;  %v26298_v19 = vadd.f32 %v26297_v41, %v26217_v36  ;;  %v43738_v10 = vmul.u32 8, %v45238_v8 }
0x1a24   :  { %v26326_v13 = vsel %vm7968_vm4, %v26308_v3, 0  ;;  %v26307_v57 = vmax.f32 %v26298_v19, 0.0  ;;  %v45245_v19 = vld [vmem:[#allocation6_spill] sm:$0xff] }
0x1a25   :  { %v43651_v61 = vand.u32 4294901760, %v26326_v13  ;;  %vm62_vm12 = vcmp.eq.s32.totalorder %v45245_v19, %v43738_v10 }
0x1a26   :  { %v26323_v12 = vsel %vm7968_vm4, %v26307_v57, 0 }
0x1a27   :  { %v26412_v45 = vsub.f32 %v26326_v13, %v43651_v61  ;;  %v26401_v0 = vand.u32 4294901760, %v26323_v12 }
0x1a29   :  { %v26413_v40 = vand.u32 4294901760, %v26412_v45  ;;  %v26402_v46 = vsub.f32 %v26323_v12, %v26401_v0  ;;  %38887 = vmatprep.mubr.f32.mxu1 %v26401_v0  ;;  %v45246_v12 = vsub.s32 6, %v45238_v8 }
0x1a2a   :  { %38888 = vmatmul.mubr.f32.vlgmr.msra.gmra.mxu1 %v43651_v61 }
0x1a2b   :  { %38910 = vmatpush3.msra.mxu1 %v43528_v38  ;;  %v26403_v27 = vand.u32 4294901760, %v26402_v46  ;;  %v26414_v25 = vsub.f32 %v26412_v45, %v26413_v40 }
0x1a2c   :  { %38911 = vmatprep.subr.mxu1 %v43536_v15 }
0x1a2d   :  { %38912 = vmatpush3.msra.mxu1 %v43536_v15  ;;  %38925 = vmatprep.mubr.f32.mxu1 %v26403_v27  ;;  %v26404_v9 = vsub.f32 %v26402_v46, %v26403_v27  ;;  %v26415_v18 = vand.u32 4294901760, %v26414_v25 }
0x1a2e   :  { %38913 = vmatprep.subr.mxu1 %v43549_v35 }
0x1a2f   :  { %38914 = vmatpush3.msra.mxu1 %v43549_v35  ;;  %v26405_v24 = vand.u32 4294901760, %v26404_v9 }
0x1a30   :  { %38915 = vmatprep.subr.mxu1 %v43564_v37 }
0x1a31   :  { %38916 = vmatpush3.msra.mxu1 %v43564_v37  ;;  %38868 = vmatprep.mubr.f32.mxu0 %v26405_v24 }
0x1a32   :  { %38917 = vmatprep.subr.mxu1 %v43580_v11  ;;  %38869 = vmatmul.mubr.f32.vlgmr.msra.gmra.mxu0 %v26415_v18 }
0x1a33   :  { %38891 = vmatpush3.msra.mxu0 %v43534_v50  ;;  %38918 = vmatpush3.msra.mxu1 %v43580_v11 }
0x1a34   :  { %38892 = vmatprep.subr.mxu0 %v43547_v53  ;;  %38906 = vmatprep.mubr.f32.mxu0 %v26402_v46 }
0x1a35   :  { %38919 = vmatprep.subr.mxu1 %v43591_v28  ;;  %38893 = vmatpush3.msra.mxu0 %v43547_v53 }
0x1a36   :  { %38920 = vmatpush3.msra.mxu1 %v43591_v28  ;;  %38894 = vmatprep.subr.mxu0 %v43562_v49 }
0x1a37   :  { %38921 = vmatprep.subr.mxu1 %v43605_v39  ;;  %38895 = vmatpush3.msra.mxu0 %v43562_v49 }
0x1a38   :  { %38922 = vmatpush3.msra.mxu1 %v43605_v39  ;;  %38896 = vmatprep.subr.mxu0 %v43577_v59 }
0x1a39   :  { %38923 = vmatprep.subr.mxu1 %v43621_v48  ;;  %38897 = vmatpush3.msra.mxu0 %v43577_v59 }
0x1a3a   :  { %38924 = vmatpush3.msra.mxu1 %v43621_v48  ;;  %38898 = vmatprep.subr.mxu0 %v43594_v1 }
0x1a3b   :  { %38926 = vmatmul.mubr.f32.vlgmr.msra.gmra.mxu1 %v26413_v40  ;;  %38947 = vmatprep.subr.mxu1 %v43528_v38  ;;  %v45247_v40 = vsub.s32 7, %v45238_v8 }
0x1a3c   :  { %38899 = vmatpush3.msra.mxu0 %v43594_v1  ;;  %38948 = vmatpush3.msra.mxu1 %v43528_v38  ;;  %v45243_v38 = vmov 0.0  }
0x1a3d   :  { %38963 = vmatprep.mubr.f32.mxu1 %v26401_v0  ;;  %38900 = vmatprep.subr.mxu0 %v43603_v52  ;;  %v63_v13 = vsel %vm62_vm12, 1.0, %v45243_v38 }
0x1a3e   :  { %38949 = vmatprep.subr.mxu1 %v43536_v15  ;;  %38901 = vmatpush3.msra.mxu0 %v43603_v52  ;;  %v26951_v57 = vsel %vm26949_vm13, %v63_v13, 0 }
0x1a3f   :  { %38950 = vmatpush3.msra.mxu1 %v43536_v15  ;;  %38902 = vmatprep.subr.mxu0 %v43619_v30  ;;  %v39929_v15 = vld [vmem:[%s45052_s5 + $0x8] sm:$0xff] }
0x1a40   :  { %38951 = vmatprep.subr.mxu1 %v43549_v35  ;;  %38903 = vmatpush3.msra.mxu0 %v43619_v30  ;;  %v26945_v46 = vrot.slane %v39929_v15, %v45247_v40 }
0x1a41   :  { %38952 = vmatpush3.msra.mxu1 %v43549_v35  ;;  %38904 = vmatprep.subr.mxu0 %v43633_v32 }
0x1a42   :  { %38953 = vmatprep.subr.mxu1 %v43564_v37  ;;  %38905 = vmatpush3.msra.mxu0 %v43633_v32 }
0x1a43   :  { %38954 = vmatpush3.msra.mxu1 %v43564_v37  ;;  %38907 = vmatmul.mubr.f32.vlgmr.msra.gmra.mxu0 %v26412_v45  ;;  %v26939_v45 = vrot.slane %v39929_v15, %v45246_v12 }
0x1a44   :  { %38928 = vmatprep.subr.mxu0 %v43544_v6  ;;  %38955 = vmatprep.subr.mxu1 %v43580_v11 }
0x1a45   :  { %38929 = vmatpush3.msra.mxu0 %v43544_v6  ;;  %38944 = vmatprep.mubr.f32.mxu0 %v26401_v0  ;;  %v45244_v6 = vsub.s32 5, %v45238_v8 }
0x1a46   :  { %38956 = vmatpush3.msra.mxu1 %v43580_v11  ;;  %38930 = vmatprep.subr.mxu0 %v43559_v63 }
0x1a47   :  { %38957 = vmatprep.subr.mxu1 %v43591_v28  ;;  %38931 = vmatpush3.msra.mxu0 %v43559_v63  ;;  %v26321_v53 = vrot.slane %v39929_v15, %v45244_v6 }
0x1a48   :  { %38958 = vmatpush3.msra.mxu1 %v43591_v28  ;;  %38932 = vmatprep.subr.mxu0 %v43574_v29 }
0x1a49   :  { %38959 = vmatprep.subr.mxu1 %v43605_v39  ;;  %38933 = vmatpush3.msra.mxu0 %v43574_v29 }
0x1a4a   :  { %38960 = vmatpush3.msra.mxu1 %v43605_v39  ;;  %38934 = vmatprep.subr.mxu0 %v43589_v55 }
0x1a4b   :  { %38961 = vmatprep.subr.mxu1 %v43621_v48  ;;  %38935 = vmatpush3.msra.mxu0 %v43589_v55 }
0x1a4c   :  { %38962 = vmatpush3.msra.mxu1 %v43621_v48  ;;  %38936 = vmatprep.subr.mxu0 %v43609_v5 }
0x1a4d   :  { %38964 = vmatmul.mubr.f32.vlgmr.msra.gmra.mxu1 %v43651_v61  ;;  %38937 = vmatpush3.msra.mxu0 %v43609_v5 }
0x1a4e   :  { %38938 = vmatprep.subr.mxu0 %v43616_v14  ;;  %38973 = vmatprep.subr.mxu1 %v45243_v38 }
0x1a4f   :  { %38939 = vmatpush3.msra.mxu0 %v43616_v14  ;;  %38977 = vmatprep.mubr.msk.f32.mxu1 %vm39953_vm1, %v45243_v38 }
0x1a50   :  { %38940 = vmatprep.subr.mxu0 %v43630_v2 }
0x1a51   :  { %38941 = vmatpush3.msra.mxu0 %v43630_v2 }
0x1a52   :  { %38942 = vmatprep.subr.mxu0 %v43640_v34 }
0x1a53   :  { %38943 = vmatpush3.msra.mxu0 %v43640_v34 }
0x1a54   :  { %38945 = vmatmul.mubr.f32.vlgmr.msra.gmra.mxu0 %v43651_v61  ;;  %38966 = vmatprep.subr.mxu0 %v45243_v38  ;;  %v27021_v61 = vsub.f32 %v26951_v57, %v26951_v57 }
0x1a55   :  { %38970 = vmatprep.mubr.msk.f32.mxu0 %vm39953_vm1, %v45243_v38 }
0x1a56   :  { %v27022_v25 = vand.u32 4294901760, %v27021_v61 }
0x1a58   :  { %v27023_v6 = vsub.f32 %v27021_v61, %v27022_v25 }
0x1a5a   :  { %v27024_v8 = vand.u32 4294901760, %v27023_v6 }
0x1aea   :  { %v38889_v35 = vpop.f32.mrf.mxu1 }
0x1aec   :  { %v26528_v59 = vpop.f32.mrf.mxu1 }
0x1af2   :  { %v38870_v50 = vpop.f32.mrf.mxu0 }
0x1af3   :  { %v26418_v49 = vadd.f32 %v38870_v50, %v26321_v53 }
0x1af4   :  { %v26407_v63 = vpop.f32.mrf.mxu0 }
0x1af5   :  { %v26408_v29 = vadd.f32 %v26407_v63, %v26321_v53  ;;  %v26535_v11 = vadd.f32 %v38889_v35, %v26418_v49 }
0x1af7   :  { %v26529_v52 = vadd.f32 %v26528_v59, %v26408_v29 }
0x1afb   :  { %v38927_v55 = vpop.f32.mrf.mxu1 }
0x1afd   :  { %v26710_v5 = vpop.f32.mrf.mxu1 }
0x1b03   :  { %v38908_v37 = vpop.f32.mrf.mxu0 }
0x1b04   :  { %v26630_v1 = vadd.f32 %v38908_v37, %v26535_v11 }
0x1b05   :  { %v26622_v28 = vpop.f32.mrf.mxu0 }
0x1b06   :  { %v26623_v39 = vadd.f32 %v26622_v28, %v26529_v52  ;;  %v26719_v14 = vadd.f32 %v38927_v55, %v26630_v1  ;;  %v27415_v52 = vld [vmem:[%s45053_s6 + $0x18] sm:$0xff] }
0x1b08   :  { %v26711_v32 = vadd.f32 %v26710_v5, %v26623_v39  ;;  %v43814_v39 = vand.u32 4294901760, %v27415_v52  ;;  %v27414_v5 = vld [vmem:[%s45053_s6 + $0x10] sm:$0xff] }
0x1b0d   :  { %v38965_v30 = vpop.f32.mrf.mxu1 }
0x1b0f   :  { %v26898_v26 = vpop.f32.mrf.mxu1 }
0x1b14   :  { %v38946_v48 = vpop.f32.mrf.mxu0 }
0x1b15   :  { %v26820_v2 = vadd.f32 %v38946_v48, %v26719_v14  ;;  %v43820_v14 = vsub.f32 %v27415_v52, %v43814_v39  ;;  %v27413_v48 = vld [vmem:[%s45053_s6 + $0x8] sm:$0xff] }
0x1b16   :  { %v26813_v34 = vpop.f32.mrf.mxu0 }
0x1b17   :  { %v26905_v4 = vadd.f32 %v38965_v30, %v26820_v2  ;;  %v26814_v51 = vadd.f32 %v26813_v34, %v26711_v32  ;;  %v43822_v30 = vand.u32 4294901760, %v27414_v5  ;;  %v27525_v2 = vand.u32 4294901760, %v43820_v14 }
0x1b18   :  { %v43833_v34 = vand.u32 4294901760, %v27413_v48 }
0x1b19   :  { %v26899_v42 = vadd.f32 %v26898_v26, %v26814_v51  ;;  %v26909_v7 = vadd.f32 %v26905_v4, %v43491_v31  ;;  %v43831_v32 = vsub.f32 %v27414_v5, %v43822_v30  ;;  %v27412_v4 = vld [vmem:[%s45053_s6] sm:$0xff]  ;;  %v27526_v51 = vsub.f32 %v43820_v14, %v27525_v2 }
0x1b1b   :  { %v26913_v23 = vsel %vm94_vm0, %v26909_v7, 0.0  ;;  %v26908_v22 = vadd.f32 %v26899_v42, %v43487_v54  ;;  %v27532_v26 = vand.u32 4294901760, %v43831_v32  ;;  %v43845_v42 = vsub.f32 %v27413_v48, %v43833_v34 }
0x1b1c   :  { %26914 = vadd.xlane.f32.xlu0 %v26913_v23  ;;  %v27527_v23 = vand.u32 4294901760, %v27526_v51  ;;  %v28373_v51 = vld [vmem:[%s45053_s6 + $0x20] sm:$0xff] }
0x1b1d   :  { %v26910_v47 = vsel %vm94_vm0, %v26908_v22, 0.0 }
0x1b20   :  { %26911 = vadd.xlane.f32.xlu0 %v26910_v47  ;;  %v27539_v47 = vand.u32 4294901760, %v43845_v42 }
0x1ba5   :  { %v26915_v62 = vpop.xlane.xlu0 %26914 }
0x1ba6   :  { %v26917_v21 = vmul.f32 0.03125, %v26915_v62 }
0x1ba8   :  { %v26919_v43 = vsub.f32 %v26909_v7, %v26917_v21  ;;  %v43847_v7 = vand.u32 4294901760, %v27412_v4 }
0x1ba9   :  { %v26912_v60 = vpop.xlane.xlu0 %26911 }
0x1baa   :  { %v26916_v44 = vmul.f32 0.03125, %v26912_v60  ;;  %v26921_v17 = vmul.f32 %v26919_v43, %v26919_v43  ;;  %v43856_v62 = vsub.f32 %v27412_v4, %v43847_v7 }
0x1bac   :  { %v26918_v58 = vsub.f32 %v26908_v22, %v26916_v44  ;;  %v26925_v20 = vsel %vm94_vm0, %v26921_v17, 0.0  ;;  %v27533_v22 = vsub.f32 %v43831_v32, %v27532_v26  ;;  %v27546_v60 = vand.u32 4294901760, %v43856_v62 }
0x1bad   :  { %26926 = vadd.xlane.f32.xlu0 %v26925_v20 }
0x1bae   :  { %v26920_v16 = vmul.f32 %v26918_v58, %v26918_v58  ;;  %v27534_v21 = vand.u32 4294901760, %v27533_v22  ;;  %v27547_v17 = vsub.f32 %v43856_v62, %v27546_v60 }
0x1bb0   :  { %v26922_v31 = vsel %vm94_vm0, %v26920_v16, 0.0 }
0x1bb1   :  { %26923 = vadd.xlane.f32.xlu0 %v26922_v31 }
0x1c36   :  { %v26927_v33 = vpop.xlane.xlu0 %26926 }
0x1c37   :  { %v26929_v54 = vmul.f32 0.03125, %v26927_v33 }
0x1c39   :  { %v26931_v56 = vadd.f32 1e-05, %v26929_v54 }
0x1c3a   :  { %v26924_v36 = vpop.xlane.xlu0 %26923 }
0x1c3b   :  { %39920 = vrsqrt.f32 %v26931_v56  ;;  %v26928_v41 = vmul.f32 0.03125, %v26924_v36 }
0x1c3d   :  { %v26930_v3 = vadd.f32 1e-05, %v26928_v41 }
0x1c3f   :  { %39922 = vrsqrt.f32 %v26930_v3 }
0x1c48   :  { %v39921_v0 = vpop.eup %39920 }
0x1c49   :  { %v26935_v27 = vmul.f32 %v39921_v0, %v26919_v43  ;;  %v27540_v43 = vsub.f32 %v43845_v42, %v27539_v47 }
0x1c4b   :  { %v26941_v9 = vmul.f32 %v26939_v45, %v26935_v27  ;;  %v27541_v44 = vand.u32 4294901760, %v27540_v43 }
0x1c4c   :  { %v39923_v24 = vpop.eup %39922 }
0x1c4d   :  { %v26947_v18 = vadd.f32 %v26945_v46, %v26941_v9  ;;  %v26934_v50 = vmul.f32 %v39923_v24, %v26918_v58  ;;  %v27548_v58 = vand.u32 4294901760, %v27547_v17 }
0x1c4f   :  { %v43748_v53 = vand.u32 4294901760, %v26947_v18  ;;  %v26940_v35 = vmul.f32 %v26939_v45, %v26934_v50  ;;  %v64_v50 = vadd.s32 1, %v43738_v10 }
0x1c51   :  { %v43751_v63 = vsub.f32 %v26947_v18, %v43748_v53  ;;  %v26946_v49 = vadd.f32 %v26945_v46, %v26940_v35  ;;  %38967 = vmatpush3.msra.mxu0 %v43748_v53  ;;  %vm65_vm14 = vcmp.eq.s32.totalorder %v45245_v19, %v64_v50 }
0x1c52   :  { %38968 = vmatprep.subr.mxu0 %v45243_v38  ;;  %v43892_v35 = vsel %vm65_vm14, 1.0, %v45243_v38 }
0x1c53   :  { %v43756_v15 = vand.u32 4294901760, %v43751_v63  ;;  %v43758_v37 = vand.u32 4294901760, %v26946_v49 }
0x1c55   :  { %v43761_v29 = vsub.f32 %v26946_v49, %v43758_v37  ;;  %38969 = vmatpush3.msra.mxu0 %v43758_v37  ;;  %v27062_v59 = vsub.f32 %v43751_v63, %v43756_v15  ;;  %v27912_v49 = vsel %vm26949_vm13, %v43892_v35, 0 }
0x1c56   :  { %38980 = vmatprep.subr.mxu0 %v45243_v38  ;;  %38971 = vmatmul.mubr.f32.vlgmr.msra.gmra.mxu0 %v27024_v8  ;;  %v27982_v8 = vsub.f32 %v27912_v49, %v27912_v49 }
0x1c57   :  { %v43768_v11 = vand.u32 4294901760, %v43761_v29  ;;  %38981 = vmatpush3.msra.mxu0 %v43751_v63  ;;  %v43771_v55 = vand.u32 4294901760, %v27062_v59  ;;  %38984 = vmatprep.mubr.msk.f32.mxu0 %vm39953_vm1, %v45243_v38 }
0x1c58   :  { %38982 = vmatprep.subr.mxu0 %v45243_v38  ;;  %v27983_v59 = vand.u32 4294901760, %v27982_v8 }
0x1c59   :  { %38974 = vmatpush3.msra.mxu1 %v43771_v55  ;;  %38983 = vmatpush3.msra.mxu0 %v43761_v29  ;;  %v27069_v28 = vsub.f32 %v43761_v29, %v43768_v11 }
0x1c5a   :  { %38994 = vmatprep.subr.mxu0 %v45243_v38  ;;  %38985 = vmatmul.mubr.f32.vlgmr.msra.gmra.mxu0 %v27021_v61 }
0x1c5b   :  { %38995 = vmatpush3.msra.mxu0 %v43756_v15  ;;  %38975 = vmatprep.subr.mxu1 %v45243_v38  ;;  %v43783_v1 = vand.u32 4294901760, %v27069_v28  ;;  %v27984_v28 = vsub.f32 %v27982_v8, %v27983_v59 }
0x1c5c   :  { %38996 = vmatprep.subr.mxu0 %v45243_v38  ;;  %38998 = vmatprep.mubr.msk.f32.mxu0 %vm39953_vm1, %v45243_v38 }
0x1c5d   :  { %38976 = vmatpush3.msra.mxu1 %v43783_v1  ;;  %38997 = vmatpush3.msra.mxu0 %v43768_v11  ;;  %v27985_v52 = vand.u32 4294901760, %v27984_v28 }
0x1c5e   :  { %38978 = vmatmul.mubr.msk.f32.vlgmr.msra.gmra.mxu1 %vm26949_vm13, %v63_v13  ;;  %38987 = vmatprep.subr.mxu1 %v45243_v38 }
0x1c5f   :  { %38988 = vmatpush3.msra.mxu1 %v43748_v53  ;;  %38991 = vmatprep.mubr.msk.f32.mxu1 %vm39953_vm1, %v45243_v38 }
0x1c60   :  { %38989 = vmatprep.subr.mxu1 %v45243_v38  ;;  %38999 = vmatmul.mubr.msk.f32.vlgmr.msra.gmra.mxu0 %vm26949_vm13, %v63_v13 }
0x1c61   :  { %38990 = vmatpush3.msra.mxu1 %v43758_v37  ;;  %39008 = vmatprep.subr.mxu0 %v45243_v38 }
0x1c62   :  { %38992 = vmatmul.mubr.f32.vlgmr.msra.gmra.mxu1 %v27022_v25  ;;  %39001 = vmatprep.subr.mxu1 %v45243_v38 }
0x1c63   :  { %39002 = vmatpush3.msra.mxu1 %v43748_v53  ;;  %39005 = vmatprep.mubr.msk.f32.mxu1 %vm39953_vm1, %v45243_v38 }
0x1c64   :  { %39003 = vmatprep.subr.mxu1 %v45243_v38  ;;  %39016 = vmatprep.mubr.msk.f32.mxu0 %vm39953_vm1, %v45243_v38 }
0x1c65   :  { %39004 = vmatpush3.msra.mxu1 %v43758_v37  ;;  %39009 = vmatpush3.msra.mxu0 %v43814_v39 }
0x1c66   :  { %39006 = vmatmul.mubr.msk.f32.vlgmr.msra.gmra.mxu1 %vm26949_vm13, %v63_v13  ;;  %39019 = vmatprep.subr.mxu1 %v45243_v38 }
0x1c67   :  { %39027 = vmatprep.mubr.msk.f32.mxu1 %vm39953_vm1, %v45243_v38  ;;  %39010 = vmatprep.subr.mxu0 %v45243_v38 }
0x1c68   :  { %39011 = vmatpush3.msra.mxu0 %v43822_v30  ;;  %39020 = vmatpush3.msra.mxu1 %v27527_v23  ;;  %v44005_v23 = vand.u32 4294901760, %v28373_v51 }
0x1c69   :  { %39012 = vmatprep.subr.mxu0 %v45243_v38  ;;  %39021 = vmatprep.subr.mxu1 %v45243_v38 }
0x1c6a   :  { %39013 = vmatpush3.msra.mxu0 %v43833_v34  ;;  %39022 = vmatpush3.msra.mxu1 %v27534_v21  ;;  %v44014_v21 = vsub.f32 %v28373_v51, %v44005_v23 }
0x1c6b   :  { %39014 = vmatprep.subr.mxu0 %v45243_v38  ;;  %39023 = vmatprep.subr.mxu1 %v45243_v38 }
0x1c6c   :  { %39015 = vmatpush3.msra.mxu0 %v43847_v7  ;;  %39024 = vmatpush3.msra.mxu1 %v27541_v44  ;;  %v28507_v44 = vand.u32 4294901760, %v44014_v21 }
0x1c6d   :  { %39030 = vmatprep.subr.mxu0 %v45243_v38  ;;  %39025 = vmatprep.subr.mxu1 %v45243_v38 }
0x1c6e   :  { %39026 = vmatpush3.msra.mxu1 %v27548_v58  ;;  %v28508_v58 = vsub.f32 %v44014_v21, %v28507_v44 }
0x1c6f   :  { %39041 = vmatprep.subr.mxu1 %v45243_v38 }
0x1d16   :  { %v27026_v20 = vpop.f32.mrf.mxu0 }
0x1d18   :  { %v38972_v16 = vpop.f32.mrf.mxu0 }
0x1d1a   :  { %v27183_v31 = vpop.f32.mrf.mxu0 }
0x1d1c   :  { %v38986_v33 = vpop.f32.mrf.mxu0 }
0x1d1e   :  { %v27107_v54 = vpop.f32.mrf.mxu1 }
0x1d1f   :  { %v27108_v56 = vadd.f32 %v27107_v54, %v27026_v20  ;;  %v28509_v20 = vand.u32 4294901760, %v28508_v58  ;;  %v67_v58 = vadd.s32 2, %v43738_v10 }
0x1d20   :  { %v38979_v36 = vpop.f32.mrf.mxu1  ;;  %v27335_v41 = vpop.f32.mrf.mxu0 }
0x1d21   :  { %v27184_v3 = vadd.f32 %v27183_v31, %v27108_v56  ;;  %vm68_vm15 = vcmp.eq.s32.totalorder %v45245_v19, %v67_v58 }
0x1d22   :  { %v27258_v13 = vpop.f32.mrf.mxu1  ;;  %v39000_v57 = vpop.f32.mrf.mxu0 }
0x1d23   :  { %v27259_v61 = vadd.f32 %v27258_v13, %v27184_v3 }
0x1d24   :  { %v38993_v12 = vpop.f32.mrf.mxu1 }
0x1d25   :  { %v27336_v45 = vadd.f32 %v27335_v41, %v27259_v61 }
0x1d26   :  { %v27408_v0 = vpop.f32.mrf.mxu1 }
0x1d27   :  { %v27409_v40 = vadd.f32 %v27408_v0, %v27336_v45 }
0x1d28   :  { %v39007_v46 = vpop.f32.mrf.mxu1 }
0x1d29   :  { %v27417_v27 = vsel %vm94_vm0, %v27409_v40, 0 }
0x1d2a   :  { %v27488_v25 = vand.u32 4294901760, %v27417_v27 }
0x1d2c   :  { %v27489_v9 = vsub.f32 %v27417_v27, %v27488_v25  ;;  %39028 = vmatmul.mubr.f32.vlgmr.msra.gmra.mxu1 %v27488_v25 }
0x1d2d   :  { %39042 = vmatpush3.msra.mxu1 %v43814_v39  ;;  %39049 = vmatprep.mubr.msk.f32.mxu1 %vm39953_vm1, %v45243_v38 }
0x1d2e   :  { %v27490_v24 = vand.u32 4294901760, %v27489_v9  ;;  %39043 = vmatprep.subr.mxu1 %v45243_v38 }
0x1d2f   :  { %39044 = vmatpush3.msra.mxu1 %v43822_v30 }
0x1d30   :  { %v27491_v18 = vsub.f32 %v27489_v9, %v27490_v24  ;;  %39045 = vmatprep.subr.mxu1 %v45243_v38 }
0x1d31   :  { %39046 = vmatpush3.msra.mxu1 %v43833_v34 }
0x1d32   :  { %v27492_v6 = vand.u32 4294901760, %v27491_v18  ;;  %39047 = vmatprep.subr.mxu1 %v45243_v38 }
0x1d33   :  { %39048 = vmatpush3.msra.mxu1 %v43847_v7 }
0x1d34   :  { %39050 = vmatmul.mubr.f32.vlgmr.msra.gmra.mxu1 %v27490_v24  ;;  %39063 = vmatprep.subr.mxu1 %v45243_v38 }
0x1d35   :  { %39017 = vmatmul.mubr.f32.vlgmr.msra.gmra.mxu0 %v27492_v6  ;;  %39064 = vmatpush3.msra.mxu1 %v43814_v39  ;;  %v28376_v39 = vld [vmem:[%s45053_s6 + $0x38] sm:$0xff] }
0x1d36   :  { %39031 = vmatpush3.msra.mxu0 %v43820_v14  ;;  %39065 = vmatprep.subr.mxu1 %v45243_v38  ;;  %v43972_v5 = vand.u32 4294901760, %v28376_v39  ;;  %v28375_v14 = vld [vmem:[%s45053_s6 + $0x30] sm:$0xff] }
0x1d37   :  { %39032 = vmatprep.subr.mxu0 %v45243_v38  ;;  %39066 = vmatpush3.msra.mxu1 %v43822_v30  ;;  %v43980_v48 = vand.u32 4294901760, %v28375_v14 }
0x1d38   :  { %39033 = vmatpush3.msra.mxu0 %v43831_v32  ;;  %39067 = vmatprep.subr.mxu1 %v45243_v38  ;;  %v43978_v30 = vsub.f32 %v28376_v39, %v43972_v5 }
0x1d39   :  { %39034 = vmatprep.subr.mxu0 %v45243_v38  ;;  %39068 = vmatpush3.msra.mxu1 %v43833_v34  ;;  %v43989_v34 = vsub.f32 %v28375_v14, %v43980_v48 }
0x1d3a   :  { %39035 = vmatpush3.msra.mxu0 %v43845_v42  ;;  %39069 = vmatprep.subr.mxu1 %v45243_v38  ;;  %v28486_v32 = vand.u32 4294901760, %v43978_v30 }
0x1d3b   :  { %39036 = vmatprep.subr.mxu0 %v45243_v38  ;;  %39038 = vmatprep.mubr.msk.f32.mxu0 %vm39953_vm1, %v45243_v38  ;;  %v28493_v42 = vand.u32 4294901760, %v43989_v34 }
0x1d3c   :  { %39037 = vmatpush3.msra.mxu0 %v43856_v62  ;;  %39070 = vmatpush3.msra.mxu1 %v43847_v7 }
0x1d3d   :  { %39071 = vmatprep.mubr.msk.f32.mxu1 %vm39953_vm1, %v45243_v38  ;;  %39039 = vmatmul.mubr.f32.vlgmr.msra.gmra.mxu0 %v27489_v9 }
0x1d3e   :  { %39052 = vmatprep.subr.mxu0 %v45243_v38  ;;  %39072 = vmatmul.mubr.f32.vlgmr.msra.gmra.mxu1 %v27488_v25 }
0x1d3f   :  { %39081 = vmatprep.subr.mxu1 %v45243_v38  ;;  %39053 = vmatpush3.msra.mxu0 %v27525_v2  ;;  %v28374_v2 = vld [vmem:[%s45053_s6 + $0x28] sm:$0xff] }
0x1d40   :  { %39082 = vmatpush3.msra.mxu1 %v43771_v55  ;;  %39054 = vmatprep.subr.mxu0 %v45243_v38  ;;  %v43991_v4 = vand.u32 4294901760, %v28374_v2 }
0x1d41   :  { %39083 = vmatprep.subr.mxu1 %v45243_v38  ;;  %39055 = vmatpush3.msra.mxu0 %v27532_v26  ;;  %v28487_v26 = vsub.f32 %v43978_v30, %v28486_v32 }
0x1d42   :  { %39084 = vmatpush3.msra.mxu1 %v43783_v1  ;;  %39056 = vmatprep.subr.mxu0 %v45243_v38  ;;  %v44003_v7 = vsub.f32 %v28374_v2, %v43991_v4 }
0x1d43   :  { %39085 = vmatprep.mubr.msk.f32.mxu1 %vm39953_vm1, %v45243_v38  ;;  %39095 = vmatprep.subr.mxu1 %v45243_v38  ;;  %v28488_v22 = vand.u32 4294901760, %v28487_v26 }
0x1d44   :  { %39057 = vmatpush3.msra.mxu0 %v27539_v47  ;;  %39086 = vmatmul.mubr.msk.f32.vlgmr.msra.gmra.mxu1 %vm26949_vm13, %v43892_v35  ;;  %v28494_v47 = vsub.f32 %v43989_v34, %v28493_v42  ;;  %v28500_v62 = vand.u32 4294901760, %v44003_v7 }
0x1d45   :  { %39096 = vmatpush3.msra.mxu1 %v43748_v53  ;;  %39058 = vmatprep.subr.mxu0 %v45243_v38 }
0x1d46   :  { %39097 = vmatprep.subr.mxu1 %v45243_v38  ;;  %39059 = vmatpush3.msra.mxu0 %v27546_v60  ;;  %v28495_v43 = vand.u32 4294901760, %v28494_v47  ;;  %v28501_v60 = vsub.f32 %v44003_v7, %v28500_v62 }
0x1d47   :  { %39060 = vmatprep.mubr.msk.f32.mxu0 %vm39953_vm1, %v45243_v38  ;;  %39098 = vmatpush3.msra.mxu1 %v43758_v37 }
0x1d48   :  { %39061 = vmatmul.mubr.f32.vlgmr.msra.gmra.mxu0 %v27488_v25  ;;  %39074 = vmatprep.subr.mxu0 %v45243_v38  ;;  %v28502_v17 = vand.u32 4294901760, %v28501_v60 }
0x1d49   :  { %39099 = vmatprep.mubr.msk.f32.mxu1 %vm39953_vm1, %v45243_v38  ;;  %39109 = vmatprep.subr.mxu1 %v45243_v38 }
0x1d4a   :  { %39075 = vmatpush3.msra.mxu0 %v43748_v53  ;;  %39100 = vmatmul.mubr.f32.vlgmr.msra.gmra.mxu1 %v27983_v59 }
0x1d4b   :  { %39110 = vmatpush3.msra.mxu1 %v43748_v53  ;;  %39076 = vmatprep.subr.mxu0 %v45243_v38 }
0x1d4c   :  { %39111 = vmatprep.subr.mxu1 %v45243_v38  ;;  %39077 = vmatpush3.msra.mxu0 %v43758_v37 }
0x1d4d   :  { %39078 = vmatprep.mubr.msk.f32.mxu0 %vm39953_vm1, %v45243_v38  ;;  %39112 = vmatpush3.msra.mxu1 %v43758_v37 }
0x1d4e   :  { %39079 = vmatmul.mubr.f32.vlgmr.msra.gmra.mxu0 %v27985_v52  ;;  %39088 = vmatprep.subr.mxu0 %v45243_v38 }
0x1d4f   :  { %39089 = vmatpush3.msra.mxu0 %v43751_v63  ;;  %39092 = vmatprep.mubr.msk.f32.mxu0 %vm39953_vm1, %v45243_v38 }
0x1d50   :  { %39090 = vmatprep.subr.mxu0 %v45243_v38  ;;  %39113 = vmatprep.mubr.msk.f32.mxu1 %vm39953_vm1, %v45243_v38 }
0x1d51   :  { %39091 = vmatpush3.msra.mxu0 %v43761_v29  ;;  %39114 = vmatmul.mubr.msk.f32.vlgmr.msra.gmra.mxu1 %vm26949_vm13, %v43892_v35 }
0x1d52   :  { %39093 = vmatmul.mubr.f32.vlgmr.msra.gmra.mxu0 %v27982_v8  ;;  %39102 = vmatprep.subr.mxu0 %v45243_v38 }
0x1d53   :  { %39103 = vmatpush3.msra.mxu0 %v43756_v15  ;;  %39106 = vmatprep.mubr.msk.f32.mxu0 %vm39953_vm1, %v45243_v38 }
0x1d54   :  { %39104 = vmatprep.subr.mxu0 %v45243_v38  ;;  %39127 = vmatprep.subr.mxu1 %v45243_v38 }
0x1d55   :  { %39105 = vmatpush3.msra.mxu0 %v43768_v11  ;;  %39135 = vmatprep.mubr.msk.f32.mxu1 %vm39953_vm1, %v45243_v38 }
0x1d56   :  { %39107 = vmatmul.mubr.msk.f32.vlgmr.msra.gmra.mxu0 %vm26949_vm13, %v43892_v35  ;;  %39116 = vmatprep.subr.mxu0 %v45243_v38 }
0x1d57   :  { %39124 = vmatprep.mubr.msk.f32.mxu0 %vm39953_vm1, %v45243_v38  ;;  %39117 = vmatpush3.msra.mxu0 %v43972_v5 }
0x1d58   :  { %39118 = vmatprep.subr.mxu0 %v45243_v38  ;;  %39128 = vmatpush3.msra.mxu1 %v28488_v22 }
0x1d59   :  { %39119 = vmatpush3.msra.mxu0 %v43980_v48  ;;  %39129 = vmatprep.subr.mxu1 %v45243_v38 }
0x1d5a   :  { %39120 = vmatprep.subr.mxu0 %v45243_v38  ;;  %39130 = vmatpush3.msra.mxu1 %v28495_v43 }
0x1d5b   :  { %39121 = vmatpush3.msra.mxu0 %v43991_v4  ;;  %39131 = vmatprep.subr.mxu1 %v45243_v38 }
0x1d5c   :  { %39122 = vmatprep.subr.mxu0 %v45243_v38  ;;  %39132 = vmatpush3.msra.mxu1 %v28502_v17 }
0x1d5d   :  { %39123 = vmatpush3.msra.mxu0 %v44005_v23  ;;  %39133 = vmatprep.subr.mxu1 %v45243_v38 }
0x1d5e   :  { %39138 = vmatprep.subr.mxu0 %v45243_v38  ;;  %39134 = vmatpush3.msra.mxu1 %v28509_v20 }
0x1d5f   :  { %39149 = vmatprep.subr.mxu1 %v45243_v38 }
0x1dec   :  { %v27585_v16 = vpop.f32.mrf.mxu1 }
0x1dee   :  { %v39029_v31 = vpop.f32.mrf.mxu1 }
0x1df4   :  { %v27742_v33 = vpop.f32.mrf.mxu1 }
0x1df5   :  { %v27494_v54 = vpop.f32.mrf.mxu0 }
0x1df6   :  { %v27586_v56 = vadd.f32 %v27585_v16, %v27494_v54  ;;  %v39051_v36 = vpop.f32.mrf.mxu1  ;;  %v44052_v16 = vsel %vm68_vm15, 1.0, %v45243_v38  ;;  %v29328_v54 = vld [vmem:[%s45053_s6 + $0x40] sm:$0xff] }
0x1df7   :  { %v39018_v41 = vpop.f32.mrf.mxu0 }
0x1dfd   :  { %v27665_v3 = vpop.f32.mrf.mxu0 }
0x1dfe   :  { %v27666_v13 = vadd.f32 %v27665_v3, %v27586_v56  ;;  %v27900_v57 = vpop.f32.mrf.mxu1  ;;  %v44165_v3 = vand.u32 4294901760, %v29328_v54 }
0x1dff   :  { %v39040_v61 = vpop.f32.mrf.mxu0 }
0x1e00   :  { %v39073_v12 = vpop.f32.mrf.mxu1  ;;  %v27743_v45 = vadd.f32 %v27742_v33, %v27666_v13 }
0x1e01   :  { %v44174_v12 = vsub.f32 %v29328_v54, %v44165_v3 }
0x1e04   :  { %v28068_v0 = vpop.f32.mrf.mxu1 }
0x1e06   :  { %v39087_v40 = vpop.f32.mrf.mxu1 }
0x1e07   :  { %v29462_v40 = vand.u32 4294901760, %v44174_v12 }
0x1e08   :  { %v27825_v46 = vpop.f32.mrf.mxu0 }
0x1e09   :  { %v27826_v27 = vadd.f32 %v27825_v46, %v27743_v45 }
0x1e0a   :  { %v39062_v25 = vpop.f32.mrf.mxu0  ;;  %v28219_v9 = vpop.f32.mrf.mxu1 }
0x1e0b   :  { %v44029_v24 = vadd.f32 %v27900_v57, %v27826_v27  ;;  %v29463_v27 = vsub.f32 %v44174_v12, %v29462_v40 }
0x1e0c   :  { %v39101_v18 = vpop.f32.mrf.mxu1 }
0x1e0d   :  { %v29464_v25 = vand.u32 4294901760, %v29463_v27 }
0x1e0e   :  { %v27987_v50 = vpop.f32.mrf.mxu0 }
0x1e0f   :  { %v28069_v35 = vadd.f32 %v28068_v0, %v27987_v50 }
0x1e10   :  { %v39080_v6 = vpop.f32.mrf.mxu0 }
0x1e11   :  { %v28369_v49 = vpop.f32.mrf.mxu1 }
0x1e12   :  { %v28144_v8 = vpop.f32.mrf.mxu0 }
0x1e13   :  { %v28145_v59 = vadd.f32 %v28144_v8, %v28069_v35  ;;  %v39115_v28 = vpop.f32.mrf.mxu1 }
0x1e14   :  { %v39094_v52 = vpop.f32.mrf.mxu0 }
0x1e15   :  { %v28220_v39 = vadd.f32 %v28219_v9, %v28145_v59 }
0x1e16   :  { %v28296_v14 = vpop.f32.mrf.mxu0 }
0x1e17   :  { %v28297_v2 = vadd.f32 %v28296_v14, %v28220_v39 }
0x1e18   :  { %v39108_v51 = vpop.f32.mrf.mxu0 }
0x1e19   :  { %v28370_v26 = vadd.f32 %v28369_v49, %v28297_v2 }
0x1e1b   :  { %v28378_v22 = vsel %vm94_vm0, %v28370_v26, 0 }
0x1e1c   :  { %v28449_v47 = vand.u32 4294901760, %v28378_v22 }
0x1e1e   :  { %v28450_v43 = vsub.f32 %v28378_v22, %v28449_v47  ;;  %39136 = vmatmul.mubr.f32.vlgmr.msra.gmra.mxu1 %v28449_v47  ;;  %v34684_v22 = vld [vmem:[%s45054_s7] ss:$0 sm:$0xff] }
0x1e1f   :  { %39150 = vmatpush3.msra.mxu1 %v43972_v5  ;;  %39157 = vmatprep.mubr.msk.f32.mxu1 %vm39953_vm1, %v45243_v38  ;;  %v27910_v58 = vadd.f32 %v34684_v22, %v44029_v24 }
0x1e20   :  { %v28451_v60 = vand.u32 4294901760, %v28450_v43  ;;  %39151 = vmatprep.subr.mxu1 %v45243_v38 }
0x1e21   :  { %39152 = vmatpush3.msra.mxu1 %v43980_v48 }
0x1e22   :  { %v28452_v17 = vsub.f32 %v28450_v43, %v28451_v60  ;;  %39153 = vmatprep.subr.mxu1 %v45243_v38 }
0x1e23   :  { %39154 = vmatpush3.msra.mxu1 %v43991_v4 }
0x1e24   :  { %v28453_v20 = vand.u32 4294901760, %v28452_v17  ;;  %39155 = vmatprep.subr.mxu1 %v45243_v38 }
0x1e25   :  { %39156 = vmatpush3.msra.mxu1 %v44005_v23 }
0x1e26   :  { %39158 = vmatmul.mubr.f32.vlgmr.msra.gmra.mxu1 %v28451_v60  ;;  %39171 = vmatprep.subr.mxu1 %v45243_v38 }
0x1e27   :  { %39125 = vmatmul.mubr.f32.vlgmr.msra.gmra.mxu0 %v28453_v20  ;;  %39172 = vmatpush3.msra.mxu1 %v43972_v5  ;;  %v28867_v5 = vsel %vm26949_vm13, %v44052_v16, 0 }
0x1e28   :  { %39139 = vmatpush3.msra.mxu0 %v43978_v30  ;;  %39173 = vmatprep.subr.mxu1 %v45243_v38 }
0x1e29   :  { %39140 = vmatprep.subr.mxu0 %v45243_v38  ;;  %39174 = vmatpush3.msra.mxu1 %v43980_v48  ;;  %v28937_v48 = vsub.f32 %v28867_v5, %v28867_v5 }
0x1e2a   :  { %39141 = vmatpush3.msra.mxu0 %v43989_v34  ;;  %39175 = vmatprep.subr.mxu1 %v45243_v38  ;;  %v29331_v34 = vld [vmem:[%s45053_s6 + $0x58] sm:$0xff] }
0x1e2b   :  { %39142 = vmatprep.subr.mxu0 %v45243_v38  ;;  %39176 = vmatpush3.msra.mxu1 %v43991_v4  ;;  %v28938_v4 = vand.u32 4294901760, %v28937_v48 }
0x1e2c   :  { %39143 = vmatpush3.msra.mxu0 %v44003_v7  ;;  %39177 = vmatprep.subr.mxu1 %v45243_v38  ;;  %v29330_v7 = vld [vmem:[%s45053_s6 + $0x50] sm:$0xff] }
0x1e2d   :  { %39144 = vmatprep.subr.mxu0 %v45243_v38  ;;  %39146 = vmatprep.mubr.msk.f32.mxu0 %vm39953_vm1, %v45243_v38  ;;  %v28939_v30 = vsub.f32 %v28937_v48, %v28938_v4 }
0x1e2e   :  { %39145 = vmatpush3.msra.mxu0 %v44014_v21  ;;  %39178 = vmatpush3.msra.mxu1 %v44005_v23  ;;  %v29329_v21 = vld [vmem:[%s45053_s6 + $0x48] sm:$0xff] }
0x1e2f   :  { %39179 = vmatprep.mubr.msk.f32.mxu1 %vm39953_vm1, %v45243_v38  ;;  %39147 = vmatmul.mubr.f32.vlgmr.msra.gmra.mxu0 %v28450_v43  ;;  %v44151_v33 = vand.u32 4294901760, %v29329_v21 }
0x1e30   :  { %39160 = vmatprep.subr.mxu0 %v45243_v38  ;;  %39180 = vmatmul.mubr.f32.vlgmr.msra.gmra.mxu1 %v28449_v47 }
0x1e31   :  { %39189 = vmatprep.subr.mxu1 %v45243_v38  ;;  %39161 = vmatpush3.msra.mxu0 %v28486_v32  ;;  %v28940_v32 = vand.u32 4294901760, %v28939_v30  ;;  %v44163_v41 = vsub.f32 %v29329_v21, %v44151_v33 }
0x1e32   :  { %39190 = vmatpush3.msra.mxu1 %v43771_v55  ;;  %39162 = vmatprep.subr.mxu0 %v45243_v38 }
0x1e33   :  { %39191 = vmatprep.subr.mxu1 %v45243_v38  ;;  %39163 = vmatpush3.msra.mxu0 %v28493_v42  ;;  %v44132_v42 = vand.u32 4294901760, %v29331_v34  ;;  %v29455_v61 = vand.u32 4294901760, %v44163_v41 }
0x1e34   :  { %39192 = vmatpush3.msra.mxu1 %v43783_v1  ;;  %39164 = vmatprep.subr.mxu0 %v45243_v38 }
0x1e35   :  { %39193 = vmatprep.mubr.msk.f32.mxu1 %vm39953_vm1, %v45243_v38  ;;  %39203 = vmatprep.subr.mxu1 %v45243_v38  ;;  %v44138_v23 = vsub.f32 %v29331_v34, %v44132_v42  ;;  %v29456_v0 = vsub.f32 %v44163_v41, %v29455_v61 }
0x1e36   :  { %39165 = vmatpush3.msra.mxu0 %v28500_v62  ;;  %39194 = vmatmul.mubr.msk.f32.vlgmr.msra.gmra.mxu1 %vm26949_vm13, %v44052_v16  ;;  %v44140_v62 = vand.u32 4294901760, %v29330_v7 }
0x1e37   :  { %39204 = vmatpush3.msra.mxu1 %v43748_v53  ;;  %39166 = vmatprep.subr.mxu0 %v45243_v38  ;;  %v29457_v46 = vand.u32 4294901760, %v29456_v0 }
0x1e38   :  { %39205 = vmatprep.subr.mxu1 %v45243_v38  ;;  %39167 = vmatpush3.msra.mxu0 %v28507_v44  ;;  %v29441_v44 = vand.u32 4294901760, %v44138_v23  ;;  %v44149_v31 = vsub.f32 %v29330_v7, %v44140_v62 }
0x1e39   :  { %39168 = vmatprep.mubr.msk.f32.mxu0 %vm39953_vm1, %v45243_v38  ;;  %39206 = vmatpush3.msra.mxu1 %v43758_v37 }
0x1e3a   :  { %39169 = vmatmul.mubr.f32.vlgmr.msra.gmra.mxu0 %v28449_v47  ;;  %39182 = vmatprep.subr.mxu0 %v45243_v38  ;;  %v29442_v56 = vsub.f32 %v44138_v23, %v29441_v44  ;;  %v29448_v36 = vand.u32 4294901760, %v44149_v31 }
0x1e3b   :  { %39207 = vmatprep.mubr.msk.f32.mxu1 %vm39953_vm1, %v45243_v38  ;;  %39217 = vmatprep.subr.mxu1 %v45243_v38 }
0x1e3c   :  { %39183 = vmatpush3.msra.mxu0 %v43748_v53  ;;  %39208 = vmatmul.mubr.f32.vlgmr.msra.gmra.mxu1 %v28938_v4  ;;  %v29443_v13 = vand.u32 4294901760, %v29442_v56  ;;  %v29449_v57 = vsub.f32 %v44149_v31, %v29448_v36 }
0x1e3d   :  { %39218 = vmatpush3.msra.mxu1 %v43748_v53  ;;  %39184 = vmatprep.subr.mxu0 %v45243_v38 }
0x1e3e   :  { %39219 = vmatprep.subr.mxu1 %v45243_v38  ;;  %39185 = vmatpush3.msra.mxu0 %v43758_v37  ;;  %v29450_v45 = vand.u32 4294901760, %v29449_v57 }
0x1e3f   :  { %39186 = vmatprep.mubr.msk.f32.mxu0 %vm39953_vm1, %v45243_v38  ;;  %39220 = vmatpush3.msra.mxu1 %v43758_v37 }
0x1e40   :  { %39187 = vmatmul.mubr.f32.vlgmr.msra.gmra.mxu0 %v28940_v32  ;;  %39196 = vmatprep.subr.mxu0 %v45243_v38 }
0x1e41   :  { %39197 = vmatpush3.msra.mxu0 %v43751_v63  ;;  %39200 = vmatprep.mubr.msk.f32.mxu0 %vm39953_vm1, %v45243_v38 }
0x1e42   :  { %39198 = vmatprep.subr.mxu0 %v45243_v38  ;;  %39221 = vmatprep.mubr.msk.f32.mxu1 %vm39953_vm1, %v45243_v38 }
0x1e43   :  { %39199 = vmatpush3.msra.mxu0 %v43761_v29  ;;  %39222 = vmatmul.mubr.msk.f32.vlgmr.msra.gmra.mxu1 %vm26949_vm13, %v44052_v16 }
0x1e44   :  { %39201 = vmatmul.mubr.f32.vlgmr.msra.gmra.mxu0 %v28937_v48  ;;  %39210 = vmatprep.subr.mxu0 %v45243_v38 }
0x1e45   :  { %39211 = vmatpush3.msra.mxu0 %v43756_v15  ;;  %39214 = vmatprep.mubr.msk.f32.mxu0 %vm39953_vm1, %v45243_v38 }
0x1e46   :  { %39212 = vmatprep.subr.mxu0 %v45243_v38  ;;  %39235 = vmatprep.subr.mxu1 %v45243_v38 }
0x1e47   :  { %39213 = vmatpush3.msra.mxu0 %v43768_v11  ;;  %39243 = vmatprep.mubr.msk.f32.mxu1 %vm39953_vm1, %v45243_v38 }
0x1e48   :  { %39215 = vmatmul.mubr.msk.f32.vlgmr.msra.gmra.mxu0 %vm26949_vm13, %v44052_v16  ;;  %39224 = vmatprep.subr.mxu0 %v45243_v38 }
0x1e49   :  { %39232 = vmatprep.mubr.msk.f32.mxu0 %vm39953_vm1, %v45243_v38  ;;  %39225 = vmatpush3.msra.mxu0 %v44132_v42 }
0x1e4a   :  { %39226 = vmatprep.subr.mxu0 %v45243_v38  ;;  %39236 = vmatpush3.msra.mxu1 %v29443_v13 }
0x1e4b   :  { %39227 = vmatpush3.msra.mxu0 %v44140_v62  ;;  %39237 = vmatprep.subr.mxu1 %v45243_v38 }
0x1e4c   :  { %39228 = vmatprep.subr.mxu0 %v45243_v38  ;;  %39238 = vmatpush3.msra.mxu1 %v29450_v45 }
0x1e4d   :  { %39229 = vmatpush3.msra.mxu0 %v44151_v33  ;;  %39239 = vmatprep.subr.mxu1 %v45243_v38 }
0x1e4e   :  { %39230 = vmatprep.subr.mxu0 %v45243_v38  ;;  %39240 = vmatpush3.msra.mxu1 %v29457_v46 }
0x1e4f   :  { %39231 = vmatpush3.msra.mxu0 %v44165_v3  ;;  %39241 = vmatprep.subr.mxu1 %v45243_v38 }
0x1e50   :  { %39246 = vmatprep.subr.mxu0 %v45243_v38  ;;  %39242 = vmatpush3.msra.mxu1 %v29464_v25 }
0x1e51   :  { %39257 = vmatprep.subr.mxu1 %v45243_v38 }
0x1ede   :  { %v28546_v9 = vpop.f32.mrf.mxu1 }
0x1ee0   :  { %v39137_v18 = vpop.f32.mrf.mxu1 }
0x1ee1   :  { %v70_v18 = vadd.s32 3, %v43738_v10 }
0x1ee3   :  { %vm71_vm2 = vcmp.eq.s32.totalorder %v45245_v19, %v70_v18 }
0x1ee6   :  { %v28703_v50 = vpop.f32.mrf.mxu1 }
0x1ee7   :  { %v28455_v6 = vpop.f32.mrf.mxu0 }
0x1ee8   :  { %v28547_v35 = vadd.f32 %v28546_v9, %v28455_v6  ;;  %v39159_v49 = vpop.f32.mrf.mxu1  ;;  %v44216_v6 = vsel %vm71_vm2, 1.0, %v45243_v38 }
0x1ee9   :  { %v39126_v8 = vpop.f32.mrf.mxu0 }
0x1eea   :  { %v30283_v8 = vld [vmem:[%s45053_s6 + $0x60] sm:$0xff] }
0x1eef   :  { %v28626_v59 = vpop.f32.mrf.mxu0 }
0x1ef0   :  { %v28627_v28 = vadd.f32 %v28626_v59, %v28547_v35  ;;  %v28861_v52 = vpop.f32.mrf.mxu1 }
0x1ef1   :  { %v39148_v39 = vpop.f32.mrf.mxu0 }
0x1ef2   :  { %v39181_v14 = vpop.f32.mrf.mxu1  ;;  %v28704_v2 = vadd.f32 %v28703_v50, %v28627_v28  ;;  %v44329_v39 = vand.u32 4294901760, %v30283_v8 }
0x1ef6   :  { %v29023_v51 = vpop.f32.mrf.mxu1 }
0x1ef8   :  { %v39195_v26 = vpop.f32.mrf.mxu1 }
0x1ef9   :  { %v44338_v26 = vsub.f32 %v30283_v8, %v44329_v39 }
0x1efa   :  { %v28786_v47 = vpop.f32.mrf.mxu0 }
0x1efb   :  { %v28787_v43 = vadd.f32 %v28786_v47, %v28704_v2 }
0x1efc   :  { %v39170_v60 = vpop.f32.mrf.mxu0  ;;  %v29174_v17 = vpop.f32.mrf.mxu1 }
0x1efd   :  { %v28862_v20 = vadd.f32 %v28861_v52, %v28787_v43  ;;  %v30417_v43 = vand.u32 4294901760, %v44338_v26 }
0x1efe   :  { %v39209_v16 = vpop.f32.mrf.mxu1 }
0x1eff   :  { %v44193_v5 = vadd.f32 %v28862_v20, %v27910_v58 }
0x1f00   :  { %v28942_v48 = vpop.f32.mrf.mxu0 }
0x1f01   :  { %v29024_v30 = vadd.f32 %v29023_v51, %v28942_v48 }
0x1f02   :  { %v39188_v4 = vpop.f32.mrf.mxu0 }
0x1f03   :  { %v29324_v32 = vpop.f32.mrf.mxu1 }
0x1f04   :  { %v29099_v34 = vpop.f32.mrf.mxu0 }
0x1f05   :  { %v29100_v7 = vadd.f32 %v29099_v34, %v29024_v30  ;;  %v39223_v21 = vpop.f32.mrf.mxu1 }
0x1f06   :  { %v39202_v54 = vpop.f32.mrf.mxu0 }
0x1f07   :  { %v29175_v56 = vadd.f32 %v29174_v17, %v29100_v7  ;;  %v30418_v17 = vsub.f32 %v44338_v26, %v30417_v43 }
0x1f08   :  { %v29251_v13 = vpop.f32.mrf.mxu0 }
0x1f09   :  { %v29252_v57 = vadd.f32 %v29251_v13, %v29175_v56  ;;  %v30419_v58 = vand.u32 4294901760, %v30418_v17 }
0x1f0a   :  { %v39216_v45 = vpop.f32.mrf.mxu0 }
0x1f0b   :  { %v29325_v0 = vadd.f32 %v29324_v32, %v29252_v57 }
0x1f0d   :  { %v29333_v46 = vsel %vm94_vm0, %v29325_v0, 0 }
0x1f0e   :  { %v29404_v24 = vand.u32 4294901760, %v29333_v46 }
0x1f10   :  { %v29405_v27 = vsub.f32 %v29333_v46, %v29404_v24  ;;  %39244 = vmatmul.mubr.f32.vlgmr.msra.gmra.mxu1 %v29404_v24 }
0x1f11   :  { %39258 = vmatpush3.msra.mxu1 %v44132_v42  ;;  %39265 = vmatprep.mubr.msk.f32.mxu1 %vm39953_vm1, %v45243_v38 }
0x1f12   :  { %v29406_v25 = vand.u32 4294901760, %v29405_v27  ;;  %39259 = vmatprep.subr.mxu1 %v45243_v38 }
0x1f13   :  { %39260 = vmatpush3.msra.mxu1 %v44140_v62 }
0x1f14   :  { %v29407_v9 = vsub.f32 %v29405_v27, %v29406_v25  ;;  %39261 = vmatprep.subr.mxu1 %v45243_v38 }
0x1f15   :  { %39262 = vmatpush3.msra.mxu1 %v44151_v33 }
0x1f16   :  { %v29408_v50 = vand.u32 4294901760, %v29407_v9  ;;  %39263 = vmatprep.subr.mxu1 %v45243_v38 }
0x1f17   :  { %39264 = vmatpush3.msra.mxu1 %v44165_v3 }
0x1f18   :  { %39266 = vmatmul.mubr.f32.vlgmr.msra.gmra.mxu1 %v29406_v25  ;;  %39279 = vmatprep.subr.mxu1 %v45243_v38 }
0x1f19   :  { %39233 = vmatmul.mubr.f32.vlgmr.msra.gmra.mxu0 %v29408_v50  ;;  %39280 = vmatpush3.msra.mxu1 %v44132_v42  ;;  %v29822_v42 = vsel %vm26949_vm13, %v44216_v6, 0 }
0x1f1a   :  { %39247 = vmatpush3.msra.mxu0 %v44138_v23  ;;  %39281 = vmatprep.subr.mxu1 %v45243_v38 }
0x1f1b   :  { %39248 = vmatprep.subr.mxu0 %v45243_v38  ;;  %39282 = vmatpush3.msra.mxu1 %v44140_v62  ;;  %v29892_v62 = vsub.f32 %v29822_v42, %v29822_v42 }
0x1f1c   :  { %39249 = vmatpush3.msra.mxu0 %v44149_v31  ;;  %39283 = vmatprep.subr.mxu1 %v45243_v38  ;;  %v30286_v31 = vld [vmem:[%s45053_s6 + $0x78] sm:$0xff] }
0x1f1d   :  { %39250 = vmatprep.subr.mxu0 %v45243_v38  ;;  %39284 = vmatpush3.msra.mxu1 %v44151_v33  ;;  %v29893_v33 = vand.u32 4294901760, %v29892_v62 }
0x1f1e   :  { %39251 = vmatpush3.msra.mxu0 %v44163_v41  ;;  %39285 = vmatprep.subr.mxu1 %v45243_v38  ;;  %v30285_v41 = vld [vmem:[%s45053_s6 + $0x70] sm:$0xff] }
0x1f1f   :  { %39252 = vmatprep.subr.mxu0 %v45243_v38  ;;  %39254 = vmatprep.mubr.msk.f32.mxu0 %vm39953_vm1, %v45243_v38  ;;  %v29894_v23 = vsub.f32 %v29892_v62, %v29893_v33 }
0x1f20   :  { %39253 = vmatpush3.msra.mxu0 %v44174_v12  ;;  %39286 = vmatpush3.msra.mxu1 %v44165_v3  ;;  %v30284_v12 = vld [vmem:[%s45053_s6 + $0x68] sm:$0xff] }
0x1f21   :  { %39287 = vmatprep.mubr.msk.f32.mxu1 %vm39953_vm1, %v45243_v38  ;;  %39255 = vmatmul.mubr.f32.vlgmr.msra.gmra.mxu0 %v29405_v27  ;;  %v44315_v49 = vand.u32 4294901760, %v30284_v12 }
0x1f22   :  { %39268 = vmatprep.subr.mxu0 %v45243_v38  ;;  %39288 = vmatmul.mubr.f32.vlgmr.msra.gmra.mxu1 %v29404_v24 }
0x1f23   :  { %39297 = vmatprep.subr.mxu1 %v45243_v38  ;;  %39269 = vmatpush3.msra.mxu0 %v29441_v44  ;;  %v29895_v44 = vand.u32 4294901760, %v29894_v23  ;;  %v44327_v52 = vsub.f32 %v30284_v12, %v44315_v49 }
0x1f24   :  { %39298 = vmatpush3.msra.mxu1 %v43771_v55  ;;  %39270 = vmatprep.subr.mxu0 %v45243_v38 }
0x1f25   :  { %39299 = vmatprep.subr.mxu1 %v45243_v38  ;;  %39271 = vmatpush3.msra.mxu0 %v29448_v36  ;;  %v44296_v36 = vand.u32 4294901760, %v30286_v31  ;;  %v30410_v51 = vand.u32 4294901760, %v44327_v52 }
0x1f26   :  { %39300 = vmatpush3.msra.mxu1 %v43783_v1  ;;  %39272 = vmatprep.subr.mxu0 %v45243_v38 }
0x1f27   :  { %39301 = vmatprep.mubr.msk.f32.mxu1 %vm39953_vm1, %v45243_v38  ;;  %39311 = vmatprep.subr.mxu1 %v45243_v38  ;;  %v44302_v3 = vsub.f32 %v30286_v31, %v44296_v36  ;;  %v30411_v47 = vsub.f32 %v44327_v52, %v30410_v51 }
0x1f28   :  { %39273 = vmatpush3.msra.mxu0 %v29455_v61  ;;  %39302 = vmatmul.mubr.msk.f32.vlgmr.msra.gmra.mxu1 %vm26949_vm13, %v44216_v6  ;;  %v44304_v61 = vand.u32 4294901760, %v30285_v41 }
0x1f29   :  { %39312 = vmatpush3.msra.mxu1 %v43748_v53  ;;  %39274 = vmatprep.subr.mxu0 %v45243_v38  ;;  %v30412_v60 = vand.u32 4294901760, %v30411_v47 }
0x1f2a   :  { %39313 = vmatprep.subr.mxu1 %v45243_v38  ;;  %39275 = vmatpush3.msra.mxu0 %v29462_v40  ;;  %v30396_v40 = vand.u32 4294901760, %v44302_v3  ;;  %v44313_v35 = vsub.f32 %v30285_v41, %v44304_v61 }
0x1f2b   :  { %39276 = vmatprep.mubr.msk.f32.mxu0 %vm39953_vm1, %v45243_v38  ;;  %39314 = vmatpush3.msra.mxu1 %v43758_v37 }
0x1f2c   :  { %39277 = vmatmul.mubr.f32.vlgmr.msra.gmra.mxu0 %v29404_v24  ;;  %39290 = vmatprep.subr.mxu0 %v45243_v38  ;;  %v30397_v59 = vsub.f32 %v44302_v3, %v30396_v40  ;;  %v30403_v28 = vand.u32 4294901760, %v44313_v35 }
0x1f2d   :  { %39315 = vmatprep.mubr.msk.f32.mxu1 %vm39953_vm1, %v45243_v38  ;;  %39325 = vmatprep.subr.mxu1 %v45243_v38 }
0x1f2e   :  { %39291 = vmatpush3.msra.mxu0 %v43748_v53  ;;  %39316 = vmatmul.mubr.f32.vlgmr.msra.gmra.mxu1 %v29893_v33  ;;  %v30398_v14 = vand.u32 4294901760, %v30397_v59  ;;  %v30404_v2 = vsub.f32 %v44313_v35, %v30403_v28 }
0x1f2f   :  { %39326 = vmatpush3.msra.mxu1 %v43748_v53  ;;  %39292 = vmatprep.subr.mxu0 %v45243_v38 }
0x1f30   :  { %39327 = vmatprep.subr.mxu1 %v45243_v38  ;;  %39293 = vmatpush3.msra.mxu0 %v43758_v37  ;;  %v30405_v22 = vand.u32 4294901760, %v30404_v2 }
0x1f31   :  { %39294 = vmatprep.mubr.msk.f32.mxu0 %vm39953_vm1, %v45243_v38  ;;  %39328 = vmatpush3.msra.mxu1 %v43758_v37 }
0x1f32   :  { %39295 = vmatmul.mubr.f32.vlgmr.msra.gmra.mxu0 %v29895_v44  ;;  %39304 = vmatprep.subr.mxu0 %v45243_v38 }
0x1f33   :  { %39305 = vmatpush3.msra.mxu0 %v43751_v63  ;;  %39308 = vmatprep.mubr.msk.f32.mxu0 %vm39953_vm1, %v45243_v38 }
0x1f34   :  { %39306 = vmatprep.subr.mxu0 %v45243_v38  ;;  %39329 = vmatprep.mubr.msk.f32.mxu1 %vm39953_vm1, %v45243_v38 }
0x1f35   :  { %39307 = vmatpush3.msra.mxu0 %v43761_v29  ;;  %39330 = vmatmul.mubr.msk.f32.vlgmr.msra.gmra.mxu1 %vm26949_vm13, %v44216_v6 }
0x1f36   :  { %39309 = vmatmul.mubr.f32.vlgmr.msra.gmra.mxu0 %v29892_v62  ;;  %39318 = vmatprep.subr.mxu0 %v45243_v38 }
0x1f37   :  { %39319 = vmatpush3.msra.mxu0 %v43756_v15  ;;  %39322 = vmatprep.mubr.msk.f32.mxu0 %vm39953_vm1, %v45243_v38 }
0x1f38   :  { %39320 = vmatprep.subr.mxu0 %v45243_v38  ;;  %39343 = vmatprep.subr.mxu1 %v45243_v38 }
0x1f39   :  { %39321 = vmatpush3.msra.mxu0 %v43768_v11  ;;  %39351 = vmatprep.mubr.msk.f32.mxu1 %vm39953_vm1, %v45243_v38 }
0x1f3a   :  { %39323 = vmatmul.mubr.msk.f32.vlgmr.msra.gmra.mxu0 %vm26949_vm13, %v44216_v6  ;;  %39332 = vmatprep.subr.mxu0 %v45243_v38 }
0x1f3b   :  { %39340 = vmatprep.mubr.msk.f32.mxu0 %vm39953_vm1, %v45243_v38  ;;  %39333 = vmatpush3.msra.mxu0 %v44296_v36 }
0x1f3c   :  { %39334 = vmatprep.subr.mxu0 %v45243_v38  ;;  %39344 = vmatpush3.msra.mxu1 %v30398_v14 }
0x1f3d   :  { %39335 = vmatpush3.msra.mxu0 %v44304_v61  ;;  %39345 = vmatprep.subr.mxu1 %v45243_v38 }
0x1f3e   :  { %39336 = vmatprep.subr.mxu0 %v45243_v38  ;;  %39346 = vmatpush3.msra.mxu1 %v30405_v22 }
0x1f3f   :  { %39337 = vmatpush3.msra.mxu0 %v44315_v49  ;;  %39347 = vmatprep.subr.mxu1 %v45243_v38 }
0x1f40   :  { %39338 = vmatprep.subr.mxu0 %v45243_v38  ;;  %39348 = vmatpush3.msra.mxu1 %v30412_v60 }
0x1f41   :  { %39339 = vmatpush3.msra.mxu0 %v44329_v39  ;;  %39349 = vmatprep.subr.mxu1 %v45243_v38 }
0x1f42   :  { %39354 = vmatprep.subr.mxu0 %v45243_v38  ;;  %39350 = vmatpush3.msra.mxu1 %v30419_v58  ;;  %v73_v58 = vadd.s32 4, %v43738_v10 }
0x1f43   :  { %39365 = vmatprep.subr.mxu1 %v45243_v38 }
0x1f44   :  { %vm74_vm3 = vcmp.eq.s32.totalorder %v45245_v19, %v73_v58 }
0x1fd0   :  { %v29501_v20 = vpop.f32.mrf.mxu1 }
0x1fd2   :  { %v39245_v16 = vpop.f32.mrf.mxu1 }
0x1fd3   :  { %v44377_v16 = vsel %vm74_vm3, 1.0, %v45243_v38 }
0x1fd8   :  { %v29658_v48 = vpop.f32.mrf.mxu1 }
0x1fd9   :  { %v29410_v4 = vpop.f32.mrf.mxu0 }
0x1fda   :  { %v29502_v30 = vadd.f32 %v29501_v20, %v29410_v4  ;;  %v39267_v32 = vpop.f32.mrf.mxu1 }
0x1fdb   :  { %v39234_v34 = vpop.f32.mrf.mxu0 }
0x1fe1   :  { %v29581_v7 = vpop.f32.mrf.mxu0 }
0x1fe2   :  { %v29582_v21 = vadd.f32 %v29581_v7, %v29502_v30  ;;  %v29816_v54 = vpop.f32.mrf.mxu1  ;;  %v31238_v30 = vld [vmem:[%s45053_s6 + $0x80] sm:$0xff] }
0x1fe3   :  { %v39256_v56 = vpop.f32.mrf.mxu0 }
0x1fe4   :  { %v39289_v13 = vpop.f32.mrf.mxu1  ;;  %v29659_v57 = vadd.f32 %v29658_v48, %v29582_v21  ;;  %v44490_v21 = vand.u32 4294901760, %v31238_v30 }
0x1fe8   :  { %v29978_v45 = vpop.f32.mrf.mxu1 }
0x1fea   :  { %v39303_v0 = vpop.f32.mrf.mxu1 }
0x1fec   :  { %v29741_v46 = vpop.f32.mrf.mxu0 }
0x1fed   :  { %v29742_v24 = vadd.f32 %v29741_v46, %v29659_v57  ;;  %v44499_v57 = vsub.f32 %v31238_v30, %v44490_v21 }
0x1fee   :  { %v39278_v27 = vpop.f32.mrf.mxu0  ;;  %v30129_v25 = vpop.f32.mrf.mxu1 }
0x1fef   :  { %v29817_v9 = vadd.f32 %v29816_v54, %v29742_v24  ;;  %v31372_v46 = vand.u32 4294901760, %v44499_v57 }
0x1ff0   :  { %v39317_v18 = vpop.f32.mrf.mxu1 }
0x1ff1   :  { %v44354_v50 = vadd.f32 %v29817_v9, %v44193_v5  ;;  %v31373_v27 = vsub.f32 %v44499_v57, %v31372_v46 }
0x1ff2   :  { %v29897_v6 = vpop.f32.mrf.mxu0 }
0x1ff3   :  { %v29979_v62 = vadd.f32 %v29978_v45, %v29897_v6 }
0x1ff4   :  { %v39296_v42 = vpop.f32.mrf.mxu0 }
0x1ff5   :  { %v30279_v33 = vpop.f32.mrf.mxu1 }
0x1ff6   :  { %v30054_v23 = vpop.f32.mrf.mxu0 }
0x1ff7   :  { %v30055_v44 = vadd.f32 %v30054_v23, %v29979_v62  ;;  %v39331_v31 = vpop.f32.mrf.mxu1 }
0x1ff8   :  { %v39310_v41 = vpop.f32.mrf.mxu0 }
0x1ff9   :  { %v30130_v12 = vadd.f32 %v30129_v25, %v30055_v44  ;;  %v31374_v25 = vand.u32 4294901760, %v31373_v27 }
0x1ffa   :  { %v30206_v8 = vpop.f32.mrf.mxu0 }
0x1ffb   :  { %v30207_v59 = vadd.f32 %v30206_v8, %v30130_v12 }
0x1ffc   :  { %v39324_v14 = vpop.f32.mrf.mxu0 }
0x1ffd   :  { %v30280_v2 = vadd.f32 %v30279_v33, %v30207_v59 }
0x1fff   :  { %v30288_v22 = vsel %vm94_vm0, %v30280_v2, 0 }
0x2000   :  { %v30359_v47 = vand.u32 4294901760, %v30288_v22 }
0x2002   :  { %v30360_v60 = vsub.f32 %v30288_v22, %v30359_v47  ;;  %39352 = vmatmul.mubr.f32.vlgmr.msra.gmra.mxu1 %v30359_v47 }
0x2003   :  { %39366 = vmatpush3.msra.mxu1 %v44296_v36  ;;  %39373 = vmatprep.mubr.msk.f32.mxu1 %vm39953_vm1, %v45243_v38 }
0x2004   :  { %v30361_v5 = vand.u32 4294901760, %v30360_v60  ;;  %39367 = vmatprep.subr.mxu1 %v45243_v38 }
0x2005   :  { %39368 = vmatpush3.msra.mxu1 %v44304_v61 }
0x2006   :  { %v30362_v17 = vsub.f32 %v30360_v60, %v30361_v5  ;;  %39369 = vmatprep.subr.mxu1 %v45243_v38 }
0x2007   :  { %39370 = vmatpush3.msra.mxu1 %v44315_v49 }
0x2008   :  { %v30363_v20 = vand.u32 4294901760, %v30362_v17  ;;  %39371 = vmatprep.subr.mxu1 %v45243_v38 }
0x2009   :  { %39372 = vmatpush3.msra.mxu1 %v44329_v39 }
0x200a   :  { %39374 = vmatmul.mubr.f32.vlgmr.msra.gmra.mxu1 %v30361_v5  ;;  %39387 = vmatprep.subr.mxu1 %v45243_v38 }
0x200b   :  { %39341 = vmatmul.mubr.f32.vlgmr.msra.gmra.mxu0 %v30363_v20  ;;  %39388 = vmatpush3.msra.mxu1 %v44296_v36  ;;  %v30777_v36 = vsel %vm26949_vm13, %v44377_v16, 0 }
0x200c   :  { %39355 = vmatpush3.msra.mxu0 %v44302_v3  ;;  %39389 = vmatprep.subr.mxu1 %v45243_v38 }
0x200d   :  { %39356 = vmatprep.subr.mxu0 %v45243_v38  ;;  %39390 = vmatpush3.msra.mxu1 %v44304_v61  ;;  %v30847_v61 = vsub.f32 %v30777_v36, %v30777_v36 }
0x200e   :  { %39357 = vmatpush3.msra.mxu0 %v44313_v35  ;;  %39391 = vmatprep.subr.mxu1 %v45243_v38  ;;  %v31241_v35 = vld [vmem:[%s45053_s6 + $0x98] sm:$0xff] }
0x200f   :  { %39358 = vmatprep.subr.mxu0 %v45243_v38  ;;  %39392 = vmatpush3.msra.mxu1 %v44315_v49  ;;  %v30848_v49 = vand.u32 4294901760, %v30847_v61 }
0x2010   :  { %39359 = vmatpush3.msra.mxu0 %v44327_v52  ;;  %39393 = vmatprep.subr.mxu1 %v45243_v38  ;;  %v31240_v52 = vld [vmem:[%s45053_s6 + $0x90] sm:$0xff] }
0x2011   :  { %39360 = vmatprep.subr.mxu0 %v45243_v38  ;;  %39362 = vmatprep.mubr.msk.f32.mxu0 %vm39953_vm1, %v45243_v38  ;;  %v30849_v3 = vsub.f32 %v30847_v61, %v30848_v49 }
0x2012   :  { %39361 = vmatpush3.msra.mxu0 %v44338_v26  ;;  %39394 = vmatpush3.msra.mxu1 %v44329_v39  ;;  %v31239_v26 = vld [vmem:[%s45053_s6 + $0x88] sm:$0xff] }
0x2013   :  { %39395 = vmatprep.mubr.msk.f32.mxu1 %vm39953_vm1, %v45243_v38  ;;  %39363 = vmatmul.mubr.f32.vlgmr.msra.gmra.mxu0 %v30360_v60  ;;  %v44476_v4 = vand.u32 4294901760, %v31239_v26 }
0x2014   :  { %39376 = vmatprep.subr.mxu0 %v45243_v38  ;;  %39396 = vmatmul.mubr.f32.vlgmr.msra.gmra.mxu1 %v30359_v47 }
0x2015   :  { %39405 = vmatprep.subr.mxu1 %v45243_v38  ;;  %39377 = vmatpush3.msra.mxu0 %v30396_v40  ;;  %v30850_v40 = vand.u32 4294901760, %v30849_v3  ;;  %v44488_v7 = vsub.f32 %v31239_v26, %v44476_v4 }
0x2016   :  { %39406 = vmatpush3.msra.mxu1 %v43771_v55  ;;  %39378 = vmatprep.subr.mxu0 %v45243_v38 }
0x2017   :  { %39407 = vmatprep.subr.mxu1 %v45243_v38  ;;  %39379 = vmatpush3.msra.mxu0 %v30403_v28  ;;  %v44457_v28 = vand.u32 4294901760, %v31241_v35  ;;  %v31365_v13 = vand.u32 4294901760, %v44488_v7 }
0x2018   :  { %39408 = vmatpush3.msra.mxu1 %v43783_v1  ;;  %39380 = vmatprep.subr.mxu0 %v45243_v38 }
0x2019   :  { %39409 = vmatprep.mubr.msk.f32.mxu1 %vm39953_vm1, %v45243_v38  ;;  %39419 = vmatprep.subr.mxu1 %v45243_v38  ;;  %v44463_v39 = vsub.f32 %v31241_v35, %v44457_v28  ;;  %v31366_v0 = vsub.f32 %v44488_v7, %v31365_v13 }
0x201a   :  { %39381 = vmatpush3.msra.mxu0 %v30410_v51  ;;  %39410 = vmatmul.mubr.msk.f32.vlgmr.msra.gmra.mxu1 %vm26949_vm13, %v44377_v16  ;;  %v44465_v51 = vand.u32 4294901760, %v31240_v52 }
0x201b   :  { %39420 = vmatpush3.msra.mxu1 %v43748_v53  ;;  %39382 = vmatprep.subr.mxu0 %v45243_v38  ;;  %v31367_v24 = vand.u32 4294901760, %v31366_v0 }
0x201c   :  { %39421 = vmatprep.subr.mxu1 %v45243_v38  ;;  %39383 = vmatpush3.msra.mxu0 %v30417_v43  ;;  %v31351_v43 = vand.u32 4294901760, %v44463_v39  ;;  %v44474_v48 = vsub.f32 %v31240_v52, %v44465_v51 }
0x201d   :  { %39384 = vmatprep.mubr.msk.f32.mxu0 %vm39953_vm1, %v45243_v38  ;;  %39422 = vmatpush3.msra.mxu1 %v43758_v37 }
0x201e   :  { %39385 = vmatmul.mubr.f32.vlgmr.msra.gmra.mxu0 %v30359_v47  ;;  %39398 = vmatprep.subr.mxu0 %v45243_v38  ;;  %v31352_v32 = vsub.f32 %v44463_v39, %v31351_v43  ;;  %v31358_v34 = vand.u32 4294901760, %v44474_v48 }
0x201f   :  { %39423 = vmatprep.mubr.msk.f32.mxu1 %vm39953_vm1, %v45243_v38  ;;  %39433 = vmatprep.subr.mxu1 %v45243_v38 }
0x2020   :  { %39399 = vmatpush3.msra.mxu0 %v43748_v53  ;;  %39424 = vmatmul.mubr.f32.vlgmr.msra.gmra.mxu1 %v30848_v49  ;;  %v31353_v54 = vand.u32 4294901760, %v31352_v32  ;;  %v31359_v56 = vsub.f32 %v44474_v48, %v31358_v34 }
0x2021   :  { %39434 = vmatpush3.msra.mxu1 %v43748_v53  ;;  %39400 = vmatprep.subr.mxu0 %v45243_v38 }
0x2022   :  { %39435 = vmatprep.subr.mxu1 %v45243_v38  ;;  %39401 = vmatpush3.msra.mxu0 %v43758_v37  ;;  %v31360_v45 = vand.u32 4294901760, %v31359_v56 }
0x2023   :  { %39402 = vmatprep.mubr.msk.f32.mxu0 %vm39953_vm1, %v45243_v38  ;;  %39436 = vmatpush3.msra.mxu1 %v43758_v37 }
0x2024   :  { %39403 = vmatmul.mubr.f32.vlgmr.msra.gmra.mxu0 %v30850_v40  ;;  %39412 = vmatprep.subr.mxu0 %v45243_v38 }
0x2025   :  { %39413 = vmatpush3.msra.mxu0 %v43751_v63  ;;  %39416 = vmatprep.mubr.msk.f32.mxu0 %vm39953_vm1, %v45243_v38 }
0x2026   :  { %39414 = vmatprep.subr.mxu0 %v45243_v38  ;;  %39437 = vmatprep.mubr.msk.f32.mxu1 %vm39953_vm1, %v45243_v38 }
0x2027   :  { %39415 = vmatpush3.msra.mxu0 %v43761_v29  ;;  %39438 = vmatmul.mubr.msk.f32.vlgmr.msra.gmra.mxu1 %vm26949_vm13, %v44377_v16 }
0x2028   :  { %39417 = vmatmul.mubr.f32.vlgmr.msra.gmra.mxu0 %v30847_v61  ;;  %39426 = vmatprep.subr.mxu0 %v45243_v38 }
0x2029   :  { %39427 = vmatpush3.msra.mxu0 %v43756_v15  ;;  %39430 = vmatprep.mubr.msk.f32.mxu0 %vm39953_vm1, %v45243_v38 }
0x202a   :  { %39428 = vmatprep.subr.mxu0 %v45243_v38  ;;  %39451 = vmatprep.subr.mxu1 %v45243_v38 }
0x202b   :  { %39429 = vmatpush3.msra.mxu0 %v43768_v11  ;;  %39459 = vmatprep.mubr.msk.f32.mxu1 %vm39953_vm1, %v45243_v38 }
0x202c   :  { %39431 = vmatmul.mubr.msk.f32.vlgmr.msra.gmra.mxu0 %vm26949_vm13, %v44377_v16  ;;  %39440 = vmatprep.subr.mxu0 %v45243_v38 }
0x202d   :  { %39448 = vmatprep.mubr.msk.f32.mxu0 %vm39953_vm1, %v45243_v38  ;;  %39441 = vmatpush3.msra.mxu0 %v44457_v28 }
0x202e   :  { %39442 = vmatprep.subr.mxu0 %v45243_v38  ;;  %39452 = vmatpush3.msra.mxu1 %v31353_v54 }
0x202f   :  { %39443 = vmatpush3.msra.mxu0 %v44465_v51  ;;  %39453 = vmatprep.subr.mxu1 %v45243_v38 }
0x2030   :  { %39444 = vmatprep.subr.mxu0 %v45243_v38  ;;  %39454 = vmatpush3.msra.mxu1 %v31360_v45 }
0x2031   :  { %39445 = vmatpush3.msra.mxu0 %v44476_v4  ;;  %39455 = vmatprep.subr.mxu1 %v45243_v38 }
0x2032   :  { %39446 = vmatprep.subr.mxu0 %v45243_v38  ;;  %39456 = vmatpush3.msra.mxu1 %v31367_v24 }
0x2033   :  { %39447 = vmatpush3.msra.mxu0 %v44490_v21  ;;  %39457 = vmatprep.subr.mxu1 %v45243_v38 }
0x2034   :  { %39462 = vmatprep.subr.mxu0 %v45243_v38  ;;  %39458 = vmatpush3.msra.mxu1 %v31374_v25  ;;  %v76_v25 = vadd.s32 5, %v43738_v10 }
0x2035   :  { %39473 = vmatprep.subr.mxu1 %v45243_v38 }
0x2036   :  { %vm77_vm4 = vcmp.eq.s32.totalorder %v45245_v19, %v76_v25 }
0x20c2   :  { %v30456_v9 = vpop.f32.mrf.mxu1 }
0x20c4   :  { %v39353_v18 = vpop.f32.mrf.mxu1 }
0x20c5   :  { %v44538_v18 = vsel %vm77_vm4, 1.0, %v45243_v38 }
0x20ca   :  { %v30613_v6 = vpop.f32.mrf.mxu1 }
0x20cb   :  { %v30365_v42 = vpop.f32.mrf.mxu0 }
0x20cc   :  { %v30457_v62 = vadd.f32 %v30456_v9, %v30365_v42  ;;  %v39375_v33 = vpop.f32.mrf.mxu1 }
0x20cd   :  { %v39342_v23 = vpop.f32.mrf.mxu0 }
0x20d3   :  { %v30536_v44 = vpop.f32.mrf.mxu0 }
0x20d4   :  { %v30537_v31 = vadd.f32 %v30536_v44, %v30457_v62  ;;  %v30771_v41 = vpop.f32.mrf.mxu1  ;;  %v32193_v62 = vld [vmem:[%s45053_s6 + $0xa0] sm:$0xff] }
0x20d5   :  { %v39364_v12 = vpop.f32.mrf.mxu0 }
0x20d6   :  { %v39397_v8 = vpop.f32.mrf.mxu1  ;;  %v30614_v59 = vadd.f32 %v30613_v6, %v30537_v31  ;;  %v44651_v31 = vand.u32 4294901760, %v32193_v62 }
0x20da   :  { %v30933_v14 = vpop.f32.mrf.mxu1 }
0x20dc   :  { %v39411_v2 = vpop.f32.mrf.mxu1 }
0x20de   :  { %v30696_v22 = vpop.f32.mrf.mxu0 }
0x20df   :  { %v30697_v47 = vadd.f32 %v30696_v22, %v30614_v59  ;;  %v44660_v59 = vsub.f32 %v32193_v62, %v44651_v31 }
0x20e0   :  { %v39386_v60 = vpop.f32.mrf.mxu0  ;;  %v31084_v5 = vpop.f32.mrf.mxu1 }
0x20e1   :  { %v30772_v17 = vadd.f32 %v30771_v41, %v30697_v47  ;;  %v32327_v22 = vand.u32 4294901760, %v44660_v59 }
0x20e2   :  { %v39425_v58 = vpop.f32.mrf.mxu1 }
0x20e3   :  { %v44515_v20 = vadd.f32 %v30772_v17, %v44354_v50  ;;  %v32328_v60 = vsub.f32 %v44660_v59, %v32327_v22 }
0x20e4   :  { %v30852_v16 = vpop.f32.mrf.mxu0 }
0x20e5   :  { %v30934_v61 = vadd.f32 %v30933_v14, %v30852_v16 }
0x20e6   :  { %v39404_v36 = vpop.f32.mrf.mxu0 }
0x20e7   :  { %v31234_v49 = vpop.f32.mrf.mxu1 }
0x20e8   :  { %v31009_v3 = vpop.f32.mrf.mxu0 }
0x20e9   :  { %v31010_v40 = vadd.f32 %v31009_v3, %v30934_v61  ;;  %v39439_v35 = vpop.f32.mrf.mxu1 }
0x20ea   :  { %v39418_v52 = vpop.f32.mrf.mxu0 }
0x20eb   :  { %v31085_v26 = vadd.f32 %v31084_v5, %v31010_v40  ;;  %v32329_v5 = vand.u32 4294901760, %v32328_v60 }
0x20ec   :  { %v31161_v30 = vpop.f32.mrf.mxu0 }
0x20ed   :  { %v31162_v32 = vadd.f32 %v31161_v30, %v31085_v26 }
0x20ee   :  { %v39432_v54 = vpop.f32.mrf.mxu0 }
0x20ef   :  { %v31235_v56 = vadd.f32 %v31234_v49, %v31162_v32 }
0x20f1   :  { %v31243_v45 = vsel %vm94_vm0, %v31235_v56, 0 }
0x20f2   :  { %v31314_v0 = vand.u32 4294901760, %v31243_v45 }
0x20f4   :  { %v31315_v24 = vsub.f32 %v31243_v45, %v31314_v0  ;;  %39460 = vmatmul.mubr.f32.vlgmr.msra.gmra.mxu1 %v31314_v0 }
0x20f5   :  { %39474 = vmatpush3.msra.mxu1 %v44457_v28  ;;  %39481 = vmatprep.mubr.msk.f32.mxu1 %vm39953_vm1, %v45243_v38 }
0x20f6   :  { %v31316_v50 = vand.u32 4294901760, %v31315_v24  ;;  %39475 = vmatprep.subr.mxu1 %v45243_v38 }
0x20f7   :  { %39476 = vmatpush3.msra.mxu1 %v44465_v51 }
0x20f8   :  { %v31317_v27 = vsub.f32 %v31315_v24, %v31316_v50  ;;  %39477 = vmatprep.subr.mxu1 %v45243_v38 }
0x20f9   :  { %39478 = vmatpush3.msra.mxu1 %v44476_v4 }
0x20fa   :  { %v31318_v9 = vand.u32 4294901760, %v31317_v27  ;;  %39479 = vmatprep.subr.mxu1 %v45243_v38 }
0x20fb   :  { %39480 = vmatpush3.msra.mxu1 %v44490_v21 }
0x20fc   :  { %39482 = vmatmul.mubr.f32.vlgmr.msra.gmra.mxu1 %v31316_v50  ;;  %39495 = vmatprep.subr.mxu1 %v45243_v38 }
0x20fd   :  { %39449 = vmatmul.mubr.f32.vlgmr.msra.gmra.mxu0 %v31318_v9  ;;  %39496 = vmatpush3.msra.mxu1 %v44457_v28  ;;  %v31732_v28 = vsel %vm26949_vm13, %v44538_v18, 0 }
0x20fe   :  { %39463 = vmatpush3.msra.mxu0 %v44463_v39  ;;  %39497 = vmatprep.subr.mxu1 %v45243_v38 }
0x20ff   :  { %39464 = vmatprep.subr.mxu0 %v45243_v38  ;;  %39498 = vmatpush3.msra.mxu1 %v44465_v51  ;;  %v31802_v51 = vsub.f32 %v31732_v28, %v31732_v28 }
0x2100   :  { %39465 = vmatpush3.msra.mxu0 %v44474_v48  ;;  %39499 = vmatprep.subr.mxu1 %v45243_v38  ;;  %v32196_v48 = vld [vmem:[%s45053_s6 + $0xb8] sm:$0xff] }
0x2101   :  { %39466 = vmatprep.subr.mxu0 %v45243_v38  ;;  %39500 = vmatpush3.msra.mxu1 %v44476_v4  ;;  %v31803_v4 = vand.u32 4294901760, %v31802_v51 }
0x2102   :  { %39467 = vmatpush3.msra.mxu0 %v44488_v7  ;;  %39501 = vmatprep.subr.mxu1 %v45243_v38  ;;  %v32195_v7 = vld [vmem:[%s45053_s6 + $0xb0] sm:$0xff] }
0x2103   :  { %39468 = vmatprep.subr.mxu0 %v45243_v38  ;;  %39470 = vmatprep.mubr.msk.f32.mxu0 %vm39953_vm1, %v45243_v38  ;;  %v31804_v39 = vsub.f32 %v31802_v51, %v31803_v4 }
0x2104   :  { %39469 = vmatpush3.msra.mxu0 %v44499_v57  ;;  %39502 = vmatpush3.msra.mxu1 %v44490_v21  ;;  %v32194_v57 = vld [vmem:[%s45053_s6 + $0xa8] sm:$0xff] }
0x2105   :  { %39503 = vmatprep.mubr.msk.f32.mxu1 %vm39953_vm1, %v45243_v38  ;;  %39471 = vmatmul.mubr.f32.vlgmr.msra.gmra.mxu0 %v31315_v24  ;;  %v44637_v42 = vand.u32 4294901760, %v32194_v57 }
0x2106   :  { %39484 = vmatprep.subr.mxu0 %v45243_v38  ;;  %39504 = vmatmul.mubr.f32.vlgmr.msra.gmra.mxu1 %v31314_v0 }
0x2107   :  { %39513 = vmatprep.subr.mxu1 %v45243_v38  ;;  %39485 = vmatpush3.msra.mxu0 %v31351_v43  ;;  %v31805_v43 = vand.u32 4294901760, %v31804_v39  ;;  %v44649_v44 = vsub.f32 %v32194_v57, %v44637_v42 }
0x2108   :  { %39514 = vmatpush3.msra.mxu1 %v43771_v55  ;;  %39486 = vmatprep.subr.mxu0 %v45243_v38 }
0x2109   :  { %39515 = vmatprep.subr.mxu1 %v45243_v38  ;;  %39487 = vmatpush3.msra.mxu0 %v31358_v34  ;;  %v44618_v34 = vand.u32 4294901760, %v32196_v48  ;;  %v32320_v8 = vand.u32 4294901760, %v44649_v44 }
0x210a   :  { %39516 = vmatpush3.msra.mxu1 %v43783_v1  ;;  %39488 = vmatprep.subr.mxu0 %v45243_v38 }
0x210b   :  { %39517 = vmatprep.mubr.msk.f32.mxu1 %vm39953_vm1, %v45243_v38  ;;  %39527 = vmatprep.subr.mxu1 %v45243_v38  ;;  %v44624_v21 = vsub.f32 %v32196_v48, %v44618_v34  ;;  %v32321_v2 = vsub.f32 %v44649_v44, %v32320_v8 }
0x210c   :  { %39489 = vmatpush3.msra.mxu0 %v31365_v13  ;;  %39518 = vmatmul.mubr.msk.f32.vlgmr.msra.gmra.mxu1 %vm26949_vm13, %v44538_v18  ;;  %v44626_v13 = vand.u32 4294901760, %v32195_v7 }
0x210d   :  { %39528 = vmatpush3.msra.mxu1 %v43748_v53  ;;  %39490 = vmatprep.subr.mxu0 %v45243_v38  ;;  %v32322_v47 = vand.u32 4294901760, %v32321_v2 }
0x210e   :  { %39529 = vmatprep.subr.mxu1 %v45243_v38  ;;  %39491 = vmatpush3.msra.mxu0 %v31372_v46  ;;  %v32306_v46 = vand.u32 4294901760, %v44624_v21  ;;  %v44635_v6 = vsub.f32 %v32195_v7, %v44626_v13 }
0x210f   :  { %39492 = vmatprep.mubr.msk.f32.mxu0 %vm39953_vm1, %v45243_v38  ;;  %39530 = vmatpush3.msra.mxu1 %v43758_v37 }
0x2110   :  { %39493 = vmatmul.mubr.f32.vlgmr.msra.gmra.mxu0 %v31314_v0  ;;  %39506 = vmatprep.subr.mxu0 %v45243_v38  ;;  %v32307_v33 = vsub.f32 %v44624_v21, %v32306_v46  ;;  %v32313_v23 = vand.u32 4294901760, %v44635_v6 }
0x2111   :  { %39531 = vmatprep.mubr.msk.f32.mxu1 %vm39953_vm1, %v45243_v38  ;;  %39541 = vmatprep.subr.mxu1 %v45243_v38 }
0x2112   :  { %39507 = vmatpush3.msra.mxu0 %v43748_v53  ;;  %39532 = vmatmul.mubr.f32.vlgmr.msra.gmra.mxu1 %v31803_v4  ;;  %v32308_v41 = vand.u32 4294901760, %v32307_v33  ;;  %v32314_v12 = vsub.f32 %v44635_v6, %v32313_v23 }
0x2113   :  { %39542 = vmatpush3.msra.mxu1 %v43748_v53  ;;  %39508 = vmatprep.subr.mxu0 %v45243_v38 }
0x2114   :  { %39543 = vmatprep.subr.mxu1 %v45243_v38  ;;  %39509 = vmatpush3.msra.mxu0 %v43758_v37  ;;  %v32315_v14 = vand.u32 4294901760, %v32314_v12 }
0x2115   :  { %39510 = vmatprep.mubr.msk.f32.mxu0 %vm39953_vm1, %v45243_v38  ;;  %39544 = vmatpush3.msra.mxu1 %v43758_v37 }
0x2116   :  { %39511 = vmatmul.mubr.f32.vlgmr.msra.gmra.mxu0 %v31805_v43  ;;  %39520 = vmatprep.subr.mxu0 %v45243_v38 }
0x2117   :  { %39521 = vmatpush3.msra.mxu0 %v43751_v63  ;;  %39524 = vmatprep.mubr.msk.f32.mxu0 %vm39953_vm1, %v45243_v38 }
0x2118   :  { %39522 = vmatprep.subr.mxu0 %v45243_v38  ;;  %39545 = vmatprep.mubr.msk.f32.mxu1 %vm39953_vm1, %v45243_v38 }
0x2119   :  { %39523 = vmatpush3.msra.mxu0 %v43761_v29  ;;  %39546 = vmatmul.mubr.msk.f32.vlgmr.msra.gmra.mxu1 %vm26949_vm13, %v44538_v18 }
0x211a   :  { %39525 = vmatmul.mubr.f32.vlgmr.msra.gmra.mxu0 %v31802_v51  ;;  %39534 = vmatprep.subr.mxu0 %v45243_v38 }
0x211b   :  { %39535 = vmatpush3.msra.mxu0 %v43756_v15  ;;  %39538 = vmatprep.mubr.msk.f32.mxu0 %vm39953_vm1, %v45243_v38 }
0x211c   :  { %39536 = vmatprep.subr.mxu0 %v45243_v38  ;;  %39559 = vmatprep.subr.mxu1 %v45243_v38 }
0x211d   :  { %39537 = vmatpush3.msra.mxu0 %v43768_v11  ;;  %39567 = vmatprep.mubr.msk.f32.mxu1 %vm39953_vm1, %v45243_v38 }
0x211e   :  { %39539 = vmatmul.mubr.msk.f32.vlgmr.msra.gmra.mxu0 %vm26949_vm13, %v44538_v18  ;;  %39548 = vmatprep.subr.mxu0 %v45243_v38 }
0x211f   :  { %39556 = vmatprep.mubr.msk.f32.mxu0 %vm39953_vm1, %v45243_v38  ;;  %39549 = vmatpush3.msra.mxu0 %v44618_v34 }
0x2120   :  { %39550 = vmatprep.subr.mxu0 %v45243_v38  ;;  %39560 = vmatpush3.msra.mxu1 %v32308_v41 }
0x2121   :  { %39551 = vmatpush3.msra.mxu0 %v44626_v13  ;;  %39561 = vmatprep.subr.mxu1 %v45243_v38 }
0x2122   :  { %39552 = vmatprep.subr.mxu0 %v45243_v38  ;;  %39562 = vmatpush3.msra.mxu1 %v32315_v14 }
0x2123   :  { %39553 = vmatpush3.msra.mxu0 %v44637_v42  ;;  %39563 = vmatprep.subr.mxu1 %v45243_v38 }
0x2124   :  { %39554 = vmatprep.subr.mxu0 %v45243_v38  ;;  %39564 = vmatpush3.msra.mxu1 %v32322_v47 }
0x2125   :  { %39555 = vmatpush3.msra.mxu0 %v44651_v31  ;;  %39565 = vmatprep.subr.mxu1 %v45243_v38 }
0x2126   :  { %39570 = vmatprep.subr.mxu0 %v45243_v38  ;;  %39566 = vmatpush3.msra.mxu1 %v32329_v5  ;;  %v79_v5 = vadd.s32 6, %v43738_v10 }
0x2127   :  { %39581 = vmatprep.subr.mxu1 %v45243_v38 }
0x2128   :  { %vm80_vm5 = vcmp.eq.s32.totalorder %v45245_v19, %v79_v5 }
0x21b4   :  { %v31411_v17 = vpop.f32.mrf.mxu1 }
0x21b6   :  { %v39461_v58 = vpop.f32.mrf.mxu1 }
0x21b7   :  { %v44699_v58 = vsel %vm80_vm5, 1.0, %v45243_v38 }
0x21bc   :  { %v31568_v16 = vpop.f32.mrf.mxu1 }
0x21bd   :  { %v31320_v36 = vpop.f32.mrf.mxu0 }
0x21be   :  { %v31412_v61 = vadd.f32 %v31411_v17, %v31320_v36  ;;  %v39483_v49 = vpop.f32.mrf.mxu1 }
0x21bf   :  { %v39450_v3 = vpop.f32.mrf.mxu0 }
0x21c5   :  { %v31491_v40 = vpop.f32.mrf.mxu0 }
0x21c6   :  { %v31492_v35 = vadd.f32 %v31491_v40, %v31412_v61  ;;  %v31726_v52 = vpop.f32.mrf.mxu1  ;;  %v33148_v61 = vld [vmem:[%s45053_s6 + $0xc0] sm:$0xff] }
0x21c7   :  { %v39472_v26 = vpop.f32.mrf.mxu0 }
0x21c8   :  { %v39505_v30 = vpop.f32.mrf.mxu1  ;;  %v31569_v32 = vadd.f32 %v31568_v16, %v31492_v35  ;;  %v44812_v35 = vand.u32 4294901760, %v33148_v61 }
0x21cc   :  { %v31888_v54 = vpop.f32.mrf.mxu1 }
0x21ce   :  { %v39519_v56 = vpop.f32.mrf.mxu1 }
0x21d0   :  { %v31651_v45 = vpop.f32.mrf.mxu0 }
0x21d1   :  { %v31652_v0 = vadd.f32 %v31651_v45, %v31569_v32  ;;  %v44821_v32 = vsub.f32 %v33148_v61, %v44812_v35 }
0x21d2   :  { %v39494_v24 = vpop.f32.mrf.mxu0  ;;  %v32039_v50 = vpop.f32.mrf.mxu1 }
0x21d3   :  { %v31727_v27 = vadd.f32 %v31726_v52, %v31652_v0  ;;  %v33282_v45 = vand.u32 4294901760, %v44821_v32 }
0x21d4   :  { %v39533_v25 = vpop.f32.mrf.mxu1 }
0x21d5   :  { %v44676_v9 = vadd.f32 %v31727_v27, %v44515_v20  ;;  %v33283_v24 = vsub.f32 %v44821_v32, %v33282_v45 }
0x21d6   :  { %v31807_v18 = vpop.f32.mrf.mxu0 }
0x21d7   :  { %v31889_v51 = vadd.f32 %v31888_v54, %v31807_v18 }
0x21d8   :  { %v39512_v28 = vpop.f32.mrf.mxu0 }
0x21d9   :  { %v32189_v4 = vpop.f32.mrf.mxu1 }
0x21da   :  { %v31964_v39 = vpop.f32.mrf.mxu0 }
0x21db   :  { %v31965_v43 = vadd.f32 %v31964_v39, %v31889_v51  ;;  %v39547_v48 = vpop.f32.mrf.mxu1 }
0x21dc   :  { %v39526_v7 = vpop.f32.mrf.mxu0 }
0x21dd   :  { %v32040_v57 = vadd.f32 %v32039_v50, %v31965_v43  ;;  %v33284_v50 = vand.u32 4294901760, %v33283_v24 }
0x21de   :  { %v32116_v62 = vpop.f32.mrf.mxu0 }
0x21df   :  { %v32117_v33 = vadd.f32 %v32116_v62, %v32040_v57 }
0x21e0   :  { %v39540_v41 = vpop.f32.mrf.mxu0 }
0x21e1   :  { %v32190_v12 = vadd.f32 %v32189_v4, %v32117_v33 }
0x21e3   :  { %v32198_v14 = vsel %vm94_vm0, %v32190_v12, 0 }
0x21e4   :  { %v32269_v2 = vand.u32 4294901760, %v32198_v14 }
0x21e6   :  { %v32270_v47 = vsub.f32 %v32198_v14, %v32269_v2  ;;  %39568 = vmatmul.mubr.f32.vlgmr.msra.gmra.mxu1 %v32269_v2 }
0x21e7   :  { %39582 = vmatpush3.msra.mxu1 %v44618_v34  ;;  %39589 = vmatprep.mubr.msk.f32.mxu1 %vm39953_vm1, %v45243_v38 }
0x21e8   :  { %v32271_v20 = vand.u32 4294901760, %v32270_v47  ;;  %39583 = vmatprep.subr.mxu1 %v45243_v38 }
0x21e9   :  { %39584 = vmatpush3.msra.mxu1 %v44626_v13 }
0x21ea   :  { %v32272_v60 = vsub.f32 %v32270_v47, %v32271_v20  ;;  %39585 = vmatprep.subr.mxu1 %v45243_v38 }
0x21eb   :  { %39586 = vmatpush3.msra.mxu1 %v44637_v42 }
0x21ec   :  { %v32273_v17 = vand.u32 4294901760, %v32272_v60  ;;  %39587 = vmatprep.subr.mxu1 %v45243_v38 }
0x21ed   :  { %39588 = vmatpush3.msra.mxu1 %v44651_v31 }
0x21ee   :  { %39590 = vmatmul.mubr.f32.vlgmr.msra.gmra.mxu1 %v32271_v20  ;;  %39603 = vmatprep.subr.mxu1 %v45243_v38 }
0x21ef   :  { %39557 = vmatmul.mubr.f32.vlgmr.msra.gmra.mxu0 %v32273_v17  ;;  %39604 = vmatpush3.msra.mxu1 %v44618_v34  ;;  %v32687_v34 = vsel %vm26949_vm13, %v44699_v58, 0 }
0x21f0   :  { %39571 = vmatpush3.msra.mxu0 %v44624_v21  ;;  %39605 = vmatprep.subr.mxu1 %v45243_v38 }
0x21f1   :  { %39572 = vmatprep.subr.mxu0 %v45243_v38  ;;  %39606 = vmatpush3.msra.mxu1 %v44626_v13  ;;  %v32757_v13 = vsub.f32 %v32687_v34, %v32687_v34 }
0x21f2   :  { %39573 = vmatpush3.msra.mxu0 %v44635_v6  ;;  %39607 = vmatprep.subr.mxu1 %v45243_v38  ;;  %v33151_v6 = vld [vmem:[%s45053_s6 + $0xd8] sm:$0xff] }
0x21f3   :  { %39574 = vmatprep.subr.mxu0 %v45243_v38  ;;  %39608 = vmatpush3.msra.mxu1 %v44637_v42  ;;  %v32758_v42 = vand.u32 4294901760, %v32757_v13 }
0x21f4   :  { %39575 = vmatpush3.msra.mxu0 %v44649_v44  ;;  %39609 = vmatprep.subr.mxu1 %v45243_v38  ;;  %v33150_v44 = vld [vmem:[%s45053_s6 + $0xd0] sm:$0xff] }
0x21f5   :  { %39576 = vmatprep.subr.mxu0 %v45243_v38  ;;  %39578 = vmatprep.mubr.msk.f32.mxu0 %vm39953_vm1, %v45243_v38  ;;  %v32759_v21 = vsub.f32 %v32757_v13, %v32758_v42 }
0x21f6   :  { %39577 = vmatpush3.msra.mxu0 %v44660_v59  ;;  %39610 = vmatpush3.msra.mxu1 %v44651_v31  ;;  %v33149_v59 = vld [vmem:[%s45053_s6 + $0xc8] sm:$0xff] }
0x21f7   :  { %39611 = vmatprep.mubr.msk.f32.mxu1 %vm39953_vm1, %v45243_v38  ;;  %39579 = vmatmul.mubr.f32.vlgmr.msra.gmra.mxu0 %v32270_v47  ;;  %v44798_v36 = vand.u32 4294901760, %v33149_v59 }
0x21f8   :  { %39592 = vmatprep.subr.mxu0 %v45243_v38  ;;  %39612 = vmatmul.mubr.f32.vlgmr.msra.gmra.mxu1 %v32269_v2 }
0x21f9   :  { %39621 = vmatprep.subr.mxu1 %v45243_v38  ;;  %39593 = vmatpush3.msra.mxu0 %v32306_v46  ;;  %v32760_v46 = vand.u32 4294901760, %v32759_v21  ;;  %v44810_v40 = vsub.f32 %v33149_v59, %v44798_v36 }
0x21fa   :  { %39622 = vmatpush3.msra.mxu1 %v43771_v55  ;;  %39594 = vmatprep.subr.mxu0 %v45243_v38 }
0x21fb   :  { %39623 = vmatprep.subr.mxu1 %v45243_v38  ;;  %39595 = vmatpush3.msra.mxu0 %v32313_v23  ;;  %v44779_v23 = vand.u32 4294901760, %v33151_v6  ;;  %v33275_v30 = vand.u32 4294901760, %v44810_v40 }
0x21fc   :  { %39624 = vmatpush3.msra.mxu1 %v43783_v1  ;;  %39596 = vmatprep.subr.mxu0 %v45243_v38 }
0x21fd   :  { %39625 = vmatprep.mubr.msk.f32.mxu1 %vm39953_vm1, %v45243_v38  ;;  %39635 = vmatprep.subr.mxu1 %v45243_v38  ;;  %v44785_v31 = vsub.f32 %v33151_v6, %v44779_v23  ;;  %v33276_v56 = vsub.f32 %v44810_v40, %v33275_v30 }
0x21fe   :  { %39597 = vmatpush3.msra.mxu0 %v32320_v8  ;;  %39626 = vmatmul.mubr.msk.f32.vlgmr.msra.gmra.mxu1 %vm26949_vm13, %v44699_v58  ;;  %v44787_v8 = vand.u32 4294901760, %v33150_v44 }
0x21ff   :  { %39636 = vmatpush3.msra.mxu1 %v43748_v53  ;;  %39598 = vmatprep.subr.mxu0 %v45243_v38  ;;  %v33277_v0 = vand.u32 4294901760, %v33276_v56 }
0x2200   :  { %39637 = vmatprep.subr.mxu1 %v45243_v38  ;;  %39599 = vmatpush3.msra.mxu0 %v32327_v22  ;;  %v33261_v22 = vand.u32 4294901760, %v44785_v31  ;;  %v44796_v16 = vsub.f32 %v33150_v44, %v44787_v8 }
0x2201   :  { %39600 = vmatprep.mubr.msk.f32.mxu0 %vm39953_vm1, %v45243_v38  ;;  %39638 = vmatpush3.msra.mxu1 %v43758_v37 }
0x2202   :  { %39601 = vmatmul.mubr.f32.vlgmr.msra.gmra.mxu0 %v32269_v2  ;;  %39614 = vmatprep.subr.mxu0 %v45243_v38  ;;  %v33262_v49 = vsub.f32 %v44785_v31, %v33261_v22  ;;  %v33268_v3 = vand.u32 4294901760, %v44796_v16 }
0x2203   :  { %39639 = vmatprep.mubr.msk.f32.mxu1 %vm39953_vm1, %v45243_v38  ;;  %39649 = vmatprep.subr.mxu1 %v45243_v38 }
0x2204   :  { %39615 = vmatpush3.msra.mxu0 %v43748_v53  ;;  %39640 = vmatmul.mubr.f32.vlgmr.msra.gmra.mxu1 %v32758_v42  ;;  %v33263_v52 = vand.u32 4294901760, %v33262_v49  ;;  %v33269_v26 = vsub.f32 %v44796_v16, %v33268_v3 }
0x2205   :  { %39650 = vmatpush3.msra.mxu1 %v43748_v53  ;;  %39616 = vmatprep.subr.mxu0 %v45243_v38 }
0x2206   :  { %39651 = vmatprep.subr.mxu1 %v45243_v38  ;;  %39617 = vmatpush3.msra.mxu0 %v43758_v37  ;;  %v33270_v54 = vand.u32 4294901760, %v33269_v26 }
0x2207   :  { %39618 = vmatprep.mubr.msk.f32.mxu0 %vm39953_vm1, %v45243_v38  ;;  %39652 = vmatpush3.msra.mxu1 %v43758_v37 }
0x2208   :  { %39619 = vmatmul.mubr.f32.vlgmr.msra.gmra.mxu0 %v32760_v46  ;;  %39628 = vmatprep.subr.mxu0 %v45243_v38 }
0x2209   :  { %39629 = vmatpush3.msra.mxu0 %v43751_v63  ;;  %39632 = vmatprep.mubr.msk.f32.mxu0 %vm39953_vm1, %v45243_v38 }
0x220a   :  { %39630 = vmatprep.subr.mxu0 %v45243_v38  ;;  %39653 = vmatprep.mubr.msk.f32.mxu1 %vm39953_vm1, %v45243_v38 }
0x220b   :  { %39631 = vmatpush3.msra.mxu0 %v43761_v29  ;;  %39654 = vmatmul.mubr.msk.f32.vlgmr.msra.gmra.mxu1 %vm26949_vm13, %v44699_v58 }
0x220c   :  { %39633 = vmatmul.mubr.f32.vlgmr.msra.gmra.mxu0 %v32757_v13  ;;  %39642 = vmatprep.subr.mxu0 %v45243_v38 }
0x220d   :  { %39643 = vmatpush3.msra.mxu0 %v43756_v15  ;;  %39646 = vmatprep.mubr.msk.f32.mxu0 %vm39953_vm1, %v45243_v38 }
0x220e   :  { %39644 = vmatprep.subr.mxu0 %v45243_v38  ;;  %39667 = vmatprep.subr.mxu1 %v45243_v38 }
0x220f   :  { %39645 = vmatpush3.msra.mxu0 %v43768_v11  ;;  %39675 = vmatprep.mubr.msk.f32.mxu1 %vm39953_vm1, %v45243_v38 }
0x2210   :  { %39647 = vmatmul.mubr.msk.f32.vlgmr.msra.gmra.mxu0 %vm26949_vm13, %v44699_v58  ;;  %39656 = vmatprep.subr.mxu0 %v45243_v38 }
0x2211   :  { %39664 = vmatprep.mubr.msk.f32.mxu0 %vm39953_vm1, %v45243_v38  ;;  %39657 = vmatpush3.msra.mxu0 %v44779_v23 }
0x2212   :  { %39658 = vmatprep.subr.mxu0 %v45243_v38  ;;  %39668 = vmatpush3.msra.mxu1 %v33263_v52 }
0x2213   :  { %39659 = vmatpush3.msra.mxu0 %v44787_v8  ;;  %39669 = vmatprep.subr.mxu1 %v45243_v38 }
0x2214   :  { %39660 = vmatprep.subr.mxu0 %v45243_v38  ;;  %39670 = vmatpush3.msra.mxu1 %v33270_v54 }
0x2215   :  { %39661 = vmatpush3.msra.mxu0 %v44798_v36  ;;  %39671 = vmatprep.subr.mxu1 %v45243_v38 }
0x2216   :  { %39662 = vmatprep.subr.mxu0 %v45243_v38  ;;  %39672 = vmatpush3.msra.mxu1 %v33277_v0 }
0x2217   :  { %39663 = vmatpush3.msra.mxu0 %v44812_v35  ;;  %39673 = vmatprep.subr.mxu1 %v45243_v38 }
0x2218   :  { %39678 = vmatprep.subr.mxu0 %v45243_v38  ;;  %39674 = vmatpush3.msra.mxu1 %v33284_v50  ;;  %v82_v50 = vadd.s32 7, %v43738_v10 }
0x2219   :  { %39689 = vmatprep.subr.mxu1 %v45243_v38 }
0x221a   :  { %vm83_vm6 = vcmp.eq.s32.totalorder %v45245_v19, %v82_v50 }
0x221b   :  { %v44860_v10 = vsel %vm83_vm6, 1.0, %v45243_v38 }
0x221c   :  { %v33642_v19 = vsel %vm26949_vm13, %v44860_v10, 0 }
0x22a6   :  { %v32366_v27 = vpop.f32.mrf.mxu1 }
0x22a8   :  { %v39569_v25 = vpop.f32.mrf.mxu1 }
0x22ae   :  { %v32523_v18 = vpop.f32.mrf.mxu1 }
0x22af   :  { %v32275_v28 = vpop.f32.mrf.mxu0 }
0x22b0   :  { %v32367_v51 = vadd.f32 %v32366_v27, %v32275_v28  ;;  %v39591_v4 = vpop.f32.mrf.mxu1 }
0x22b1   :  { %v39558_v39 = vpop.f32.mrf.mxu0 }
0x22b7   :  { %v32446_v43 = vpop.f32.mrf.mxu0 }
0x22b8   :  { %v32447_v48 = vadd.f32 %v32446_v43, %v32367_v51  ;;  %v32681_v7 = vpop.f32.mrf.mxu1 }
0x22b9   :  { %v39580_v57 = vpop.f32.mrf.mxu0 }
0x22ba   :  { %v39613_v62 = vpop.f32.mrf.mxu1  ;;  %v32524_v33 = vadd.f32 %v32523_v18, %v32447_v48 }
0x22be   :  { %v32843_v41 = vpop.f32.mrf.mxu1 }
0x22c0   :  { %v39627_v12 = vpop.f32.mrf.mxu1 }
0x22c2   :  { %v32606_v14 = vpop.f32.mrf.mxu0 }
0x22c3   :  { %v32607_v2 = vadd.f32 %v32606_v14, %v32524_v33 }
0x22c4   :  { %v39602_v47 = vpop.f32.mrf.mxu0  ;;  %v32994_v20 = vpop.f32.mrf.mxu1 }
0x22c5   :  { %v32682_v60 = vadd.f32 %v32681_v7, %v32607_v2 }
0x22c6   :  { %v39641_v5 = vpop.f32.mrf.mxu1 }
0x22c7   :  { %v44837_v17 = vadd.f32 %v32682_v60, %v44676_v9 }
0x22c8   :  { %v32762_v58 = vpop.f32.mrf.mxu0 }
0x22c9   :  { %v32844_v13 = vadd.f32 %v32843_v41, %v32762_v58 }
0x22ca   :  { %v39620_v34 = vpop.f32.mrf.mxu0 }
0x22cb   :  { %v33144_v42 = vpop.f32.mrf.mxu1 }
0x22cc   :  { %v32919_v21 = vpop.f32.mrf.mxu0 }
0x22cd   :  { %v32920_v46 = vadd.f32 %v32919_v21, %v32844_v13  ;;  %v39655_v6 = vpop.f32.mrf.mxu1 }
0x22ce   :  { %v39634_v44 = vpop.f32.mrf.mxu0 }
0x22cf   :  { %v32995_v59 = vadd.f32 %v32994_v20, %v32920_v46 }
0x22d0   :  { %v33071_v61 = vpop.f32.mrf.mxu0 }
0x22d1   :  { %v33072_v49 = vadd.f32 %v33071_v61, %v32995_v59 }
0x22d2   :  { %v39648_v52 = vpop.f32.mrf.mxu0 }
0x22d3   :  { %v33145_v26 = vadd.f32 %v33144_v42, %v33072_v49 }
0x22d5   :  { %v33153_v54 = vsel %vm94_vm0, %v33145_v26, 0 }
0x22d6   :  { %v33224_v56 = vand.u32 4294901760, %v33153_v54 }
0x22d8   :  { %v33225_v0 = vsub.f32 %v33153_v54, %v33224_v56  ;;  %39676 = vmatmul.mubr.f32.vlgmr.msra.gmra.mxu1 %v33224_v56 }
0x22d9   :  { %39690 = vmatpush3.msra.mxu1 %v44779_v23  ;;  %39697 = vmatprep.mubr.msk.f32.mxu1 %vm39953_vm1, %v45243_v38 }
0x22da   :  { %v33226_v9 = vand.u32 4294901760, %v33225_v0  ;;  %39691 = vmatprep.subr.mxu1 %v45243_v38 }
0x22db   :  { %39692 = vmatpush3.msra.mxu1 %v44787_v8 }
0x22dc   :  { %v33227_v24 = vsub.f32 %v33225_v0, %v33226_v9  ;;  %39693 = vmatprep.subr.mxu1 %v45243_v38 }
0x22dd   :  { %39694 = vmatpush3.msra.mxu1 %v44798_v36 }
0x22de   :  { %v33228_v27 = vand.u32 4294901760, %v33227_v24  ;;  %39695 = vmatprep.subr.mxu1 %v45243_v38 }
0x22df   :  { %39696 = vmatpush3.msra.mxu1 %v44812_v35 }
0x22e0   :  { %39698 = vmatmul.mubr.f32.vlgmr.msra.gmra.mxu1 %v33226_v9  ;;  %39711 = vmatprep.subr.mxu1 %v45243_v38 }
0x22e1   :  { %39665 = vmatmul.mubr.f32.vlgmr.msra.gmra.mxu0 %v33228_v27  ;;  %39712 = vmatpush3.msra.mxu1 %v44779_v23  ;;  %v33712_v23 = vsub.f32 %v33642_v19, %v33642_v19 }
0x22e2   :  { %39679 = vmatpush3.msra.mxu0 %v44785_v31  ;;  %39713 = vmatprep.subr.mxu1 %v45243_v38 }
0x22e3   :  { %39680 = vmatprep.subr.mxu0 %v45243_v38  ;;  %39714 = vmatpush3.msra.mxu1 %v44787_v8  ;;  %v33713_v8 = vand.u32 4294901760, %v33712_v23 }
0x22e4   :  { %39681 = vmatpush3.msra.mxu0 %v44796_v16  ;;  %39715 = vmatprep.subr.mxu1 %v45243_v38 }
0x22e5   :  { %39682 = vmatprep.subr.mxu0 %v45243_v38  ;;  %39716 = vmatpush3.msra.mxu1 %v44798_v36  ;;  %v34103_v36 = vld [vmem:[%s45053_s6 + $0xe0] sm:$0xff] }
0x22e6   :  { %39683 = vmatpush3.msra.mxu0 %v44810_v40  ;;  %39717 = vmatprep.subr.mxu1 %v45243_v38 }
0x22e7   :  { %39684 = vmatprep.subr.mxu0 %v45243_v38  ;;  %39686 = vmatprep.mubr.msk.f32.mxu0 %vm39953_vm1, %v45243_v38 }
0x22e8   :  { %39685 = vmatpush3.msra.mxu0 %v44821_v32  ;;  %39718 = vmatpush3.msra.mxu1 %v44812_v35 }
0x22e9   :  { %39719 = vmatprep.mubr.msk.f32.mxu1 %vm39953_vm1, %v45243_v38  ;;  %39687 = vmatmul.mubr.f32.vlgmr.msra.gmra.mxu0 %v33225_v0 }
0x22ea   :  { %39700 = vmatprep.subr.mxu0 %v45243_v38  ;;  %39720 = vmatmul.mubr.f32.vlgmr.msra.gmra.mxu1 %v33224_v56 }
0x22eb   :  { %39729 = vmatprep.subr.mxu1 %v45243_v38  ;;  %39701 = vmatpush3.msra.mxu0 %v33261_v22 }
0x22ec   :  { %39730 = vmatpush3.msra.mxu1 %v43771_v55  ;;  %39702 = vmatprep.subr.mxu0 %v45243_v38  ;;  %v33714_v55 = vsub.f32 %v33712_v23, %v33713_v8 }
0x22ed   :  { %39731 = vmatprep.subr.mxu1 %v45243_v38  ;;  %39703 = vmatpush3.msra.mxu0 %v33268_v3 }
0x22ee   :  { %39732 = vmatpush3.msra.mxu1 %v43783_v1  ;;  %39704 = vmatprep.subr.mxu0 %v45243_v38  ;;  %v33715_v1 = vand.u32 4294901760, %v33714_v55 }
0x22ef   :  { %39733 = vmatprep.mubr.msk.f32.mxu1 %vm39953_vm1, %v45243_v38  ;;  %39743 = vmatprep.subr.mxu1 %v45243_v38 }
0x22f0   :  { %39705 = vmatpush3.msra.mxu0 %v33275_v30  ;;  %39734 = vmatmul.mubr.msk.f32.vlgmr.msra.gmra.mxu1 %vm26949_vm13, %v44860_v10  ;;  %v44973_v30 = vand.u32 4294901760, %v34103_v36 }
0x22f1   :  { %39744 = vmatpush3.msra.mxu1 %v43748_v53  ;;  %39706 = vmatprep.subr.mxu0 %v45243_v38 }
0x22f2   :  { %39745 = vmatprep.subr.mxu1 %v45243_v38  ;;  %39707 = vmatpush3.msra.mxu0 %v33282_v45  ;;  %v44982_v18 = vsub.f32 %v34103_v36, %v44973_v30 }
0x22f3   :  { %39708 = vmatprep.mubr.msk.f32.mxu0 %vm39953_vm1, %v45243_v38  ;;  %39746 = vmatpush3.msra.mxu1 %v43758_v37 }
0x22f4   :  { %39709 = vmatmul.mubr.f32.vlgmr.msra.gmra.mxu0 %v33224_v56  ;;  %39722 = vmatprep.subr.mxu0 %v45243_v38  ;;  %v34237_v4 = vand.u32 4294901760, %v44982_v18 }
0x22f5   :  { %39747 = vmatprep.mubr.msk.f32.mxu1 %vm39953_vm1, %v45243_v38  ;;  %39757 = vmatprep.subr.mxu1 %v45243_v38 }
0x22f6   :  { %39723 = vmatpush3.msra.mxu0 %v43748_v53  ;;  %39748 = vmatmul.mubr.f32.vlgmr.msra.gmra.mxu1 %v33713_v8  ;;  %v34238_v43 = vsub.f32 %v44982_v18, %v34237_v4 }
0x22f7   :  { %39758 = vmatpush3.msra.mxu1 %v43748_v53  ;;  %39724 = vmatprep.subr.mxu0 %v45243_v38  ;;  %v34106_v53 = vld [vmem:[%s45053_s6 + $0xf8] sm:$0xff] }
0x22f8   :  { %39759 = vmatprep.subr.mxu1 %v45243_v38  ;;  %39725 = vmatpush3.msra.mxu0 %v43758_v37  ;;  %v34239_v48 = vand.u32 4294901760, %v34238_v43 }
0x22f9   :  { %39726 = vmatprep.mubr.msk.f32.mxu0 %vm39953_vm1, %v45243_v38  ;;  %39760 = vmatpush3.msra.mxu1 %v43758_v37 }
0x22fa   :  { %39727 = vmatmul.mubr.f32.vlgmr.msra.gmra.mxu0 %v33715_v1  ;;  %39736 = vmatprep.subr.mxu0 %v45243_v38 }
0x22fb   :  { %39737 = vmatpush3.msra.mxu0 %v43751_v63  ;;  %39740 = vmatprep.mubr.msk.f32.mxu0 %vm39953_vm1, %v45243_v38  ;;  %v44940_v63 = vand.u32 4294901760, %v34106_v53 }
0x22fc   :  { %39738 = vmatprep.subr.mxu0 %v45243_v38  ;;  %39761 = vmatprep.mubr.msk.f32.mxu1 %vm39953_vm1, %v45243_v38 }
0x22fd   :  { %39739 = vmatpush3.msra.mxu0 %v43761_v29  ;;  %39762 = vmatmul.mubr.msk.f32.vlgmr.msra.gmra.mxu1 %vm26949_vm13, %v44860_v10  ;;  %v44946_v37 = vsub.f32 %v34106_v53, %v44940_v63 }
0x22fe   :  { %39741 = vmatmul.mubr.f32.vlgmr.msra.gmra.mxu0 %v33712_v23  ;;  %39750 = vmatprep.subr.mxu0 %v45243_v38 }
0x22ff   :  { %39751 = vmatpush3.msra.mxu0 %v43756_v15  ;;  %39754 = vmatprep.mubr.msk.f32.mxu0 %vm39953_vm1, %v45243_v38  ;;  %v34105_v15 = vld [vmem:[%s45053_s6 + $0xf0] sm:$0xff]  ;;  %v34216_v31 = vand.u32 4294901760, %v44946_v37 }
0x2300   :  { %39752 = vmatprep.subr.mxu0 %v45243_v38  ;;  %39775 = vmatprep.subr.mxu1 %v45243_v38  ;;  %v44948_v29 = vand.u32 4294901760, %v34105_v15 }
0x2301   :  { %39753 = vmatpush3.msra.mxu0 %v43768_v11  ;;  %39783 = vmatprep.mubr.msk.f32.mxu1 %vm39953_vm1, %v45243_v38  ;;  %v34104_v11 = vld [vmem:[%s45053_s6 + $0xe8] sm:$0xff]  ;;  %v34217_v3 = vsub.f32 %v44946_v37, %v34216_v31  ;;  %s39965_s6 = smov [#allocation2]  }
0x2302   :  { %39755 = vmatmul.mubr.msk.f32.vlgmr.msra.gmra.mxu0 %vm26949_vm13, %v44860_v10  ;;  %39764 = vmatprep.subr.mxu0 %v45243_v38  ;;  %v44957_v22 = vsub.f32 %v34105_v15, %v44948_v29  ;;  %v44959_v16 = vand.u32 4294901760, %v34104_v11  ;;  %s34604_s13 = sshll.u32 %s39965_s6, 4  ;;  %s34605_s13 = int_to_ptr.vmem [resolvable:$true] %s34604_s13 }
0x2303   :  { %39772 = vmatprep.mubr.msk.f32.mxu0 %vm39953_vm1, %v45243_v38  ;;  %39765 = vmatpush3.msra.mxu0 %v44940_v63  ;;  %v34218_v32 = vand.u32 4294901760, %v34217_v3  ;;  %s39930_s14 = scalar_lea.vmem %s34605_s13, 32  ;;  %p39935_p1 = scmp.lt.s32.totalorder %s34605_s13, %s34605_s13 }
0x2304   :  { %39766 = vmatprep.subr.mxu0 %v45243_v38  ;;  %v34223_v40 = vand.u32 4294901760, %v44957_v22  ;;  %v44971_v35 = vsub.f32 %v34104_v11, %v44959_v16  ;;  %p39931_p0 = scmp.ne.s32.totalorder %s34605_s13, %s39930_s14  ;;  %p39936_p2 = scmp.lt.s32.totalorder %s39930_s14, %s39930_s14 }
0x2305   :  { %39767 = vmatpush3.msra.mxu0 %v44948_v29  ;;  %39776 = vmatpush3.msra.mxu1 %v34218_v32 }
0x2306   :  { %39768 = vmatprep.subr.mxu0 %v45243_v38  ;;  %v34224_v45 = vsub.f32 %v44957_v22, %v34223_v40  ;;  %v34230_v25 = vand.u32 4294901760, %v44971_v35  ;;  %39777 = vmatprep.subr.mxu1 %v45243_v38  ;;  %p39937_p3 = por %p39936_p2, %p39935_p1 }
0x2307   :  { %39769 = vmatpush3.msra.mxu0 %v44959_v16 }
0x2308   :  { %39770 = vmatprep.subr.mxu0 %v45243_v38  ;;  %v34225_v28 = vand.u32 4294901760, %v34224_v45  ;;  %v34231_v51 = vsub.f32 %v44971_v35, %v34230_v25  ;;  %p39938_p4 = pnand %p39937_p3, %p39931_p0 }
0x2309   :  { %39771 = vmatpush3.msra.mxu0 %v44973_v30 }
0x230a   :  { %39786 = vmatprep.subr.mxu0 %v45243_v38  ;;  %39778 = vmatpush3.msra.mxu1 %v34225_v28  ;;  %v34232_v39 = vand.u32 4294901760, %v34231_v51 }
0x230b   :  { %39779 = vmatprep.subr.mxu1 %v45243_v38 }
0x230c   :  { %39780 = vmatpush3.msra.mxu1 %v34232_v39 }
0x230d   :  { %39781 = vmatprep.subr.mxu1 %v45243_v38 }
0x230e   :  { %39782 = vmatpush3.msra.mxu1 %v34239_v48 }
0x230f   :  { %39797 = vmatprep.subr.mxu1 %v45243_v38 }
0x2398   :  { %v33321_v7 = vpop.f32.mrf.mxu1 }
0x239a   :  { %v39677_v57 = vpop.f32.mrf.mxu1 }
0x23a0   :  { %v33478_v62 = vpop.f32.mrf.mxu1 }
0x23a1   :  { %v33230_v33 = vpop.f32.mrf.mxu0 }
0x23a2   :  { %v33322_v41 = vadd.f32 %v33321_v7, %v33230_v33  ;;  %v39699_v12 = vpop.f32.mrf.mxu1 }
0x23a3   :  { %v39666_v14 = vpop.f32.mrf.mxu0 }
0x23a9   :  { %v33401_v2 = vpop.f32.mrf.mxu0 }
0x23aa   :  { %v33402_v47 = vadd.f32 %v33401_v2, %v33322_v41  ;;  %v33636_v20 = vpop.f32.mrf.mxu1 }
0x23ab   :  { %v39688_v60 = vpop.f32.mrf.mxu0 }
0x23ac   :  { %v39721_v5 = vpop.f32.mrf.mxu1  ;;  %v33479_v58 = vadd.f32 %v33478_v62, %v33402_v47 }
0x23b0   :  { %v33798_v34 = vpop.f32.mrf.mxu1 }
0x23b2   :  { %v39735_v13 = vpop.f32.mrf.mxu1 }
0x23b4   :  { %v33561_v42 = vpop.f32.mrf.mxu0 }
0x23b5   :  { %v33562_v21 = vadd.f32 %v33561_v42, %v33479_v58 }
0x23b6   :  { %v39710_v46 = vpop.f32.mrf.mxu0  ;;  %v33949_v6 = vpop.f32.mrf.mxu1 }
0x23b7   :  { %v33637_v44 = vadd.f32 %v33636_v20, %v33562_v21 }
0x23b8   :  { %v39749_v59 = vpop.f32.mrf.mxu1 }
0x23b9   :  { %v44998_v61 = vadd.f32 %v33637_v44, %v44837_v17 }
0x23ba   :  { %v33717_v49 = vpop.f32.mrf.mxu0 }
0x23bb   :  { %v33799_v26 = vadd.f32 %v33798_v34, %v33717_v49 }
0x23bc   :  { %v39728_v52 = vpop.f32.mrf.mxu0 }
0x23bd   :  { %v34099_v54 = vpop.f32.mrf.mxu1 }
0x23be   :  { %v33874_v56 = vpop.f32.mrf.mxu0 }
0x23bf   :  { %v33875_v0 = vadd.f32 %v33874_v56, %v33799_v26  ;;  %v39763_v9 = vpop.f32.mrf.mxu1 }
0x23c0   :  { %v39742_v24 = vpop.f32.mrf.mxu0 }
0x23c1   :  { %v33950_v50 = vadd.f32 %v33949_v6, %v33875_v0 }
0x23c2   :  { %v34026_v27 = vpop.f32.mrf.mxu0 }
0x23c3   :  { %v34027_v10 = vadd.f32 %v34026_v27, %v33950_v50 }
0x23c4   :  { %v39756_v19 = vpop.f32.mrf.mxu0 }
0x23c5   :  { %v34100_v23 = vadd.f32 %v34099_v54, %v34027_v10 }
0x23c7   :  { %v34108_v8 = vsel %vm94_vm0, %v34100_v23, 0  ;;  %vm34596_vm0 = vcmask 25600  }
0x23c8   :  { %v34179_v55 = vand.u32 4294901760, %v34108_v8 }
0x23ca   :  { %v34180_v1 = vsub.f32 %v34108_v8, %v34179_v55  ;;  %39784 = vmatmul.mubr.f32.vlgmr.msra.gmra.mxu1 %v34179_v55 }
0x23cb   :  { %39798 = vmatpush3.msra.mxu1 %v44940_v63  ;;  %39805 = vmatprep.mubr.msk.f32.mxu1 %vm39953_vm1, %v45243_v38 }
0x23cc   :  { %v34181_v17 = vand.u32 4294901760, %v34180_v1  ;;  %39799 = vmatprep.subr.mxu1 %v45243_v38 }
0x23cd   :  { %39800 = vmatpush3.msra.mxu1 %v44948_v29 }
0x23ce   :  { %v34182_v53 = vsub.f32 %v34180_v1, %v34181_v17  ;;  %39801 = vmatprep.subr.mxu1 %v45243_v38 }
0x23cf   :  { %39802 = vmatpush3.msra.mxu1 %v44959_v16 }
0x23d0   :  { %v34183_v15 = vand.u32 4294901760, %v34182_v53  ;;  %39803 = vmatprep.subr.mxu1 %v45243_v38 }
0x23d1   :  { %39804 = vmatpush3.msra.mxu1 %v44973_v30 }
0x23d2   :  { %39806 = vmatmul.mubr.f32.vlgmr.msra.gmra.mxu1 %v34181_v17  ;;  %39819 = vmatprep.subr.mxu1 %v45243_v38 }
0x23d3   :  { %39773 = vmatmul.mubr.f32.vlgmr.msra.gmra.mxu0 %v34183_v15  ;;  %39820 = vmatpush3.msra.mxu1 %v44940_v63 }
0x23d4   :  { %39787 = vmatpush3.msra.mxu0 %v44946_v37  ;;  %39821 = vmatprep.subr.mxu1 %v45243_v38 }
0x23d5   :  { %39788 = vmatprep.subr.mxu0 %v45243_v38  ;;  %39822 = vmatpush3.msra.mxu1 %v44948_v29 }
0x23d6   :  { %39789 = vmatpush3.msra.mxu0 %v44957_v22  ;;  %39823 = vmatprep.subr.mxu1 %v45243_v38 }
0x23d7   :  { %39790 = vmatprep.subr.mxu0 %v45243_v38  ;;  %39824 = vmatpush3.msra.mxu1 %v44959_v16 }
0x23d8   :  { %39791 = vmatpush3.msra.mxu0 %v44971_v35  ;;  %39825 = vmatprep.subr.mxu1 %v45243_v38 }
0x23d9   :  { %39792 = vmatprep.subr.mxu0 %v45243_v38  ;;  %39794 = vmatprep.mubr.msk.f32.mxu0 %vm39953_vm1, %v45243_v38 }
0x23da   :  { %39793 = vmatpush3.msra.mxu0 %v44982_v18  ;;  %39826 = vmatpush3.msra.mxu1 %v44973_v30 }
0x23db   :  { %39827 = vmatprep.mubr.msk.f32.mxu1 %vm39953_vm1, %v45243_v38  ;;  %39795 = vmatmul.mubr.f32.vlgmr.msra.gmra.mxu0 %v34180_v1 }
0x23dc   :  { %39808 = vmatprep.subr.mxu0 %v45243_v38  ;;  %39828 = vmatmul.mubr.f32.vlgmr.msra.gmra.mxu1 %v34179_v55 }
0x23dd   :  { %39809 = vmatpush3.msra.mxu0 %v34216_v31  ;;  %39816 = vmatprep.mubr.msk.f32.mxu0 %vm39953_vm1, %v45243_v38 }
0x23de   :  { %39810 = vmatprep.subr.mxu0 %v45243_v38 }
0x23df   :  { %39811 = vmatpush3.msra.mxu0 %v34223_v40 }
0x23e0   :  { %39812 = vmatprep.subr.mxu0 %v45243_v38 }
0x23e1   :  { %39813 = vmatpush3.msra.mxu0 %v34230_v25 }
0x23e2   :  { %39814 = vmatprep.subr.mxu0 %v45243_v38 }
0x23e3   :  { %39815 = vmatpush3.msra.mxu0 %v34237_v4 }
0x23e4   :  { %39817 = vmatmul.mubr.f32.vlgmr.msra.gmra.mxu0 %v34179_v55 }
0x248a   :  { %v34276_v63 = vpop.f32.mrf.mxu1 }
0x248c   :  { %v39785_v37 = vpop.f32.mrf.mxu1 }
0x2492   :  { %v34433_v29 = vpop.f32.mrf.mxu1 }
0x2493   :  { %v34185_v11 = vpop.f32.mrf.mxu0 }
0x2494   :  { %v39807_v31 = vpop.f32.mrf.mxu1  ;;  %v34277_v3 = vadd.f32 %v34276_v63, %v34185_v11 }
0x2495   :  { %v39774_v16 = vpop.f32.mrf.mxu0 }
0x249b   :  { %v34356_v36 = vpop.f32.mrf.mxu0 }
0x249c   :  { %v34591_v22 = vpop.f32.mrf.mxu1  ;;  %v34357_v32 = vadd.f32 %v34356_v36, %v34277_v3 }
0x249d   :  { %v39796_v40 = vpop.f32.mrf.mxu0 }
0x249e   :  { %v39829_v30 = vpop.f32.mrf.mxu1  ;;  %v34434_v35 = vadd.f32 %v34433_v29, %v34357_v32 }
0x24a4   :  { %v34516_v45 = vpop.f32.mrf.mxu0 }
0x24a5   :  { %v34517_v25 = vadd.f32 %v34516_v45, %v34434_v35 }
0x24a6   :  { %v39818_v38 = vpop.f32.mrf.mxu0 }
0x24a7   :  { %v34592_v18 = vadd.f32 %v34591_v22, %v34517_v25 }
0x24a9   :  { %v34595_v28 = vadd.f32 %v34592_v18, %v44998_v61 }
0x24ab   :  { %34597 = vst.msk [vmem:[#allocation2] sm:$0x3] %vm34596_vm0, %v34595_v28 }
0x24ac   :  { %39941 = shalt.err (!%p39938_p4)
}
0x24ad   :  { %34607 = dma.vmem_to_hbm [thread:$0]  %s34605_s13, 32, %s45055_s8, [#allocation3]  }
0x24ae   :  { %39950 = dma.done.wait [#allocation3], 32  }
0x24af   :  { %39951 = vsyncadd [#allocation3], 4294967264 }
0x24b0   :  { %34611 = vsyncpa [#allocation3], 1 }

</bundles_post_ra>
